<compile_context>
chip_gen: v7x
topology: tpu7x:2x2x1
jax: 0.10.0
libtpu: 0.0.40
codegen_flags: <defaults>
</compile_context>

<pallas_src>
import math

import jax
import jax.numpy as jnp
from jax import lax
from jax.experimental import pallas as pl
from jax.experimental.pallas import tpu as pltpu

# ---- sizes from SER_MODEL.__init__ (langs == 'en') ----
ALLO_CONV_SIZE = 128
ALLO_LSTM_SIZE = 128
ALLO_ATTN_SIZE = 128
MFCC_CONV_SIZE = 32
MFCC_LSTM_SIZE = 64
HIDDEN_SIZE = 256
NUM_LABELS = 4
ALLO_IN = 230   # conv1d_1 / conv1d_2 in_channels
MFCC_IN = 24    # conv1d_*_mfcc in_channels
BN_EPS = 1e-5
LANE = 128      # TPU lane width; hidden/conv-out sizes are padded to this
KTAPS = 5       # common conv halo window (covers both k=3 and k=5, 'same')

_BRANCH_KEYS = ('wc', 'bc', 'wih_f', 'whh_f', 'bg_f', 'wih_b', 'whh_b', 'bg_b',
                'wq_f', 'wq_b', 'bq', 'wk_f', 'wk_b', 'bk', 'wv_f', 'wv_b', 'bv')
_HEAD_KEYS = ('w1', 'b1', 'bn_g', 'bn_b', 'w2', 'b2', 'bn1_g', 'bn1_b',
              'w3', 'b3', 'bn2_g', 'bn2_b', 'wo', 'bo')
N_BRANCH_SCRATCH = 5


# ============================================================================
# In-kernel helpers (traced inside the single fused kernel body)
# ============================================================================
def _branch_ctx(x_ref, len_ref, w, scr):
    """One branch: dual Conv1d (single im2col MXU dot) -> bi-LSTM (hoisted
    input projection; unrolled, interleaved, vreg-carried recurrence) ->
    self-attention.  Returns the (B, A) f32 context as a value."""
    im2col_scr, gx_f_scr, gx_b_scr, out_f_scr, out_b_scr = scr
    B, T, C = x_ref.shape
    BT = B * T
    KC = im2col_scr.shape[2]
    CP = KC // KTAPS                 # per-tap channel stride (256 allo / 24 mfcc)
    OP = w['wc'].shape[1]            # conv out channels, padded to 128
    HP = w['whh_f'].shape[0]         # LSTM hidden size, padded to 128
    A = w['bq'].shape[1]

    # ---- (1) conv as ONE big-K matmul: zero-fill + 5 static shifted copies
    #      build the im2col taps, then (BT, 5*CP) @ (5*CP, OP), bf16 operands,
    #      f32 accumulation.  Channel padding C->CP exists only in this scratch.
    im2col_scr[...] = jnp.zeros_like(im2col_scr)
    for j in range(KTAPS):           # tap j multiplies x[t + j - 2]
        dst = max(0, 2 - j)
        src = max(0, j - 2)
        n = T - abs(j - 2)
        im2col_scr[:, dst:dst + n, j * CP:j * CP + C] = x_ref[:, src:src + n, :]
    taps = im2col_scr[...].reshape(BT, KC).astype(jnp.bfloat16)
    conv = jnp.dot(taps, w['wc'][...],
                   preferred_element_type=jnp.float32) + w['bc'][...]   # (BT, OP)

    # ---- (2) hoisted LSTM input projection: one MXU pass per direction -------
    conv16 = conv.astype(jnp.bfloat16)
    gx_f_scr[...] = (jnp.dot(conv16, w['wih_f'][...],
                             preferred_element_type=jnp.float32)
                     + w['bg_f'][...]).reshape(B, T, 4 * HP)
    gx_b_scr[...] = (jnp.dot(conv16, w['wih_b'][...],
                             preferred_element_type=jnp.float32)
                     + w['bg_b'][...]).reshape(B, T, 4 * HP)

    # ---- (3) bidirectional recurrence over axis 0 (torch nn.LSTM
    #      batch_first=False quirk: it scans the batch dim).  Fully unrolled
    #      (B is small & static == fori_loop(..., unroll=True)), fwd/bwd
    #      interleaved, h/c carried in vregs; only out_scr[idx] stored. --------
    def gates(g):
        return (jax.nn.sigmoid(g[:, 0:HP]),
                jax.nn.sigmoid(g[:, HP:2 * HP]),
                jnp.tanh(g[:, 2 * HP:3 * HP]),
                jax.nn.sigmoid(g[:, 3 * HP:4 * HP]))

    h_f = jnp.zeros((T, HP), jnp.float32)
    c_f = jnp.zeros((T, HP), jnp.float32)
    h_b = jnp.zeros((T, HP), jnp.float32)
    c_b = jnp.zeros((T, HP), jnp.float32)
    for t in range(B):
        rt = B - 1 - t
        gf = gx_f_scr[t] + jnp.dot(h_f, w['whh_f'][...],
                                   preferred_element_type=jnp.float32)
        gb = gx_b_scr[rt] + jnp.dot(h_b, w['whh_b'][...],
                                    preferred_element_type=jnp.float32)
        i_f, f_f, g_f, o_f = gates(gf)
        i_b, f_b, g_b, o_b = gates(gb)
        c_f = f_f * c_f + i_f * g_f
        h_f = o_f * jnp.tanh(c_f)
        c_b = f_b * c_b + i_b * g_b
        h_b = o_b * jnp.tanh(c_b)
        out_f_scr[t] = h_f
        out_b_scr[rt] = h_b

    # ---- (4) self-attention: K/V for all (B*T) rows; per-row (B, T, 1)
    #      scores; last-hidden gather via SMEM length + dynamic row slice. -----
    hf = out_f_scr[...].reshape(BT, HP).astype(jnp.bfloat16)
    hb = out_b_scr[...].reshape(BT, HP).astype(jnp.bfloat16)
    k_mat = (jnp.dot(hf, w['wk_f'][...], preferred_element_type=jnp.float32)
             + jnp.dot(hb, w['wk_b'][...], preferred_element_type=jnp.float32)
             + w['bk'][...]).reshape(B, T, A)
    v_mat = (jnp.dot(hf, w['wv_f'][...], preferred_element_type=jnp.float32)
             + jnp.dot(hb, w['wv_b'][...], preferred_element_type=jnp.float32)
             + w['bv'][...]).reshape(B, T, A)

    # lstm_out[b, length[b], :] (same index as the torch code, no -1)
    last_f = jnp.concatenate(
        [out_f_scr[b, pl.ds(len_ref[b], 1), :] for b in range(B)], axis=0)
    last_b = jnp.concatenate(
        [out_b_scr[b, pl.ds(len_ref[b], 1), :] for b in range(B)], axis=0)
    q = (jnp.dot(last_f.astype(jnp.bfloat16), w['wq_f'][...],
                 preferred_element_type=jnp.float32)
         + jnp.dot(last_b.astype(jnp.bfloat16), w['wq_b'][...],
                   preferred_element_type=jnp.float32)
         + w['bq'][...])                                               # (B, A)

    scores = jnp.sum(q[:, None, :] * k_mat, axis=-1, keepdims=True)    # (B, T, 1)
    scores = scores * (1.0 / math.sqrt(float(T)))
    lens = jnp.concatenate(
        [jnp.full((1, 1, 1), len_ref[b], jnp.int32) for b in range(B)], axis=0)
    tpos = lax.broadcasted_iota(jnp.int32, (B, T, 1), 1)
    valid = (tpos < lens).astype(jnp.float32)
    scores = scores + (1.0 - valid) * (-10000.0)     # same adder as the reference
    probs = jax.nn.softmax(scores, axis=1)
    return jnp.sum(probs * v_mat, axis=1)                              # (B, A)


def _head(x, lab_ref, w, logits_ref, loss_ref):
    """dense1 -> BN -> tanh -> dense2 -> BN -> relu -> dense3 -> BN -> gelu
    -> out_proj, plus mean CrossEntropy loss."""
    def bn(h, gamma, beta):
        mean = jnp.mean(h, axis=0, keepdims=True)
        var = jnp.mean((h - mean) ** 2, axis=0, keepdims=True)
        return (h - mean) * lax.rsqrt(var + BN_EPS) * gamma + beta

    def dense(h, wk, bk):
        return jnp.dot(h.astype(jnp.bfloat16), w[wk][...],
                       preferred_element_type=jnp.float32) + w[bk][...]

    h = jnp.tanh(bn(dense(x, 'w1', 'b1'), w['bn_g'][...], w['bn_b'][...]))
    # dropout: identity (deterministic forward)
    h = jnp.maximum(bn(dense(h, 'w2', 'b2'), w['bn1_g'][...], w['bn1_b'][...]), 0.0)
    h = bn(dense(h, 'w3', 'b3'), w['bn2_g'][...], w['bn2_b'][...])
    h = 0.5 * h * (1.0 + lax.erf(h * (1.0 / math.sqrt(2.0))))          # exact gelu
    logits = dense(h, 'wo', 'bo')
    logits_ref[...] = logits.astype(logits_ref.dtype)

    # CrossEntropyLoss, reduction='mean'
    B, L = logits.shape
    m = jnp.max(logits, axis=-1, keepdims=True)
    lse = m + jnp.log(jnp.sum(jnp.exp(logits - m), axis=-1, keepdims=True))
    logp = logits - lse
    cls = lax.broadcasted_iota(jnp.int32, (B, L), 1)
    lab = jnp.concatenate(
        [jnp.full((1, 1), lab_ref[b], jnp.int32) for b in range(B)], axis=0)
    onehot = (cls == lab).astype(jnp.float32)
    nll = -jnp.sum(onehot * logp, axis=-1, keepdims=True)              # (B, 1)
    loss_ref[...] = jnp.mean(nll, axis=0, keepdims=True)               # (1, 1)


# ============================================================================
# The single fused kernel + its wrapper
# ============================================================================
def fused_ser_kernel(*refs):
    it = iter(refs)
    len_a, len_m, labels = next(it), next(it), next(it)      # SMEM int32 (B,)
    xa, xm = next(it), next(it)                              # branch inputs
    w_a = {k: next(it) for k in _BRANCH_KEYS}
    w_m = {k: next(it) for k in _BRANCH_KEYS}
    w_h = {k: next(it) for k in _HEAD_KEYS}
    logits_ref, loss_ref = next(it), next(it)                # outputs
    scr_a = [next(it) for _ in range(N_BRANCH_SCRATCH)]
    scr_m = [next(it) for _ in range(N_BRANCH_SCRATCH)]

    ctx_a = _branch_ctx(xa, len_a, w_a, scr_a)
    ctx_m = _branch_ctx(xm, len_m, w_m, scr_m)
    # args.MFCC and not args.no_Allo  =>  add the two branch contexts
    _head(ctx_a + ctx_m, labels, w_h, logits_ref, loss_ref)


def _branch_scratch(B, T, p):
    cp = p['wc'].shape[0] // KTAPS
    hp = p['whh_f'].shape[0]
    return [pltpu.VMEM((B, T, KTAPS * cp), jnp.float32),     # im2col taps
            pltpu.VMEM((B, T, 4 * hp), jnp.float32),         # hoisted gates (fwd)
            pltpu.VMEM((B, T, 4 * hp), jnp.float32),         # hoisted gates (bwd)
            pltpu.VMEM((B, T, hp), jnp.float32),             # lstm out (fwd)
            pltpu.VMEM((B, T, hp), jnp.float32)]             # lstm out (bwd)


def ser_forward(params, feat_emb, mfcc_emb, label, length, mfcc_length):
    B, Ta, _ = feat_emb.shape
    _, Tm, _ = mfcc_emb.shape
    p_a, p_m, p_h = params['allo'], params['mfcc'], params['head']

    args = ([length.astype(jnp.int32), mfcc_length.astype(jnp.int32),
             label.astype(jnp.int32), feat_emb, mfcc_emb]
            + [p_a[k] for k in _BRANCH_KEYS]
            + [p_m[k] for k in _BRANCH_KEYS]
            + [p_h[k] for k in _HEAD_KEYS])
    smem = pl.BlockSpec(memory_space=pltpu.MemorySpace.SMEM)
    vmem = pl.BlockSpec(memory_space=pltpu.MemorySpace.VMEM)
    in_specs = [smem, smem, smem] + [vmem] * (len(args) - 3)

    logits, loss = pl.pallas_call(
        fused_ser_kernel,
        out_shape=(jax.ShapeDtypeStruct((B, NUM_LABELS), jnp.float32),
                   jax.ShapeDtypeStruct((1, 1), jnp.float32)),
        in_specs=in_specs,
        out_specs=(vmem, vmem),
        scratch_shapes=_branch_scratch(B, Ta, p_a) + _branch_scratch(B, Tm, p_m),
        compiler_params=pltpu.CompilerParams(vmem_limit_bytes=32 * 1024 * 1024),
    )(*args)

    # TODO(synk): GE2E SpeakerEncoder contrastive loss not representable here; 0.
    contrastive_loss = jnp.float32(0.0)
    total_loss = loss[0, 0] + 0.3 * contrastive_loss
    return total_loss, logits


# ============================================================================
# Parameter construction: torch-layout random init, converted once (eagerly)
# to the kernel layout: combined im2col conv weight, per-gate lane-padded LSTM
# weights, attention weights split into fwd/bwd halves, bf16 MXU operands.
# ============================================================================
def _round_up(v, m):
    return ((v + m - 1) // m) * m


def _pad_to(x, axis, size):
    if x.shape[axis] == size:
        return x
    widths = [(0, 0)] * x.ndim
    widths[axis] = (0, size - x.shape[axis])
    return jnp.pad(x, widths)


def _pad_gate_cols(w, h, hp):
    # (..., 4h) -> (..., 4hp): gate g placed at [g*hp, g*hp + h), zeros elsewhere.
    gates = [_pad_to(w[..., g * h:(g + 1) * h], w.ndim - 1, hp) for g in range(4)]
    return jnp.concatenate(gates, axis=-1)


def init_torch_params(seed=0):
    keys = iter(jax.random.split(jax.random.PRNGKey(seed), 64))

    def w(shape, scale=0.05):
        return (scale * jax.random.normal(next(keys), shape)).astype(jnp.float32)

    def conv(cin, cout, k):
        return {'weight': w((cout, cin, k)), 'bias': w((cout,))}

    def lstm(insize, hsize):
        def one_dir():
            return {'w_ih': w((4 * hsize, insize)), 'w_hh': w((4 * hsize, hsize)),
                    'b_ih': w((4 * hsize,)), 'b_hh': w((4 * hsize,))}
        return {'fwd': one_dir(), 'bwd': one_dir()}

    def linear(insize, outsize):
        return {'weight': w((outsize, insize)), 'bias': w((outsize,))}

    def branch(cin, csize, hsize):
        return {'conv1': conv(cin, csize, 3), 'conv2': conv(cin, csize, 5),
                'lstm': lstm(csize, hsize),
                'Q': linear(hsize * 2, ALLO_ATTN_SIZE),
                'K': linear(hsize * 2, ALLO_ATTN_SIZE),
                'V': linear(hsize * 2, ALLO_ATTN_SIZE)}

    head = {'dense1': linear(ALLO_ATTN_SIZE, HIDDEN_SIZE * 2),
            'dense2': linear(HIDDEN_SIZE * 2, HIDDEN_SIZE),
            'dense3': linear(HIDDEN_SIZE, HIDDEN_SIZE // 2),
            'out_proj': linear(HIDDEN_SIZE // 2, NUM_LABELS),
            'bn_g': jnp.ones((HIDDEN_SIZE * 2,), jnp.float32),
            'bn_b': jnp.zeros((HIDDEN_SIZE * 2,), jnp.float32),
            'bn1_g': jnp.ones((HIDDEN_SIZE,), jnp.float32),
            'bn1_b': jnp.zeros((HIDDEN_SIZE,), jnp.float32),
            'bn2_g': jnp.ones((HIDDEN_SIZE // 2,), jnp.float32),
            'bn2_b': jnp.zeros((HIDDEN_SIZE // 2,), jnp.float32)}

    return {'allo': branch(ALLO_IN, ALLO_CONV_SIZE, ALLO_LSTM_SIZE),
            'mfcc': branch(MFCC_IN, MFCC_CONV_SIZE, MFCC_LSTM_SIZE),
            'head': head}


def _branch_kernel_params(tp, hsize, cp):
    hp = _round_up(hsize, LANE)
    osize = tp['conv1']['weight'].shape[0]
    op = _round_up(osize, LANE)
    cin = tp['conv1']['weight'].shape[1]

    # combined im2col conv weight: tap j multiplies x[t + j - 2]; the k=3 taps
    # land on j = 1..3.  Shape (KTAPS*cp, op); bf16 operand for the MXU.
    w5 = jnp.transpose(tp['conv2']['weight'], (2, 1, 0))    # (5, C, O)
    w3 = jnp.transpose(tp['conv1']['weight'], (2, 1, 0))    # (3, C, O)
    wc = jnp.zeros((KTAPS, cp, op), jnp.float32)
    wc = wc.at[:, :cin, :osize].set(w5)
    wc = wc.at[1:4, :cin, :osize].add(w3)
    wc = wc.reshape(KTAPS * cp, op).astype(jnp.bfloat16)
    bc = _pad_to((tp['conv1']['bias'] + tp['conv2']['bias'])[None, :], 1, op)

    def lstm_dir(d):
        # torch (4H, I)/(4H, H) -> (OP, 4HP)/(HP, 4HP); padded lanes are zero so
        # padded hidden units stay exactly 0 through the recurrence.
        wih = _pad_to(_pad_gate_cols(d['w_ih'].T, hsize, hp), 0, op)
        whh = _pad_to(_pad_gate_cols(d['w_hh'].T, hsize, hp), 0, hp)
        bias = _pad_gate_cols((d['b_ih'] + d['b_hh'])[None, :], hsize, hp)
        return wih.astype(jnp.bfloat16), whh, bias  # whh stays f32 (serial path)

    def attn(lin):
        wt = lin['weight'].T                 # (2H, A): rows [0:H]=fwd, [H:2H]=bwd
        return (_pad_to(wt[:hsize], 0, hp).astype(jnp.bfloat16),
                _pad_to(wt[hsize:], 0, hp).astype(jnp.bfloat16),
                lin['bias'][None, :])

    wih_f, whh_f, bg_f = lstm_dir(tp['lstm']['fwd'])
    wih_b, whh_b, bg_b = lstm_dir(tp['lstm']['bwd'])
    wq_f, wq_b, bq = attn(tp['Q'])
    wk_f, wk_b, bk = attn(tp['K'])
    wv_f, wv_b, bv = attn(tp['V'])
    return dict(wc=wc, bc=bc,
                wih_f=wih_f, whh_f=whh_f, bg_f=bg_f,
                wih_b=wih_b, whh_b=whh_b, bg_b=bg_b,
                wq_f=wq_f, wq_b=wq_b, bq=bq,
                wk_f=wk_f, wk_b=wk_b, bk=bk,
                wv_f=wv_f, wv_b=wv_b, bv=bv)


def _head_kernel_params(tp):
    def lin(l):
        return l['weight'].T.astype(jnp.bfloat16), l['bias'][None, :]
    w1, b1 = lin(tp['dense1'])
    w2, b2 = lin(tp['dense2'])
    w3, b3 = lin(tp['dense3'])
    wo, bo = lin(tp['out_proj'])
    return dict(w1=w1, b1=b1, w2=w2, b2=b2, w3=w3, b3=b3, wo=wo, bo=bo,
                bn_g=tp['bn_g'][None, :], bn_b=tp['bn_b'][None, :],
                bn1_g=tp['bn1_g'][None, :], bn1_b=tp['bn1_b'][None, :],
                bn2_g=tp['bn2_g'][None, :], bn2_b=tp['bn2_b'][None, :])


def to_kernel_params(tp):
    return {'allo': _branch_kernel_params(tp['allo'], ALLO_LSTM_SIZE,
                                          _round_up(ALLO_IN, LANE)),  # tap stride 256
            'mfcc': _branch_kernel_params(tp['mfcc'], MFCC_LSTM_SIZE,
                                          MFCC_IN),                   # tap stride 24
            'head': _head_kernel_params(tp['head'])}


if __name__ == "__main__":
    B, T_ALLO, T_MFCC = 2, 8, 8
    key = jax.random.PRNGKey(0)
    k1, k2 = jax.random.split(key)
    feat_emb = jax.random.normal(k1, (B, T_ALLO, ALLO_IN), jnp.float32)   # (B, T, 230)
    mfcc_emb = jax.random.normal(k2, (B, T_MFCC, MFCC_IN), jnp.float32)   # (B, Tm, 24)
    label = jnp.array([1, 3], dtype=jnp.int32)
    length = jnp.array([5, 7], dtype=jnp.int32)        # indices < T (used as-is)
    mfcc_length = jnp.array([6, 4], dtype=jnp.int32)

    params = to_kernel_params(init_torch_params(0))    # kernel layout built once
    fwd = jax.jit(ser_forward)
    total_loss, logits = fwd(params, feat_emb, mfcc_emb, label, length, mfcc_length)
    jax.block_until_ready((total_loss, logits))
    assert logits.shape == (B, NUM_LABELS)
    assert bool(jnp.isfinite(total_loss))
    print("KERNEL_OK")
</pallas_src>

<mosaic_0001>
module attributes {stable_mosaic.version = 11 : i64} {
  func.func @fused_ser_kernel(%arg0: memref<2xi32, #tpu.memory_space<smem>>, %arg1: memref<2xi32, #tpu.memory_space<smem>>, %arg2: memref<2xi32, #tpu.memory_space<smem>>, %arg3: memref<2x8x230xf32, #tpu.memory_space<vmem>>, %arg4: memref<2x8x24xf32, #tpu.memory_space<vmem>>, %arg5: memref<1280x128xbf16, #tpu.memory_space<vmem>>, %arg6: memref<1x128xf32, #tpu.memory_space<vmem>>, %arg7: memref<128x512xbf16, #tpu.memory_space<vmem>>, %arg8: memref<128x512xf32, #tpu.memory_space<vmem>>, %arg9: memref<1x512xf32, #tpu.memory_space<vmem>>, %arg10: memref<128x512xbf16, #tpu.memory_space<vmem>>, %arg11: memref<128x512xf32, #tpu.memory_space<vmem>>, %arg12: memref<1x512xf32, #tpu.memory_space<vmem>>, %arg13: memref<128x128xbf16, #tpu.memory_space<vmem>>, %arg14: memref<128x128xbf16, #tpu.memory_space<vmem>>, %arg15: memref<1x128xf32, #tpu.memory_space<vmem>>, %arg16: memref<128x128xbf16, #tpu.memory_space<vmem>>, %arg17: memref<128x128xbf16, #tpu.memory_space<vmem>>, %arg18: memref<1x128xf32, #tpu.memory_space<vmem>>, %arg19: memref<128x128xbf16, #tpu.memory_space<vmem>>, %arg20: memref<128x128xbf16, #tpu.memory_space<vmem>>, %arg21: memref<1x128xf32, #tpu.memory_space<vmem>>, %arg22: memref<120x128xbf16, #tpu.memory_space<vmem>>, %arg23: memref<1x128xf32, #tpu.memory_space<vmem>>, %arg24: memref<128x512xbf16, #tpu.memory_space<vmem>>, %arg25: memref<128x512xf32, #tpu.memory_space<vmem>>, %arg26: memref<1x512xf32, #tpu.memory_space<vmem>>, %arg27: memref<128x512xbf16, #tpu.memory_space<vmem>>, %arg28: memref<128x512xf32, #tpu.memory_space<vmem>>, %arg29: memref<1x512xf32, #tpu.memory_space<vmem>>, %arg30: memref<128x128xbf16, #tpu.memory_space<vmem>>, %arg31: memref<128x128xbf16, #tpu.memory_space<vmem>>, %arg32: memref<1x128xf32, #tpu.memory_space<vmem>>, %arg33: memref<128x128xbf16, #tpu.memory_space<vmem>>, %arg34: memref<128x128xbf16, #tpu.memory_space<vmem>>, %arg35: memref<1x128xf32, #tpu.memory_space<vmem>>, %arg36: memref<128x128xbf16, #tpu.memory_space<vmem>>, %arg37: memref<128x128xbf16, #tpu.memory_space<vmem>>, %arg38: memref<1x128xf32, #tpu.memory_space<vmem>>, %arg39: memref<128x512xbf16, #tpu.memory_space<vmem>>, %arg40: memref<1x512xf32, #tpu.memory_space<vmem>>, %arg41: memref<1x512xf32, #tpu.memory_space<vmem>>, %arg42: memref<1x512xf32, #tpu.memory_space<vmem>>, %arg43: memref<512x256xbf16, #tpu.memory_space<vmem>>, %arg44: memref<1x256xf32, #tpu.memory_space<vmem>>, %arg45: memref<1x256xf32, #tpu.memory_space<vmem>>, %arg46: memref<1x256xf32, #tpu.memory_space<vmem>>, %arg47: memref<256x128xbf16, #tpu.memory_space<vmem>>, %arg48: memref<1x128xf32, #tpu.memory_space<vmem>>, %arg49: memref<1x128xf32, #tpu.memory_space<vmem>>, %arg50: memref<1x128xf32, #tpu.memory_space<vmem>>, %arg51: memref<128x4xbf16, #tpu.memory_space<vmem>>, %arg52: memref<1x4xf32, #tpu.memory_space<vmem>>, %arg53: memref<2x4xf32, #tpu.memory_space<vmem>>, %arg54: memref<1x1xf32, #tpu.memory_space<vmem>>, %arg55: memref<2x8x1280xf32, #tpu.memory_space<vmem>>, %arg56: memref<2x8x512xf32, #tpu.memory_space<vmem>>, %arg57: memref<2x8x512xf32, #tpu.memory_space<vmem>>, %arg58: memref<2x8x128xf32, #tpu.memory_space<vmem>>, %arg59: memref<2x8x128xf32, #tpu.memory_space<vmem>>, %arg60: memref<2x8x120xf32, #tpu.memory_space<vmem>>, %arg61: memref<2x8x512xf32, #tpu.memory_space<vmem>>, %arg62: memref<2x8x512xf32, #tpu.memory_space<vmem>>, %arg63: memref<2x8x128xf32, #tpu.memory_space<vmem>>, %arg64: memref<2x8x128xf32, #tpu.memory_space<vmem>>) attributes {dimension_semantics = [], scalar_prefetch = 0 : i64, scratch_operands = 10 : i64, tpu.core_type = #tpu.core_type<tc>} {
    %cst = arith.constant 0.000000e+00 : f32
    %0 = vector.broadcast %cst : f32 to vector<2x8x1280xf32>
    %c0 = arith.constant 0 : index
    %c0_0 = arith.constant 0 : index
    %c0_1 = arith.constant 0 : index
    %1 = vector.load %arg55[%c0, %c0_0, %c0_1] : memref<2x8x1280xf32, #tpu.memory_space<vmem>>, vector<2x8x1280xf32>
    tpu.vector_store %arg55[%c0, %c0_0, %c0_1], %0 {strides = array<i32>} : memref<2x8x1280xf32, #tpu.memory_space<vmem>>, vector<2x8x1280xf32>,
    %c0_2 = arith.constant 0 : index
    %c0_3 = arith.constant 0 : index
    %c0_4 = arith.constant 0 : index
    %2 = vector.load %arg3[%c0_2, %c0_3, %c0_4] : memref<2x8x230xf32, #tpu.memory_space<vmem>>, vector<2x6x230xf32>
    %c0_5 = arith.constant 0 : index
    %c2 = arith.constant 2 : index
    %c0_6 = arith.constant 0 : index
    %3 = vector.load %arg55[%c0_5, %c2, %c0_6] : memref<2x8x1280xf32, #tpu.memory_space<vmem>>, vector<2x6x230xf32>
    tpu.vector_store %arg55[%c0_5, %c2, %c0_6], %2 {strides = array<i32>} : memref<2x8x1280xf32, #tpu.memory_space<vmem>>, vector<2x6x230xf32>,
    %c0_7 = arith.constant 0 : index
    %c0_8 = arith.constant 0 : index
    %c0_9 = arith.constant 0 : index
    %4 = vector.load %arg3[%c0_7, %c0_8, %c0_9] : memref<2x8x230xf32, #tpu.memory_space<vmem>>, vector<2x7x230xf32>
    %c0_10 = arith.constant 0 : index
    %c1 = arith.constant 1 : index
    %c256 = arith.constant 256 : index
    %5 = vector.load %arg55[%c0_10, %c1, %c256] : memref<2x8x1280xf32, #tpu.memory_space<vmem>>, vector<2x7x230xf32>
    tpu.vector_store %arg55[%c0_10, %c1, %c256], %4 {strides = array<i32>} : memref<2x8x1280xf32, #tpu.memory_space<vmem>>, vector<2x7x230xf32>,
    %c0_11 = arith.constant 0 : index
    %c0_12 = arith.constant 0 : index
    %c0_13 = arith.constant 0 : index
    %6 = vector.load %arg3[%c0_11, %c0_12, %c0_13] : memref<2x8x230xf32, #tpu.memory_space<vmem>>, vector<2x8x230xf32>
    %c0_14 = arith.constant 0 : index
    %c0_15 = arith.constant 0 : index
    %c512 = arith.constant 512 : index
    %7 = vector.load %arg55[%c0_14, %c0_15, %c512] : memref<2x8x1280xf32, #tpu.memory_space<vmem>>, vector<2x8x230xf32>
    tpu.vector_store %arg55[%c0_14, %c0_15, %c512], %6 {strides = array<i32>} : memref<2x8x1280xf32, #tpu.memory_space<vmem>>, vector<2x8x230xf32>,
    %c0_16 = arith.constant 0 : index
    %c1_17 = arith.constant 1 : index
    %c0_18 = arith.constant 0 : index
    %8 = vector.load %arg3[%c0_16, %c1_17, %c0_18] : memref<2x8x230xf32, #tpu.memory_space<vmem>>, vector<2x7x230xf32>
    %c0_19 = arith.constant 0 : index
    %c0_20 = arith.constant 0 : index
    %c768 = arith.constant 768 : index
    %9 = vector.load %arg55[%c0_19, %c0_20, %c768] : memref<2x8x1280xf32, #tpu.memory_space<vmem>>, vector<2x7x230xf32>
    tpu.vector_store %arg55[%c0_19, %c0_20, %c768], %8 {strides = array<i32>} : memref<2x8x1280xf32, #tpu.memory_space<vmem>>, vector<2x7x230xf32>,
    %c0_21 = arith.constant 0 : index
    %c2_22 = arith.constant 2 : index
    %c0_23 = arith.constant 0 : index
    %10 = vector.load %arg3[%c0_21, %c2_22, %c0_23] : memref<2x8x230xf32, #tpu.memory_space<vmem>>, vector<2x6x230xf32>
    %c0_24 = arith.constant 0 : index
    %c0_25 = arith.constant 0 : index
    %c1024 = arith.constant 1024 : index
    %11 = vector.load %arg55[%c0_24, %c0_25, %c1024] : memref<2x8x1280xf32, #tpu.memory_space<vmem>>, vector<2x6x230xf32>
    tpu.vector_store %arg55[%c0_24, %c0_25, %c1024], %10 {strides = array<i32>} : memref<2x8x1280xf32, #tpu.memory_space<vmem>>, vector<2x6x230xf32>,
    %c0_26 = arith.constant 0 : index
    %c0_27 = arith.constant 0 : index
    %c0_28 = arith.constant 0 : index
    %12 = vector.load %arg55[%c0_26, %c0_27, %c0_28] : memref<2x8x1280xf32, #tpu.memory_space<vmem>>, vector<2x8x1280xf32>
    %13 = vector.shape_cast %12 : vector<2x8x1280xf32> to vector<16x1280xf32>
    %14 = arith.truncf %13 : vector<16x1280xf32> to vector<16x1280xbf16>
    %c0_29 = arith.constant 0 : index
    %c0_30 = arith.constant 0 : index
    %15 = vector.load %arg5[%c0_29, %c0_30] : memref<1280x128xbf16, #tpu.memory_space<vmem>>, vector<1280x128xbf16>
    %cst_31 = arith.constant dense<0.000000e+00> : vector<16x128xf32>
    %16 = tpu.matmul %14, %15, %cst_31 {dimension_numbers = #tpu.dot_dimension_numbers<[1], [0], [0], [1], [0, 0, 1, 1], [], []>} : vector<16x1280xbf16>, vector<1280x128xbf16>, vector<16x128xf32> -> vector<16x128xf32>
    %c0_32 = arith.constant 0 : index
    %c0_33 = arith.constant 0 : index
    %17 = vector.load %arg6[%c0_32, %c0_33] : memref<1x128xf32, #tpu.memory_space<vmem>>, vector<1x128xf32>
    %18 = vector.broadcast %17 : vector<1x128xf32> to vector<16x128xf32>
    %19 = arith.addf %16, %18 : vector<16x128xf32>
    %20 = arith.truncf %19 : vector<16x128xf32> to vector<16x128xbf16>
    %c0_34 = arith.constant 0 : index
    %c0_35 = arith.constant 0 : index
    %21 = vector.load %arg7[%c0_34, %c0_35] : memref<128x512xbf16, #tpu.memory_space<vmem>>, vector<128x512xbf16>
    %cst_36 = arith.constant dense<0.000000e+00> : vector<16x512xf32>
    %22 = tpu.matmul %20, %21, %cst_36 {dimension_numbers = #tpu.dot_dimension_numbers<[1], [0], [0], [1], [0, 0, 1, 1], [], []>} : vector<16x128xbf16>, vector<128x512xbf16>, vector<16x512xf32> -> vector<16x512xf32>
    %c0_37 = arith.constant 0 : index
    %c0_38 = arith.constant 0 : index
    %23 = vector.load %arg9[%c0_37, %c0_38] : memref<1x512xf32, #tpu.memory_space<vmem>>, vector<1x512xf32>
    %24 = vector.broadcast %23 : vector<1x512xf32> to vector<16x512xf32>
    %25 = arith.addf %22, %24 : vector<16x512xf32>
    %26 = vector.shape_cast %25 : vector<16x512xf32> to vector<2x8x512xf32>
    %c0_39 = arith.constant 0 : index
    %c0_40 = arith.constant 0 : index
    %c0_41 = arith.constant 0 : index
    %27 = vector.load %arg56[%c0_39, %c0_40, %c0_41] : memref<2x8x512xf32, #tpu.memory_space<vmem>>, vector<2x8x512xf32>
    tpu.vector_store %arg56[%c0_39, %c0_40, %c0_41], %26 {strides = array<i32>} : memref<2x8x512xf32, #tpu.memory_space<vmem>>, vector<2x8x512xf32>,
    %c0_42 = arith.constant 0 : index
    %c0_43 = arith.constant 0 : index
    %28 = vector.load %arg10[%c0_42, %c0_43] : memref<128x512xbf16, #tpu.memory_space<vmem>>, vector<128x512xbf16>
    %cst_44 = arith.constant dense<0.000000e+00> : vector<16x512xf32>
    %29 = tpu.matmul %20, %28, %cst_44 {dimension_numbers = #tpu.dot_dimension_numbers<[1], [0], [0], [1], [0, 0, 1, 1], [], []>} : vector<16x128xbf16>, vector<128x512xbf16>, vector<16x512xf32> -> vector<16x512xf32>
    %c0_45 = arith.constant 0 : index
    %c0_46 = arith.constant 0 : index
    %30 = vector.load %arg12[%c0_45, %c0_46] : memref<1x512xf32, #tpu.memory_space<vmem>>, vector<1x512xf32>
    %31 = vector.broadcast %30 : vector<1x512xf32> to vector<16x512xf32>
    %32 = arith.addf %29, %31 : vector<16x512xf32>
    %33 = vector.shape_cast %32 : vector<16x512xf32> to vector<2x8x512xf32>
    %c0_47 = arith.constant 0 : index
    %c0_48 = arith.constant 0 : index
    %c0_49 = arith.constant 0 : index
    %34 = vector.load %arg57[%c0_47, %c0_48, %c0_49] : memref<2x8x512xf32, #tpu.memory_space<vmem>>, vector<2x8x512xf32>
    tpu.vector_store %arg57[%c0_47, %c0_48, %c0_49], %33 {strides = array<i32>} : memref<2x8x512xf32, #tpu.memory_space<vmem>>, vector<2x8x512xf32>,
    %cst_50 = arith.constant 0.000000e+00 : f32
    %35 = vector.broadcast %cst_50 : f32 to vector<8x128xf32>
    %cst_51 = arith.constant 0.000000e+00 : f32
    %36 = vector.broadcast %cst_51 : f32 to vector<8x128xf32>
    %cst_52 = arith.constant 0.000000e+00 : f32
    %37 = vector.broadcast %cst_52 : f32 to vector<8x128xf32>
    %cst_53 = arith.constant 0.000000e+00 : f32
    %38 = vector.broadcast %cst_53 : f32 to vector<8x128xf32>
    %c0_54 = arith.constant 0 : index
    %c0_55 = arith.constant 0 : index
    %c0_56 = arith.constant 0 : index
    %39 = vector.load %arg56[%c0_54, %c0_55, %c0_56] : memref<2x8x512xf32, #tpu.memory_space<vmem>>, vector<1x8x512xf32>
    %40 = vector.shape_cast %39 : vector<1x8x512xf32> to vector<8x512xf32>
    %c0_57 = arith.constant 0 : index
    %c0_58 = arith.constant 0 : index
    %41 = vector.load %arg8[%c0_57, %c0_58] : memref<128x512xf32, #tpu.memory_space<vmem>>, vector<128x512xf32>
    %cst_59 = arith.constant dense<0.000000e+00> : vector<8x512xf32>
    %42 = tpu.matmul %35, %41, %cst_59 {dimension_numbers = #tpu.dot_dimension_numbers<[1], [0], [0], [1], [0, 0, 1, 1], [], []>} : vector<8x128xf32>, vector<128x512xf32>, vector<8x512xf32> -> vector<8x512xf32>
    %43 = arith.addf %40, %42 : vector<8x512xf32>
    %c1_60 = arith.constant 1 : index
    %c0_61 = arith.constant 0 : index
    %c0_62 = arith.constant 0 : index
    %44 = vector.load %arg57[%c1_60, %c0_61, %c0_62] : memref<2x8x512xf32, #tpu.memory_space<vmem>>, vector<1x8x512xf32>
    %45 = vector.shape_cast %44 : vector<1x8x512xf32> to vector<8x512xf32>
    %c0_63 = arith.constant 0 : index
    %c0_64 = arith.constant 0 : index
    %46 = vector.load %arg11[%c0_63, %c0_64] : memref<128x512xf32, #tpu.memory_space<vmem>>, vector<128x512xf32>
    %cst_65 = arith.constant dense<0.000000e+00> : vector<8x512xf32>
    %47 = tpu.matmul %37, %46, %cst_65 {dimension_numbers = #tpu.dot_dimension_numbers<[1], [0], [0], [1], [0, 0, 1, 1], [], []>} : vector<8x128xf32>, vector<128x512xf32>, vector<8x512xf32> -> vector<8x512xf32>
    %48 = arith.addf %45, %47 : vector<8x512xf32>
    %49 = vector.extract_strided_slice %43 {offsets = [0, 0], sizes = [8, 128], strides = [1, 1]} : vector<8x512xf32> to vector<8x128xf32>
    %50 = arith.negf %49 : vector<8x128xf32>
    %51 = math.exp %50 : vector<8x128xf32>
    %cst_66 = arith.constant 1.000000e+00 : f32
    %52 = vector.broadcast %cst_66 : f32 to vector<8x128xf32>
    %53 = arith.addf %52, %51 : vector<8x128xf32>
    %54 = arith.divf %52, %53 : vector<8x128xf32>
    %55 = vector.extract_strided_slice %43 {offsets = [0, 128], sizes = [8, 128], strides = [1, 1]} : vector<8x512xf32> to vector<8x128xf32>
    %56 = arith.negf %55 : vector<8x128xf32>
    %57 = math.exp %56 : vector<8x128xf32>
    %cst_67 = arith.constant 1.000000e+00 : f32
    %58 = vector.broadcast %cst_67 : f32 to vector<8x128xf32>
    %59 = arith.addf %58, %57 : vector<8x128xf32>
    %60 = arith.divf %58, %59 : vector<8x128xf32>
    %61 = vector.extract_strided_slice %43 {offsets = [0, 256], sizes = [8, 128], strides = [1, 1]} : vector<8x512xf32> to vector<8x128xf32>
    %62 = math.tanh %61 : vector<8x128xf32>
    %63 = vector.extract_strided_slice %43 {offsets = [0, 384], sizes = [8, 128], strides = [1, 1]} : vector<8x512xf32> to vector<8x128xf32>
    %64 = arith.negf %63 : vector<8x128xf32>
    %65 = math.exp %64 : vector<8x128xf32>
    %cst_68 = arith.constant 1.000000e+00 : f32
    %66 = vector.broadcast %cst_68 : f32 to vector<8x128xf32>
    %67 = arith.addf %66, %65 : vector<8x128xf32>
    %68 = arith.divf %66, %67 : vector<8x128xf32>
    %69 = vector.extract_strided_slice %48 {offsets = [0, 0], sizes = [8, 128], strides = [1, 1]} : vector<8x512xf32> to vector<8x128xf32>
    %70 = arith.negf %69 : vector<8x128xf32>
    %71 = math.exp %70 : vector<8x128xf32>
    %cst_69 = arith.constant 1.000000e+00 : f32
    %72 = vector.broadcast %cst_69 : f32 to vector<8x128xf32>
    %73 = arith.addf %72, %71 : vector<8x128xf32>
    %74 = arith.divf %72, %73 : vector<8x128xf32>
    %75 = vector.extract_strided_slice %48 {offsets = [0, 128], sizes = [8, 128], strides = [1, 1]} : vector<8x512xf32> to vector<8x128xf32>
    %76 = arith.negf %75 : vector<8x128xf32>
    %77 = math.exp %76 : vector<8x128xf32>
    %cst_70 = arith.constant 1.000000e+00 : f32
    %78 = vector.broadcast %cst_70 : f32 to vector<8x128xf32>
    %79 = arith.addf %78, %77 : vector<8x128xf32>
    %80 = arith.divf %78, %79 : vector<8x128xf32>
    %81 = vector.extract_strided_slice %48 {offsets = [0, 256], sizes = [8, 128], strides = [1, 1]} : vector<8x512xf32> to vector<8x128xf32>
    %82 = math.tanh %81 : vector<8x128xf32>
    %83 = vector.extract_strided_slice %48 {offsets = [0, 384], sizes = [8, 128], strides = [1, 1]} : vector<8x512xf32> to vector<8x128xf32>
    %84 = arith.negf %83 : vector<8x128xf32>
    %85 = math.exp %84 : vector<8x128xf32>
    %cst_71 = arith.constant 1.000000e+00 : f32
    %86 = vector.broadcast %cst_71 : f32 to vector<8x128xf32>
    %87 = arith.addf %86, %85 : vector<8x128xf32>
    %88 = arith.divf %86, %87 : vector<8x128xf32>
    %89 = arith.mulf %60, %36 : vector<8x128xf32>
    %90 = arith.mulf %54, %62 : vector<8x128xf32>
    %91 = arith.addf %89, %90 : vector<8x128xf32>
    %92 = math.tanh %91 : vector<8x128xf32>
    %93 = arith.mulf %68, %92 : vector<8x128xf32>
    %94 = arith.mulf %80, %38 : vector<8x128xf32>
    %95 = arith.mulf %74, %82 : vector<8x128xf32>
    %96 = arith.addf %94, %95 : vector<8x128xf32>
    %97 = math.tanh %96 : vector<8x128xf32>
    %98 = arith.mulf %88, %97 : vector<8x128xf32>
    %c0_72 = arith.constant 0 : index
    %c0_73 = arith.constant 0 : index
    %c0_74 = arith.constant 0 : index
    %99 = vector.load %arg58[%c0_72, %c0_73, %c0_74] : memref<2x8x128xf32, #tpu.memory_space<vmem>>, vector<1x8x128xf32>
    %100 = vector.shape_cast %99 : vector<1x8x128xf32> to vector<8x128xf32>
    %101 = vector.shape_cast %93 : vector<8x128xf32> to vector<1x8x128xf32>
    tpu.vector_store %arg58[%c0_72, %c0_73, %c0_74], %101 {strides = array<i32>} : memref<2x8x128xf32, #tpu.memory_space<vmem>>, vector<1x8x128xf32>,
    %c1_75 = arith.constant 1 : index
    %c0_76 = arith.constant 0 : index
    %c0_77 = arith.constant 0 : index
    %102 = vector.load %arg59[%c1_75, %c0_76, %c0_77] : memref<2x8x128xf32, #tpu.memory_space<vmem>>, vector<1x8x128xf32>
    %103 = vector.shape_cast %102 : vector<1x8x128xf32> to vector<8x128xf32>
    %104 = vector.shape_cast %98 : vector<8x128xf32> to vector<1x8x128xf32>
    tpu.vector_store %arg59[%c1_75, %c0_76, %c0_77], %104 {strides = array<i32>} : memref<2x8x128xf32, #tpu.memory_space<vmem>>, vector<1x8x128xf32>,
    %c1_78 = arith.constant 1 : index
    %c0_79 = arith.constant 0 : index
    %c0_80 = arith.constant 0 : index
    %105 = vector.load %arg56[%c1_78, %c0_79, %c0_80] : memref<2x8x512xf32, #tpu.memory_space<vmem>>, vector<1x8x512xf32>
    %106 = vector.shape_cast %105 : vector<1x8x512xf32> to vector<8x512xf32>
    %c0_81 = arith.constant 0 : index
    %c0_82 = arith.constant 0 : index
    %107 = vector.load %arg8[%c0_81, %c0_82] : memref<128x512xf32, #tpu.memory_space<vmem>>, vector<128x512xf32>
    %cst_83 = arith.constant dense<0.000000e+00> : vector<8x512xf32>
    %108 = tpu.matmul %93, %107, %cst_83 {dimension_numbers = #tpu.dot_dimension_numbers<[1], [0], [0], [1], [0, 0, 1, 1], [], []>} : vector<8x128xf32>, vector<128x512xf32>, vector<8x512xf32> -> vector<8x512xf32>
    %109 = arith.addf %106, %108 : vector<8x512xf32>
    %c0_84 = arith.constant 0 : index
    %c0_85 = arith.constant 0 : index
    %c0_86 = arith.constant 0 : index
    %110 = vector.load %arg57[%c0_84, %c0_85, %c0_86] : memref<2x8x512xf32, #tpu.memory_space<vmem>>, vector<1x8x512xf32>
    %111 = vector.shape_cast %110 : vector<1x8x512xf32> to vector<8x512xf32>
    %c0_87 = arith.constant 0 : index
    %c0_88 = arith.constant 0 : index
    %112 = vector.load %arg11[%c0_87, %c0_88] : memref<128x512xf32, #tpu.memory_space<vmem>>, vector<128x512xf32>
    %cst_89 = arith.constant dense<0.000000e+00> : vector<8x512xf32>
    %113 = tpu.matmul %98, %112, %cst_89 {dimension_numbers = #tpu.dot_dimension_numbers<[1], [0], [0], [1], [0, 0, 1, 1], [], []>} : vector<8x128xf32>, vector<128x512xf32>, vector<8x512xf32> -> vector<8x512xf32>
    %114 = arith.addf %111, %113 : vector<8x512xf32>
    %115 = vector.extract_strided_slice %109 {offsets = [0, 0], sizes = [8, 128], strides = [1, 1]} : vector<8x512xf32> to vector<8x128xf32>
    %116 = arith.negf %115 : vector<8x128xf32>
    %117 = math.exp %116 : vector<8x128xf32>
    %cst_90 = arith.constant 1.000000e+00 : f32
    %118 = vector.broadcast %cst_90 : f32 to vector<8x128xf32>
    %119 = arith.addf %118, %117 : vector<8x128xf32>
    %120 = arith.divf %118, %119 : vector<8x128xf32>
    %121 = vector.extract_strided_slice %109 {offsets = [0, 128], sizes = [8, 128], strides = [1, 1]} : vector<8x512xf32> to vector<8x128xf32>
    %122 = arith.negf %121 : vector<8x128xf32>
    %123 = math.exp %122 : vector<8x128xf32>
    %cst_91 = arith.constant 1.000000e+00 : f32
    %124 = vector.broadcast %cst_91 : f32 to vector<8x128xf32>
    %125 = arith.addf %124, %123 : vector<8x128xf32>
    %126 = arith.divf %124, %125 : vector<8x128xf32>
    %127 = vector.extract_strided_slice %109 {offsets = [0, 256], sizes = [8, 128], strides = [1, 1]} : vector<8x512xf32> to vector<8x128xf32>
    %128 = math.tanh %127 : vector<8x128xf32>
    %129 = vector.extract_strided_slice %109 {offsets = [0, 384], sizes = [8, 128], strides = [1, 1]} : vector<8x512xf32> to vector<8x128xf32>
    %130 = arith.negf %129 : vector<8x128xf32>
    %131 = math.exp %130 : vector<8x128xf32>
    %cst_92 = arith.constant 1.000000e+00 : f32
    %132 = vector.broadcast %cst_92 : f32 to vector<8x128xf32>
    %133 = arith.addf %132, %131 : vector<8x128xf32>
    %134 = arith.divf %132, %133 : vector<8x128xf32>
    %135 = vector.extract_strided_slice %114 {offsets = [0, 0], sizes = [8, 128], strides = [1, 1]} : vector<8x512xf32> to vector<8x128xf32>
    %136 = arith.negf %135 : vector<8x128xf32>
    %137 = math.exp %136 : vector<8x128xf32>
    %cst_93 = arith.constant 1.000000e+00 : f32
    %138 = vector.broadcast %cst_93 : f32 to vector<8x128xf32>
    %139 = arith.addf %138, %137 : vector<8x128xf32>
    %140 = arith.divf %138, %139 : vector<8x128xf32>
    %141 = vector.extract_strided_slice %114 {offsets = [0, 128], sizes = [8, 128], strides = [1, 1]} : vector<8x512xf32> to vector<8x128xf32>
    %142 = arith.negf %141 : vector<8x128xf32>
    %143 = math.exp %142 : vector<8x128xf32>
    %cst_94 = arith.constant 1.000000e+00 : f32
    %144 = vector.broadcast %cst_94 : f32 to vector<8x128xf32>
    %145 = arith.addf %144, %143 : vector<8x128xf32>
    %146 = arith.divf %144, %145 : vector<8x128xf32>
    %147 = vector.extract_strided_slice %114 {offsets = [0, 256], sizes = [8, 128], strides = [1, 1]} : vector<8x512xf32> to vector<8x128xf32>
    %148 = math.tanh %147 : vector<8x128xf32>
    %149 = vector.extract_strided_slice %114 {offsets = [0, 384], sizes = [8, 128], strides = [1, 1]} : vector<8x512xf32> to vector<8x128xf32>
    %150 = arith.negf %149 : vector<8x128xf32>
    %151 = math.exp %150 : vector<8x128xf32>
    %cst_95 = arith.constant 1.000000e+00 : f32
    %152 = vector.broadcast %cst_95 : f32 to vector<8x128xf32>
    %153 = arith.addf %152, %151 : vector<8x128xf32>
    %154 = arith.divf %152, %153 : vector<8x128xf32>
    %155 = arith.mulf %126, %91 : vector<8x128xf32>
    %156 = arith.mulf %120, %128 : vector<8x128xf32>
    %157 = arith.addf %155, %156 : vector<8x128xf32>
    %158 = math.tanh %157 : vector<8x128xf32>
    %159 = arith.mulf %134, %158 : vector<8x128xf32>
    %160 = arith.mulf %146, %96 : vector<8x128xf32>
    %161 = arith.mulf %140, %148 : vector<8x128xf32>
    %162 = arith.addf %160, %161 : vector<8x128xf32>
    %163 = math.tanh %162 : vector<8x128xf32>
    %164 = arith.mulf %154, %163 : vector<8x128xf32>
    %c1_96 = arith.constant 1 : index
    %c0_97 = arith.constant 0 : index
    %c0_98 = arith.constant 0 : index
    %165 = vector.load %arg58[%c1_96, %c0_97, %c0_98] : memref<2x8x128xf32, #tpu.memory_space<vmem>>, vector<1x8x128xf32>
    %166 = vector.shape_cast %165 : vector<1x8x128xf32> to vector<8x128xf32>
    %167 = vector.shape_cast %159 : vector<8x128xf32> to vector<1x8x128xf32>
    tpu.vector_store %arg58[%c1_96, %c0_97, %c0_98], %167 {strides = array<i32>} : memref<2x8x128xf32, #tpu.memory_space<vmem>>, vector<1x8x128xf32>,
    %c0_99 = arith.constant 0 : index
    %c0_100 = arith.constant 0 : index
    %c0_101 = arith.constant 0 : index
    %168 = vector.load %arg59[%c0_99, %c0_100, %c0_101] : memref<2x8x128xf32, #tpu.memory_space<vmem>>, vector<1x8x128xf32>
    %169 = vector.shape_cast %168 : vector<1x8x128xf32> to vector<8x128xf32>
    %170 = vector.shape_cast %164 : vector<8x128xf32> to vector<1x8x128xf32>
    tpu.vector_store %arg59[%c0_99, %c0_100, %c0_101], %170 {strides = array<i32>} : memref<2x8x128xf32, #tpu.memory_space<vmem>>, vector<1x8x128xf32>,
    %c0_102 = arith.constant 0 : index
    %c0_103 = arith.constant 0 : index
    %c0_104 = arith.constant 0 : index
    %171 = vector.load %arg58[%c0_102, %c0_103, %c0_104] : memref<2x8x128xf32, #tpu.memory_space<vmem>>, vector<2x8x128xf32>
    %172 = vector.shape_cast %171 : vector<2x8x128xf32> to vector<16x128xf32>
    %173 = arith.truncf %172 : vector<16x128xf32> to vector<16x128xbf16>
    %c0_105 = arith.constant 0 : index
    %c0_106 = arith.constant 0 : index
    %c0_107 = arith.constant 0 : index
    %174 = vector.load %arg59[%c0_105, %c0_106, %c0_107] : memref<2x8x128xf32, #tpu.memory_space<vmem>>, vector<2x8x128xf32>
    %175 = vector.shape_cast %174 : vector<2x8x128xf32> to vector<16x128xf32>
    %176 = arith.truncf %175 : vector<16x128xf32> to vector<16x128xbf16>
    %c0_108 = arith.constant 0 : index
    %c0_109 = arith.constant 0 : index
    %177 = vector.load %arg16[%c0_108, %c0_109] : memref<128x128xbf16, #tpu.memory_space<vmem>>, vector<128x128xbf16>
    %cst_110 = arith.constant dense<0.000000e+00> : vector<16x128xf32>
    %178 = tpu.matmul %173, %177, %cst_110 {dimension_numbers = #tpu.dot_dimension_numbers<[1], [0], [0], [1], [0, 0, 1, 1], [], []>} : vector<16x128xbf16>, vector<128x128xbf16>, vector<16x128xf32> -> vector<16x128xf32>
    %c0_111 = arith.constant 0 : index
    %c0_112 = arith.constant 0 : index
    %179 = vector.load %arg17[%c0_111, %c0_112] : memref<128x128xbf16, #tpu.memory_space<vmem>>, vector<128x128xbf16>
    %cst_113 = arith.constant dense<0.000000e+00> : vector<16x128xf32>
    %180 = tpu.matmul %176, %179, %cst_113 {dimension_numbers = #tpu.dot_dimension_numbers<[1], [0], [0], [1], [0, 0, 1, 1], [], []>} : vector<16x128xbf16>, vector<128x128xbf16>, vector<16x128xf32> -> vector<16x128xf32>
    %181 = arith.addf %178, %180 : vector<16x128xf32>
    %c0_114 = arith.constant 0 : index
    %c0_115 = arith.constant 0 : index
    %182 = vector.load %arg18[%c0_114, %c0_115] : memref<1x128xf32, #tpu.memory_space<vmem>>, vector<1x128xf32>
    %183 = vector.broadcast %182 : vector<1x128xf32> to vector<16x128xf32>
    %184 = arith.addf %181, %183 : vector<16x128xf32>
    %185 = vector.shape_cast %184 : vector<16x128xf32> to vector<2x8x128xf32>
    %c0_116 = arith.constant 0 : index
    %c0_117 = arith.constant 0 : index
    %186 = vector.load %arg19[%c0_116, %c0_117] : memref<128x128xbf16, #tpu.memory_space<vmem>>, vector<128x128xbf16>
    %cst_118 = arith.constant dense<0.000000e+00> : vector<16x128xf32>
    %187 = tpu.matmul %173, %186, %cst_118 {dimension_numbers = #tpu.dot_dimension_numbers<[1], [0], [0], [1], [0, 0, 1, 1], [], []>} : vector<16x128xbf16>, vector<128x128xbf16>, vector<16x128xf32> -> vector<16x128xf32>
    %c0_119 = arith.constant 0 : index
    %c0_120 = arith.constant 0 : index
    %188 = vector.load %arg20[%c0_119, %c0_120] : memref<128x128xbf16, #tpu.memory_space<vmem>>, vector<128x128xbf16>
    %cst_121 = arith.constant dense<0.000000e+00> : vector<16x128xf32>
    %189 = tpu.matmul %176, %188, %cst_121 {dimension_numbers = #tpu.dot_dimension_numbers<[1], [0], [0], [1], [0, 0, 1, 1], [], []>} : vector<16x128xbf16>, vector<128x128xbf16>, vector<16x128xf32> -> vector<16x128xf32>
    %190 = arith.addf %187, %189 : vector<16x128xf32>
    %c0_122 = arith.constant 0 : index
    %c0_123 = arith.constant 0 : index
    %191 = vector.load %arg21[%c0_122, %c0_123] : memref<1x128xf32, #tpu.memory_space<vmem>>, vector<1x128xf32>
    %192 = vector.broadcast %191 : vector<1x128xf32> to vector<16x128xf32>
    %193 = arith.addf %190, %192 : vector<16x128xf32>
    %194 = vector.shape_cast %193 : vector<16x128xf32> to vector<2x8x128xf32>
    %c0_124 = arith.constant 0 : index
    %195 = memref.load %arg0[%c0_124] : memref<2xi32, #tpu.memory_space<smem>>
    %c0_125 = arith.constant 0 : index
    %196 = arith.index_cast %195 : i32 to index
    %c0_126 = arith.constant 0 : index
    %197 = vector.load %arg58[%c0_125, %196, %c0_126] : memref<2x8x128xf32, #tpu.memory_space<vmem>>, vector<1x1x128xf32>
    %198 = vector.shape_cast %197 : vector<1x1x128xf32> to vector<1x128xf32>
    %c1_127 = arith.constant 1 : index
    %199 = memref.load %arg0[%c1_127] : memref<2xi32, #tpu.memory_space<smem>>
    %c1_128 = arith.constant 1 : index
    %200 = arith.index_cast %199 : i32 to index
    %c0_129 = arith.constant 0 : index
    %201 = vector.load %arg58[%c1_128, %200, %c0_129] : memref<2x8x128xf32, #tpu.memory_space<vmem>>, vector<1x1x128xf32>
    %202 = vector.shape_cast %201 : vector<1x1x128xf32> to vector<1x128xf32>
    %203 = tpu.concatenate %198, %202 in 0 : vector<1x128xf32>, vector<1x128xf32> -> vector<2x128xf32>
    %c0_130 = arith.constant 0 : index
    %204 = memref.load %arg0[%c0_130] : memref<2xi32, #tpu.memory_space<smem>>
    %c0_131 = arith.constant 0 : index
    %205 = arith.index_cast %204 : i32 to index
    %c0_132 = arith.constant 0 : index
    %206 = vector.load %arg59[%c0_131, %205, %c0_132] : memref<2x8x128xf32, #tpu.memory_space<vmem>>, vector<1x1x128xf32>
    %207 = vector.shape_cast %206 : vector<1x1x128xf32> to vector<1x128xf32>
    %c1_133 = arith.constant 1 : index
    %208 = memref.load %arg0[%c1_133] : memref<2xi32, #tpu.memory_space<smem>>
    %c1_134 = arith.constant 1 : index
    %209 = arith.index_cast %208 : i32 to index
    %c0_135 = arith.constant 0 : index
    %210 = vector.load %arg59[%c1_134, %209, %c0_135] : memref<2x8x128xf32, #tpu.memory_space<vmem>>, vector<1x1x128xf32>
    %211 = vector.shape_cast %210 : vector<1x1x128xf32> to vector<1x128xf32>
    %212 = tpu.concatenate %207, %211 in 0 : vector<1x128xf32>, vector<1x128xf32> -> vector<2x128xf32>
    %213 = arith.truncf %203 : vector<2x128xf32> to vector<2x128xbf16>
    %c0_136 = arith.constant 0 : index
    %c0_137 = arith.constant 0 : index
    %214 = vector.load %arg13[%c0_136, %c0_137] : memref<128x128xbf16, #tpu.memory_space<vmem>>, vector<128x128xbf16>
    %cst_138 = arith.constant dense<0.000000e+00> : vector<2x128xf32>
    %215 = tpu.matmul %213, %214, %cst_138 {dimension_numbers = #tpu.dot_dimension_numbers<[1], [0], [0], [1], [0, 0, 1, 1], [], []>} : vector<2x128xbf16>, vector<128x128xbf16>, vector<2x128xf32> -> vector<2x128xf32>
    %216 = arith.truncf %212 : vector<2x128xf32> to vector<2x128xbf16>
    %c0_139 = arith.constant 0 : index
    %c0_140 = arith.constant 0 : index
    %217 = vector.load %arg14[%c0_139, %c0_140] : memref<128x128xbf16, #tpu.memory_space<vmem>>, vector<128x128xbf16>
    %cst_141 = arith.constant dense<0.000000e+00> : vector<2x128xf32>
    %218 = tpu.matmul %216, %217, %cst_141 {dimension_numbers = #tpu.dot_dimension_numbers<[1], [0], [0], [1], [0, 0, 1, 1], [], []>} : vector<2x128xbf16>, vector<128x128xbf16>, vector<2x128xf32> -> vector<2x128xf32>
    %219 = arith.addf %215, %218 : vector<2x128xf32>
    %c0_142 = arith.constant 0 : index
    %c0_143 = arith.constant 0 : index
    %220 = vector.load %arg15[%c0_142, %c0_143] : memref<1x128xf32, #tpu.memory_space<vmem>>, vector<1x128xf32>
    %221 = vector.broadcast %220 : vector<1x128xf32> to vector<2x128xf32>
    %222 = arith.addf %219, %221 : vector<2x128xf32>
    %223 = vector.shape_cast %222 : vector<2x128xf32> to vector<2x1x128xf32>
    %224 = vector.broadcast %223 : vector<2x1x128xf32> to vector<2x8x128xf32>
    %225 = arith.mulf %224, %185 : vector<2x8x128xf32>
    %cst_144 = arith.constant dense<0.000000e+00> : vector<2x8xf32>
    %226 = vector.multi_reduction <add>, %225, %cst_144 [2] : vector<2x8x128xf32> to vector<2x8xf32>
    %227 = vector.shape_cast %226 : vector<2x8xf32> to vector<2x8x1xf32>
    %cst_145 = arith.constant 0.353553385 : f32
    %228 = vector.broadcast %cst_145 : f32 to vector<2x8x1xf32>
    %229 = arith.mulf %227, %228 : vector<2x8x1xf32>
    %c0_146 = arith.constant 0 : index
    %230 = memref.load %arg0[%c0_146] : memref<2xi32, #tpu.memory_space<smem>>
    %231 = vector.broadcast %230 : i32 to vector<1x1x1xi32>
    %c1_147 = arith.constant 1 : index
    %232 = memref.load %arg0[%c1_147] : memref<2xi32, #tpu.memory_space<smem>>
    %233 = vector.broadcast %232 : i32 to vector<1x1x1xi32>
    %234 = tpu.concatenate %231, %233 in 0 : vector<1x1x1xi32>, vector<1x1x1xi32> -> vector<2x1x1xi32>
    %235 = tpu.iota {dimensions = array<i32: 1>} : vector<2x8x1xi32>
    %236 = vector.broadcast %234 : vector<2x1x1xi32> to vector<2x8x1xi32>
    %237 = arith.cmpi slt, %235, %236 : vector<2x8x1xi32>
    %238 = arith.extui %237 : vector<2x8x1xi1> to vector<2x8x1xi32>
    %239 = arith.sitofp %238 : vector<2x8x1xi32> to vector<2x8x1xf32>
    %cst_148 = arith.constant 1.000000e+00 : f32
    %240 = vector.broadcast %cst_148 : f32 to vector<2x8x1xf32>
    %241 = arith.subf %240, %239 : vector<2x8x1xf32>
    %cst_149 = arith.constant -1.000000e+04 : f32
    %242 = vector.broadcast %cst_149 : f32 to vector<2x8x1xf32>
    %243 = arith.mulf %241, %242 : vector<2x8x1xf32>
    %244 = arith.addf %229, %243 : vector<2x8x1xf32>
    %cst_150 = arith.constant dense<0xFF800000> : vector<2x1xf32>
    %245 = vector.multi_reduction <maximumf>, %244, %cst_150 [1] : vector<2x8x1xf32> to vector<2x1xf32>
    %cst_151 = arith.constant 0xFF800000 : f32
    %246 = vector.broadcast %cst_151 : f32 to vector<2x1xf32>
    %247 = arith.maximumf %246, %245 : vector<2x1xf32>
    %248 = vector.shape_cast %247 : vector<2x1xf32> to vector<2x1x1xf32>
    %249 = vector.broadcast %248 : vector<2x1x1xf32> to vector<2x8x1xf32>
    %250 = arith.subf %244, %249 : vector<2x8x1xf32>
    %251 = math.exp %250 : vector<2x8x1xf32>
    %cst_152 = arith.constant dense<0.000000e+00> : vector<2x1xf32>
    %252 = vector.multi_reduction <add>, %251, %cst_152 [1] : vector<2x8x1xf32> to vector<2x1xf32>
    %253 = vector.shape_cast %252 : vector<2x1xf32> to vector<2x1x1xf32>
    %254 = vector.broadcast %253 : vector<2x1x1xf32> to vector<2x8x1xf32>
    %255 = arith.divf %251, %254 : vector<2x8x1xf32>
    %256 = vector.broadcast %255 : vector<2x8x1xf32> to vector<2x8x128xf32>
    %257 = arith.mulf %256, %194 : vector<2x8x128xf32>
    %cst_153 = arith.constant dense<0.000000e+00> : vector<2x128xf32>
    %258 = vector.multi_reduction <add>, %257, %cst_153 [1] : vector<2x8x128xf32> to vector<2x128xf32>
    %cst_154 = arith.constant 0.000000e+00 : f32
    %259 = vector.broadcast %cst_154 : f32 to vector<2x8x120xf32>
    %c0_155 = arith.constant 0 : index
    %c0_156 = arith.constant 0 : index
    %c0_157 = arith.constant 0 : index
    %260 = vector.load %arg60[%c0_155, %c0_156, %c0_157] : memref<2x8x120xf32, #tpu.memory_space<vmem>>, vector<2x8x120xf32>
    tpu.vector_store %arg60[%c0_155, %c0_156, %c0_157], %259 {strides = array<i32>} : memref<2x8x120xf32, #tpu.memory_space<vmem>>, vector<2x8x120xf32>,
    %c0_158 = arith.constant 0 : index
    %c0_159 = arith.constant 0 : index
    %c0_160 = arith.constant 0 : index
    %261 = vector.load %arg4[%c0_158, %c0_159, %c0_160] : memref<2x8x24xf32, #tpu.memory_space<vmem>>, vector<2x6x24xf32>
    %c0_161 = arith.constant 0 : index
    %c2_162 = arith.constant 2 : index
    %c0_163 = arith.constant 0 : index
    %262 = vector.load %arg60[%c0_161, %c2_162, %c0_163] : memref<2x8x120xf32, #tpu.memory_space<vmem>>, vector<2x6x24xf32>
    tpu.vector_store %arg60[%c0_161, %c2_162, %c0_163], %261 {strides = array<i32>} : memref<2x8x120xf32, #tpu.memory_space<vmem>>, vector<2x6x24xf32>,
    %c0_164 = arith.constant 0 : index
    %c0_165 = arith.constant 0 : index
    %c0_166 = arith.constant 0 : index
    %263 = vector.load %arg4[%c0_164, %c0_165, %c0_166] : memref<2x8x24xf32, #tpu.memory_space<vmem>>, vector<2x7x24xf32>
    %c0_167 = arith.constant 0 : index
    %c1_168 = arith.constant 1 : index
    %c24 = arith.constant 24 : index
    %264 = vector.load %arg60[%c0_167, %c1_168, %c24] : memref<2x8x120xf32, #tpu.memory_space<vmem>>, vector<2x7x24xf32>
    tpu.vector_store %arg60[%c0_167, %c1_168, %c24], %263 {strides = array<i32>} : memref<2x8x120xf32, #tpu.memory_space<vmem>>, vector<2x7x24xf32>,
    %c0_169 = arith.constant 0 : index
    %c0_170 = arith.constant 0 : index
    %c0_171 = arith.constant 0 : index
    %265 = vector.load %arg4[%c0_169, %c0_170, %c0_171] : memref<2x8x24xf32, #tpu.memory_space<vmem>>, vector<2x8x24xf32>
    %c0_172 = arith.constant 0 : index
    %c0_173 = arith.constant 0 : index
    %c48 = arith.constant 48 : index
    %266 = vector.load %arg60[%c0_172, %c0_173, %c48] : memref<2x8x120xf32, #tpu.memory_space<vmem>>, vector<2x8x24xf32>
    tpu.vector_store %arg60[%c0_172, %c0_173, %c48], %265 {strides = array<i32>} : memref<2x8x120xf32, #tpu.memory_space<vmem>>, vector<2x8x24xf32>,
    %c0_174 = arith.constant 0 : index
    %c1_175 = arith.constant 1 : index
    %c0_176 = arith.constant 0 : index
    %267 = vector.load %arg4[%c0_174, %c1_175, %c0_176] : memref<2x8x24xf32, #tpu.memory_space<vmem>>, vector<2x7x24xf32>
    %c0_177 = arith.constant 0 : index
    %c0_178 = arith.constant 0 : index
    %c72 = arith.constant 72 : index
    %268 = vector.load %arg60[%c0_177, %c0_178, %c72] : memref<2x8x120xf32, #tpu.memory_space<vmem>>, vector<2x7x24xf32>
    tpu.vector_store %arg60[%c0_177, %c0_178, %c72], %267 {strides = array<i32>} : memref<2x8x120xf32, #tpu.memory_space<vmem>>, vector<2x7x24xf32>,
    %c0_179 = arith.constant 0 : index
    %c2_180 = arith.constant 2 : index
    %c0_181 = arith.constant 0 : index
    %269 = vector.load %arg4[%c0_179, %c2_180, %c0_181] : memref<2x8x24xf32, #tpu.memory_space<vmem>>, vector<2x6x24xf32>
    %c0_182 = arith.constant 0 : index
    %c0_183 = arith.constant 0 : index
    %c96 = arith.constant 96 : index
    %270 = vector.load %arg60[%c0_182, %c0_183, %c96] : memref<2x8x120xf32, #tpu.memory_space<vmem>>, vector<2x6x24xf32>
    tpu.vector_store %arg60[%c0_182, %c0_183, %c96], %269 {strides = array<i32>} : memref<2x8x120xf32, #tpu.memory_space<vmem>>, vector<2x6x24xf32>,
    %c0_184 = arith.constant 0 : index
    %c0_185 = arith.constant 0 : index
    %c0_186 = arith.constant 0 : index
    %271 = vector.load %arg60[%c0_184, %c0_185, %c0_186] : memref<2x8x120xf32, #tpu.memory_space<vmem>>, vector<2x8x120xf32>
    %272 = vector.shape_cast %271 : vector<2x8x120xf32> to vector<16x120xf32>
    %273 = arith.truncf %272 : vector<16x120xf32> to vector<16x120xbf16>
    %c0_187 = arith.constant 0 : index
    %c0_188 = arith.constant 0 : index
    %274 = vector.load %arg22[%c0_187, %c0_188] : memref<120x128xbf16, #tpu.memory_space<vmem>>, vector<120x128xbf16>
    %cst_189 = arith.constant dense<0.000000e+00> : vector<16x128xf32>
    %275 = tpu.matmul %273, %274, %cst_189 {dimension_numbers = #tpu.dot_dimension_numbers<[1], [0], [0], [1], [0, 0, 1, 1], [], []>} : vector<16x120xbf16>, vector<120x128xbf16>, vector<16x128xf32> -> vector<16x128xf32>
    %c0_190 = arith.constant 0 : index
    %c0_191 = arith.constant 0 : index
    %276 = vector.load %arg23[%c0_190, %c0_191] : memref<1x128xf32, #tpu.memory_space<vmem>>, vector<1x128xf32>
    %277 = vector.broadcast %276 : vector<1x128xf32> to vector<16x128xf32>
    %278 = arith.addf %275, %277 : vector<16x128xf32>
    %279 = arith.truncf %278 : vector<16x128xf32> to vector<16x128xbf16>
    %c0_192 = arith.constant 0 : index
    %c0_193 = arith.constant 0 : index
    %280 = vector.load %arg24[%c0_192, %c0_193] : memref<128x512xbf16, #tpu.memory_space<vmem>>, vector<128x512xbf16>
    %cst_194 = arith.constant dense<0.000000e+00> : vector<16x512xf32>
    %281 = tpu.matmul %279, %280, %cst_194 {dimension_numbers = #tpu.dot_dimension_numbers<[1], [0], [0], [1], [0, 0, 1, 1], [], []>} : vector<16x128xbf16>, vector<128x512xbf16>, vector<16x512xf32> -> vector<16x512xf32>
    %c0_195 = arith.constant 0 : index
    %c0_196 = arith.constant 0 : index
    %282 = vector.load %arg26[%c0_195, %c0_196] : memref<1x512xf32, #tpu.memory_space<vmem>>, vector<1x512xf32>
    %283 = vector.broadcast %282 : vector<1x512xf32> to vector<16x512xf32>
    %284 = arith.addf %281, %283 : vector<16x512xf32>
    %285 = vector.shape_cast %284 : vector<16x512xf32> to vector<2x8x512xf32>
    %c0_197 = arith.constant 0 : index
    %c0_198 = arith.constant 0 : index
    %c0_199 = arith.constant 0 : index
    %286 = vector.load %arg61[%c0_197, %c0_198, %c0_199] : memref<2x8x512xf32, #tpu.memory_space<vmem>>, vector<2x8x512xf32>
    tpu.vector_store %arg61[%c0_197, %c0_198, %c0_199], %285 {strides = array<i32>} : memref<2x8x512xf32, #tpu.memory_space<vmem>>, vector<2x8x512xf32>,
    %c0_200 = arith.constant 0 : index
    %c0_201 = arith.constant 0 : index
    %287 = vector.load %arg27[%c0_200, %c0_201] : memref<128x512xbf16, #tpu.memory_space<vmem>>, vector<128x512xbf16>
    %cst_202 = arith.constant dense<0.000000e+00> : vector<16x512xf32>
    %288 = tpu.matmul %279, %287, %cst_202 {dimension_numbers = #tpu.dot_dimension_numbers<[1], [0], [0], [1], [0, 0, 1, 1], [], []>} : vector<16x128xbf16>, vector<128x512xbf16>, vector<16x512xf32> -> vector<16x512xf32>
    %c0_203 = arith.constant 0 : index
    %c0_204 = arith.constant 0 : index
    %289 = vector.load %arg29[%c0_203, %c0_204] : memref<1x512xf32, #tpu.memory_space<vmem>>, vector<1x512xf32>
    %290 = vector.broadcast %289 : vector<1x512xf32> to vector<16x512xf32>
    %291 = arith.addf %288, %290 : vector<16x512xf32>
    %292 = vector.shape_cast %291 : vector<16x512xf32> to vector<2x8x512xf32>
    %c0_205 = arith.constant 0 : index
    %c0_206 = arith.constant 0 : index
    %c0_207 = arith.constant 0 : index
    %293 = vector.load %arg62[%c0_205, %c0_206, %c0_207] : memref<2x8x512xf32, #tpu.memory_space<vmem>>, vector<2x8x512xf32>
    tpu.vector_store %arg62[%c0_205, %c0_206, %c0_207], %292 {strides = array<i32>} : memref<2x8x512xf32, #tpu.memory_space<vmem>>, vector<2x8x512xf32>,
    %cst_208 = arith.constant 0.000000e+00 : f32
    %294 = vector.broadcast %cst_208 : f32 to vector<8x128xf32>
    %cst_209 = arith.constant 0.000000e+00 : f32
    %295 = vector.broadcast %cst_209 : f32 to vector<8x128xf32>
    %cst_210 = arith.constant 0.000000e+00 : f32
    %296 = vector.broadcast %cst_210 : f32 to vector<8x128xf32>
    %cst_211 = arith.constant 0.000000e+00 : f32
    %297 = vector.broadcast %cst_211 : f32 to vector<8x128xf32>
    %c0_212 = arith.constant 0 : index
    %c0_213 = arith.constant 0 : index
    %c0_214 = arith.constant 0 : index
    %298 = vector.load %arg61[%c0_212, %c0_213, %c0_214] : memref<2x8x512xf32, #tpu.memory_space<vmem>>, vector<1x8x512xf32>
    %299 = vector.shape_cast %298 : vector<1x8x512xf32> to vector<8x512xf32>
    %c0_215 = arith.constant 0 : index
    %c0_216 = arith.constant 0 : index
    %300 = vector.load %arg25[%c0_215, %c0_216] : memref<128x512xf32, #tpu.memory_space<vmem>>, vector<128x512xf32>
    %cst_217 = arith.constant dense<0.000000e+00> : vector<8x512xf32>
    %301 = tpu.matmul %294, %300, %cst_217 {dimension_numbers = #tpu.dot_dimension_numbers<[1], [0], [0], [1], [0, 0, 1, 1], [], []>} : vector<8x128xf32>, vector<128x512xf32>, vector<8x512xf32> -> vector<8x512xf32>
    %302 = arith.addf %299, %301 : vector<8x512xf32>
    %c1_218 = arith.constant 1 : index
    %c0_219 = arith.constant 0 : index
    %c0_220 = arith.constant 0 : index
    %303 = vector.load %arg62[%c1_218, %c0_219, %c0_220] : memref<2x8x512xf32, #tpu.memory_space<vmem>>, vector<1x8x512xf32>
    %304 = vector.shape_cast %303 : vector<1x8x512xf32> to vector<8x512xf32>
    %c0_221 = arith.constant 0 : index
    %c0_222 = arith.constant 0 : index
    %305 = vector.load %arg28[%c0_221, %c0_222] : memref<128x512xf32, #tpu.memory_space<vmem>>, vector<128x512xf32>
    %cst_223 = arith.constant dense<0.000000e+00> : vector<8x512xf32>
    %306 = tpu.matmul %296, %305, %cst_223 {dimension_numbers = #tpu.dot_dimension_numbers<[1], [0], [0], [1], [0, 0, 1, 1], [], []>} : vector<8x128xf32>, vector<128x512xf32>, vector<8x512xf32> -> vector<8x512xf32>
    %307 = arith.addf %304, %306 : vector<8x512xf32>
    %308 = vector.extract_strided_slice %302 {offsets = [0, 0], sizes = [8, 128], strides = [1, 1]} : vector<8x512xf32> to vector<8x128xf32>
    %309 = arith.negf %308 : vector<8x128xf32>
    %310 = math.exp %309 : vector<8x128xf32>
    %cst_224 = arith.constant 1.000000e+00 : f32
    %311 = vector.broadcast %cst_224 : f32 to vector<8x128xf32>
    %312 = arith.addf %311, %310 : vector<8x128xf32>
    %313 = arith.divf %311, %312 : vector<8x128xf32>
    %314 = vector.extract_strided_slice %302 {offsets = [0, 128], sizes = [8, 128], strides = [1, 1]} : vector<8x512xf32> to vector<8x128xf32>
    %315 = arith.negf %314 : vector<8x128xf32>
    %316 = math.exp %315 : vector<8x128xf32>
    %cst_225 = arith.constant 1.000000e+00 : f32
    %317 = vector.broadcast %cst_225 : f32 to vector<8x128xf32>
    %318 = arith.addf %317, %316 : vector<8x128xf32>
    %319 = arith.divf %317, %318 : vector<8x128xf32>
    %320 = vector.extract_strided_slice %302 {offsets = [0, 256], sizes = [8, 128], strides = [1, 1]} : vector<8x512xf32> to vector<8x128xf32>
    %321 = math.tanh %320 : vector<8x128xf32>
    %322 = vector.extract_strided_slice %302 {offsets = [0, 384], sizes = [8, 128], strides = [1, 1]} : vector<8x512xf32> to vector<8x128xf32>
    %323 = arith.negf %322 : vector<8x128xf32>
    %324 = math.exp %323 : vector<8x128xf32>
    %cst_226 = arith.constant 1.000000e+00 : f32
    %325 = vector.broadcast %cst_226 : f32 to vector<8x128xf32>
    %326 = arith.addf %325, %324 : vector<8x128xf32>
    %327 = arith.divf %325, %326 : vector<8x128xf32>
    %328 = vector.extract_strided_slice %307 {offsets = [0, 0], sizes = [8, 128], strides = [1, 1]} : vector<8x512xf32> to vector<8x128xf32>
    %329 = arith.negf %328 : vector<8x128xf32>
    %330 = math.exp %329 : vector<8x128xf32>
    %cst_227 = arith.constant 1.000000e+00 : f32
    %331 = vector.broadcast %cst_227 : f32 to vector<8x128xf32>
    %332 = arith.addf %331, %330 : vector<8x128xf32>
    %333 = arith.divf %331, %332 : vector<8x128xf32>
    %334 = vector.extract_strided_slice %307 {offsets = [0, 128], sizes = [8, 128], strides = [1, 1]} : vector<8x512xf32> to vector<8x128xf32>
    %335 = arith.negf %334 : vector<8x128xf32>
    %336 = math.exp %335 : vector<8x128xf32>
    %cst_228 = arith.constant 1.000000e+00 : f32
    %337 = vector.broadcast %cst_228 : f32 to vector<8x128xf32>
    %338 = arith.addf %337, %336 : vector<8x128xf32>
    %339 = arith.divf %337, %338 : vector<8x128xf32>
    %340 = vector.extract_strided_slice %307 {offsets = [0, 256], sizes = [8, 128], strides = [1, 1]} : vector<8x512xf32> to vector<8x128xf32>
    %341 = math.tanh %340 : vector<8x128xf32>
    %342 = vector.extract_strided_slice %307 {offsets = [0, 384], sizes = [8, 128], strides = [1, 1]} : vector<8x512xf32> to vector<8x128xf32>
    %343 = arith.negf %342 : vector<8x128xf32>
    %344 = math.exp %343 : vector<8x128xf32>
    %cst_229 = arith.constant 1.000000e+00 : f32
    %345 = vector.broadcast %cst_229 : f32 to vector<8x128xf32>
    %346 = arith.addf %345, %344 : vector<8x128xf32>
    %347 = arith.divf %345, %346 : vector<8x128xf32>
    %348 = arith.mulf %319, %295 : vector<8x128xf32>
    %349 = arith.mulf %313, %321 : vector<8x128xf32>
    %350 = arith.addf %348, %349 : vector<8x128xf32>
    %351 = math.tanh %350 : vector<8x128xf32>
    %352 = arith.mulf %327, %351 : vector<8x128xf32>
    %353 = arith.mulf %339, %297 : vector<8x128xf32>
    %354 = arith.mulf %333, %341 : vector<8x128xf32>
    %355 = arith.addf %353, %354 : vector<8x128xf32>
    %356 = math.tanh %355 : vector<8x128xf32>
    %357 = arith.mulf %347, %356 : vector<8x128xf32>
    %c0_230 = arith.constant 0 : index
    %c0_231 = arith.constant 0 : index
    %c0_232 = arith.constant 0 : index
    %358 = vector.load %arg63[%c0_230, %c0_231, %c0_232] : memref<2x8x128xf32, #tpu.memory_space<vmem>>, vector<1x8x128xf32>
    %359 = vector.shape_cast %358 : vector<1x8x128xf32> to vector<8x128xf32>
    %360 = vector.shape_cast %352 : vector<8x128xf32> to vector<1x8x128xf32>
    tpu.vector_store %arg63[%c0_230, %c0_231, %c0_232], %360 {strides = array<i32>} : memref<2x8x128xf32, #tpu.memory_space<vmem>>, vector<1x8x128xf32>,
    %c1_233 = arith.constant 1 : index
    %c0_234 = arith.constant 0 : index
    %c0_235 = arith.constant 0 : index
    %361 = vector.load %arg64[%c1_233, %c0_234, %c0_235] : memref<2x8x128xf32, #tpu.memory_space<vmem>>, vector<1x8x128xf32>
    %362 = vector.shape_cast %361 : vector<1x8x128xf32> to vector<8x128xf32>
    %363 = vector.shape_cast %357 : vector<8x128xf32> to vector<1x8x128xf32>
    tpu.vector_store %arg64[%c1_233, %c0_234, %c0_235], %363 {strides = array<i32>} : memref<2x8x128xf32, #tpu.memory_space<vmem>>, vector<1x8x128xf32>,
    %c1_236 = arith.constant 1 : index
    %c0_237 = arith.constant 0 : index
    %c0_238 = arith.constant 0 : index
    %364 = vector.load %arg61[%c1_236, %c0_237, %c0_238] : memref<2x8x512xf32, #tpu.memory_space<vmem>>, vector<1x8x512xf32>
    %365 = vector.shape_cast %364 : vector<1x8x512xf32> to vector<8x512xf32>
    %c0_239 = arith.constant 0 : index
    %c0_240 = arith.constant 0 : index
    %366 = vector.load %arg25[%c0_239, %c0_240] : memref<128x512xf32, #tpu.memory_space<vmem>>, vector<128x512xf32>
    %cst_241 = arith.constant dense<0.000000e+00> : vector<8x512xf32>
    %367 = tpu.matmul %352, %366, %cst_241 {dimension_numbers = #tpu.dot_dimension_numbers<[1], [0], [0], [1], [0, 0, 1, 1], [], []>} : vector<8x128xf32>, vector<128x512xf32>, vector<8x512xf32> -> vector<8x512xf32>
    %368 = arith.addf %365, %367 : vector<8x512xf32>
    %c0_242 = arith.constant 0 : index
    %c0_243 = arith.constant 0 : index
    %c0_244 = arith.constant 0 : index
    %369 = vector.load %arg62[%c0_242, %c0_243, %c0_244] : memref<2x8x512xf32, #tpu.memory_space<vmem>>, vector<1x8x512xf32>
    %370 = vector.shape_cast %369 : vector<1x8x512xf32> to vector<8x512xf32>
    %c0_245 = arith.constant 0 : index
    %c0_246 = arith.constant 0 : index
    %371 = vector.load %arg28[%c0_245, %c0_246] : memref<128x512xf32, #tpu.memory_space<vmem>>, vector<128x512xf32>
    %cst_247 = arith.constant dense<0.000000e+00> : vector<8x512xf32>
    %372 = tpu.matmul %357, %371, %cst_247 {dimension_numbers = #tpu.dot_dimension_numbers<[1], [0], [0], [1], [0, 0, 1, 1], [], []>} : vector<8x128xf32>, vector<128x512xf32>, vector<8x512xf32> -> vector<8x512xf32>
    %373 = arith.addf %370, %372 : vector<8x512xf32>
    %374 = vector.extract_strided_slice %368 {offsets = [0, 0], sizes = [8, 128], strides = [1, 1]} : vector<8x512xf32> to vector<8x128xf32>
    %375 = arith.negf %374 : vector<8x128xf32>
    %376 = math.exp %375 : vector<8x128xf32>
    %cst_248 = arith.constant 1.000000e+00 : f32
    %377 = vector.broadcast %cst_248 : f32 to vector<8x128xf32>
    %378 = arith.addf %377, %376 : vector<8x128xf32>
    %379 = arith.divf %377, %378 : vector<8x128xf32>
    %380 = vector.extract_strided_slice %368 {offsets = [0, 128], sizes = [8, 128], strides = [1, 1]} : vector<8x512xf32> to vector<8x128xf32>
    %381 = arith.negf %380 : vector<8x128xf32>
    %382 = math.exp %381 : vector<8x128xf32>
    %cst_249 = arith.constant 1.000000e+00 : f32
    %383 = vector.broadcast %cst_249 : f32 to vector<8x128xf32>
    %384 = arith.addf %383, %382 : vector<8x128xf32>
    %385 = arith.divf %383, %384 : vector<8x128xf32>
    %386 = vector.extract_strided_slice %368 {offsets = [0, 256], sizes = [8, 128], strides = [1, 1]} : vector<8x512xf32> to vector<8x128xf32>
    %387 = math.tanh %386 : vector<8x128xf32>
    %388 = vector.extract_strided_slice %368 {offsets = [0, 384], sizes = [8, 128], strides = [1, 1]} : vector<8x512xf32> to vector<8x128xf32>
    %389 = arith.negf %388 : vector<8x128xf32>
    %390 = math.exp %389 : vector<8x128xf32>
    %cst_250 = arith.constant 1.000000e+00 : f32
    %391 = vector.broadcast %cst_250 : f32 to vector<8x128xf32>
    %392 = arith.addf %391, %390 : vector<8x128xf32>
    %393 = arith.divf %391, %392 : vector<8x128xf32>
    %394 = vector.extract_strided_slice %373 {offsets = [0, 0], sizes = [8, 128], strides = [1, 1]} : vector<8x512xf32> to vector<8x128xf32>
    %395 = arith.negf %394 : vector<8x128xf32>
    %396 = math.exp %395 : vector<8x128xf32>
    %cst_251 = arith.constant 1.000000e+00 : f32
    %397 = vector.broadcast %cst_251 : f32 to vector<8x128xf32>
    %398 = arith.addf %397, %396 : vector<8x128xf32>
    %399 = arith.divf %397, %398 : vector<8x128xf32>
    %400 = vector.extract_strided_slice %373 {offsets = [0, 128], sizes = [8, 128], strides = [1, 1]} : vector<8x512xf32> to vector<8x128xf32>
    %401 = arith.negf %400 : vector<8x128xf32>
    %402 = math.exp %401 : vector<8x128xf32>
    %cst_252 = arith.constant 1.000000e+00 : f32
    %403 = vector.broadcast %cst_252 : f32 to vector<8x128xf32>
    %404 = arith.addf %403, %402 : vector<8x128xf32>
    %405 = arith.divf %403, %404 : vector<8x128xf32>
    %406 = vector.extract_strided_slice %373 {offsets = [0, 256], sizes = [8, 128], strides = [1, 1]} : vector<8x512xf32> to vector<8x128xf32>
    %407 = math.tanh %406 : vector<8x128xf32>
    %408 = vector.extract_strided_slice %373 {offsets = [0, 384], sizes = [8, 128], strides = [1, 1]} : vector<8x512xf32> to vector<8x128xf32>
    %409 = arith.negf %408 : vector<8x128xf32>
    %410 = math.exp %409 : vector<8x128xf32>
    %cst_253 = arith.constant 1.000000e+00 : f32
    %411 = vector.broadcast %cst_253 : f32 to vector<8x128xf32>
    %412 = arith.addf %411, %410 : vector<8x128xf32>
    %413 = arith.divf %411, %412 : vector<8x128xf32>
    %414 = arith.mulf %385, %350 : vector<8x128xf32>
    %415 = arith.mulf %379, %387 : vector<8x128xf32>
    %416 = arith.addf %414, %415 : vector<8x128xf32>
    %417 = math.tanh %416 : vector<8x128xf32>
    %418 = arith.mulf %393, %417 : vector<8x128xf32>
    %419 = arith.mulf %405, %355 : vector<8x128xf32>
    %420 = arith.mulf %399, %407 : vector<8x128xf32>
    %421 = arith.addf %419, %420 : vector<8x128xf32>
    %422 = math.tanh %421 : vector<8x128xf32>
    %423 = arith.mulf %413, %422 : vector<8x128xf32>
    %c1_254 = arith.constant 1 : index
    %c0_255 = arith.constant 0 : index
    %c0_256 = arith.constant 0 : index
    %424 = vector.load %arg63[%c1_254, %c0_255, %c0_256] : memref<2x8x128xf32, #tpu.memory_space<vmem>>, vector<1x8x128xf32>
    %425 = vector.shape_cast %424 : vector<1x8x128xf32> to vector<8x128xf32>
    %426 = vector.shape_cast %418 : vector<8x128xf32> to vector<1x8x128xf32>
    tpu.vector_store %arg63[%c1_254, %c0_255, %c0_256], %426 {strides = array<i32>} : memref<2x8x128xf32, #tpu.memory_space<vmem>>, vector<1x8x128xf32>,
    %c0_257 = arith.constant 0 : index
    %c0_258 = arith.constant 0 : index
    %c0_259 = arith.constant 0 : index
    %427 = vector.load %arg64[%c0_257, %c0_258, %c0_259] : memref<2x8x128xf32, #tpu.memory_space<vmem>>, vector<1x8x128xf32>
    %428 = vector.shape_cast %427 : vector<1x8x128xf32> to vector<8x128xf32>
    %429 = vector.shape_cast %423 : vector<8x128xf32> to vector<1x8x128xf32>
    tpu.vector_store %arg64[%c0_257, %c0_258, %c0_259], %429 {strides = array<i32>} : memref<2x8x128xf32, #tpu.memory_space<vmem>>, vector<1x8x128xf32>,
    %c0_260 = arith.constant 0 : index
    %c0_261 = arith.constant 0 : index
    %c0_262 = arith.constant 0 : index
    %430 = vector.load %arg63[%c0_260, %c0_261, %c0_262] : memref<2x8x128xf32, #tpu.memory_space<vmem>>, vector<2x8x128xf32>
    %431 = vector.shape_cast %430 : vector<2x8x128xf32> to vector<16x128xf32>
    %432 = arith.truncf %431 : vector<16x128xf32> to vector<16x128xbf16>
    %c0_263 = arith.constant 0 : index
    %c0_264 = arith.constant 0 : index
    %c0_265 = arith.constant 0 : index
    %433 = vector.load %arg64[%c0_263, %c0_264, %c0_265] : memref<2x8x128xf32, #tpu.memory_space<vmem>>, vector<2x8x128xf32>
    %434 = vector.shape_cast %433 : vector<2x8x128xf32> to vector<16x128xf32>
    %435 = arith.truncf %434 : vector<16x128xf32> to vector<16x128xbf16>
    %c0_266 = arith.constant 0 : index
    %c0_267 = arith.constant 0 : index
    %436 = vector.load %arg33[%c0_266, %c0_267] : memref<128x128xbf16, #tpu.memory_space<vmem>>, vector<128x128xbf16>
    %cst_268 = arith.constant dense<0.000000e+00> : vector<16x128xf32>
    %437 = tpu.matmul %432, %436, %cst_268 {dimension_numbers = #tpu.dot_dimension_numbers<[1], [0], [0], [1], [0, 0, 1, 1], [], []>} : vector<16x128xbf16>, vector<128x128xbf16>, vector<16x128xf32> -> vector<16x128xf32>
    %c0_269 = arith.constant 0 : index
    %c0_270 = arith.constant 0 : index
    %438 = vector.load %arg34[%c0_269, %c0_270] : memref<128x128xbf16, #tpu.memory_space<vmem>>, vector<128x128xbf16>
    %cst_271 = arith.constant dense<0.000000e+00> : vector<16x128xf32>
    %439 = tpu.matmul %435, %438, %cst_271 {dimension_numbers = #tpu.dot_dimension_numbers<[1], [0], [0], [1], [0, 0, 1, 1], [], []>} : vector<16x128xbf16>, vector<128x128xbf16>, vector<16x128xf32> -> vector<16x128xf32>
    %440 = arith.addf %437, %439 : vector<16x128xf32>
    %c0_272 = arith.constant 0 : index
    %c0_273 = arith.constant 0 : index
    %441 = vector.load %arg35[%c0_272, %c0_273] : memref<1x128xf32, #tpu.memory_space<vmem>>, vector<1x128xf32>
    %442 = vector.broadcast %441 : vector<1x128xf32> to vector<16x128xf32>
    %443 = arith.addf %440, %442 : vector<16x128xf32>
    %444 = vector.shape_cast %443 : vector<16x128xf32> to vector<2x8x128xf32>
    %c0_274 = arith.constant 0 : index
    %c0_275 = arith.constant 0 : index
    %445 = vector.load %arg36[%c0_274, %c0_275] : memref<128x128xbf16, #tpu.memory_space<vmem>>, vector<128x128xbf16>
    %cst_276 = arith.constant dense<0.000000e+00> : vector<16x128xf32>
    %446 = tpu.matmul %432, %445, %cst_276 {dimension_numbers = #tpu.dot_dimension_numbers<[1], [0], [0], [1], [0, 0, 1, 1], [], []>} : vector<16x128xbf16>, vector<128x128xbf16>, vector<16x128xf32> -> vector<16x128xf32>
    %c0_277 = arith.constant 0 : index
    %c0_278 = arith.constant 0 : index
    %447 = vector.load %arg37[%c0_277, %c0_278] : memref<128x128xbf16, #tpu.memory_space<vmem>>, vector<128x128xbf16>
    %cst_279 = arith.constant dense<0.000000e+00> : vector<16x128xf32>
    %448 = tpu.matmul %435, %447, %cst_279 {dimension_numbers = #tpu.dot_dimension_numbers<[1], [0], [0], [1], [0, 0, 1, 1], [], []>} : vector<16x128xbf16>, vector<128x128xbf16>, vector<16x128xf32> -> vector<16x128xf32>
    %449 = arith.addf %446, %448 : vector<16x128xf32>
    %c0_280 = arith.constant 0 : index
    %c0_281 = arith.constant 0 : index
    %450 = vector.load %arg38[%c0_280, %c0_281] : memref<1x128xf32, #tpu.memory_space<vmem>>, vector<1x128xf32>
    %451 = vector.broadcast %450 : vector<1x128xf32> to vector<16x128xf32>
    %452 = arith.addf %449, %451 : vector<16x128xf32>
    %453 = vector.shape_cast %452 : vector<16x128xf32> to vector<2x8x128xf32>
    %c0_282 = arith.constant 0 : index
    %454 = memref.load %arg1[%c0_282] : memref<2xi32, #tpu.memory_space<smem>>
    %c0_283 = arith.constant 0 : index
    %455 = arith.index_cast %454 : i32 to index
    %c0_284 = arith.constant 0 : index
    %456 = vector.load %arg63[%c0_283, %455, %c0_284] : memref<2x8x128xf32, #tpu.memory_space<vmem>>, vector<1x1x128xf32>
    %457 = vector.shape_cast %456 : vector<1x1x128xf32> to vector<1x128xf32>
    %c1_285 = arith.constant 1 : index
    %458 = memref.load %arg1[%c1_285] : memref<2xi32, #tpu.memory_space<smem>>
    %c1_286 = arith.constant 1 : index
    %459 = arith.index_cast %458 : i32 to index
    %c0_287 = arith.constant 0 : index
    %460 = vector.load %arg63[%c1_286, %459, %c0_287] : memref<2x8x128xf32, #tpu.memory_space<vmem>>, vector<1x1x128xf32>
    %461 = vector.shape_cast %460 : vector<1x1x128xf32> to vector<1x128xf32>
    %462 = tpu.concatenate %457, %461 in 0 : vector<1x128xf32>, vector<1x128xf32> -> vector<2x128xf32>
    %c0_288 = arith.constant 0 : index
    %463 = memref.load %arg1[%c0_288] : memref<2xi32, #tpu.memory_space<smem>>
    %c0_289 = arith.constant 0 : index
    %464 = arith.index_cast %463 : i32 to index
    %c0_290 = arith.constant 0 : index
    %465 = vector.load %arg64[%c0_289, %464, %c0_290] : memref<2x8x128xf32, #tpu.memory_space<vmem>>, vector<1x1x128xf32>
    %466 = vector.shape_cast %465 : vector<1x1x128xf32> to vector<1x128xf32>
    %c1_291 = arith.constant 1 : index
    %467 = memref.load %arg1[%c1_291] : memref<2xi32, #tpu.memory_space<smem>>
    %c1_292 = arith.constant 1 : index
    %468 = arith.index_cast %467 : i32 to index
    %c0_293 = arith.constant 0 : index
    %469 = vector.load %arg64[%c1_292, %468, %c0_293] : memref<2x8x128xf32, #tpu.memory_space<vmem>>, vector<1x1x128xf32>
    %470 = vector.shape_cast %469 : vector<1x1x128xf32> to vector<1x128xf32>
    %471 = tpu.concatenate %466, %470 in 0 : vector<1x128xf32>, vector<1x128xf32> -> vector<2x128xf32>
    %472 = arith.truncf %462 : vector<2x128xf32> to vector<2x128xbf16>
    %c0_294 = arith.constant 0 : index
    %c0_295 = arith.constant 0 : index
    %473 = vector.load %arg30[%c0_294, %c0_295] : memref<128x128xbf16, #tpu.memory_space<vmem>>, vector<128x128xbf16>
    %cst_296 = arith.constant dense<0.000000e+00> : vector<2x128xf32>
    %474 = tpu.matmul %472, %473, %cst_296 {dimension_numbers = #tpu.dot_dimension_numbers<[1], [0], [0], [1], [0, 0, 1, 1], [], []>} : vector<2x128xbf16>, vector<128x128xbf16>, vector<2x128xf32> -> vector<2x128xf32>
    %475 = arith.truncf %471 : vector<2x128xf32> to vector<2x128xbf16>
    %c0_297 = arith.constant 0 : index
    %c0_298 = arith.constant 0 : index
    %476 = vector.load %arg31[%c0_297, %c0_298] : memref<128x128xbf16, #tpu.memory_space<vmem>>, vector<128x128xbf16>
    %cst_299 = arith.constant dense<0.000000e+00> : vector<2x128xf32>
    %477 = tpu.matmul %475, %476, %cst_299 {dimension_numbers = #tpu.dot_dimension_numbers<[1], [0], [0], [1], [0, 0, 1, 1], [], []>} : vector<2x128xbf16>, vector<128x128xbf16>, vector<2x128xf32> -> vector<2x128xf32>
    %478 = arith.addf %474, %477 : vector<2x128xf32>
    %c0_300 = arith.constant 0 : index
    %c0_301 = arith.constant 0 : index
    %479 = vector.load %arg32[%c0_300, %c0_301] : memref<1x128xf32, #tpu.memory_space<vmem>>, vector<1x128xf32>
    %480 = vector.broadcast %479 : vector<1x128xf32> to vector<2x128xf32>
    %481 = arith.addf %478, %480 : vector<2x128xf32>
    %482 = vector.shape_cast %481 : vector<2x128xf32> to vector<2x1x128xf32>
    %483 = vector.broadcast %482 : vector<2x1x128xf32> to vector<2x8x128xf32>
    %484 = arith.mulf %483, %444 : vector<2x8x128xf32>
    %cst_302 = arith.constant dense<0.000000e+00> : vector<2x8xf32>
    %485 = vector.multi_reduction <add>, %484, %cst_302 [2] : vector<2x8x128xf32> to vector<2x8xf32>
    %486 = vector.shape_cast %485 : vector<2x8xf32> to vector<2x8x1xf32>
    %cst_303 = arith.constant 0.353553385 : f32
    %487 = vector.broadcast %cst_303 : f32 to vector<2x8x1xf32>
    %488 = arith.mulf %486, %487 : vector<2x8x1xf32>
    %c0_304 = arith.constant 0 : index
    %489 = memref.load %arg1[%c0_304] : memref<2xi32, #tpu.memory_space<smem>>
    %490 = vector.broadcast %489 : i32 to vector<1x1x1xi32>
    %c1_305 = arith.constant 1 : index
    %491 = memref.load %arg1[%c1_305] : memref<2xi32, #tpu.memory_space<smem>>
    %492 = vector.broadcast %491 : i32 to vector<1x1x1xi32>
    %493 = tpu.concatenate %490, %492 in 0 : vector<1x1x1xi32>, vector<1x1x1xi32> -> vector<2x1x1xi32>
    %494 = tpu.iota {dimensions = array<i32: 1>} : vector<2x8x1xi32>
    %495 = vector.broadcast %493 : vector<2x1x1xi32> to vector<2x8x1xi32>
    %496 = arith.cmpi slt, %494, %495 : vector<2x8x1xi32>
    %497 = arith.extui %496 : vector<2x8x1xi1> to vector<2x8x1xi32>
    %498 = arith.sitofp %497 : vector<2x8x1xi32> to vector<2x8x1xf32>
    %cst_306 = arith.constant 1.000000e+00 : f32
    %499 = vector.broadcast %cst_306 : f32 to vector<2x8x1xf32>
    %500 = arith.subf %499, %498 : vector<2x8x1xf32>
    %cst_307 = arith.constant -1.000000e+04 : f32
    %501 = vector.broadcast %cst_307 : f32 to vector<2x8x1xf32>
    %502 = arith.mulf %500, %501 : vector<2x8x1xf32>
    %503 = arith.addf %488, %502 : vector<2x8x1xf32>
    %cst_308 = arith.constant dense<0xFF800000> : vector<2x1xf32>
    %504 = vector.multi_reduction <maximumf>, %503, %cst_308 [1] : vector<2x8x1xf32> to vector<2x1xf32>
    %cst_309 = arith.constant 0xFF800000 : f32
    %505 = vector.broadcast %cst_309 : f32 to vector<2x1xf32>
    %506 = arith.maximumf %505, %504 : vector<2x1xf32>
    %507 = vector.shape_cast %506 : vector<2x1xf32> to vector<2x1x1xf32>
    %508 = vector.broadcast %507 : vector<2x1x1xf32> to vector<2x8x1xf32>
    %509 = arith.subf %503, %508 : vector<2x8x1xf32>
    %510 = math.exp %509 : vector<2x8x1xf32>
    %cst_310 = arith.constant dense<0.000000e+00> : vector<2x1xf32>
    %511 = vector.multi_reduction <add>, %510, %cst_310 [1] : vector<2x8x1xf32> to vector<2x1xf32>
    %512 = vector.shape_cast %511 : vector<2x1xf32> to vector<2x1x1xf32>
    %513 = vector.broadcast %512 : vector<2x1x1xf32> to vector<2x8x1xf32>
    %514 = arith.divf %510, %513 : vector<2x8x1xf32>
    %515 = vector.broadcast %514 : vector<2x8x1xf32> to vector<2x8x128xf32>
    %516 = arith.mulf %515, %453 : vector<2x8x128xf32>
    %cst_311 = arith.constant dense<0.000000e+00> : vector<2x128xf32>
    %517 = vector.multi_reduction <add>, %516, %cst_311 [1] : vector<2x8x128xf32> to vector<2x128xf32>
    %518 = arith.addf %258, %517 : vector<2x128xf32>
    %519 = arith.truncf %518 : vector<2x128xf32> to vector<2x128xbf16>
    %c0_312 = arith.constant 0 : index
    %c0_313 = arith.constant 0 : index
    %520 = vector.load %arg39[%c0_312, %c0_313] : memref<128x512xbf16, #tpu.memory_space<vmem>>, vector<128x512xbf16>
    %cst_314 = arith.constant dense<0.000000e+00> : vector<2x512xf32>
    %521 = tpu.matmul %519, %520, %cst_314 {dimension_numbers = #tpu.dot_dimension_numbers<[1], [0], [0], [1], [0, 0, 1, 1], [], []>} : vector<2x128xbf16>, vector<128x512xbf16>, vector<2x512xf32> -> vector<2x512xf32>
    %c0_315 = arith.constant 0 : index
    %c0_316 = arith.constant 0 : index
    %522 = vector.load %arg40[%c0_315, %c0_316] : memref<1x512xf32, #tpu.memory_space<vmem>>, vector<1x512xf32>
    %523 = vector.broadcast %522 : vector<1x512xf32> to vector<2x512xf32>
    %524 = arith.addf %521, %523 : vector<2x512xf32>
    %c0_317 = arith.constant 0 : index
    %c0_318 = arith.constant 0 : index
    %525 = vector.load %arg41[%c0_317, %c0_318] : memref<1x512xf32, #tpu.memory_space<vmem>>, vector<1x512xf32>
    %c0_319 = arith.constant 0 : index
    %c0_320 = arith.constant 0 : index
    %526 = vector.load %arg42[%c0_319, %c0_320] : memref<1x512xf32, #tpu.memory_space<vmem>>, vector<1x512xf32>
    %cst_321 = arith.constant dense<0.000000e+00> : vector<512xf32>
    %527 = vector.multi_reduction <add>, %524, %cst_321 [0] : vector<2x512xf32> to vector<512xf32>
    %528 = vector.shape_cast %527 : vector<512xf32> to vector<1x512xf32>
    %cst_322 = arith.constant 2.000000e+00 : f32
    %529 = vector.broadcast %cst_322 : f32 to vector<1x512xf32>
    %530 = arith.divf %528, %529 : vector<1x512xf32>
    %531 = vector.broadcast %530 : vector<1x512xf32> to vector<2x512xf32>
    %532 = arith.subf %524, %531 : vector<2x512xf32>
    %533 = arith.mulf %532, %532 : vector<2x512xf32>
    %cst_323 = arith.constant dense<0.000000e+00> : vector<512xf32>
    %534 = vector.multi_reduction <add>, %533, %cst_323 [0] : vector<2x512xf32> to vector<512xf32>
    %535 = vector.shape_cast %534 : vector<512xf32> to vector<1x512xf32>
    %cst_324 = arith.constant 2.000000e+00 : f32
    %536 = vector.broadcast %cst_324 : f32 to vector<1x512xf32>
    %537 = arith.divf %535, %536 : vector<1x512xf32>
    %538 = vector.broadcast %530 : vector<1x512xf32> to vector<2x512xf32>
    %539 = arith.subf %524, %538 : vector<2x512xf32>
    %cst_325 = arith.constant 9.99999974E-6 : f32
    %540 = vector.broadcast %cst_325 : f32 to vector<1x512xf32>
    %541 = arith.addf %537, %540 : vector<1x512xf32>
    %542 = math.rsqrt %541 : vector<1x512xf32>
    %543 = vector.broadcast %542 : vector<1x512xf32> to vector<2x512xf32>
    %544 = arith.mulf %539, %543 : vector<2x512xf32>
    %545 = vector.broadcast %525 : vector<1x512xf32> to vector<2x512xf32>
    %546 = arith.mulf %544, %545 : vector<2x512xf32>
    %547 = vector.broadcast %526 : vector<1x512xf32> to vector<2x512xf32>
    %548 = arith.addf %546, %547 : vector<2x512xf32>
    %549 = math.tanh %548 : vector<2x512xf32>
    %550 = arith.truncf %549 : vector<2x512xf32> to vector<2x512xbf16>
    %c0_326 = arith.constant 0 : index
    %c0_327 = arith.constant 0 : index
    %551 = vector.load %arg43[%c0_326, %c0_327] : memref<512x256xbf16, #tpu.memory_space<vmem>>, vector<512x256xbf16>
    %cst_328 = arith.constant dense<0.000000e+00> : vector<2x256xf32>
    %552 = tpu.matmul %550, %551, %cst_328 {dimension_numbers = #tpu.dot_dimension_numbers<[1], [0], [0], [1], [0, 0, 1, 1], [], []>} : vector<2x512xbf16>, vector<512x256xbf16>, vector<2x256xf32> -> vector<2x256xf32>
    %c0_329 = arith.constant 0 : index
    %c0_330 = arith.constant 0 : index
    %553 = vector.load %arg44[%c0_329, %c0_330] : memref<1x256xf32, #tpu.memory_space<vmem>>, vector<1x256xf32>
    %554 = vector.broadcast %553 : vector<1x256xf32> to vector<2x256xf32>
    %555 = arith.addf %552, %554 : vector<2x256xf32>
    %c0_331 = arith.constant 0 : index
    %c0_332 = arith.constant 0 : index
    %556 = vector.load %arg45[%c0_331, %c0_332] : memref<1x256xf32, #tpu.memory_space<vmem>>, vector<1x256xf32>
    %c0_333 = arith.constant 0 : index
    %c0_334 = arith.constant 0 : index
    %557 = vector.load %arg46[%c0_333, %c0_334] : memref<1x256xf32, #tpu.memory_space<vmem>>, vector<1x256xf32>
    %cst_335 = arith.constant dense<0.000000e+00> : vector<256xf32>
    %558 = vector.multi_reduction <add>, %555, %cst_335 [0] : vector<2x256xf32> to vector<256xf32>
    %559 = vector.shape_cast %558 : vector<256xf32> to vector<1x256xf32>
    %cst_336 = arith.constant 2.000000e+00 : f32
    %560 = vector.broadcast %cst_336 : f32 to vector<1x256xf32>
    %561 = arith.divf %559, %560 : vector<1x256xf32>
    %562 = vector.broadcast %561 : vector<1x256xf32> to vector<2x256xf32>
    %563 = arith.subf %555, %562 : vector<2x256xf32>
    %564 = arith.mulf %563, %563 : vector<2x256xf32>
    %cst_337 = arith.constant dense<0.000000e+00> : vector<256xf32>
    %565 = vector.multi_reduction <add>, %564, %cst_337 [0] : vector<2x256xf32> to vector<256xf32>
    %566 = vector.shape_cast %565 : vector<256xf32> to vector<1x256xf32>
    %cst_338 = arith.constant 2.000000e+00 : f32
    %567 = vector.broadcast %cst_338 : f32 to vector<1x256xf32>
    %568 = arith.divf %566, %567 : vector<1x256xf32>
    %569 = vector.broadcast %561 : vector<1x256xf32> to vector<2x256xf32>
    %570 = arith.subf %555, %569 : vector<2x256xf32>
    %cst_339 = arith.constant 9.99999974E-6 : f32
    %571 = vector.broadcast %cst_339 : f32 to vector<1x256xf32>
    %572 = arith.addf %568, %571 : vector<1x256xf32>
    %573 = math.rsqrt %572 : vector<1x256xf32>
    %574 = vector.broadcast %573 : vector<1x256xf32> to vector<2x256xf32>
    %575 = arith.mulf %570, %574 : vector<2x256xf32>
    %576 = vector.broadcast %556 : vector<1x256xf32> to vector<2x256xf32>
    %577 = arith.mulf %575, %576 : vector<2x256xf32>
    %578 = vector.broadcast %557 : vector<1x256xf32> to vector<2x256xf32>
    %579 = arith.addf %577, %578 : vector<2x256xf32>
    %cst_340 = arith.constant 0.000000e+00 : f32
    %580 = vector.broadcast %cst_340 : f32 to vector<2x256xf32>
    %581 = arith.maximumf %579, %580 : vector<2x256xf32>
    %582 = arith.truncf %581 : vector<2x256xf32> to vector<2x256xbf16>
    %c0_341 = arith.constant 0 : index
    %c0_342 = arith.constant 0 : index
    %583 = vector.load %arg47[%c0_341, %c0_342] : memref<256x128xbf16, #tpu.memory_space<vmem>>, vector<256x128xbf16>
    %cst_343 = arith.constant dense<0.000000e+00> : vector<2x128xf32>
    %584 = tpu.matmul %582, %583, %cst_343 {dimension_numbers = #tpu.dot_dimension_numbers<[1], [0], [0], [1], [0, 0, 1, 1], [], []>} : vector<2x256xbf16>, vector<256x128xbf16>, vector<2x128xf32> -> vector<2x128xf32>
    %c0_344 = arith.constant 0 : index
    %c0_345 = arith.constant 0 : index
    %585 = vector.load %arg48[%c0_344, %c0_345] : memref<1x128xf32, #tpu.memory_space<vmem>>, vector<1x128xf32>
    %586 = vector.broadcast %585 : vector<1x128xf32> to vector<2x128xf32>
    %587 = arith.addf %584, %586 : vector<2x128xf32>
    %c0_346 = arith.constant 0 : index
    %c0_347 = arith.constant 0 : index
    %588 = vector.load %arg49[%c0_346, %c0_347] : memref<1x128xf32, #tpu.memory_space<vmem>>, vector<1x128xf32>
    %c0_348 = arith.constant 0 : index
    %c0_349 = arith.constant 0 : index
    %589 = vector.load %arg50[%c0_348, %c0_349] : memref<1x128xf32, #tpu.memory_space<vmem>>, vector<1x128xf32>
    %cst_350 = arith.constant dense<0.000000e+00> : vector<128xf32>
    %590 = vector.multi_reduction <add>, %587, %cst_350 [0] : vector<2x128xf32> to vector<128xf32>
    %591 = vector.shape_cast %590 : vector<128xf32> to vector<1x128xf32>
    %cst_351 = arith.constant 2.000000e+00 : f32
    %592 = vector.broadcast %cst_351 : f32 to vector<1x128xf32>
    %593 = arith.divf %591, %592 : vector<1x128xf32>
    %594 = vector.broadcast %593 : vector<1x128xf32> to vector<2x128xf32>
    %595 = arith.subf %587, %594 : vector<2x128xf32>
    %596 = arith.mulf %595, %595 : vector<2x128xf32>
    %cst_352 = arith.constant dense<0.000000e+00> : vector<128xf32>
    %597 = vector.multi_reduction <add>, %596, %cst_352 [0] : vector<2x128xf32> to vector<128xf32>
    %598 = vector.shape_cast %597 : vector<128xf32> to vector<1x128xf32>
    %cst_353 = arith.constant 2.000000e+00 : f32
    %599 = vector.broadcast %cst_353 : f32 to vector<1x128xf32>
    %600 = arith.divf %598, %599 : vector<1x128xf32>
    %601 = vector.broadcast %593 : vector<1x128xf32> to vector<2x128xf32>
    %602 = arith.subf %587, %601 : vector<2x128xf32>
    %cst_354 = arith.constant 9.99999974E-6 : f32
    %603 = vector.broadcast %cst_354 : f32 to vector<1x128xf32>
    %604 = arith.addf %600, %603 : vector<1x128xf32>
    %605 = math.rsqrt %604 : vector<1x128xf32>
    %606 = vector.broadcast %605 : vector<1x128xf32> to vector<2x128xf32>
    %607 = arith.mulf %602, %606 : vector<2x128xf32>
    %608 = vector.broadcast %588 : vector<1x128xf32> to vector<2x128xf32>
    %609 = arith.mulf %607, %608 : vector<2x128xf32>
    %610 = vector.broadcast %589 : vector<1x128xf32> to vector<2x128xf32>
    %611 = arith.addf %609, %610 : vector<2x128xf32>
    %cst_355 = arith.constant 5.000000e-01 : f32
    %612 = vector.broadcast %cst_355 : f32 to vector<2x128xf32>
    %613 = arith.mulf %612, %611 : vector<2x128xf32>
    %cst_356 = arith.constant 0.707106769 : f32
    %614 = vector.broadcast %cst_356 : f32 to vector<2x128xf32>
    %615 = arith.mulf %611, %614 : vector<2x128xf32>
    %616 = math.erf %615 : vector<2x128xf32>
    %cst_357 = arith.constant 1.000000e+00 : f32
    %617 = vector.broadcast %cst_357 : f32 to vector<2x128xf32>
    %618 = arith.addf %617, %616 : vector<2x128xf32>
    %619 = arith.mulf %613, %618 : vector<2x128xf32>
    %620 = arith.truncf %619 : vector<2x128xf32> to vector<2x128xbf16>
    %c0_358 = arith.constant 0 : index
    %c0_359 = arith.constant 0 : index
    %621 = vector.load %arg51[%c0_358, %c0_359] : memref<128x4xbf16, #tpu.memory_space<vmem>>, vector<128x4xbf16>
    %cst_360 = arith.constant dense<0.000000e+00> : vector<2x4xf32>
    %622 = tpu.matmul %620, %621, %cst_360 {dimension_numbers = #tpu.dot_dimension_numbers<[1], [0], [0], [1], [0, 0, 1, 1], [], []>} : vector<2x128xbf16>, vector<128x4xbf16>, vector<2x4xf32> -> vector<2x4xf32>
    %c0_361 = arith.constant 0 : index
    %c0_362 = arith.constant 0 : index
    %623 = vector.load %arg52[%c0_361, %c0_362] : memref<1x4xf32, #tpu.memory_space<vmem>>, vector<1x4xf32>
    %624 = vector.broadcast %623 : vector<1x4xf32> to vector<2x4xf32>
    %625 = arith.addf %622, %624 : vector<2x4xf32>
    %c0_363 = arith.constant 0 : index
    %c0_364 = arith.constant 0 : index
    %626 = vector.load %arg53[%c0_363, %c0_364] : memref<2x4xf32, #tpu.memory_space<vmem>>, vector<2x4xf32>
    tpu.vector_store %arg53[%c0_363, %c0_364], %625 {strides = array<i32>} : memref<2x4xf32, #tpu.memory_space<vmem>>, vector<2x4xf32>,
    %cst_365 = arith.constant dense<0xFF800000> : vector<2xf32>
    %627 = vector.multi_reduction <maximumf>, %625, %cst_365 [1] : vector<2x4xf32> to vector<2xf32>
    %628 = vector.shape_cast %627 : vector<2xf32> to vector<2x1xf32>
    %629 = vector.broadcast %628 : vector<2x1xf32> to vector<2x4xf32>
    %630 = arith.subf %625, %629 : vector<2x4xf32>
    %631 = math.exp %630 : vector<2x4xf32>
    %cst_366 = arith.constant dense<0.000000e+00> : vector<2xf32>
    %632 = vector.multi_reduction <add>, %631, %cst_366 [1] : vector<2x4xf32> to vector<2xf32>
    %633 = vector.shape_cast %632 : vector<2xf32> to vector<2x1xf32>
    %634 = math.log %633 : vector<2x1xf32>
    %635 = arith.addf %628, %634 : vector<2x1xf32>
    %636 = vector.broadcast %635 : vector<2x1xf32> to vector<2x4xf32>
    %637 = arith.subf %625, %636 : vector<2x4xf32>
    %638 = tpu.iota {dimensions = array<i32: 1>} : vector<2x4xi32>
    %c0_367 = arith.constant 0 : index
    %639 = memref.load %arg2[%c0_367] : memref<2xi32, #tpu.memory_space<smem>>
    %640 = vector.broadcast %639 : i32 to vector<1x1xi32>
    %c1_368 = arith.constant 1 : index
    %641 = memref.load %arg2[%c1_368] : memref<2xi32, #tpu.memory_space<smem>>
    %642 = vector.broadcast %641 : i32 to vector<1x1xi32>
    %643 = tpu.concatenate %640, %642 in 0 : vector<1x1xi32>, vector<1x1xi32> -> vector<2x1xi32>
    %644 = vector.broadcast %643 : vector<2x1xi32> to vector<2x4xi32>
    %645 = arith.cmpi eq, %638, %644 : vector<2x4xi32>
    %646 = arith.extui %645 : vector<2x4xi1> to vector<2x4xi32>
    %647 = arith.sitofp %646 : vector<2x4xi32> to vector<2x4xf32>
    %648 = arith.mulf %647, %637 : vector<2x4xf32>
    %cst_369 = arith.constant dense<0.000000e+00> : vector<2xf32>
    %649 = vector.multi_reduction <add>, %648, %cst_369 [1] : vector<2x4xf32> to vector<2xf32>
    %650 = vector.shape_cast %649 : vector<2xf32> to vector<2x1xf32>
    %cst_370 = arith.constant 0.000000e+00 : f32
    %651 = vector.broadcast %cst_370 : f32 to vector<2x1xf32>
    %652 = arith.subf %651, %650 : vector<2x1xf32>
    %cst_371 = arith.constant dense<0.000000e+00> : vector<1xf32>
    %653 = vector.multi_reduction <add>, %652, %cst_371 [0] : vector<2x1xf32> to vector<1xf32>
    %654 = vector.shape_cast %653 : vector<1xf32> to vector<1x1xf32>
    %cst_372 = arith.constant 2.000000e+00 : f32
    %655 = vector.broadcast %cst_372 : f32 to vector<1x1xf32>
    %656 = arith.divf %654, %655 : vector<1x1xf32>
    %c0_373 = arith.constant 0 : index
    %c0_374 = arith.constant 0 : index
    %657 = vector.load %arg54[%c0_373, %c0_374] : memref<1x1xf32, #tpu.memory_space<vmem>>, vector<1x1xf32>
    tpu.vector_store %arg54[%c0_373, %c0_374], %656 {strides = array<i32>} : memref<1x1xf32, #tpu.memory_space<vmem>>, vector<1x1xf32>,
    return
  }
}

</mosaic_0001>

<bundles_post_ra>
// kernel: ser_forward.1
= control target key start
LH: loop header
LB: loop body
LE: loop exit
PB: predicated region body
PF: predicated region fallthrough
CT: control target
= control target key end

     0   :  { %s11759_s6 = smov 1   ;;  %s11760_s10 = smov 2   ;;  %s13441_s0 = inlined_call_operand.smem [shape: u32[55], index: -1, kind: input, shape index: {}] }
   0x1   :  { %s11887_s5 = sld [smem:[%s13441_s0]]   ;;  %s11761_s14 = smov 3  }
   0x2   :  { %s11892_s9 = sld [smem:[%s13441_s0 + %s11759_s6]]   ;;  %s11762_s18 = smov 4  }
   0x3   :  { %s11897_s13 = sld [smem:[%s13441_s0 + %s11760_s10]]   ;;  %s11763_s22 = smov 5  }
   0x4   :  { %s11902_s17 = sld [smem:[%s13441_s0 + %s11761_s14]]   ;;  %s11764_s26 = smov 6  }
   0x5   :  { %s11907_s21 = sld [smem:[%s13441_s0 + %s11762_s18]]   ;;  %s11765_s30 = smov 7  }
   0x6   :  { %s11912_s25 = sld [smem:[%s13441_s0 + %s11763_s22]]   ;;  %s11766_s4 = smov 8  }
   0x7   :  { %13517 = sst [smem:[#allocation116_spill]] %s11887_s5  ;;  %s11767_s10 = smov 9  }
   0x8   :  { %s11917_s29 = sld [smem:[%s13441_s0 + %s11764_s26]]   ;;  %s11768_s15 = smov 10  }
   0x9   :  { %13518 = sst [smem:[#allocation117_spill]] %s11897_s13  ;;  %s11769_s20 = smov 11  }
   0xa   :  { %13519 = sst [smem:[#allocation118_spill]] %s11902_s17  ;;  %s11770_s26 = smov 12  }
   0xb   :  { %13520 = sst [smem:[#allocation119_spill]] %s11907_s21  ;;  %s11771_s1 = smov 13  }
   0xc   :  { %13521 = sst [smem:[#allocation120_spill]] %s11912_s25  ;;  %s11772_s7 = smov 14  }
   0xd   :  { %s11922_s3 = sld [smem:[%s13441_s0 + %s11765_s30]]   ;;  %s11774_s22 = smov 16  }
   0xe   :  { %s11927_s8 = sld [smem:[%s13441_s0 + %s11766_s4]]   ;;  %s11775_s28 = smov 17  }
   0xf   :  { %s11932_s14 = sld [smem:[%s13441_s0 + %s11767_s10]]  }
  0x10   :  { %s11937_s19 = sld [smem:[%s13441_s0 + %s11768_s15]]   ;;  %s11773_s15 = smov 15  }
  0x11   :  { %s11942_s24 = sld [smem:[%s13441_s0 + %s11769_s20]]  }
  0x12   :  { %s11947_s30 = sld [smem:[%s13441_s0 + %s11770_s26]]  }
  0x13   :  { %13522 = sst [smem:[#allocation121_spill]] %s11922_s3 }
  0x14   :  { %s11952_s6 = sld [smem:[%s13441_s0 + %s11771_s1]]  }
  0x15   :  { %13523 = sst [smem:[#allocation122_spill]] %s11932_s14 }
  0x16   :  { %s11957_s12 = sld [smem:[%s13441_s0 + %s11772_s7]]   ;;  %s11776_s7 = smov 18  }
  0x17   :  { %13524 = sst [smem:[#allocation123_spill]] %s11942_s24 }
  0x18   :  { %s11962_s20 = sld [smem:[%s13441_s0 + %s11773_s15]]   ;;  %s11777_s15 = smov 19  }
  0x19   :  { %s11967_s27 = sld [smem:[%s13441_s0 + %s11774_s22]]   ;;  %s11778_s22 = smov 20  }
  0x1a   :  { %13525 = sst [smem:[#allocation124_spill]] %s11952_s6 }
  0x1b   :  { %s11972_s4 = sld [smem:[%s13441_s0 + %s11775_s28]]   ;;  %s11779_s28 = smov 21  }
  0x1c   :  { %s11977_s21 = sld [smem:[%s13441_s0 + %s11776_s7]]   ;;  %s11780_s7 = smov 22  }
  0x1d   :  { %s11982_s17 = sld [smem:[%s13441_s0 + %s11777_s15]]   ;;  %s11781_s15 = smov 23  }
  0x1e   :  { %13526 = sst [smem:[#allocation125_spill]] %s11962_s20 }
  0x1f   :  { %s11987_s20 = sld [smem:[%s13441_s0 + %s11778_s22]]   ;;  %s11782_s22 = smov 24  }
  0x20   :  { %s11997_s6 = sld [smem:[%s13441_s0 + %s11780_s7]]   ;;  %s11784_s7 = smov 26  }
  0x21   :  { %13527 = sst [smem:[#allocation126_spill]] %s11972_s4 }
  0x22   :  { %s11992_s4 = sld [smem:[%s13441_s0 + %s11779_s28]]   ;;  %s11783_s28 = smov 25  }
  0x23   :  { %13528 = sst [smem:[#allocation127_spill]] %s11982_s17 }
  0x24   :  { %s12002_s17 = sld [smem:[%s13441_s0 + %s11781_s15]]   ;;  %s11785_s15 = smov 27  }
  0x25   :  { %s12007_s24 = sld [smem:[%s13441_s0 + %s11782_s22]]   ;;  %s11786_s22 = smov 28  }
  0x26   :  { %s12017_s14 = sld [smem:[%s13441_s0 + %s11784_s7]]   ;;  %s11788_s7 = smov 30  }
  0x27   :  { %s12027_s3 = sld [smem:[%s13441_s0 + %s11786_s22]]   ;;  %s11790_s22 = smov 32  }
  0x28   :  { %13529 = sst [smem:[#allocation128_spill]] %s11992_s4 }
  0x29   :  { %s12012_s4 = sld [smem:[%s13441_s0 + %s11783_s28]]   ;;  %s11787_s28 = smov 29  }
  0x2a   :  { %13530 = sst [smem:[#allocation129_spill]] %s12002_s17 }
  0x2b   :  { %s12022_s17 = sld [smem:[%s13441_s0 + %s11785_s15]]   ;;  %s11789_s15 = smov 31  }
  0x2c   :  { %s12037_s25 = sld [smem:[%s13441_s0 + %s11788_s7]]   ;;  %s11792_s7 = smov 34  }
  0x2d   :  { %s12047_s13 = sld [smem:[%s13441_s0 + %s11790_s22]]   ;;  %s11794_s22 = smov 36  }
  0x2f   :  { %13531 = sst [smem:[#allocation130_spill]] %s12012_s4 }
  0x30   :  { %s12032_s4 = sld [smem:[%s13441_s0 + %s11787_s28]]   ;;  %s11791_s28 = smov 33  }
  0x31   :  { %13532 = sst [smem:[#allocation131_spill]] %s12022_s17 }
  0x32   :  { %13534 = sst [smem:[#allocation133_spill]] %s12037_s25 }
  0x33   :  { %s12042_s17 = sld [smem:[%s13441_s0 + %s11789_s15]]   ;;  %s11793_s15 = smov 35  }
  0x34   :  { %13535 = sst [smem:[#allocation134_spill]] %s12047_s13 }
  0x35   :  { %s12057_s25 = sld [smem:[%s13441_s0 + %s11792_s7]]   ;;  %s11796_s7 = smov 38  }
  0x36   :  { %13533 = sst [smem:[#allocation132_spill]] %s12032_s4 }
  0x37   :  { %s12052_s4 = sld [smem:[%s13441_s0 + %s11791_s28]]   ;;  %s11795_s28 = smov 37  }
  0x38   :  { %s12062_s5 = sld [smem:[%s13441_s0 + %s11793_s15]]   ;;  %s11797_s15 = smov 39  }
  0x39   :  { %s12067_s13 = sld [smem:[%s13441_s0 + %s11794_s22]]   ;;  %s11798_s22 = smov 40  }
  0x3b   :  { %13537 = sst [smem:[#allocation136_spill]] %s12057_s25 }
  0x3c   :  { %s12077_s25 = sld [smem:[%s13441_s0 + %s11796_s7]]   ;;  %s11800_s7 = smov 42  }
  0x3d   :  { %13536 = sst [smem:[#allocation135_spill]] %s12052_s4 }
  0x3e   :  { %13538 = sst [smem:[#allocation137_spill]] %s12062_s5 }
  0x3f   :  { %13539 = sst [smem:[#allocation138_spill]] %s12067_s13 }
  0x40   :  { %s12072_s4 = sld [smem:[%s13441_s0 + %s11795_s28]]   ;;  %s11799_s28 = smov 41  }
  0x41   :  { %s12082_s5 = sld [smem:[%s13441_s0 + %s11797_s15]]   ;;  %s11801_s15 = smov 43  }
  0x42   :  { %13541 = sst [smem:[#allocation140_spill]] %s12077_s25 }
  0x43   :  { %s12087_s13 = sld [smem:[%s13441_s0 + %s11798_s22]]   ;;  %s11802_s22 = smov 44  }
  0x44   :  { %s12097_s25 = sld [smem:[%s13441_s0 + %s11800_s7]]   ;;  %s11804_s7 = smov 46  }
  0x46   :  { %13540 = sst [smem:[#allocation139_spill]] %s12072_s4 }
  0x47   :  { %13542 = sst [smem:[#allocation141_spill]] %s12082_s5 }
  0x48   :  { %s12092_s4 = sld [smem:[%s13441_s0 + %s11799_s28]]   ;;  %s11803_s28 = smov 45  }
  0x49   :  { %13543 = sst [smem:[#allocation142_spill]] %s12087_s13 }
  0x4a   :  { %13545 = sst [smem:[#allocation144_spill]] %s12097_s25 }
  0x4b   :  { %s12102_s5 = sld [smem:[%s13441_s0 + %s11801_s15]]   ;;  %s11805_s15 = smov 47  }
  0x4c   :  { %s12107_s13 = sld [smem:[%s13441_s0 + %s11802_s22]]   ;;  %s11806_s22 = smov 48  }
  0x4d   :  { %s12117_s25 = sld [smem:[%s13441_s0 + %s11804_s7]]   ;;  %s11808_s7 = smov 50  }
  0x4e   :  { %13544 = sst [smem:[#allocation143_spill]] %s12092_s4 }
  0x4f   :  { %s12112_s4 = sld [smem:[%s13441_s0 + %s11803_s28]]   ;;  %s11807_s28 = smov 49  }
  0x51   :  { %13546 = sst [smem:[#allocation145_spill]] %s12102_s5 }
  0x52   :  { %13547 = sst [smem:[#allocation146_spill]] %s12107_s13 }
  0x53   :  { %13549 = sst [smem:[#allocation148_spill]] %s12117_s25 }
  0x54   :  { %s12122_s5 = sld [smem:[%s13441_s0 + %s11805_s15]]   ;;  %s11809_s15 = smov 51  }
  0x55   :  { %13548 = sst [smem:[#allocation147_spill]] %s12112_s4 }
  0x56   :  { %s12127_s13 = sld [smem:[%s13441_s0 + %s11806_s22]]   ;;  %s11810_s22 = smov 52  }
  0x57   :  { %s12132_s4 = sld [smem:[%s13441_s0 + %s11807_s28]]   ;;  %s11811_s28 = smov 53  }
  0x58   :  { %s12137_s25 = sld [smem:[%s13441_s0 + %s11808_s7]]   ;;  %s11812_s7 = smov 54  }
  0x5a   :  { %13550 = sst [smem:[#allocation149_spill]] %s12122_s5 }
  0x5b   :  { %s12142_s5 = sld [smem:[%s13441_s0 + %s11809_s15]]  }
  0x5c   :  { %13551 = sst [smem:[#allocation150_spill]] %s12127_s13 }
  0x5d   :  { %13552 = sst [smem:[#allocation151_spill]] %s12132_s4 }
  0x5e   :  { %13553 = sst [smem:[#allocation152_spill]] %s12137_s25 }
  0x5f   :  { %s12147_s13 = sld [smem:[%s13441_s0 + %s11810_s22]]  }
  0x60   :  { %s12152_s4 = sld [smem:[%s13441_s0 + %s11811_s28]]  }
  0x61   :  { %s12157_s25 = sld [smem:[%s13441_s0 + %s11812_s7]]  }
  0x62   :  { %115 = vsyncpa [#allocation15], 0 }
  0x63   :  { %116 = vsyncpa [#allocation17], 0 }
  0x64   :  { %117 = vsyncpa [#allocation13], 0 }
  0x65   :  { %118 = vsyncpa [#allocation21], 0 }
  0x66   :  { %119 = vsyncpa [#allocation24], 0 }
  0x67   :  { %120 = vsyncpa [#allocation27], 0 }
  0x68   :  { %121 = vsyncpa [#allocation30], 0 }
  0x69   :  { %122 = vsyncpa [#allocation33], 0 }
  0x6a   :  { %123 = vsyncpa [#allocation36], 0 }
  0x6b   :  { %124 = vsyncpa [#allocation39], 0 }
  0x6c   :  { %125 = vsyncpa [#allocation42], 0 }
  0x6d   :  { %126 = vsyncpa [#allocation45], 0 }
  0x6e   :  { %127 = vsyncpa [#allocation48], 0 }
  0x6f   :  { %128 = vsyncpa [#allocation51], 0 }
  0x70   :  { %129 = vsyncpa [#allocation54], 0 }
  0x71   :  { %130 = vsyncpa [#allocation57], 0 }
  0x72   :  { %131 = vsyncpa [#allocation60], 0 }
  0x73   :  { %132 = vsyncpa [#allocation63], 0 }
  0x74   :  { %133 = vsyncpa [#allocation66], 0 }
  0x75   :  { %134 = vsyncpa [#allocation69], 0 }
  0x76   :  { %135 = vsyncpa [#allocation72], 0 }
  0x77   :  { %136 = vsyncpa [#allocation75], 0 }
  0x78   :  { %137 = vsyncpa [#allocation78], 0 }
  0x79   :  { %138 = vsyncpa [#allocation81], 0 }
  0x7a   :  { %139 = vsyncpa [#allocation84], 0 }
  0x7b   :  { %140 = vsyncpa [#allocation14], 0  ;;  %s158_s0 = sshll.u32 %s11892_s9, 4  ;;  %s159_s0 = int_to_ptr.vmem [resolvable:$true] %s158_s0 }
  0x7c   :  { %141 = vsyncpa [#allocation88], 0  ;;  %s10635_s15 = scalar_lea.vmem %s159_s0, 16  ;;  %p10640_p1 = scmp.lt.s32.totalorder %s159_s0, %s159_s0 }
  0x7d   :  { %p10636_p0 = scmp.ne.s32.totalorder %s159_s0, %s10635_s15  ;;  %p10641_p2 = scmp.lt.s32.totalorder %s10635_s15, %s10635_s15 }
  0x7f   :  { %p10642_p3 = por %p10641_p2, %p10640_p1 }
  0x81   :  { %p10643_p4 = pnand %p10642_p3, %p10636_p0 }
  0x83   :  { %10646 = shalt.err (!%p10643_p4)
}
  0x84   :  { %s11813_s16 = smov [#allocation16]   ;;  %s11814_s18 = smov [#allocation20]  }
  0x85   :  { %161 = dma.vmem_to_smem %s159_s0, 16, %s11813_s16, [#allocation17]  }
  0x86   :  { %s194_s22 = sshll.u32 %s11814_s18, 4  ;;  %s11815_s23 = smov [#allocation23]   ;;  %s195_s22 = int_to_ptr.vmem [resolvable:$true] %s194_s22 }
  0x87   :  { %s215_s26 = sshll.u32 %s11815_s23, 4  ;;  %s10647_s9 = scalar_lea.hbm %s11917_s29, 16  ;;  %s216_s26 = int_to_ptr.vmem [resolvable:$true] %s215_s26 }
  0x88   :  { %p10648_p5 = scmp.ne.s32.totalorder %s11917_s29, %s10647_s9  ;;  %p10651_p6 = scmp.lt.u32.totalorder %s10647_s9, %s11917_s29 }
  0x8a   :  { %p10653_p7 = pnand %p10651_p6, %p10648_p5 }
  0x8c   :  { %10656 = shalt.err (!%p10653_p7)
}
  0x8d   :  { %s10657_s28 = scalar_lea.vmem %s195_s22, 16  ;;  %s10661_s1 = scalar_lea.vmem %s195_s22, 32 }
  0x8e   :  { %p10658_p8 = scmp.ne.s32.totalorder %s195_s22, %s10657_s28  ;;  %p10662_p9 = scmp.lt.s32.totalorder %s195_s22, %s195_s22 }
  0x8f   :  { %p10663_p10 = scmp.lt.s32.totalorder %s10661_s1, %s10657_s28 }
  0x91   :  { %p10664_p11 = por %p10663_p10, %p10662_p9 }
  0x93   :  { %p10665_p12 = pnand %p10664_p11, %p10658_p8 }
  0x95   :  { %10668 = shalt.err (!%p10665_p12)
}
  0x96   :  { %197 = dma.hbm_to_vmem [thread:$0]  %s11917_s29, 16, %s195_s22, [#allocation21]  }
  0x97   :  { %s10669_s2 = scalar_lea.hbm %s11927_s8, 8192 }
  0x98   :  { %p10670_p13 = scmp.ne.s32.totalorder %s11927_s8, %s10669_s2  ;;  %p10673_p0 = scmp.lt.u32.totalorder %s10669_s2, %s11927_s8 }
  0x9a   :  { %p10675_p1 = pnand %p10673_p0, %p10670_p13 }
  0x9c   :  { %10678 = shalt.err (!%p10675_p1)
}
  0x9d   :  { %s10679_s7 = scalar_lea.vmem %s216_s26, 8192  ;;  %p10684_p3 = scmp.lt.s32.totalorder %s216_s26, %s216_s26 }
  0x9e   :  { %p10680_p2 = scmp.ne.s32.totalorder %s216_s26, %s10679_s7  ;;  %p10685_p4 = scmp.lt.s32.totalorder %s10679_s7, %s10679_s7 }
  0xa0   :  { %p10686_p5 = por %p10685_p4, %p10684_p3 }
  0xa2   :  { %p10687_p6 = pnand %p10686_p5, %p10680_p2 }
  0xa4   :  { %10690 = shalt.err (!%p10687_p6)
}
  0xa5   :  { %s11816_s10 = smov 512   ;;  %s11817_s11 = smov 32  }
  0xa6   :  { %221 = dma.hbm_to_vmem [thread:$0]  %s11927_s8, 8192, %s216_s26, [#allocation24], %s11816_s10, %s11816_s10, %s11817_s11  }
  0xa7   :  { %s11818_s29 = smov [#allocation26]   ;;  %s11819_s15 = smov [#allocation29]  }
  0xa8   :  { %s237_s0 = sshll.u32 %s11818_s29, 4  ;;  %s262_s16 = sshll.u32 %s11819_s15, 4  ;;  %s238_s0 = int_to_ptr.vmem [resolvable:$true] %s237_s0  ;;  %s263_s16 = int_to_ptr.vmem [resolvable:$true] %s262_s16 }
  0xa9   :  { %s10691_s18 = scalar_lea.hbm %s11937_s19, 4096 }
  0xaa   :  { %p10692_p7 = scmp.ne.s32.totalorder %s11937_s19, %s10691_s18  ;;  %p10695_p8 = scmp.lt.u32.totalorder %s10691_s18, %s11937_s19 }
  0xac   :  { %p10697_p9 = pnand %p10695_p8, %p10692_p7 }
  0xae   :  { %10700 = shalt.err (!%p10697_p9)
}
  0xaf   :  { %s10701_s22 = scalar_lea.vmem %s238_s0, 4096  ;;  %p10706_p11 = scmp.lt.s32.totalorder %s238_s0, %s238_s0 }
  0xb0   :  { %p10702_p10 = scmp.ne.s32.totalorder %s238_s0, %s10701_s22  ;;  %p10707_p12 = scmp.lt.s32.totalorder %s10701_s22, %s10701_s22 }
  0xb2   :  { %p10708_p13 = por %p10707_p12, %p10706_p11 }
  0xb4   :  { %p10709_p0 = pnand %p10708_p13, %p10702_p10 }
  0xb6   :  { %10712 = shalt.err (!%p10709_p0)
}
  0xb7   :  { %s11820_s23 = smov 256   ;;  %s11821_s8 = smov 16  }
  0xb8   :  { %243 = dma.hbm_to_vmem [thread:$0]  %s11937_s19, 4096, %s238_s0, [#allocation27], %s11820_s23, %s11820_s23, %s11821_s8  }
  0xb9   :  { %s10713_s26 = scalar_lea.hbm %s11947_s30, 64 }
  0xba   :  { %p10714_p1 = scmp.ne.s32.totalorder %s11947_s30, %s10713_s26  ;;  %p10717_p2 = scmp.lt.u32.totalorder %s10713_s26, %s11947_s30 }
  0xbc   :  { %p10719_p3 = pnand %p10717_p2, %p10714_p1 }
  0xbe   :  { %10722 = shalt.err (!%p10719_p3)
}
  0xbf   :  { %s10723_s9 = scalar_lea.vmem %s263_s16, 64  ;;  %p10728_p5 = scmp.lt.s32.totalorder %s263_s16, %s263_s16 }
  0xc0   :  { %p10724_p4 = scmp.ne.s32.totalorder %s263_s16, %s10723_s9  ;;  %p10729_p6 = scmp.lt.s32.totalorder %s10723_s9, %s10723_s9 }
  0xc2   :  { %p10730_p7 = por %p10729_p6, %p10728_p5 }
  0xc4   :  { %p10731_p8 = pnand %p10730_p7, %p10724_p4 }
  0xc6   :  { %10734 = shalt.err (!%p10731_p8)
}
  0xc7   :  { %265 = dma.hbm_to_vmem [thread:$0]  %s11947_s30, 64, %s263_s16, [#allocation30]  }
  0xc8   :  { %s11822_s28 = smov [#allocation32]   ;;  %s11823_s1 = smov [#allocation35]  }
  0xc9   :  { %s283_s19 = sshll.u32 %s11822_s28, 4  ;;  %s305_s2 = sshll.u32 %s11823_s1, 4  ;;  %s284_s19 = int_to_ptr.vmem [resolvable:$true] %s283_s19  ;;  %s306_s2 = int_to_ptr.vmem [resolvable:$true] %s305_s2 }
  0xca   :  { %s10735_s7 = scalar_lea.hbm %s11957_s12, 1024 }
  0xcb   :  { %p10736_p9 = scmp.ne.s32.totalorder %s11957_s12, %s10735_s7  ;;  %p10739_p10 = scmp.lt.u32.totalorder %s10735_s7, %s11957_s12 }
  0xcd   :  { %p10741_p11 = pnand %p10739_p10, %p10736_p9 }
  0xcf   :  { %10744 = shalt.err (!%p10741_p11)
}
  0xd0   :  { %s10745_s29 = scalar_lea.vmem %s284_s19, 1024  ;;  %p10750_p13 = scmp.lt.s32.totalorder %s284_s19, %s284_s19 }
  0xd1   :  { %p10746_p12 = scmp.ne.s32.totalorder %s284_s19, %s10745_s29  ;;  %p10751_p0 = scmp.lt.s32.totalorder %s10745_s29, %s10745_s29 }
  0xd3   :  { %p10752_p1 = por %p10751_p0, %p10750_p13 }
  0xd5   :  { %p10753_p2 = pnand %p10752_p1, %p10746_p12 }
  0xd7   :  { %10756 = shalt.err (!%p10753_p2)
}
  0xd8   :  { %s11824_s0 = smov 64   ;;  %s11825_s30 = smov 4  }
  0xd9   :  { %289 = dma.hbm_to_vmem [thread:$0]  %s11957_s12, 1024, %s284_s19, [#allocation33], %s11824_s0, %s11824_s0, %s11825_s30  }
  0xda   :  { %s10757_s15 = scalar_lea.hbm %s11967_s27, 1024 }
  0xdb   :  { %p10758_p3 = scmp.ne.s32.totalorder %s11967_s27, %s10757_s15  ;;  %p10761_p4 = scmp.lt.u32.totalorder %s10757_s15, %s11967_s27 }
  0xdd   :  { %p10763_p5 = pnand %p10761_p4, %p10758_p3 }
  0xdf   :  { %10766 = shalt.err (!%p10763_p5)
}
  0xe0   :  { %s10767_s16 = scalar_lea.vmem %s306_s2, 1024  ;;  %p10772_p7 = scmp.lt.s32.totalorder %s306_s2, %s306_s2 }
  0xe1   :  { %p10768_p6 = scmp.ne.s32.totalorder %s306_s2, %s10767_s16  ;;  %p10773_p8 = scmp.lt.s32.totalorder %s10767_s16, %s10767_s16 }
  0xe3   :  { %p10774_p9 = por %p10773_p8, %p10772_p7 }
  0xe5   :  { %p10775_p10 = pnand %p10774_p9, %p10768_p6 }
  0xe7   :  { %10778 = shalt.err (!%p10775_p10)
}
  0xe8   :  { %311 = dma.hbm_to_vmem [thread:$0]  %s11967_s27, 1024, %s306_s2, [#allocation36], %s11824_s0, %s11824_s0, %s11825_s30  }
  0xe9   :  { %s11826_s12 = smov [#allocation38]   ;;  %s11827_s22 = smov [#allocation41]  }
  0xea   :  { %s330_s18 = sshll.u32 %s11826_s12, 4  ;;  %s351_s26 = sshll.u32 %s11827_s22, 4  ;;  %s331_s18 = int_to_ptr.vmem [resolvable:$true] %s330_s18  ;;  %s352_s26 = int_to_ptr.vmem [resolvable:$true] %s351_s26 }
  0xeb   :  { %s10779_s9 = scalar_lea.hbm %s11977_s21, 16 }
  0xec   :  { %p10780_p11 = scmp.ne.s32.totalorder %s11977_s21, %s10779_s9  ;;  %p10783_p12 = scmp.lt.u32.totalorder %s10779_s9, %s11977_s21 }
  0xee   :  { %p10785_p13 = pnand %p10783_p12, %p10780_p11 }
  0xf0   :  { %10788 = shalt.err (!%p10785_p13)
}
  0xf1   :  { %s10789_s28 = scalar_lea.vmem %s331_s18, 16  ;;  %s10793_s19 = scalar_lea.vmem %s331_s18, 32 }
  0xf2   :  { %p10790_p0 = scmp.ne.s32.totalorder %s331_s18, %s10789_s28  ;;  %p10794_p1 = scmp.lt.s32.totalorder %s331_s18, %s331_s18 }
  0xf3   :  { %p10795_p2 = scmp.lt.s32.totalorder %s10793_s19, %s10789_s28 }
  0xf5   :  { %p10796_p3 = por %p10795_p2, %p10794_p1 }
  0xf7   :  { %p10797_p4 = pnand %p10796_p3, %p10790_p0 }
  0xf9   :  { %10800 = shalt.err (!%p10797_p4)
}
  0xfa   :  { %333 = dma.hbm_to_vmem [thread:$0]  %s11977_s21, 16, %s331_s18, [#allocation39]  }
  0xfb   :  { %s10801_s27 = scalar_lea.hbm %s11987_s20, 1024 }
  0xfc   :  { %p10802_p5 = scmp.ne.s32.totalorder %s11987_s20, %s10801_s27  ;;  %p10805_p6 = scmp.lt.u32.totalorder %s10801_s27, %s11987_s20 }
  0xfe   :  { %p10807_p7 = pnand %p10805_p6, %p10802_p5 }
 0x100   :  { %10810 = shalt.err (!%p10807_p7)
}
 0x101   :  { %s10811_s1 = scalar_lea.vmem %s352_s26, 1024  ;;  %p10816_p9 = scmp.lt.s32.totalorder %s352_s26, %s352_s26 }
 0x102   :  { %p10812_p8 = scmp.ne.s32.totalorder %s352_s26, %s10811_s1  ;;  %p10817_p10 = scmp.lt.s32.totalorder %s10811_s1, %s10811_s1 }
 0x104   :  { %p10818_p11 = por %p10817_p10, %p10816_p9 }
 0x106   :  { %p10819_p12 = pnand %p10818_p11, %p10812_p8 }
 0x108   :  { %10822 = shalt.err (!%p10819_p12)
}
 0x109   :  { %357 = dma.hbm_to_vmem [thread:$0]  %s11987_s20, 1024, %s352_s26, [#allocation42], %s11824_s0, %s11824_s0, %s11825_s30  }
 0x10a   :  { %s11828_s21 = smov [#allocation44]   ;;  %s11829_s7 = smov [#allocation47]  }
 0x10b   :  { %s373_s2 = sshll.u32 %s11828_s21, 4  ;;  %s395_s29 = sshll.u32 %s11829_s7, 4  ;;  %s374_s2 = int_to_ptr.vmem [resolvable:$true] %s373_s2  ;;  %s396_s29 = int_to_ptr.vmem [resolvable:$true] %s395_s29 }
 0x10c   :  { %s10823_s15 = scalar_lea.hbm %s11997_s6, 960 }
 0x10d   :  { %p10824_p13 = scmp.ne.s32.totalorder %s11997_s6, %s10823_s15  ;;  %p10827_p0 = scmp.lt.u32.totalorder %s10823_s15, %s11997_s6 }
 0x10f   :  { %p10829_p1 = pnand %p10827_p0, %p10824_p13 }
 0x111   :  { %10832 = shalt.err (!%p10829_p1)
}
 0x112   :  { %s10833_s16 = scalar_lea.vmem %s374_s2, 960  ;;  %p10838_p3 = scmp.lt.s32.totalorder %s374_s2, %s374_s2 }
 0x113   :  { %p10834_p2 = scmp.ne.s32.totalorder %s374_s2, %s10833_s16  ;;  %p10839_p4 = scmp.lt.s32.totalorder %s10833_s16, %s10833_s16 }
 0x115   :  { %p10840_p5 = por %p10839_p4, %p10838_p3 }
 0x117   :  { %p10841_p6 = pnand %p10840_p5, %p10834_p2 }
 0x119   :  { %10844 = shalt.err (!%p10841_p6)
}
 0x11a   :  { %379 = dma.hbm_to_vmem [thread:$0]  %s11997_s6, 960, %s374_s2, [#allocation45], %s11824_s0, %s11824_s0, %s11825_s30  }
 0x11b   :  { %s10845_s20 = scalar_lea.hbm %s12007_s24, 4096 }
 0x11c   :  { %p10846_p7 = scmp.ne.s32.totalorder %s12007_s24, %s10845_s20  ;;  %p10849_p8 = scmp.lt.u32.totalorder %s10845_s20, %s12007_s24 }
 0x11e   :  { %p10851_p9 = pnand %p10849_p8, %p10846_p7 }
 0x120   :  { %10854 = shalt.err (!%p10851_p9)
}
 0x121   :  { %s10855_s12 = scalar_lea.vmem %s396_s29, 4096  ;;  %p10860_p11 = scmp.lt.s32.totalorder %s396_s29, %s396_s29 }
 0x122   :  { %p10856_p10 = scmp.ne.s32.totalorder %s396_s29, %s10855_s12  ;;  %p10861_p12 = scmp.lt.s32.totalorder %s10855_s12, %s10855_s12 }
 0x124   :  { %p10862_p13 = por %p10861_p12, %p10860_p11 }
 0x126   :  { %p10863_p0 = pnand %p10862_p13, %p10856_p10 }
 0x128   :  { %10866 = shalt.err (!%p10863_p0)
}
 0x129   :  { %401 = dma.hbm_to_vmem [thread:$0]  %s12007_s24, 4096, %s396_s29, [#allocation48], %s11820_s23, %s11820_s23, %s11821_s8  }
 0x12a   :  { %s11830_s6 = smov [#allocation50]   ;;  %s11831_s22 = smov [#allocation53]  }
 0x12b   :  { %s420_s18 = sshll.u32 %s11830_s6, 4  ;;  %s441_s26 = sshll.u32 %s11831_s22, 4  ;;  %s421_s18 = int_to_ptr.vmem [resolvable:$true] %s420_s18  ;;  %s442_s26 = int_to_ptr.vmem [resolvable:$true] %s441_s26 }
 0x12c   :  { %s10867_s9 = scalar_lea.hbm %s12017_s14, 64 }
 0x12d   :  { %p10868_p1 = scmp.ne.s32.totalorder %s12017_s14, %s10867_s9  ;;  %p10871_p2 = scmp.lt.u32.totalorder %s10867_s9, %s12017_s14 }
 0x12f   :  { %p10873_p3 = pnand %p10871_p2, %p10868_p1 }
 0x131   :  { %10876 = shalt.err (!%p10873_p3)
}
 0x132   :  { %s10877_s28 = scalar_lea.vmem %s421_s18, 64  ;;  %p10882_p5 = scmp.lt.s32.totalorder %s421_s18, %s421_s18 }
 0x133   :  { %p10878_p4 = scmp.ne.s32.totalorder %s421_s18, %s10877_s28  ;;  %p10883_p6 = scmp.lt.s32.totalorder %s10877_s28, %s10877_s28 }
 0x135   :  { %p10884_p7 = por %p10883_p6, %p10882_p5 }
 0x137   :  { %p10885_p8 = pnand %p10884_p7, %p10878_p4 }
 0x139   :  { %10888 = shalt.err (!%p10885_p8)
}
 0x13a   :  { %423 = dma.hbm_to_vmem [thread:$0]  %s12017_s14, 64, %s421_s18, [#allocation51]  }
 0x13b   :  { %s10889_s24 = scalar_lea.hbm %s12027_s3, 8192 }
 0x13c   :  { %p10890_p9 = scmp.ne.s32.totalorder %s12027_s3, %s10889_s24  ;;  %p10893_p10 = scmp.lt.u32.totalorder %s10889_s24, %s12027_s3 }
 0x13e   :  { %p10895_p11 = pnand %p10893_p10, %p10890_p9 }
 0x140   :  { %10898 = shalt.err (!%p10895_p11)
}
 0x141   :  { %s10899_s19 = scalar_lea.vmem %s442_s26, 8192  ;;  %p10904_p13 = scmp.lt.s32.totalorder %s442_s26, %s442_s26 }
 0x142   :  { %p10900_p12 = scmp.ne.s32.totalorder %s442_s26, %s10899_s19  ;;  %p10905_p0 = scmp.lt.s32.totalorder %s10899_s19, %s10899_s19 }
 0x144   :  { %p10906_p1 = por %p10905_p0, %p10904_p13 }
 0x146   :  { %p10907_p2 = pnand %p10906_p1, %p10900_p12 }
 0x148   :  { %10910 = shalt.err (!%p10907_p2)
}
 0x149   :  { %447 = dma.hbm_to_vmem [thread:$0]  %s12027_s3, 8192, %s442_s26, [#allocation54], %s11816_s10, %s11816_s10, %s11817_s11  }
 0x14a   :  { %s11832_s14 = smov [#allocation56]   ;;  %s11833_s1 = smov [#allocation59]  }
 0x14b   :  { %s465_s27 = sshll.u32 %s11832_s14, 4  ;;  %s487_s21 = sshll.u32 %s11833_s1, 4  ;;  %s466_s27 = int_to_ptr.vmem [resolvable:$true] %s465_s27  ;;  %s488_s21 = int_to_ptr.vmem [resolvable:$true] %s487_s21 }
 0x14c   :  { %s10911_s2 = scalar_lea.hbm %s12042_s17, 1024 }
 0x14d   :  { %p10912_p3 = scmp.ne.s32.totalorder %s12042_s17, %s10911_s2  ;;  %p10915_p4 = scmp.lt.u32.totalorder %s10911_s2, %s12042_s17 }
 0x14f   :  { %p10917_p5 = pnand %p10915_p4, %p10912_p3 }
 0x151   :  { %10920 = shalt.err (!%p10917_p5)
}
 0x152   :  { %s10921_s7 = scalar_lea.vmem %s466_s27, 1024  ;;  %p10926_p7 = scmp.lt.s32.totalorder %s466_s27, %s466_s27 }
 0x153   :  { %p10922_p6 = scmp.ne.s32.totalorder %s466_s27, %s10921_s7  ;;  %p10927_p8 = scmp.lt.s32.totalorder %s10921_s7, %s10921_s7 }
 0x155   :  { %p10928_p9 = por %p10927_p8, %p10926_p7 }
 0x157   :  { %p10929_p10 = pnand %p10928_p9, %p10922_p6 }
 0x159   :  { %10932 = shalt.err (!%p10929_p10)
}
 0x15a   :  { %s13554_s3 = sld [smem:[#allocation135_spill]] }
 0x15b   :  { %471 = dma.hbm_to_vmem [thread:$0]  %s12042_s17, 1024, %s466_s27, [#allocation57], %s11824_s0, %s11824_s0, %s11825_s30  }
 0x160   :  { %s10933_s29 = scalar_lea.hbm %s13554_s3, 1024 }
 0x161   :  { %p10934_p11 = scmp.ne.s32.totalorder %s13554_s3, %s10933_s29  ;;  %p10937_p12 = scmp.lt.u32.totalorder %s10933_s29, %s13554_s3 }
 0x163   :  { %p10939_p13 = pnand %p10937_p12, %p10934_p11 }
 0x165   :  { %10942 = shalt.err (!%p10939_p13)
}
 0x166   :  { %s10943_s15 = scalar_lea.vmem %s488_s21, 1024  ;;  %p10948_p1 = scmp.lt.s32.totalorder %s488_s21, %s488_s21 }
 0x167   :  { %p10944_p0 = scmp.ne.s32.totalorder %s488_s21, %s10943_s15  ;;  %p10949_p2 = scmp.lt.s32.totalorder %s10943_s15, %s10943_s15 }
 0x169   :  { %p10950_p3 = por %p10949_p2, %p10948_p1 }
 0x16b   :  { %p10951_p4 = pnand %p10950_p3, %p10944_p0 }
 0x16d   :  { %10954 = shalt.err (!%p10951_p4)
}
 0x16e   :  { %s13555_s16 = sld [smem:[#allocation137_spill]]  ;;  %s11834_s17 = smov [#allocation62]  }
 0x16f   :  { %493 = dma.hbm_to_vmem [thread:$0]  %s13554_s3, 1024, %s488_s21, [#allocation60], %s11824_s0, %s11824_s0, %s11825_s30  }
 0x170   :  { %s512_s20 = sshll.u32 %s11834_s17, 4  ;;  %s11835_s12 = smov [#allocation65]   ;;  %s513_s20 = int_to_ptr.vmem [resolvable:$true] %s512_s20 }
 0x171   :  { %s533_s6 = sshll.u32 %s11835_s12, 4  ;;  %s534_s6 = int_to_ptr.vmem [resolvable:$true] %s533_s6 }
 0x174   :  { %s10955_s18 = scalar_lea.hbm %s13555_s16, 16 }
 0x175   :  { %p10956_p5 = scmp.ne.s32.totalorder %s13555_s16, %s10955_s18  ;;  %p10959_p6 = scmp.lt.u32.totalorder %s10955_s18, %s13555_s16 }
 0x177   :  { %p10961_p7 = pnand %p10959_p6, %p10956_p5 }
 0x179   :  { %10964 = shalt.err (!%p10961_p7)
}
 0x17a   :  { %s10965_s22 = scalar_lea.vmem %s513_s20, 16  ;;  %s10969_s26 = scalar_lea.vmem %s513_s20, 32 }
 0x17b   :  { %p10966_p8 = scmp.ne.s32.totalorder %s513_s20, %s10965_s22  ;;  %p10970_p9 = scmp.lt.s32.totalorder %s513_s20, %s513_s20 }
 0x17c   :  { %p10971_p10 = scmp.lt.s32.totalorder %s10969_s26, %s10965_s22 }
 0x17e   :  { %p10972_p11 = por %p10971_p10, %p10970_p9 }
 0x180   :  { %p10973_p12 = pnand %p10972_p11, %p10966_p8 }
 0x182   :  { %10976 = shalt.err (!%p10973_p12)
}
 0x183   :  { %s13556_s9 = sld [smem:[#allocation139_spill]] }
 0x184   :  { %515 = dma.hbm_to_vmem [thread:$0]  %s13555_s16, 16, %s513_s20, [#allocation63]  }
 0x189   :  { %s10977_s28 = scalar_lea.hbm %s13556_s9, 1024 }
 0x18a   :  { %p10978_p13 = scmp.ne.s32.totalorder %s13556_s9, %s10977_s28  ;;  %p10981_p0 = scmp.lt.u32.totalorder %s10977_s28, %s13556_s9 }
 0x18c   :  { %p10983_p1 = pnand %p10981_p0, %p10978_p13 }
 0x18e   :  { %10986 = shalt.err (!%p10983_p1)
}
 0x18f   :  { %s10987_s24 = scalar_lea.vmem %s534_s6, 1024  ;;  %p10992_p3 = scmp.lt.s32.totalorder %s534_s6, %s534_s6 }
 0x190   :  { %p10988_p2 = scmp.ne.s32.totalorder %s534_s6, %s10987_s24  ;;  %p10993_p4 = scmp.lt.s32.totalorder %s10987_s24, %s10987_s24 }
 0x192   :  { %p10994_p5 = por %p10993_p4, %p10992_p3 }
 0x194   :  { %p10995_p6 = pnand %p10994_p5, %p10988_p2 }
 0x196   :  { %10998 = shalt.err (!%p10995_p6)
}
 0x197   :  { %s13557_s19 = sld [smem:[#allocation141_spill]]  ;;  %s11836_s14 = smov [#allocation68]  }
 0x198   :  { %539 = dma.hbm_to_vmem [thread:$0]  %s13556_s9, 1024, %s534_s6, [#allocation66], %s11824_s0, %s11824_s0, %s11825_s30  }
 0x199   :  { %s555_s27 = sshll.u32 %s11836_s14, 4  ;;  %s11837_s1 = smov [#allocation71]   ;;  %s556_s27 = int_to_ptr.vmem [resolvable:$true] %s555_s27 }
 0x19a   :  { %s578_s21 = sshll.u32 %s11837_s1, 4  ;;  %s579_s21 = int_to_ptr.vmem [resolvable:$true] %s578_s21 }
 0x19d   :  { %s10999_s2 = scalar_lea.hbm %s13557_s19, 4096 }
 0x19e   :  { %p11000_p7 = scmp.ne.s32.totalorder %s13557_s19, %s10999_s2  ;;  %p11003_p8 = scmp.lt.u32.totalorder %s10999_s2, %s13557_s19 }
 0x1a0   :  { %p11005_p9 = pnand %p11003_p8, %p11000_p7 }
 0x1a2   :  { %11008 = shalt.err (!%p11005_p9)
}
 0x1a3   :  { %s11009_s7 = scalar_lea.vmem %s556_s27, 4096  ;;  %p11014_p11 = scmp.lt.s32.totalorder %s556_s27, %s556_s27 }
 0x1a4   :  { %p11010_p10 = scmp.ne.s32.totalorder %s556_s27, %s11009_s7  ;;  %p11015_p12 = scmp.lt.s32.totalorder %s11009_s7, %s11009_s7 }
 0x1a6   :  { %p11016_p13 = por %p11015_p12, %p11014_p11 }
 0x1a8   :  { %p11017_p0 = pnand %p11016_p13, %p11010_p10 }
 0x1aa   :  { %11020 = shalt.err (!%p11017_p0)
}
 0x1ab   :  { %s13558_s3 = sld [smem:[#allocation143_spill]] }
 0x1ac   :  { %561 = dma.hbm_to_vmem [thread:$0]  %s13557_s19, 4096, %s556_s27, [#allocation69], %s11820_s23, %s11820_s23, %s11821_s8  }
 0x1b1   :  { %s11021_s29 = scalar_lea.hbm %s13558_s3, 64 }
 0x1b2   :  { %p11022_p1 = scmp.ne.s32.totalorder %s13558_s3, %s11021_s29  ;;  %p11025_p2 = scmp.lt.u32.totalorder %s11021_s29, %s13558_s3 }
 0x1b4   :  { %p11027_p3 = pnand %p11025_p2, %p11022_p1 }
 0x1b6   :  { %11030 = shalt.err (!%p11027_p3)
}
 0x1b7   :  { %s11031_s15 = scalar_lea.vmem %s579_s21, 64  ;;  %p11036_p5 = scmp.lt.s32.totalorder %s579_s21, %s579_s21 }
 0x1b8   :  { %p11032_p4 = scmp.ne.s32.totalorder %s579_s21, %s11031_s15  ;;  %p11037_p6 = scmp.lt.s32.totalorder %s11031_s15, %s11031_s15 }
 0x1ba   :  { %p11038_p7 = por %p11037_p6, %p11036_p5 }
 0x1bc   :  { %p11039_p8 = pnand %p11038_p7, %p11032_p4 }
 0x1be   :  { %11042 = shalt.err (!%p11039_p8)
}
 0x1bf   :  { %s13559_s16 = sld [smem:[#allocation145_spill]]  ;;  %s11838_s17 = smov [#allocation74]  }
 0x1c0   :  { %581 = dma.hbm_to_vmem [thread:$0]  %s13558_s3, 64, %s579_s21, [#allocation72]  }
 0x1c1   :  { %s597_s20 = sshll.u32 %s11838_s17, 4  ;;  %s598_s20 = int_to_ptr.vmem [resolvable:$true] %s597_s20 }
 0x1c5   :  { %s11043_s12 = scalar_lea.hbm %s13559_s16, 8192 }
 0x1c6   :  { %p11044_p9 = scmp.ne.s32.totalorder %s13559_s16, %s11043_s12  ;;  %p11047_p10 = scmp.lt.u32.totalorder %s11043_s12, %s13559_s16 }
 0x1c8   :  { %p11049_p11 = pnand %p11047_p10, %p11044_p9 }
 0x1ca   :  { %11052 = shalt.err (!%p11049_p11)
}
 0x1cb   :  { %s11053_s6 = scalar_lea.vmem %s598_s20, 8192  ;;  %p11058_p13 = scmp.lt.s32.totalorder %s598_s20, %s598_s20 }
 0x1cc   :  { %p11054_p12 = scmp.ne.s32.totalorder %s598_s20, %s11053_s6  ;;  %p11059_p0 = scmp.lt.s32.totalorder %s11053_s6, %s11053_s6 }
 0x1ce   :  { %p11060_p1 = por %p11059_p0, %p11058_p13 }
 0x1d0   :  { %p11061_p2 = pnand %p11060_p1, %p11054_p12 }
 0x1d2   :  { %11064 = shalt.err (!%p11061_p2)
}
 0x1d3   :  { %s11839_s18 = smov 128   ;;  %s13560_s22 = sld [smem:[#allocation147_spill]] }
 0x1d4   :  { %s11840_s26 = smov 8   ;;  %s11841_s9 = smov [#allocation77]  }
 0x1d5   :  { %603 = dma.hbm_to_vmem [thread:$0]  %s13559_s16, 8192, %s598_s20, [#allocation75], %s11839_s18, %s11839_s18, %s11840_s26  }
 0x1d6   :  { %s620_s28 = sshll.u32 %s11841_s9, 4  ;;  %s11842_s24 = smov [#allocation80]   ;;  %s621_s28 = int_to_ptr.vmem [resolvable:$true] %s620_s28 }
 0x1d7   :  { %s642_s19 = sshll.u32 %s11842_s24, 4  ;;  %s643_s19 = int_to_ptr.vmem [resolvable:$true] %s642_s19 }
 0x1d9   :  { %s11065_s14 = scalar_lea.hbm %s13560_s22, 32 }
 0x1da   :  { %p11066_p3 = scmp.ne.s32.totalorder %s13560_s22, %s11065_s14  ;;  %p11069_p4 = scmp.lt.u32.totalorder %s11065_s14, %s13560_s22 }
 0x1dc   :  { %p11071_p5 = pnand %p11069_p4, %p11066_p3 }
 0x1de   :  { %11074 = shalt.err (!%p11071_p5)
}
 0x1df   :  { %s11075_s27 = scalar_lea.vmem %s621_s28, 32  ;;  %p11080_p7 = scmp.lt.s32.totalorder %s621_s28, %s621_s28 }
 0x1e0   :  { %p11076_p6 = scmp.ne.s32.totalorder %s621_s28, %s11075_s27  ;;  %p11081_p8 = scmp.lt.s32.totalorder %s11075_s27, %s11075_s27 }
 0x1e2   :  { %p11082_p9 = por %p11081_p8, %p11080_p7 }
 0x1e4   :  { %p11083_p10 = pnand %p11082_p9, %p11076_p6 }
 0x1e6   :  { %11086 = shalt.err (!%p11083_p10)
}
 0x1e7   :  { %s13561_s1 = sld [smem:[#allocation150_spill]] }
 0x1e8   :  { %623 = dma.hbm_to_vmem [thread:$0]  %s13560_s22, 32, %s621_s28, [#allocation78]  }
 0x1ed   :  { %s11087_s21 = scalar_lea.hbm %s13561_s1, 16 }
 0x1ee   :  { %p11088_p11 = scmp.ne.s32.totalorder %s13561_s1, %s11087_s21  ;;  %p11091_p12 = scmp.lt.u32.totalorder %s11087_s21, %s13561_s1 }
 0x1f0   :  { %p11093_p13 = pnand %p11091_p12, %p11088_p11 }
 0x1f2   :  { %11096 = shalt.err (!%p11093_p13)
}
 0x1f3   :  { %s11097_s2 = scalar_lea.vmem %s643_s19, 16  ;;  %s11101_s7 = scalar_lea.vmem %s643_s19, 32 }
 0x1f4   :  { %p11098_p0 = scmp.ne.s32.totalorder %s643_s19, %s11097_s2  ;;  %p11102_p1 = scmp.lt.s32.totalorder %s643_s19, %s643_s19 }
 0x1f5   :  { %p11103_p2 = scmp.lt.s32.totalorder %s11101_s7, %s11097_s2 }
 0x1f7   :  { %p11104_p3 = por %p11103_p2, %p11102_p1 }
 0x1f9   :  { %p11105_p4 = pnand %p11104_p3, %p11098_p0 }
 0x1fb   :  { %11108 = shalt.err (!%p11105_p4)
}
 0x1fc   :  { %s13562_s3 = sld [smem:[#allocation116_spill]]  ;;  %s13563_s29 = sld [smem:[#allocation152_spill]] }
 0x1fd   :  { %645 = dma.hbm_to_vmem [thread:$0]  %s13561_s1, 16, %s643_s19, [#allocation81]  }
 0x1fe   :  { %s11843_s16 = smov [#allocation83]  }
 0x1ff   :  { %s662_s17 = sshll.u32 %s11843_s16, 4  ;;  %s663_s17 = int_to_ptr.vmem [resolvable:$true] %s662_s17 }
 0x202   :  { %s148_s15 = sshll.u32 %s13562_s3, 4  ;;  %s11109_s20 = scalar_lea.hbm %s13563_s29, 16  ;;  %s149_s15 = int_to_ptr.vmem [resolvable:$true] %s148_s15 }
 0x203   :  { %p11110_p5 = scmp.ne.s32.totalorder %s13563_s29, %s11109_s20  ;;  %p11113_p6 = scmp.lt.u32.totalorder %s11109_s20, %s13563_s29 }
 0x205   :  { %p11115_p7 = pnand %p11113_p6, %p11110_p5 }
 0x207   :  { %11118 = shalt.err (!%p11115_p7)
}
 0x208   :  { %s11119_s12 = scalar_lea.vmem %s663_s17, 16  ;;  %s11123_s6 = scalar_lea.vmem %s663_s17, 32 }
 0x209   :  { %p11120_p8 = scmp.ne.s32.totalorder %s663_s17, %s11119_s12  ;;  %p11124_p9 = scmp.lt.s32.totalorder %s663_s17, %s663_s17 }
 0x20a   :  { %p11125_p10 = scmp.lt.s32.totalorder %s11123_s6, %s11119_s12 }
 0x20c   :  { %p11126_p11 = por %p11125_p10, %p11124_p9 }
 0x20e   :  { %p11127_p12 = pnand %p11126_p11, %p11120_p8 }
 0x210   :  { %11130 = shalt.err (!%p11127_p12)
}
 0x211   :  { %665 = dma.hbm_to_vmem [thread:$0]  %s13563_s29, 16, %s663_s17, [#allocation84]  }
 0x212   :  { %s11131_s18 = scalar_lea.vmem %s149_s15, 16  ;;  %p11136_p0 = scmp.lt.s32.totalorder %s149_s15, %s149_s15 }
 0x213   :  { %p11132_p13 = scmp.ne.s32.totalorder %s149_s15, %s11131_s18  ;;  %p11137_p1 = scmp.lt.s32.totalorder %s11131_s18, %s11131_s18 }
 0x215   :  { %p11138_p2 = por %p11137_p1, %p11136_p0 }
 0x217   :  { %p11139_p3 = pnand %p11138_p2, %p11132_p13 }
 0x219   :  { %11142 = shalt.err (!%p11139_p3)
}
 0x21a   :  { %s11844_s22 = smov [#allocation12]   ;;  %s13564_s26 = sld [smem:[#allocation117_spill]] }
 0x21b   :  { %151 = dma.vmem_to_smem %s149_s15, 16, %s11844_s22, [#allocation15]  }
 0x220   :  { %s168_s9 = sshll.u32 %s13564_s26, 4  ;;  %s169_s9 = int_to_ptr.vmem [resolvable:$true] %s168_s9 }
 0x221   :  { %s11143_s28 = scalar_lea.vmem %s169_s9, 16  ;;  %p11148_p5 = scmp.lt.s32.totalorder %s169_s9, %s169_s9 }
 0x222   :  { %p11144_p4 = scmp.ne.s32.totalorder %s169_s9, %s11143_s28  ;;  %p11149_p6 = scmp.lt.s32.totalorder %s11143_s28, %s11143_s28 }
 0x224   :  { %p11150_p7 = por %p11149_p6, %p11148_p5 }
 0x226   :  { %p11151_p8 = pnand %p11150_p7, %p11144_p4 }
 0x228   :  { %11154 = shalt.err (!%p11151_p8)
}
 0x229   :  { %s11845_s24 = smov [#allocation18]   ;;  %s13565_s19 = sld [smem:[#allocation120_spill]] }
 0x22a   :  { %171 = dma.vmem_to_smem %s169_s9, 16, %s11845_s24, [#allocation17]  }
 0x22b   :  { %s11846_s14 = smov [#allocation19]   ;;  %s11847_s1 = smov [#allocation22]  }
 0x22c   :  { %s181_s27 = sshll.u32 %s11846_s14, 4  ;;  %s203_s21 = sshll.u32 %s11847_s1, 4  ;;  %s182_s27 = int_to_ptr.vmem [resolvable:$true] %s181_s27  ;;  %s204_s21 = int_to_ptr.vmem [resolvable:$true] %s203_s21 }
 0x22f   :  { %s11155_s2 = scalar_lea.hbm %s13565_s19, 10240 }
 0x230   :  { %p11156_p9 = scmp.ne.s32.totalorder %s13565_s19, %s11155_s2  ;;  %p11159_p10 = scmp.lt.u32.totalorder %s11155_s2, %s13565_s19 }
 0x232   :  { %p11161_p11 = pnand %p11159_p10, %p11156_p9 }
 0x234   :  { %11164 = shalt.err (!%p11161_p11)
}
 0x235   :  { %s11165_s7 = scalar_lea.vmem %s182_s27, 10240  ;;  %p11170_p13 = scmp.lt.s32.totalorder %s182_s27, %s182_s27 }
 0x236   :  { %p11166_p12 = scmp.ne.s32.totalorder %s182_s27, %s11165_s7  ;;  %p11171_p0 = scmp.lt.s32.totalorder %s11165_s7, %s11165_s7 }
 0x238   :  { %p11172_p1 = por %p11171_p0, %p11170_p13 }
 0x23a   :  { %p11173_p2 = pnand %p11172_p1, %p11166_p12 }
 0x23c   :  { %11176 = shalt.err (!%p11173_p2)
}
 0x23d   :  { %s13566_s3 = sld [smem:[#allocation121_spill]] }
 0x23e   :  { %187 = dma.hbm_to_vmem [thread:$0]  %s13565_s19, 10240, %s182_s27, [#allocation13], %s11824_s0, %s11824_s0, %s11825_s30  }
 0x243   :  { %s11177_s29 = scalar_lea.hbm %s13566_s3, 4096 }
 0x244   :  { %p11178_p3 = scmp.ne.s32.totalorder %s13566_s3, %s11177_s29  ;;  %p11181_p4 = scmp.lt.u32.totalorder %s11177_s29, %s13566_s3 }
 0x246   :  { %p11183_p5 = pnand %p11181_p4, %p11178_p3 }
 0x248   :  { %11186 = shalt.err (!%p11183_p5)
}
 0x249   :  { %s11187_s15 = scalar_lea.vmem %s204_s21, 4096  ;;  %p11192_p7 = scmp.lt.s32.totalorder %s204_s21, %s204_s21 }
 0x24a   :  { %p11188_p6 = scmp.ne.s32.totalorder %s204_s21, %s11187_s15  ;;  %p11193_p8 = scmp.lt.s32.totalorder %s11187_s15, %s11187_s15 }
 0x24c   :  { %p11194_p9 = por %p11193_p8, %p11192_p7 }
 0x24e   :  { %p11195_p10 = pnand %p11194_p9, %p11188_p6 }
 0x250   :  { %11198 = shalt.err (!%p11195_p10)
}
 0x251   :  { %s13567_s16 = sld [smem:[#allocation122_spill]]  ;;  %s11848_s17 = smov [#allocation25]  }
 0x252   :  { %209 = dma.hbm_to_vmem [thread:$0]  %s13566_s3, 4096, %s204_s21, [#allocation21], %s11820_s23, %s11820_s23, %s11821_s8  }
 0x253   :  { %s228_s20 = sshll.u32 %s11848_s17, 4  ;;  %s11849_s12 = smov [#allocation28]   ;;  %s229_s20 = int_to_ptr.vmem [resolvable:$true] %s228_s20 }
 0x254   :  { %s249_s6 = sshll.u32 %s11849_s12, 4  ;;  %s250_s6 = int_to_ptr.vmem [resolvable:$true] %s249_s6 }
 0x257   :  { %s11199_s18 = scalar_lea.hbm %s13567_s16, 64 }
 0x258   :  { %p11200_p11 = scmp.ne.s32.totalorder %s13567_s16, %s11199_s18  ;;  %p11203_p12 = scmp.lt.u32.totalorder %s11199_s18, %s13567_s16 }
 0x25a   :  { %p11205_p13 = pnand %p11203_p12, %p11200_p11 }
 0x25c   :  { %11208 = shalt.err (!%p11205_p13)
}
 0x25d   :  { %s11209_s22 = scalar_lea.vmem %s229_s20, 64  ;;  %p11214_p1 = scmp.lt.s32.totalorder %s229_s20, %s229_s20 }
 0x25e   :  { %p11210_p0 = scmp.ne.s32.totalorder %s229_s20, %s11209_s22  ;;  %p11215_p2 = scmp.lt.s32.totalorder %s11209_s22, %s11209_s22 }
 0x260   :  { %p11216_p3 = por %p11215_p2, %p11214_p1 }
 0x262   :  { %p11217_p4 = pnand %p11216_p3, %p11210_p0 }
 0x264   :  { %11220 = shalt.err (!%p11217_p4)
}
 0x265   :  { %s13568_s26 = sld [smem:[#allocation123_spill]] }
 0x266   :  { %231 = dma.hbm_to_vmem [thread:$0]  %s13567_s16, 64, %s229_s20, [#allocation24]  }
 0x26b   :  { %s11221_s9 = scalar_lea.hbm %s13568_s26, 8192 }
 0x26c   :  { %p11222_p5 = scmp.ne.s32.totalorder %s13568_s26, %s11221_s9  ;;  %p11225_p6 = scmp.lt.u32.totalorder %s11221_s9, %s13568_s26 }
 0x26e   :  { %p11227_p7 = pnand %p11225_p6, %p11222_p5 }
 0x270   :  { %11230 = shalt.err (!%p11227_p7)
}
 0x271   :  { %s11231_s28 = scalar_lea.vmem %s250_s6, 8192  ;;  %p11236_p9 = scmp.lt.s32.totalorder %s250_s6, %s250_s6 }
 0x272   :  { %p11232_p8 = scmp.ne.s32.totalorder %s250_s6, %s11231_s28  ;;  %p11237_p10 = scmp.lt.s32.totalorder %s11231_s28, %s11231_s28 }
 0x274   :  { %p11238_p11 = por %p11237_p10, %p11236_p9 }
 0x276   :  { %p11239_p12 = pnand %p11238_p11, %p11232_p8 }
 0x278   :  { %11242 = shalt.err (!%p11239_p12)
}
 0x279   :  { %s13569_s24 = sld [smem:[#allocation124_spill]]  ;;  %s11850_s19 = smov [#allocation31]  }
 0x27a   :  { %255 = dma.hbm_to_vmem [thread:$0]  %s13568_s26, 8192, %s250_s6, [#allocation27], %s11816_s10, %s11816_s10, %s11817_s11  }
 0x27b   :  { %s271_s14 = sshll.u32 %s11850_s19, 4  ;;  %s11851_s27 = smov [#allocation34]   ;;  %s272_s14 = int_to_ptr.vmem [resolvable:$true] %s271_s14 }
 0x27c   :  { %s296_s1 = sshll.u32 %s11851_s27, 4  ;;  %s297_s1 = int_to_ptr.vmem [resolvable:$true] %s296_s1 }
 0x27f   :  { %s11243_s21 = scalar_lea.hbm %s13569_s24, 1024 }
 0x280   :  { %p11244_p13 = scmp.ne.s32.totalorder %s13569_s24, %s11243_s21  ;;  %p11247_p0 = scmp.lt.u32.totalorder %s11243_s21, %s13569_s24 }
 0x282   :  { %p11249_p1 = pnand %p11247_p0, %p11244_p13 }
 0x284   :  { %11252 = shalt.err (!%p11249_p1)
}
 0x285   :  { %s11253_s2 = scalar_lea.vmem %s272_s14, 1024  ;;  %p11258_p3 = scmp.lt.s32.totalorder %s272_s14, %s272_s14 }
 0x286   :  { %p11254_p2 = scmp.ne.s32.totalorder %s272_s14, %s11253_s2  ;;  %p11259_p4 = scmp.lt.s32.totalorder %s11253_s2, %s11253_s2 }
 0x288   :  { %p11260_p5 = por %p11259_p4, %p11258_p3 }
 0x28a   :  { %p11261_p6 = pnand %p11260_p5, %p11254_p2 }
 0x28c   :  { %11264 = shalt.err (!%p11261_p6)
}
 0x28d   :  { %s13570_s7 = sld [smem:[#allocation125_spill]] }
 0x28e   :  { %277 = dma.hbm_to_vmem [thread:$0]  %s13569_s24, 1024, %s272_s14, [#allocation30], %s11824_s0, %s11824_s0, %s11825_s30  }
 0x293   :  { %s11265_s3 = scalar_lea.hbm %s13570_s7, 16 }
 0x294   :  { %p11266_p7 = scmp.ne.s32.totalorder %s13570_s7, %s11265_s3  ;;  %p11269_p8 = scmp.lt.u32.totalorder %s11265_s3, %s13570_s7 }
 0x296   :  { %p11271_p9 = pnand %p11269_p8, %p11266_p7 }
 0x298   :  { %11274 = shalt.err (!%p11271_p9)
}
 0x299   :  { %s11275_s29 = scalar_lea.vmem %s297_s1, 16  ;;  %s11279_s15 = scalar_lea.vmem %s297_s1, 32 }
 0x29a   :  { %p11276_p10 = scmp.ne.s32.totalorder %s297_s1, %s11275_s29  ;;  %p11280_p11 = scmp.lt.s32.totalorder %s297_s1, %s297_s1 }
 0x29b   :  { %p11281_p12 = scmp.lt.s32.totalorder %s11279_s15, %s11275_s29 }
 0x29d   :  { %p11282_p13 = por %p11281_p12, %p11280_p11 }
 0x29f   :  { %p11283_p0 = pnand %p11282_p13, %p11276_p10 }
 0x2a1   :  { %11286 = shalt.err (!%p11283_p0)
}
 0x2a2   :  { %s13571_s16 = sld [smem:[#allocation126_spill]]  ;;  %s11852_s17 = smov [#allocation37]  }
 0x2a3   :  { %299 = dma.hbm_to_vmem [thread:$0]  %s13570_s7, 16, %s297_s1, [#allocation33]  }
 0x2a4   :  { %s317_s20 = sshll.u32 %s11852_s17, 4  ;;  %s11853_s12 = smov [#allocation40]   ;;  %s318_s20 = int_to_ptr.vmem [resolvable:$true] %s317_s20 }
 0x2a5   :  { %s339_s6 = sshll.u32 %s11853_s12, 4  ;;  %s340_s6 = int_to_ptr.vmem [resolvable:$true] %s339_s6 }
 0x2a8   :  { %s11287_s18 = scalar_lea.hbm %s13571_s16, 1024 }
 0x2a9   :  { %p11288_p1 = scmp.ne.s32.totalorder %s13571_s16, %s11287_s18  ;;  %p11291_p2 = scmp.lt.u32.totalorder %s11287_s18, %s13571_s16 }
 0x2ab   :  { %p11293_p3 = pnand %p11291_p2, %p11288_p1 }
 0x2ad   :  { %11296 = shalt.err (!%p11293_p3)
}
 0x2ae   :  { %s11297_s22 = scalar_lea.vmem %s318_s20, 1024  ;;  %p11302_p5 = scmp.lt.s32.totalorder %s318_s20, %s318_s20 }
 0x2af   :  { %p11298_p4 = scmp.ne.s32.totalorder %s318_s20, %s11297_s22  ;;  %p11303_p6 = scmp.lt.s32.totalorder %s11297_s22, %s11297_s22 }
 0x2b1   :  { %p11304_p7 = por %p11303_p6, %p11302_p5 }
 0x2b3   :  { %p11305_p8 = pnand %p11304_p7, %p11298_p4 }
 0x2b5   :  { %11308 = shalt.err (!%p11305_p8)
}
 0x2b6   :  { %s13572_s26 = sld [smem:[#allocation127_spill]] }
 0x2b7   :  { %323 = dma.hbm_to_vmem [thread:$0]  %s13571_s16, 1024, %s318_s20, [#allocation36], %s11824_s0, %s11824_s0, %s11825_s30  }
 0x2bc   :  { %s11309_s9 = scalar_lea.hbm %s13572_s26, 1024 }
 0x2bd   :  { %p11310_p9 = scmp.ne.s32.totalorder %s13572_s26, %s11309_s9  ;;  %p11313_p10 = scmp.lt.u32.totalorder %s11309_s9, %s13572_s26 }
 0x2bf   :  { %p11315_p11 = pnand %p11313_p10, %p11310_p9 }
 0x2c1   :  { %11318 = shalt.err (!%p11315_p11)
}
 0x2c2   :  { %s11319_s28 = scalar_lea.vmem %s340_s6, 1024  ;;  %p11324_p13 = scmp.lt.s32.totalorder %s340_s6, %s340_s6 }
 0x2c3   :  { %p11320_p12 = scmp.ne.s32.totalorder %s340_s6, %s11319_s28  ;;  %p11325_p0 = scmp.lt.s32.totalorder %s11319_s28, %s11319_s28 }
 0x2c5   :  { %p11326_p1 = por %p11325_p0, %p11324_p13 }
 0x2c7   :  { %p11327_p2 = pnand %p11326_p1, %p11320_p12 }
 0x2c9   :  { %11330 = shalt.err (!%p11327_p2)
}
 0x2ca   :  { %s13573_s24 = sld [smem:[#allocation128_spill]]  ;;  %s11854_s19 = smov [#allocation43]  }
 0x2cb   :  { %345 = dma.hbm_to_vmem [thread:$0]  %s13572_s26, 1024, %s340_s6, [#allocation39], %s11824_s0, %s11824_s0, %s11825_s30  }
 0x2cc   :  { %s364_s14 = sshll.u32 %s11854_s19, 4  ;;  %s11855_s27 = smov [#allocation46]   ;;  %s365_s14 = int_to_ptr.vmem [resolvable:$true] %s364_s14 }
 0x2cd   :  { %s386_s1 = sshll.u32 %s11855_s27, 4  ;;  %s387_s1 = int_to_ptr.vmem [resolvable:$true] %s386_s1 }
 0x2d0   :  { %s11331_s21 = scalar_lea.hbm %s13573_s24, 16 }
 0x2d1   :  { %p11332_p3 = scmp.ne.s32.totalorder %s13573_s24, %s11331_s21  ;;  %p11335_p4 = scmp.lt.u32.totalorder %s11331_s21, %s13573_s24 }
 0x2d3   :  { %p11337_p5 = pnand %p11335_p4, %p11332_p3 }
 0x2d5   :  { %11340 = shalt.err (!%p11337_p5)
}
 0x2d6   :  { %s11341_s2 = scalar_lea.vmem %s365_s14, 16  ;;  %s11345_s7 = scalar_lea.vmem %s365_s14, 32 }
 0x2d7   :  { %p11342_p6 = scmp.ne.s32.totalorder %s365_s14, %s11341_s2  ;;  %p11346_p7 = scmp.lt.s32.totalorder %s365_s14, %s365_s14 }
 0x2d8   :  { %p11347_p8 = scmp.lt.s32.totalorder %s11345_s7, %s11341_s2 }
 0x2da   :  { %p11348_p9 = por %p11347_p8, %p11346_p7 }
 0x2dc   :  { %p11349_p10 = pnand %p11348_p9, %p11342_p6 }
 0x2de   :  { %11352 = shalt.err (!%p11349_p10)
}
 0x2df   :  { %s13574_s3 = sld [smem:[#allocation129_spill]] }
 0x2e0   :  { %367 = dma.hbm_to_vmem [thread:$0]  %s13573_s24, 16, %s365_s14, [#allocation42]  }
 0x2e5   :  { %s11353_s29 = scalar_lea.hbm %s13574_s3, 16 }
 0x2e6   :  { %p11354_p11 = scmp.ne.s32.totalorder %s13574_s3, %s11353_s29  ;;  %p11357_p12 = scmp.lt.u32.totalorder %s11353_s29, %s13574_s3 }
 0x2e8   :  { %p11359_p13 = pnand %p11357_p12, %p11354_p11 }
 0x2ea   :  { %11362 = shalt.err (!%p11359_p13)
}
 0x2eb   :  { %s11363_s15 = scalar_lea.vmem %s387_s1, 16  ;;  %s11367_s16 = scalar_lea.vmem %s387_s1, 32 }
 0x2ec   :  { %p11364_p0 = scmp.ne.s32.totalorder %s387_s1, %s11363_s15  ;;  %p11368_p1 = scmp.lt.s32.totalorder %s387_s1, %s387_s1 }
 0x2ed   :  { %p11369_p2 = scmp.lt.s32.totalorder %s11367_s16, %s11363_s15 }
 0x2ef   :  { %p11370_p3 = por %p11369_p2, %p11368_p1 }
 0x2f1   :  { %p11371_p4 = pnand %p11370_p3, %p11364_p0 }
 0x2f3   :  { %11374 = shalt.err (!%p11371_p4)
}
 0x2f4   :  { %s13575_s17 = sld [smem:[#allocation130_spill]]  ;;  %s11856_s20 = smov [#allocation49]  }
 0x2f5   :  { %389 = dma.hbm_to_vmem [thread:$0]  %s13574_s3, 16, %s387_s1, [#allocation45]  }
 0x2f6   :  { %s407_s12 = sshll.u32 %s11856_s20, 4  ;;  %s11857_s6 = smov [#allocation52]   ;;  %s408_s12 = int_to_ptr.vmem [resolvable:$true] %s407_s12 }
 0x2f7   :  { %s429_s18 = sshll.u32 %s11857_s6, 4  ;;  %s430_s18 = int_to_ptr.vmem [resolvable:$true] %s429_s18 }
 0x2fa   :  { %s11375_s22 = scalar_lea.hbm %s13575_s17, 8192 }
 0x2fb   :  { %p11376_p5 = scmp.ne.s32.totalorder %s13575_s17, %s11375_s22  ;;  %p11379_p6 = scmp.lt.u32.totalorder %s11375_s22, %s13575_s17 }
 0x2fd   :  { %p11381_p7 = pnand %p11379_p6, %p11376_p5 }
 0x2ff   :  { %11384 = shalt.err (!%p11381_p7)
}
 0x300   :  { %s11385_s26 = scalar_lea.vmem %s408_s12, 8192  ;;  %p11390_p9 = scmp.lt.s32.totalorder %s408_s12, %s408_s12 }
 0x301   :  { %p11386_p8 = scmp.ne.s32.totalorder %s408_s12, %s11385_s26  ;;  %p11391_p10 = scmp.lt.s32.totalorder %s11385_s26, %s11385_s26 }
 0x303   :  { %p11392_p11 = por %p11391_p10, %p11390_p9 }
 0x305   :  { %p11393_p12 = pnand %p11392_p11, %p11386_p8 }
 0x307   :  { %11396 = shalt.err (!%p11393_p12)
}
 0x308   :  { %s13576_s9 = sld [smem:[#allocation131_spill]] }
 0x309   :  { %413 = dma.hbm_to_vmem [thread:$0]  %s13575_s17, 8192, %s408_s12, [#allocation48], %s11816_s10, %s11816_s10, %s11817_s11  }
 0x30e   :  { %s11397_s28 = scalar_lea.hbm %s13576_s9, 4096 }
 0x30f   :  { %p11398_p13 = scmp.ne.s32.totalorder %s13576_s9, %s11397_s28  ;;  %p11401_p0 = scmp.lt.u32.totalorder %s11397_s28, %s13576_s9 }
 0x311   :  { %p11403_p1 = pnand %p11401_p0, %p11398_p13 }
 0x313   :  { %11406 = shalt.err (!%p11403_p1)
}
 0x314   :  { %s11407_s24 = scalar_lea.vmem %s430_s18, 4096  ;;  %p11412_p3 = scmp.lt.s32.totalorder %s430_s18, %s430_s18 }
 0x315   :  { %p11408_p2 = scmp.ne.s32.totalorder %s430_s18, %s11407_s24  ;;  %p11413_p4 = scmp.lt.s32.totalorder %s11407_s24, %s11407_s24 }
 0x317   :  { %p11414_p5 = por %p11413_p4, %p11412_p3 }
 0x319   :  { %p11415_p6 = pnand %p11414_p5, %p11408_p2 }
 0x31b   :  { %11418 = shalt.err (!%p11415_p6)
}
 0x31c   :  { %s13577_s19 = sld [smem:[#allocation132_spill]]  ;;  %s11858_s10 = smov [#allocation55]  }
 0x31d   :  { %435 = dma.hbm_to_vmem [thread:$0]  %s13576_s9, 4096, %s430_s18, [#allocation51], %s11820_s23, %s11820_s23, %s11821_s8  }
 0x31e   :  { %s454_s11 = sshll.u32 %s11858_s10, 4  ;;  %s11859_s14 = smov [#allocation58]   ;;  %s455_s11 = int_to_ptr.vmem [resolvable:$true] %s454_s11 }
 0x31f   :  { %s478_s27 = sshll.u32 %s11859_s14, 4  ;;  %s479_s27 = int_to_ptr.vmem [resolvable:$true] %s478_s27 }
 0x322   :  { %s11419_s1 = scalar_lea.hbm %s13577_s19, 64 }
 0x323   :  { %p11420_p7 = scmp.ne.s32.totalorder %s13577_s19, %s11419_s1  ;;  %p11423_p8 = scmp.lt.u32.totalorder %s11419_s1, %s13577_s19 }
 0x325   :  { %p11425_p9 = pnand %p11423_p8, %p11420_p7 }
 0x327   :  { %11428 = shalt.err (!%p11425_p9)
}
 0x328   :  { %s11429_s21 = scalar_lea.vmem %s455_s11, 64  ;;  %p11434_p11 = scmp.lt.s32.totalorder %s455_s11, %s455_s11 }
 0x329   :  { %p11430_p10 = scmp.ne.s32.totalorder %s455_s11, %s11429_s21  ;;  %p11435_p12 = scmp.lt.s32.totalorder %s11429_s21, %s11429_s21 }
 0x32b   :  { %p11436_p13 = por %p11435_p12, %p11434_p11 }
 0x32d   :  { %p11437_p0 = pnand %p11436_p13, %p11430_p10 }
 0x32f   :  { %11440 = shalt.err (!%p11437_p0)
}
 0x330   :  { %s13578_s2 = sld [smem:[#allocation134_spill]] }
 0x331   :  { %457 = dma.hbm_to_vmem [thread:$0]  %s13577_s19, 64, %s455_s11, [#allocation54]  }
 0x336   :  { %s11441_s23 = scalar_lea.hbm %s13578_s2, 16 }
 0x337   :  { %p11442_p1 = scmp.ne.s32.totalorder %s13578_s2, %s11441_s23  ;;  %p11445_p2 = scmp.lt.u32.totalorder %s11441_s23, %s13578_s2 }
 0x339   :  { %p11447_p3 = pnand %p11445_p2, %p11442_p1 }
 0x33b   :  { %11450 = shalt.err (!%p11447_p3)
}
 0x33c   :  { %s11451_s8 = scalar_lea.vmem %s479_s27, 16  ;;  %s11455_s7 = scalar_lea.vmem %s479_s27, 32 }
 0x33d   :  { %p11452_p4 = scmp.ne.s32.totalorder %s479_s27, %s11451_s8  ;;  %p11456_p5 = scmp.lt.s32.totalorder %s479_s27, %s479_s27 }
 0x33e   :  { %p11457_p6 = scmp.lt.s32.totalorder %s11455_s7, %s11451_s8 }
 0x340   :  { %p11458_p7 = por %p11457_p6, %p11456_p5 }
 0x342   :  { %p11459_p8 = pnand %p11458_p7, %p11452_p4 }
 0x344   :  { %11462 = shalt.err (!%p11459_p8)
}
 0x345   :  { %s13579_s3 = sld [smem:[#allocation136_spill]]  ;;  %s11860_s29 = smov [#allocation61]  }
 0x346   :  { %481 = dma.hbm_to_vmem [thread:$0]  %s13578_s2, 16, %s479_s27, [#allocation57]  }
 0x347   :  { %s499_s15 = sshll.u32 %s11860_s29, 4  ;;  %s11861_s16 = smov [#allocation64]   ;;  %s500_s15 = int_to_ptr.vmem [resolvable:$true] %s499_s15 }
 0x348   :  { %s521_s17 = sshll.u32 %s11861_s16, 4  ;;  %s522_s17 = int_to_ptr.vmem [resolvable:$true] %s521_s17 }
 0x34b   :  { %s11463_s20 = scalar_lea.hbm %s13579_s3, 1024 }
 0x34c   :  { %p11464_p9 = scmp.ne.s32.totalorder %s13579_s3, %s11463_s20  ;;  %p11467_p10 = scmp.lt.u32.totalorder %s11463_s20, %s13579_s3 }
 0x34e   :  { %p11469_p11 = pnand %p11467_p10, %p11464_p9 }
 0x350   :  { %11472 = shalt.err (!%p11469_p11)
}
 0x351   :  { %s11473_s12 = scalar_lea.vmem %s500_s15, 1024  ;;  %p11478_p13 = scmp.lt.s32.totalorder %s500_s15, %s500_s15 }
 0x352   :  { %p11474_p12 = scmp.ne.s32.totalorder %s500_s15, %s11473_s12  ;;  %p11479_p0 = scmp.lt.s32.totalorder %s11473_s12, %s11473_s12 }
 0x354   :  { %p11480_p1 = por %p11479_p0, %p11478_p13 }
 0x356   :  { %p11481_p2 = pnand %p11480_p1, %p11474_p12 }
 0x358   :  { %11484 = shalt.err (!%p11481_p2)
}
 0x359   :  { %s13580_s6 = sld [smem:[#allocation138_spill]] }
 0x35a   :  { %505 = dma.hbm_to_vmem [thread:$0]  %s13579_s3, 1024, %s500_s15, [#allocation60], %s11824_s0, %s11824_s0, %s11825_s30  }
 0x35f   :  { %s11485_s18 = scalar_lea.hbm %s13580_s6, 1024 }
 0x360   :  { %p11486_p3 = scmp.ne.s32.totalorder %s13580_s6, %s11485_s18  ;;  %p11489_p4 = scmp.lt.u32.totalorder %s11485_s18, %s13580_s6 }
 0x362   :  { %p11491_p5 = pnand %p11489_p4, %p11486_p3 }
 0x364   :  { %11494 = shalt.err (!%p11491_p5)
}
 0x365   :  { %s11495_s22 = scalar_lea.vmem %s522_s17, 1024  ;;  %p11500_p7 = scmp.lt.s32.totalorder %s522_s17, %s522_s17 }
 0x366   :  { %p11496_p6 = scmp.ne.s32.totalorder %s522_s17, %s11495_s22  ;;  %p11501_p8 = scmp.lt.s32.totalorder %s11495_s22, %s11495_s22 }
 0x368   :  { %p11502_p9 = por %p11501_p8, %p11500_p7 }
 0x36a   :  { %p11503_p10 = pnand %p11502_p9, %p11496_p6 }
 0x36c   :  { %11506 = shalt.err (!%p11503_p10)
}
 0x36d   :  { %s13581_s26 = sld [smem:[#allocation140_spill]]  ;;  %s11862_s9 = smov [#allocation67]  }
 0x36e   :  { %527 = dma.hbm_to_vmem [thread:$0]  %s13580_s6, 1024, %s522_s17, [#allocation63], %s11824_s0, %s11824_s0, %s11825_s30  }
 0x36f   :  { %s546_s28 = sshll.u32 %s11862_s9, 4  ;;  %s11863_s24 = smov [#allocation70]   ;;  %s547_s28 = int_to_ptr.vmem [resolvable:$true] %s546_s28 }
 0x370   :  { %s568_s19 = sshll.u32 %s11863_s24, 4  ;;  %s569_s19 = int_to_ptr.vmem [resolvable:$true] %s568_s19 }
 0x373   :  { %s11507_s10 = scalar_lea.hbm %s13581_s26, 16 }
 0x374   :  { %p11508_p11 = scmp.ne.s32.totalorder %s13581_s26, %s11507_s10  ;;  %p11511_p12 = scmp.lt.u32.totalorder %s11507_s10, %s13581_s26 }
 0x376   :  { %p11513_p13 = pnand %p11511_p12, %p11508_p11 }
 0x378   :  { %11516 = shalt.err (!%p11513_p13)
}
 0x379   :  { %s11517_s11 = scalar_lea.vmem %s547_s28, 16  ;;  %s11521_s14 = scalar_lea.vmem %s547_s28, 32 }
 0x37a   :  { %p11518_p0 = scmp.ne.s32.totalorder %s547_s28, %s11517_s11  ;;  %p11522_p1 = scmp.lt.s32.totalorder %s547_s28, %s547_s28 }
 0x37b   :  { %p11523_p2 = scmp.lt.s32.totalorder %s11521_s14, %s11517_s11 }
 0x37d   :  { %p11524_p3 = por %p11523_p2, %p11522_p1 }
 0x37f   :  { %p11525_p4 = pnand %p11524_p3, %p11518_p0 }
 0x381   :  { %11528 = shalt.err (!%p11525_p4)
}
 0x382   :  { %s13582_s0 = sld [smem:[#allocation142_spill]] }
 0x383   :  { %549 = dma.hbm_to_vmem [thread:$0]  %s13581_s26, 16, %s547_s28, [#allocation66]  }
 0x388   :  { %s11529_s30 = scalar_lea.hbm %s13582_s0, 64 }
 0x389   :  { %p11530_p5 = scmp.ne.s32.totalorder %s13582_s0, %s11529_s30  ;;  %p11533_p6 = scmp.lt.u32.totalorder %s11529_s30, %s13582_s0 }
 0x38b   :  { %p11535_p7 = pnand %p11533_p6, %p11530_p5 }
 0x38d   :  { %11538 = shalt.err (!%p11535_p7)
}
 0x38e   :  { %s11539_s27 = scalar_lea.vmem %s569_s19, 64  ;;  %p11544_p9 = scmp.lt.s32.totalorder %s569_s19, %s569_s19 }
 0x38f   :  { %p11540_p8 = scmp.ne.s32.totalorder %s569_s19, %s11539_s27  ;;  %p11545_p10 = scmp.lt.s32.totalorder %s11539_s27, %s11539_s27 }
 0x391   :  { %p11546_p11 = por %p11545_p10, %p11544_p9 }
 0x393   :  { %p11547_p12 = pnand %p11546_p11, %p11540_p8 }
 0x395   :  { %11550 = shalt.err (!%p11547_p12)
}
 0x396   :  { %s13583_s1 = sld [smem:[#allocation144_spill]]  ;;  %s11864_s21 = smov [#allocation73]  }
 0x397   :  { %571 = dma.hbm_to_vmem [thread:$0]  %s13582_s0, 64, %s569_s19, [#allocation69]  }
 0x398   :  { %s588_s2 = sshll.u32 %s11864_s21, 4  ;;  %s11865_s23 = smov [#allocation76]   ;;  %s589_s2 = int_to_ptr.vmem [resolvable:$true] %s588_s2 }
 0x399   :  { %s610_s8 = sshll.u32 %s11865_s23, 4  ;;  %s611_s8 = int_to_ptr.vmem [resolvable:$true] %s610_s8 }
 0x39c   :  { %s11551_s7 = scalar_lea.hbm %s13583_s1, 64 }
 0x39d   :  { %p11552_p13 = scmp.ne.s32.totalorder %s13583_s1, %s11551_s7  ;;  %p11555_p0 = scmp.lt.u32.totalorder %s11551_s7, %s13583_s1 }
 0x39f   :  { %p11557_p1 = pnand %p11555_p0, %p11552_p13 }
 0x3a1   :  { %11560 = shalt.err (!%p11557_p1)
}
 0x3a2   :  { %s11561_s3 = scalar_lea.vmem %s589_s2, 64  ;;  %p11566_p3 = scmp.lt.s32.totalorder %s589_s2, %s589_s2 }
 0x3a3   :  { %p11562_p2 = scmp.ne.s32.totalorder %s589_s2, %s11561_s3  ;;  %p11567_p4 = scmp.lt.s32.totalorder %s11561_s3, %s11561_s3 }
 0x3a5   :  { %p11568_p5 = por %p11567_p4, %p11566_p3 }
 0x3a7   :  { %p11569_p6 = pnand %p11568_p5, %p11562_p2 }
 0x3a9   :  { %11572 = shalt.err (!%p11569_p6)
}
 0x3aa   :  { %s13584_s29 = sld [smem:[#allocation146_spill]] }
 0x3ab   :  { %591 = dma.hbm_to_vmem [thread:$0]  %s13583_s1, 64, %s589_s2, [#allocation72]  }
 0x3b0   :  { %s11573_s15 = scalar_lea.hbm %s13584_s29, 32 }
 0x3b1   :  { %p11574_p7 = scmp.ne.s32.totalorder %s13584_s29, %s11573_s15  ;;  %p11577_p8 = scmp.lt.u32.totalorder %s11573_s15, %s13584_s29 }
 0x3b3   :  { %p11579_p9 = pnand %p11577_p8, %p11574_p7 }
 0x3b5   :  { %11582 = shalt.err (!%p11579_p9)
}
 0x3b6   :  { %s11583_s16 = scalar_lea.vmem %s611_s8, 32  ;;  %p11588_p11 = scmp.lt.s32.totalorder %s611_s8, %s611_s8 }
 0x3b7   :  { %p11584_p10 = scmp.ne.s32.totalorder %s611_s8, %s11583_s16  ;;  %p11589_p12 = scmp.lt.s32.totalorder %s11583_s16, %s11583_s16 }
 0x3b9   :  { %p11590_p13 = por %p11589_p12, %p11588_p11 }
 0x3bb   :  { %p11591_p0 = pnand %p11590_p13, %p11584_p10 }
 0x3bd   :  { %11594 = shalt.err (!%p11591_p0)
}
 0x3be   :  { %s13585_s17 = sld [smem:[#allocation148_spill]]  ;;  %s11866_s20 = smov [#allocation79]  }
 0x3bf   :  { %613 = dma.hbm_to_vmem [thread:$0]  %s13584_s29, 32, %s611_s8, [#allocation75]  }
 0x3c0   :  { %s630_s12 = sshll.u32 %s11866_s20, 4  ;;  %s11867_s6 = smov [#allocation82]   ;;  %s631_s12 = int_to_ptr.vmem [resolvable:$true] %s630_s12 }
 0x3c1   :  { %s652_s18 = sshll.u32 %s11867_s6, 4  ;;  %s653_s18 = int_to_ptr.vmem [resolvable:$true] %s652_s18 }
 0x3c4   :  { %s11595_s22 = scalar_lea.hbm %s13585_s17, 32 }
 0x3c5   :  { %p11596_p1 = scmp.ne.s32.totalorder %s13585_s17, %s11595_s22  ;;  %p11599_p2 = scmp.lt.u32.totalorder %s11595_s22, %s13585_s17 }
 0x3c7   :  { %p11601_p3 = pnand %p11599_p2, %p11596_p1 }
 0x3c9   :  { %11604 = shalt.err (!%p11601_p3)
}
 0x3ca   :  { %s11605_s26 = scalar_lea.vmem %s631_s12, 32  ;;  %p11610_p5 = scmp.lt.s32.totalorder %s631_s12, %s631_s12 }
 0x3cb   :  { %p11606_p4 = scmp.ne.s32.totalorder %s631_s12, %s11605_s26  ;;  %p11611_p6 = scmp.lt.s32.totalorder %s11605_s26, %s11605_s26 }
 0x3cd   :  { %p11612_p7 = por %p11611_p6, %p11610_p5 }
 0x3cf   :  { %p11613_p8 = pnand %p11612_p7, %p11606_p4 }
 0x3d1   :  { %11616 = shalt.err (!%p11613_p8)
}
 0x3d2   :  { %s13586_s9 = sld [smem:[#allocation151_spill]] }
 0x3d3   :  { %633 = dma.hbm_to_vmem [thread:$0]  %s13585_s17, 32, %s631_s12, [#allocation78]  }
 0x3d8   :  { %s11617_s28 = scalar_lea.hbm %s13586_s9, 16 }
 0x3d9   :  { %p11618_p9 = scmp.ne.s32.totalorder %s13586_s9, %s11617_s28  ;;  %p11621_p10 = scmp.lt.u32.totalorder %s11617_s28, %s13586_s9 }
 0x3db   :  { %p11623_p11 = pnand %p11621_p10, %p11618_p9 }
 0x3dd   :  { %11626 = shalt.err (!%p11623_p11)
}
 0x3de   :  { %s11627_s24 = scalar_lea.vmem %s653_s18, 16  ;;  %s11631_s19 = scalar_lea.vmem %s653_s18, 32 }
 0x3df   :  { %p11628_p12 = scmp.ne.s32.totalorder %s653_s18, %s11627_s24  ;;  %p11632_p13 = scmp.lt.s32.totalorder %s653_s18, %s653_s18 }
 0x3e0   :  { %p11633_p0 = scmp.lt.s32.totalorder %s11631_s19, %s11627_s24 }
 0x3e2   :  { %p11634_p1 = por %p11633_p0, %p11632_p13 }
 0x3e4   :  { %p11635_p2 = pnand %p11634_p1, %p11628_p12 }
 0x3e6   :  { %11638 = shalt.err (!%p11635_p2)
}
 0x3e7   :  { %655 = dma.hbm_to_vmem [thread:$0]  %s13586_s9, 16, %s653_s18, [#allocation81]  }
 0x3e8   :  { %s11868_s10 = smov [#allocation85]   ;;  %s11639_s14 = scalar_lea.hbm %s12147_s13, 16 }
 0x3e9   :  { %s674_s11 = sshll.u32 %s11868_s10, 4  ;;  %p11640_p3 = scmp.ne.s32.totalorder %s12147_s13, %s11639_s14  ;;  %s675_s11 = int_to_ptr.vmem [resolvable:$true] %s674_s11 }
 0x3ea   :  { %p11643_p4 = scmp.lt.u32.totalorder %s11639_s14, %s12147_s13 }
 0x3ec   :  { %p11645_p5 = pnand %p11643_p4, %p11640_p3 }
 0x3ee   :  { %11648 = shalt.err (!%p11645_p5)
}
 0x3ef   :  { %s11649_s0 = scalar_lea.vmem %s675_s11, 16  ;;  %s11653_s30 = scalar_lea.vmem %s675_s11, 32 }
 0x3f0   :  { %p11650_p6 = scmp.ne.s32.totalorder %s675_s11, %s11649_s0  ;;  %p11654_p7 = scmp.lt.s32.totalorder %s675_s11, %s675_s11 }
 0x3f1   :  { %p11655_p8 = scmp.lt.s32.totalorder %s11653_s30, %s11649_s0 }
 0x3f3   :  { %p11656_p9 = por %p11655_p8, %p11654_p7 }
 0x3f5   :  { %p11657_p10 = pnand %p11656_p9, %p11650_p6 }
 0x3f7   :  { %11660 = shalt.err (!%p11657_p10)
}
 0x3f8   :  { %677 = dma.hbm_to_vmem [thread:$0]  %s12147_s13, 16, %s675_s11, [#allocation84]  }
 0x3f9   :  { %11705 = dma.done.wait [#allocation15], 16  }
 0x3fa   :  { %11706 = vsyncadd [#allocation15], 4294967280 }
 0x3fb   :  { %11707 = dma.done.wait [#allocation17], 32  }
 0x3fc   :  { %11708 = vsyncadd [#allocation17], 4294967264 }
 0x3fd   :  { %11709 = dma.done.wait [#allocation13], 10240  }
 0x3fe   :  { %11710 = vsyncadd [#allocation13], 4294957056 }
 0x3ff   :  { %11711 = dma.done.wait [#allocation21], 4112  }
 0x400   :  { %11712 = vsyncadd [#allocation21], 4294963184 }
 0x401   :  { %11713 = dma.done.wait [#allocation24], 8256  }
 0x402   :  { %11714 = vsyncadd [#allocation24], 4294959040 }
 0x403   :  { %11715 = dma.done.wait [#allocation27], 12288  }
 0x404   :  { %11716 = vsyncadd [#allocation27], 4294955008 }
 0x405   :  { %11717 = dma.done.wait [#allocation30], 1088  }
 0x406   :  { %11718 = vsyncadd [#allocation30], 4294966208 }
 0x407   :  { %11719 = dma.done.wait [#allocation33], 1040  }
 0x408   :  { %11720 = vsyncadd [#allocation33], 4294966256 }
 0x409   :  { %11721 = dma.done.wait [#allocation36], 2048  }
 0x40a   :  { %11722 = vsyncadd [#allocation36], 4294965248 }
 0x40b   :  { %11723 = dma.done.wait [#allocation39], 1040  }
 0x40c   :  { %11724 = vsyncadd [#allocation39], 4294966256 }
 0x40d   :  { %11725 = dma.done.wait [#allocation42], 1040  }
 0x40e   :  { %11726 = vsyncadd [#allocation42], 4294966256 }
 0x40f   :  { %11727 = dma.done.wait [#allocation45], 976  }
 0x410   :  { %11728 = vsyncadd [#allocation45], 4294966320 }
 0x411   :  { %11729 = dma.done.wait [#allocation48], 12288  }
 0x412   :  { %11730 = vsyncadd [#allocation48], 4294955008 }
 0x413   :  { %11731 = dma.done.wait [#allocation51], 4160  }
 0x414   :  { %11732 = vsyncadd [#allocation51], 4294963136 }
 0x415   :  { %11733 = dma.done.wait [#allocation54], 8256  }
 0x416   :  { %11734 = vsyncadd [#allocation54], 4294959040 }
 0x417   :  { %11735 = dma.done.wait [#allocation57], 1040  }
 0x418   :  { %11736 = vsyncadd [#allocation57], 4294966256 }
 0x419   :  { %11737 = dma.done.wait [#allocation60], 2048  }
 0x41a   :  { %11738 = vsyncadd [#allocation60], 4294965248 }
 0x41b   :  { %11739 = dma.done.wait [#allocation63], 1040  }
 0x41c   :  { %11740 = vsyncadd [#allocation63], 4294966256 }
 0x41d   :  { %11741 = dma.done.wait [#allocation66], 1040  }
 0x41e   :  { %11742 = vsyncadd [#allocation66], 4294966256 }
 0x41f   :  { %11743 = dma.done.wait [#allocation69], 4160  }
 0x420   :  { %11744 = vsyncadd [#allocation69], 4294963136 }
 0x421   :  { %11745 = dma.done.wait [#allocation72], 128  }
 0x422   :  { %11746 = vsyncadd [#allocation72], 4294967168 }
 0x423   :  { %11747 = dma.done.wait [#allocation75], 8224  }
 0x424   :  { %11748 = vsyncadd [#allocation75], 4294959072 }
 0x425   :  { %11749 = dma.done.wait [#allocation78], 64  }
 0x426   :  { %11750 = vsyncadd [#allocation78], 4294967232 }
 0x427   :  { %11751 = dma.done.wait [#allocation81], 32  }
 0x428   :  { %11752 = vsyncadd [#allocation81], 4294967264 }
 0x429   :  { %11753 = dma.done.wait [#allocation84], 32  }
 0x42a   :  { %11754 = vsyncadd [#allocation84], 4294967264 }
 0x42b   :  { %822 = sfence }
 0x42c   :  { %v9919_v0 = vld [vmem:[#allocation19 + $0x40] sm:$0xff]   ;;  %v13479_v2 = vmov 0.0   ;;  %v9921_v3 = vld [vmem:[#allocation19 + $0x48] sm:$0xff]   ;;  %s13587_s13 = sld [smem:[#allocation118_spill]]  ;;  %v9923_v5 = vld [vmem:[#allocation19 + $0x50] sm:$0xff]   ;;  %vm861_vm0 = vcmask 834562  }
 0x42d   :  { %v9920_v1 = vld [vmem:[#allocation19] sm:$0xff]   ;;  %825 = vst [vmem:[#allocation2 + $0x8] sm:$0xff] %v13479_v2  ;;  %835 = vst [vmem:[#allocation2 + $0x58] sm:$0xff] %v13479_v2  ;;  %8741 = vmatprep.subr.bf16.mxu1 %v9919_v0  ;;  %v9922_v4 = vld [vmem:[#allocation19 + $0x8] sm:$0xff]   ;;  %vm891_vm1 = vcmask 834560   ;;  %vm882_vm2 = vcmask 834561  }
 0x42e   :  { %824 = vst [vmem:[#allocation2] sm:$0xff] %v13479_v2  ;;  %826 = vst [vmem:[#allocation2 + $0x10] sm:$0xff] %v13479_v2  ;;  %8742 = vmatpush3.bf16.msra.mxu1 %v9920_v1  ;;  %v9924_v6 = vld [vmem:[#allocation19 + $0x10] sm:$0xff]   ;;  %v9925_v7 = vld [vmem:[#allocation19 + $0x58] sm:$0xff]   ;;  %vm933_vm3 = vcmask 832512   ;;  %vm912_vm4 = vcmask 833536  }
 0x42f   :  { %827 = vst [vmem:[#allocation2 + $0x18] sm:$0xff] %v13479_v2  ;;  %829 = vst [vmem:[#allocation2 + $0x28] sm:$0xff] %v13479_v2  ;;  %8743 = vmatprep.subr.bf16.mxu1 %v9921_v3  ;;  %v9926_v8 = vld [vmem:[#allocation19 + $0x18] sm:$0xff]   ;;  %v9927_v9 = vld [vmem:[#allocation19 + $0x60] sm:$0xff]   ;;  %s13613_s27 = sld [smem:[#allocation119_spill]]  ;;  %s11871_s1 = smov 48  }
 0x430   :  { %830 = vst [vmem:[#allocation2 + $0x30] sm:$0xff] %v13479_v2  ;;  %831 = vst [vmem:[#allocation2 + $0x38] sm:$0xff] %v13479_v2  ;;  %v9928_v10 = vld [vmem:[#allocation19 + $0x20] sm:$0xff]   ;;  %v9929_v11 = vld [vmem:[#allocation19 + $0x68] sm:$0xff]   ;;  %s11872_s21 = smov 24   ;;  %s11873_s2 = smov 72  }
 0x431   :  { %832 = vst [vmem:[#allocation2 + $0x40] sm:$0xff] %v13479_v2  ;;  %833 = vst [vmem:[#allocation2 + $0x48] sm:$0xff] %v13479_v2  ;;  %v9930_v14 = vld [vmem:[#allocation19 + $0x28] sm:$0xff]   ;;  %v9935_v17 = vld [vmem:[#allocation19 + $0x140] sm:$0xff]   ;;  %s11874_s23 = smov 96   ;;  %vm11875_vm5 = vmmov 0  }
 0x432   :  { %834 = vst [vmem:[#allocation2 + $0x50] sm:$0xff] %v13479_v2  ;;  %836 = vst [vmem:[#allocation2 + $0x60] sm:$0xff] %v13479_v2  ;;  %8744 = vmatpush3.bf16.msra.mxu1 %v9922_v4  ;;  %v845_v12 = vld [vmem:[%s13587_s13 + $0x8] sm:$0x3f]  ;;  %v847_v13 = vld [vmem:[%s13587_s13 + $0x18] sm:$0x3f]  ;;  %8785 = vmatprep.subr.bf16.mxu0 %v9935_v17 }
 0x433   :  { %837 = vst [vmem:[#allocation2 + $0x68] sm:$0xff] %v13479_v2  ;;  %839 = vst [vmem:[#allocation2 + $0x78] sm:$0xff] %v13479_v2  ;;  %8745 = vmatprep.subr.bf16.mxu1 %v9923_v5  ;;  %v853_v15 = vrot.slane %v845_v12, 6  ;;  %v855_v16 = vrot.slane %v847_v13, 6  ;;  %v9931_v18 = vld [vmem:[#allocation19 + $0x70] sm:$0xff]   ;;  %v9937_v23 = vld [vmem:[#allocation19 + $0x100] sm:$0xff]  }
 0x434   :  { %840 = vst [vmem:[#allocation2 + $0x80] sm:$0xff] %v13479_v2  ;;  %841 = vst [vmem:[#allocation2 + $0x88] sm:$0xff] %v13479_v2  ;;  %v844_v19 = vld [vmem:[%s13587_s13] sm:$0x3f]  ;;  %v846_v20 = vld [vmem:[%s13587_s13 + $0x10] sm:$0x3f]  ;;  %8786 = vmatpush3.bf16.msra.mxu0 %v9937_v23 }
 0x435   :  { %842 = vst [vmem:[#allocation2 + $0x90] sm:$0xff] %v13479_v2  ;;  %843 = vst [vmem:[#allocation2 + $0x98] sm:$0xff] %v13479_v2  ;;  %v852_v21 = vrot.slane %v844_v19, 6  ;;  %v854_v22 = vrot.slane %v846_v20, 6  ;;  %v9932_v24 = vld [vmem:[#allocation19 + $0x30] sm:$0xff]   ;;  %v9939_v25 = vld [vmem:[#allocation19 + $0x148] sm:$0xff]  }
 0x436   :  { %8746 = vmatpush3.bf16.msra.mxu1 %v9924_v6  ;;  %862 = vst.msk [vmem:[#allocation2 + $0x8] sm:$0xfc] %vm861_vm0, %v853_v15  ;;  %864 = vst.msk [vmem:[#allocation2 + $0x58] sm:$0xfc] %vm861_vm0, %v855_v16  ;;  %v9933_v26 = vld [vmem:[#allocation19 + $0x78] sm:$0xff]   ;;  %8787 = vmatprep.subr.bf16.mxu0 %v9939_v25  ;;  %v9941_v27 = vld [vmem:[#allocation19 + $0x108] sm:$0xff]  }
 0x437   :  { %8747 = vmatprep.subr.bf16.mxu1 %v9925_v7  ;;  %860 = vst [vmem:[#allocation2] sm:$0xfc] %v852_v21  ;;  %863 = vst [vmem:[#allocation2 + $0x50] sm:$0xfc] %v854_v22  ;;  %v9934_v28 = vld [vmem:[#allocation19 + $0x38] sm:$0xff]   ;;  %v9943_v32 = vld [vmem:[#allocation19 + $0x150] sm:$0xff]  }
 0x438   :  { %8788 = vmatpush3.bf16.msra.mxu0 %v9941_v27  ;;  %v9936_v35 = vld [vmem:[#allocation19 + $0xc0] sm:$0xff]   ;;  %v9945_v36 = vld [vmem:[#allocation19 + $0x110] sm:$0xff]   ;;  %v9947_v39 = vld [vmem:[#allocation19 + $0x158] sm:$0xff]   ;;  %vm4204_vm6 = vcmask 982016   ;;  %vm4209_vm7 = vcmask 193536   ;;  %vm4222_vm8 = vcmask 391360  }
 0x439   :  { %8789 = vmatprep.subr.bf16.mxu0 %v9943_v32  ;;  %v9938_v38 = vld [vmem:[#allocation19 + $0x80] sm:$0xff]   ;;  %v9940_v40 = vld [vmem:[#allocation19 + $0xc8] sm:$0xff]   ;;  %v9949_v41 = vld [vmem:[#allocation19 + $0x118] sm:$0xff]   ;;  %vm4235_vm9 = vcmask 589184   ;;  %vm4248_vm10 = vcmask 784960   ;;  %vm4261_vm11 = vcmask 980736  }
 0x43a   :  { %8748 = vmatpush3.bf16.msra.mxu1 %v9926_v8  ;;  %v9942_v42 = vld [vmem:[#allocation19 + $0x88] sm:$0xff]   ;;  %v9951_v43 = vld [vmem:[#allocation19 + $0x160] sm:$0xff]   ;;  %v9944_v44 = vld [vmem:[#allocation19 + $0xd0] sm:$0xff]   ;;  %s12855_s8 = sld [smem:[#allocation12 + $0x1]]  ;;  %s12861_s7 = sld [smem:[#allocation12]]  ;;  %vm3850_vm12 = vcmask 1040384  }
 0x43b   :  { %8749 = vmatprep.subr.bf16.mxu1 %v9927_v9  ;;  %v9953_v45 = vld [vmem:[#allocation19 + $0x120] sm:$0xff]   ;;  %v9946_v46 = vld [vmem:[#allocation19 + $0x90] sm:$0xff]   ;;  %v9955_v47 = vld [vmem:[#allocation19 + $0x168] sm:$0xff]   ;;  %vm4337_vm13 = vcmask 1043456   ;;  %vm4141_vm15 = vcmask 7168   ;;  %s13648_s17 = sld [smem:[#allocation133_spill]] }
 0x43c   :  { %8790 = vmatpush3.bf16.msra.mxu0 %v9945_v36  ;;  %v9948_v48 = vld [vmem:[#allocation19 + $0xd8] sm:$0xff]   ;;  %v9957_v49 = vld [vmem:[#allocation19 + $0x128] sm:$0xff]   ;;  %v9959_v51 = vld [vmem:[#allocation19 + $0x170] sm:$0xff]   ;;  %s13287_s20 = sld [smem:[#allocation16 + $0x1]]  ;;  %s13294_s12 = sld [smem:[#allocation16]] }
 0x43d   :  { %v938_v29 = vld [vmem:[#allocation2 + $0x8] sm:$0xff]  ;;  %v948_v30 = vld [vmem:[#allocation2 + $0x58] sm:$0xff]  ;;  %8791 = vmatprep.subr.bf16.mxu0 %v9947_v39  ;;  %v9952_v52 = vld [vmem:[#allocation19 + $0xe0] sm:$0xff]   ;;  %s13654_s9 = sld [smem:[#allocation149_spill]]  ;;  %s8739_s28 = sld [smem:[#allocation18 + $0x1]] }
 0x43e   :  { %8750 = vmatpush3.bf16.msra.mxu1 %v9928_v10  ;;  %v958_v31 = vpack.c.bf16 %v948_v30, %v938_v29  ;;  %v937_v33 = vld [vmem:[#allocation2] sm:$0xff]  ;;  %v947_v34 = vld [vmem:[#allocation2 + $0x50] sm:$0xff]  ;;  %v9950_v50 = vld [vmem:[#allocation19 + $0x98] sm:$0xff]   ;;  %s11877_s24 = smov [#allocation86]  }
 0x43f   :  { %8751 = vmatprep.subr.bf16.mxu1 %v9929_v11  ;;  %v957_v37 = vpack.c.bf16 %v947_v34, %v937_v33  ;;  %v9961_v53 = vld [vmem:[#allocation19 + $0x130] sm:$0xff]   ;;  %v9954_v54 = vld [vmem:[#allocation19 + $0xa0] sm:$0xff]   ;;  %v9963_v55 = vld [vmem:[#allocation19 + $0x178] sm:$0xff]   ;;  %s8147_s19 = sshll.u32 %s11877_s24, 4  ;;  %s8148_s19 = int_to_ptr.vmem [resolvable:$true] %s8147_s19 }
 0x440   :  { %1646 = vmatprep.mubr.bf16.mxu1 %v958_v31  ;;  %8792 = vmatpush3.bf16.msra.mxu0 %v9949_v41  ;;  %v9956_v56 = vld [vmem:[#allocation19 + $0xe8] sm:$0xff]   ;;  %v9965_v58 = vld [vmem:[#allocation19 + $0x138] sm:$0xff]   ;;  %v9960_v59 = vld [vmem:[#allocation19 + $0xf0] sm:$0xff]   ;;  %s8195_s3 = scalar_lea.vmem [#allocation5], %s12855_s8  ;;  %s3841_s29 = scalar_lea.vmem [#allocation5], %s12861_s7 }
 0x441   :  { %8793 = vmatprep.subr.bf16.mxu0 %v9951_v43  ;;  %v9958_v57 = vld [vmem:[#allocation19 + $0xa8] sm:$0xff]   ;;  %v866_v60 = vld [vmem:[%s13587_s13 + $0x8] sm:$0x7f]  ;;  %v9967_v3 = vld [vmem:[#allocation19 + $0x240] sm:$0xff]   ;;  %s8198_s15 = scalar_lea.vmem [#allocation6], %s12855_s8  ;;  %s3852_s16 = scalar_lea.vmem [#allocation6], %s12861_s7 }
 0x442   :  { %8752 = vmatpush3.bf16.msra.mxu1 %v9930_v14  ;;  %v868_v61 = vld [vmem:[%s13587_s13 + $0x18] sm:$0x7f]  ;;  %v887_v62 = vld [vmem:[%s13587_s13 + $0x8] sm:$0xff]  ;;  %v874_v63 = vrot.slane %v866_v60, 7  ;;  %v865_v4 = vld [vmem:[%s13587_s13] sm:$0x7f]  ;;  %p11666_p12 = scmp.lt.s32.totalorder %s8148_s19, %s8148_s19 }
 0x443   :  { %8753 = vmatprep.subr.bf16.mxu1 %v9931_v18  ;;  %v876_v0 = vrot.slane %v868_v61, 7  ;;  %v889_v1 = vld [vmem:[%s13587_s13 + $0x18] sm:$0xff]  ;;  %892 = vst.msk [vmem:[#allocation2 + $0x28] sm:$0xff] %vm891_vm1, %v887_v62  ;;  %v867_v5 = vld [vmem:[%s13587_s13 + $0x10] sm:$0x7f]  ;;  %v873_v6 = vrot.slane %v865_v4, 7 }
 0x444   :  { %8794 = vmatpush3.bf16.msra.mxu0 %v9953_v45  ;;  %894 = vst.msk [vmem:[#allocation2 + $0x78] sm:$0xff] %vm891_vm1, %v889_v1  ;;  %v875_v7 = vrot.slane %v867_v5, 7  ;;  %v886_v8 = vld [vmem:[%s13587_s13] sm:$0xff]  ;;  %v888_v9 = vld [vmem:[%s13587_s13 + $0x10] sm:$0xff]  ;;  %v9964_v11 = vld [vmem:[#allocation19 + $0xf8] sm:$0xff]   ;;  %s8201_s6 = scalar_lea.vmem [#allocation10], %s13287_s20 }
 0x445   :  { %8795 = vmatprep.subr.bf16.mxu0 %v9955_v47  ;;  %883 = vst.msk [vmem:[#allocation2 + $0x18] sm:$0xfe] %vm882_vm2, %v874_v63  ;;  %885 = vst.msk [vmem:[#allocation2 + $0x68] sm:$0xfe] %vm882_vm2, %v876_v0  ;;  %v9962_v10 = vld [vmem:[#allocation19 + $0xb0] sm:$0xff]   ;;  %v9966_v12 = vld [vmem:[#allocation19 + $0xb8] sm:$0xff]   ;;  %v961_v17 = vpack.c.bf16 %v888_v9, %v886_v8 }
 0x446   :  { %8754 = vmatpush3.bf16.msra.mxu1 %v9932_v24  ;;  %881 = vst [vmem:[#allocation2 + $0x10] sm:$0xfe] %v873_v6  ;;  %884 = vst [vmem:[#allocation2 + $0x60] sm:$0xfe] %v875_v7  ;;  %v9968_v14 = vld [vmem:[#allocation19 + $0x1c0] sm:$0xff]   ;;  %v9971_v22 = vld [vmem:[#allocation19 + $0x248] sm:$0xff]  }
 0x447   :  { %8755 = vmatprep.subr.bf16.mxu1 %v9933_v26  ;;  %v9969_v15 = vld [vmem:[#allocation19 + $0x200] sm:$0xff]   ;;  %v9972_v24 = vld [vmem:[#allocation19 + $0x1c8] sm:$0xff]   ;;  %v9975_v30 = vld [vmem:[#allocation19 + $0x250] sm:$0xff]   ;;  %s6404_s18 = scalar_lea.vmem [#allocation10], %s13294_s12  ;;  %s8204_s22 = scalar_lea.vmem [#allocation11], %s13287_s20 }
 0x448   :  { %8796 = vmatpush3.bf16.msra.mxu0 %v9957_v49  ;;  %v9970_v21 = vld [vmem:[#allocation19 + $0x180] sm:$0xff]   ;;  %v9974_v29 = vld [vmem:[#allocation19 + $0x188] sm:$0xff]   ;;  %v9976_v31 = vld [vmem:[#allocation19 + $0x1d0] sm:$0xff]   ;;  %s6414_s26 = scalar_lea.vmem [#allocation11], %s13294_s12  ;;  %s11661_s10 = scalar_lea.vmem %s8148_s19, 32 }
 0x449   :  { %8797 = vmatprep.subr.bf16.mxu0 %v9959_v51  ;;  %v9977_v32 = vld [vmem:[#allocation19 + $0x210] sm:$0xff]   ;;  %v9979_v34 = vld [vmem:[#allocation19 + $0x258] sm:$0xff]   ;;  %v9984_v39 = vld [vmem:[#allocation19 + $0x1e0] sm:$0xff]   ;;  %p11662_p11 = scmp.ne.s32.totalorder %s8148_s19, %s11661_s10  ;;  %p11667_p13 = scmp.lt.s32.totalorder %s11661_s10, %s11661_s10 }
 0x44a   :  { %8756 = vmatpush3.bf16.msra.mxu1 %v9934_v28  ;;  %v942_v13 = vld [vmem:[#allocation2 + $0x28] sm:$0xff]  ;;  %v9973_v28 = vld [vmem:[#allocation19 + $0x208] sm:$0xff]   ;;  %v9978_v33 = vld [vmem:[#allocation19 + $0x190] sm:$0xff]  }
 0x44b   :  { %8763 = vmatprep.subr.bf16.mxu1 %v9936_v35  ;;  %v952_v16 = vld [vmem:[#allocation2 + $0x78] sm:$0xff]  ;;  %v9980_v35 = vld [vmem:[#allocation19 + $0x1d8] sm:$0xff]   ;;  %v9986_v41 = vld [vmem:[#allocation19 + $0x1a0] sm:$0xff]   ;;  %p11668_p0 = por %p11667_p13, %p11666_p12 }
 0x44c   :  { %8798 = vmatpush3.bf16.msra.mxu0 %v9961_v53  ;;  %v940_v18 = vld [vmem:[#allocation2 + $0x18] sm:$0xff]  ;;  %v950_v19 = vld [vmem:[#allocation2 + $0x68] sm:$0xff]  ;;  %v962_v20 = vpack.c.bf16 %v952_v16, %v942_v13  ;;  %v9992_v47 = vld [vmem:[#allocation19 + $0x1f0] sm:$0xff]  }
 0x44d   :  { %1647 = vmatmul.mubr.bf16.vlgmr.msra.gmra.mrb[0].mxu1 %v957_v37  ;;  %8799 = vmatprep.subr.bf16.mxu0 %v9963_v55  ;;  %v960_v23 = vpack.c.bf16 %v950_v19, %v940_v18  ;;  %v939_v25 = vld [vmem:[#allocation2 + $0x10] sm:$0xff]  ;;  %v949_v26 = vld [vmem:[#allocation2 + $0x60] sm:$0xff]  ;;  %v9981_v36 = vld [vmem:[#allocation19 + $0x218] sm:$0xff]   ;;  %p11669_p1 = pnand %p11668_p0, %p11662_p11 }
 0x44e   :  { %8764 = vmatpush3.bf16.msra.mxu1 %v9938_v38  ;;  %1728 = vmatprep.mubr.bf16.mxu0 %v962_v20  ;;  %v959_v27 = vpack.c.bf16 %v949_v26, %v939_v25  ;;  %v9982_v37 = vld [vmem:[#allocation19 + $0x198] sm:$0xff]   ;;  %v9983_v38 = vld [vmem:[#allocation19 + $0x260] sm:$0xff]   ;;  %v9988_v43 = vld [vmem:[#allocation19 + $0x1e8] sm:$0xff]  }
 0x44f   :  { %8765 = vmatprep.subr.bf16.mxu1 %v9940_v40  ;;  %1687 = vmatprep.mubr.bf16.mxu1 %v960_v23  ;;  %v9985_v40 = vld [vmem:[#allocation19 + $0x220] sm:$0xff]   ;;  %v9990_v45 = vld [vmem:[#allocation19 + $0x1a8] sm:$0xff]   ;;  %v9994_v49 = vld [vmem:[#allocation19 + $0x1b0] sm:$0xff]  }
 0x450   :  { %8800 = vmatpush3.bf16.msra.mxu0 %v9965_v58  ;;  %v9996_v51 = vld [vmem:[#allocation19 + $0x1f8] sm:$0xff]   ;;  %v916_v61 = vld [vmem:[%s13587_s13] sm:$0xfc]  ;;  %v918_v63 = vld [vmem:[%s13587_s13 + $0x10] sm:$0xfc] }
 0x451   :  { %8829 = vmatprep.subr.bf16.mxu0 %v9967_v3  ;;  %v917_v53 = vld [vmem:[%s13587_s13 + $0x8] sm:$0xfc]  ;;  %v924_v0 = vrot.slane %v916_v61, 2  ;;  %v895_v1 = vld [vmem:[%s13587_s13] sm:$0xfe]  ;;  %v926_v3 = vrot.slane %v918_v63, 2 }
 0x452   :  { %8766 = vmatpush3.bf16.msra.mxu1 %v9942_v42  ;;  %v9987_v42 = vld [vmem:[#allocation19 + $0x268] sm:$0xff]   ;;  %v925_v55 = vrot.slane %v917_v53, 2  ;;  %v897_v4 = vld [vmem:[%s13587_s13 + $0x10] sm:$0xfe]  ;;  %v903_v5 = vrot.slane %v895_v1, 1  ;;  %v13477_v53 = vmov 0  }
 0x453   :  { %8767 = vmatprep.subr.bf16.mxu1 %v9944_v44  ;;  %1729 = vmatmul.mubr.bf16.vlgmr.msra.gmra.mrb[0].mxu0 %v961_v17  ;;  %v9989_v44 = vld [vmem:[#allocation19 + $0x228] sm:$0xff]   ;;  %932 = vst [vmem:[#allocation2 + $0x40] sm:$0x3f] %v924_v0  ;;  %v905_v6 = vrot.slane %v897_v4, 1  ;;  %935 = vst [vmem:[#allocation2 + $0x90] sm:$0x3f] %v926_v3 }
 0x454   :  { %8830 = vmatpush3.bf16.msra.mxu0 %v9969_v15  ;;  %934 = vst.msk [vmem:[#allocation2 + $0x48] sm:$0x3f] %vm933_vm3, %v925_v55  ;;  %911 = vst [vmem:[#allocation2 + $0x30] sm:$0x7f] %v903_v5  ;;  %v9999_v19 = vld [vmem:[#allocation22] ss:$16 sps:$4 sm:$0xff]   ;;  %9917 = vset.pattern.permute.xlu1 %v13477_v53 }
 0x455   :  { %8831 = vmatprep.subr.bf16.mxu0 %v9971_v22  ;;  %914 = vst [vmem:[#allocation2 + $0x80] sm:$0x7f] %v905_v6  ;;  %v10001_v20 = vld [vmem:[#allocation22 + $0x4] ss:$16 sps:$4 sm:$0xff]   ;;  %v10004_v22 = vld [vmem:[#allocation22 + $0xc] ss:$16 sps:$4 sm:$0xff]   ;;  %9918 = vset.pattern.permute.xlu0 %v13477_v53 }
 0x456   :  { %8768 = vmatpush3.bf16.msra.mxu1 %v9946_v46  ;;  %v9991_v46 = vld [vmem:[#allocation19 + $0x270] sm:$0xff]   ;;  %v10008_v26 = vld [vmem:[#allocation22 + $0x28] ss:$16 sps:$4 sm:$0xff]   ;;  %v8260_v61 = vld [vmem:[#allocation20] ss:$0 sm:$0xff] }
 0x457   :  { %8769 = vmatprep.subr.bf16.mxu1 %v9948_v48  ;;  %v9993_v48 = vld [vmem:[#allocation19 + $0x230] sm:$0xff]  }
 0x458   :  { %8832 = vmatpush3.bf16.msra.mxu0 %v9973_v28  ;;  %v10007_v23 = vld [vmem:[#allocation22 + $0x24] ss:$16 sps:$4 sm:$0xff]   ;;  %v10005_v25 = vld [vmem:[#allocation22 + $0x20] ss:$16 sps:$4 sm:$0xff]  }
 0x459   :  { %8833 = vmatprep.subr.bf16.mxu0 %v9975_v30  ;;  %v10011_v28 = vld [vmem:[#allocation22 + $0x40] ss:$16 sps:$4 sm:$0xff]   ;;  %v10014_v30 = vld [vmem:[#allocation22 + $0x48] ss:$16 sps:$4 sm:$0xff]  }
 0x45a   :  { %8770 = vmatpush3.bf16.msra.mxu1 %v9950_v50  ;;  %v9995_v50 = vld [vmem:[#allocation19 + $0x278] sm:$0xff]  }
 0x45b   :  { %8771 = vmatprep.subr.bf16.mxu1 %v9952_v52  ;;  %v9997_v52 = vld [vmem:[#allocation19 + $0x238] sm:$0xff]   ;;  %v943_v15 = vld [vmem:[#allocation2 + $0x30] sm:$0xff] }
 0x45c   :  { %8834 = vmatpush3.bf16.msra.mxu0 %v9977_v32  ;;  %v946_v7 = vld [vmem:[#allocation2 + $0x48] sm:$0xff]  ;;  %v953_v17 = vld [vmem:[#allocation2 + $0x80] sm:$0xff] }
 0x45d   :  { %8835 = vmatprep.subr.bf16.mxu0 %v9979_v34  ;;  %v963_v18 = vpack.c.bf16 %v953_v17, %v943_v15  ;;  %v10022_v32 = vld [vmem:[#allocation22 + $0x6c] ss:$16 sps:$4 sm:$0xff]   ;;  %v10020_v34 = vld [vmem:[#allocation22 + $0x68] ss:$16 sps:$4 sm:$0xff]  }
 0x45e   :  { %8772 = vmatpush3.bf16.msra.mxu1 %v9954_v54  ;;  %v919_v54 = vld [vmem:[%s13587_s13 + $0x18] sm:$0xfc] }
 0x45f   :  { %8773 = vmatprep.subr.bf16.mxu1 %v9956_v56  ;;  %v896_v56 = vld [vmem:[%s13587_s13 + $0x8] sm:$0xfe]  ;;  %v927_v58 = vrot.slane %v919_v54, 2 }
 0x460   :  { %8836 = vmatpush3.bf16.msra.mxu0 %v9981_v36  ;;  %v904_v60 = vrot.slane %v896_v56, 1  ;;  %v10028_v36 = vld [vmem:[#allocation22 + $0x8c] ss:$16 sps:$4 sm:$0xff]  }
 0x461   :  { %8837 = vmatprep.subr.bf16.mxu0 %v9983_v38  ;;  %936 = vst.msk [vmem:[#allocation2 + $0x98] sm:$0x3f] %vm933_vm3, %v927_v58  ;;  %v10026_v38 = vld [vmem:[#allocation22 + $0x88] ss:$16 sps:$4 sm:$0xff]   ;;  %vm6825_vm3 = vcmask 1041409  }
 0x462   :  { %8774 = vmatpush3.bf16.msra.mxu1 %v9958_v57  ;;  %v9998_v57 = vld [vmem:[#allocation19 + $0x1b8] sm:$0xff]   ;;  %913 = vst.msk [vmem:[#allocation2 + $0x38] sm:$0x7f] %vm912_vm4, %v904_v60 }
 0x463   :  { %8775 = vmatprep.subr.bf16.mxu1 %v9960_v59  ;;  %v898_v59 = vld [vmem:[%s13587_s13 + $0x18] sm:$0xfe] }
 0x464   :  { %8838 = vmatpush3.bf16.msra.mxu0 %v9985_v40  ;;  %v906_v62 = vrot.slane %v898_v59, 1  ;;  %v10034_v40 = vld [vmem:[#allocation22 + $0xac] ss:$16 sps:$4 sm:$0xff]  }
 0x465   :  { %8839 = vmatprep.subr.bf16.mxu0 %v9987_v42  ;;  %v10032_v42 = vld [vmem:[#allocation22 + $0xa8] ss:$16 sps:$4 sm:$0xff]  }
 0x466   :  { %8776 = vmatpush3.bf16.msra.mxu1 %v9962_v10  ;;  %915 = vst.msk [vmem:[#allocation2 + $0x88] sm:$0x7f] %vm912_vm4, %v906_v62  ;;  %vm7073_vm4 = vcmask 1041408  }
 0x467   :  { %8777 = vmatprep.subr.bf16.mxu1 %v9964_v11 }
 0x468   :  { %8840 = vmatpush3.bf16.msra.mxu0 %v9989_v44  ;;  %v956_v8 = vld [vmem:[#allocation2 + $0x98] sm:$0xff] }
 0x469   :  { %8841 = vmatprep.subr.bf16.mxu0 %v9991_v46  ;;  %v944_v9 = vld [vmem:[#allocation2 + $0x38] sm:$0xff]  ;;  %v966_v10 = vpack.c.bf16 %v956_v8, %v946_v7 }
 0x46a   :  { %8778 = vmatpush3.bf16.msra.mxu1 %v9966_v12  ;;  %v945_v12 = vld [vmem:[#allocation2 + $0x40] sm:$0xff]  ;;  %v10038_v46 = vld [vmem:[#allocation22 + $0xc8] ss:$16 sps:$4 sm:$0xff]  }
 0x46b   :  { %8807 = vmatprep.subr.bf16.mxu1 %v9968_v14  ;;  %v955_v14 = vld [vmem:[#allocation2 + $0x90] sm:$0xff]  ;;  %1810 = vmatprep.mubr.bf16.mxu0 %v966_v10 }
 0x46c   :  { %8842 = vmatpush3.bf16.msra.mxu0 %v9993_v48  ;;  %v965_v16 = vpack.c.bf16 %v955_v14, %v945_v12  ;;  %v10040_v44 = vld [vmem:[#allocation22 + $0xcc] ss:$16 sps:$4 sm:$0xff]  }
 0x46d   :  { %1688 = vmatmul.mubr.bf16.vlgmr.msra.gmra.mrb[4].mxu1 %v959_v27  ;;  %8843 = vmatprep.subr.bf16.mxu0 %v9995_v50  ;;  %v954_v11 = vld [vmem:[#allocation2 + $0x88] sm:$0xff] }
 0x46e   :  { %8808 = vmatpush3.bf16.msra.mxu1 %v9970_v21  ;;  %v964_v13 = vpack.c.bf16 %v954_v11, %v944_v9  ;;  %v10002_v21 = vld [vmem:[#allocation22 + $0x8] ss:$16 sps:$4 sm:$0xff]   ;;  %v10013_v27 = vld [vmem:[#allocation22 + $0x44] ss:$16 sps:$4 sm:$0xff]   ;;  %v10046_v48 = vld [vmem:[#allocation22 + $0xec] ss:$16 sps:$4 sm:$0xff]  }
 0x46f   :  { %8809 = vmatprep.subr.bf16.mxu1 %v9972_v24  ;;  %v10010_v24 = vld [vmem:[#allocation22 + $0x2c] ss:$16 sps:$4 sm:$0xff]   ;;  %v10044_v50 = vld [vmem:[#allocation22 + $0xe8] ss:$16 sps:$4 sm:$0xff]  }
 0x470   :  { %8844 = vmatpush3.bf16.msra.mxu0 %v9997_v52  ;;  %1769 = vmatprep.mubr.bf16.mxu1 %v964_v13  ;;  %v10052_v52 = vld [vmem:[#allocation26 + $0xc] ss:$16 sps:$4 sm:$0xff]  }
 0x471   :  { %2077 = vmatprep.subr.bf16.mxu0 %v10004_v22 }
 0x472   :  { %8810 = vmatpush3.bf16.msra.mxu1 %v9974_v29  ;;  %v10016_v29 = vld [vmem:[#allocation22 + $0x4c] ss:$16 sps:$4 sm:$0xff]  }
 0x473   :  { %8811 = vmatprep.subr.bf16.mxu1 %v9976_v31  ;;  %1811 = vmatmul.mubr.bf16.vlgmr.msra.gmra.mrb[4].mxu0 %v965_v16  ;;  %v10019_v31 = vld [vmem:[#allocation22 + $0x64] ss:$16 sps:$4 sm:$0xff]  }
 0x474   :  { %2078 = vmatpush1.bf16.msra.mxu0 %v10002_v21  ;;  %2109 = vmatprep.mubr.bf16.mxu0 %v13477_v53 }
 0x475   :  { %2079 = vmatprep.subr.bf16.mxu0 %v10010_v24 }
 0x476   :  { %8812 = vmatpush3.bf16.msra.mxu1 %v9978_v33  ;;  %v10017_v33 = vld [vmem:[#allocation22 + $0x60] ss:$16 sps:$4 sm:$0xff]  }
 0x477   :  { %8813 = vmatprep.subr.bf16.mxu1 %v9980_v35  ;;  %v10025_v35 = vld [vmem:[#allocation22 + $0x84] ss:$16 sps:$4 sm:$0xff]  }
 0x478   :  { %2080 = vmatpush1.bf16.msra.mxu0 %v10008_v26 }
 0x479   :  { %2081 = vmatprep.subr.bf16.mxu0 %v10016_v29 }
 0x47a   :  { %8814 = vmatpush3.bf16.msra.mxu1 %v9982_v37  ;;  %v10023_v37 = vld [vmem:[#allocation22 + $0x80] ss:$16 sps:$4 sm:$0xff]  }
 0x47b   :  { %8815 = vmatprep.subr.bf16.mxu1 %v9984_v39  ;;  %v10031_v39 = vld [vmem:[#allocation22 + $0xa4] ss:$16 sps:$4 sm:$0xff]  }
 0x47c   :  { %2082 = vmatpush1.bf16.msra.mxu0 %v10014_v30 }
 0x47d   :  { %2083 = vmatprep.subr.bf16.mxu0 %v10022_v32  ;;  %v10047_v32 = vld [vmem:[#allocation26] ss:$16 sps:$4 sm:$0xff]  }
 0x47e   :  { %8816 = vmatpush3.bf16.msra.mxu1 %v9986_v41  ;;  %v10029_v41 = vld [vmem:[#allocation22 + $0xa0] ss:$16 sps:$4 sm:$0xff]  }
 0x47f   :  { %8817 = vmatprep.subr.bf16.mxu1 %v9988_v43  ;;  %v10037_v43 = vld [vmem:[#allocation22 + $0xc4] ss:$16 sps:$4 sm:$0xff]  }
 0x480   :  { %2084 = vmatpush1.bf16.msra.mxu0 %v10020_v34 }
 0x481   :  { %2085 = vmatprep.subr.bf16.mxu0 %v10028_v36  ;;  %v10058_v36 = vld [vmem:[#allocation26 + $0x2c] ss:$16 sps:$4 sm:$0xff]  }
 0x482   :  { %8818 = vmatpush3.bf16.msra.mxu1 %v9990_v45  ;;  %v10035_v45 = vld [vmem:[#allocation22 + $0xc0] ss:$16 sps:$4 sm:$0xff]  }
 0x483   :  { %8819 = vmatprep.subr.bf16.mxu1 %v9992_v47  ;;  %v10043_v47 = vld [vmem:[#allocation22 + $0xe4] ss:$16 sps:$4 sm:$0xff]  }
 0x484   :  { %2086 = vmatpush1.bf16.msra.mxu0 %v10026_v38  ;;  %v10056_v38 = vld [vmem:[#allocation26 + $0x28] ss:$16 sps:$4 sm:$0xff]  }
 0x485   :  { %2087 = vmatprep.subr.bf16.mxu0 %v10034_v40  ;;  %v10064_v40 = vld [vmem:[#allocation26 + $0x4c] ss:$16 sps:$4 sm:$0xff]  }
 0x486   :  { %8820 = vmatpush3.bf16.msra.mxu1 %v9994_v49  ;;  %v10041_v49 = vld [vmem:[#allocation22 + $0xe0] ss:$16 sps:$4 sm:$0xff]  }
 0x487   :  { %8821 = vmatprep.subr.bf16.mxu1 %v9996_v51  ;;  %v10049_v51 = vld [vmem:[#allocation26 + $0x4] ss:$16 sps:$4 sm:$0xff]  }
 0x488   :  { %2088 = vmatpush1.bf16.msra.mxu0 %v10032_v42  ;;  %v10062_v42 = vld [vmem:[#allocation26 + $0x48] ss:$16 sps:$4 sm:$0xff]  }
 0x489   :  { %2089 = vmatprep.subr.bf16.mxu0 %v10040_v44  ;;  %v10070_v44 = vld [vmem:[#allocation26 + $0x6c] ss:$16 sps:$4 sm:$0xff]  }
 0x48a   :  { %8822 = vmatpush3.bf16.msra.mxu1 %v9998_v57 }
 0x48b   :  { %2034 = vmatprep.subr.bf16.mxu1 %v10001_v20 }
 0x48c   :  { %2090 = vmatpush1.bf16.msra.mxu0 %v10038_v46  ;;  %v10068_v46 = vld [vmem:[#allocation26 + $0x68] ss:$16 sps:$4 sm:$0xff]  }
 0x48d   :  { %1770 = vmatmul.mubr.bf16.vlgmr.msra.gmra.mrb[8].mxu1 %v963_v18  ;;  %2091 = vmatprep.subr.bf16.mxu0 %v10046_v48  ;;  %v10076_v48 = vld [vmem:[#allocation26 + $0x8c] ss:$16 sps:$4 sm:$0xff]  }
 0x48e   :  { %2035 = vmatpush1.bf16.msra.mxu1 %v9999_v19  ;;  %2066 = vmatprep.mubr.bf16.mxu1 %v13477_v53 }
 0x48f   :  { %2036 = vmatprep.subr.bf16.mxu1 %v10007_v23 }
 0x490   :  { %2092 = vmatpush1.bf16.msra.mxu0 %v10044_v50  ;;  %v10074_v50 = vld [vmem:[#allocation26 + $0x88] ss:$16 sps:$4 sm:$0xff]  }
 0x491   :  { %2385 = vmatprep.subr.bf16.mxu0 %v10052_v52  ;;  %v10082_v52 = vld [vmem:[#allocation26 + $0xac] ss:$16 sps:$4 sm:$0xff]  }
 0x492   :  { %2037 = vmatpush1.bf16.msra.mxu1 %v10005_v25 }
 0x493   :  { %2038 = vmatprep.subr.bf16.mxu1 %v10013_v27 }
 0x496   :  { %2039 = vmatpush1.bf16.msra.mxu1 %v10011_v28 }
 0x497   :  { %2040 = vmatprep.subr.bf16.mxu1 %v10019_v31 }
 0x49a   :  { %2041 = vmatpush1.bf16.msra.mxu1 %v10017_v33  ;;  %v10050_v33 = vld [vmem:[#allocation26 + $0x8] ss:$16 sps:$4 sm:$0xff]  }
 0x49b   :  { %2042 = vmatprep.subr.bf16.mxu1 %v10025_v35  ;;  %v10055_v35 = vld [vmem:[#allocation26 + $0x24] ss:$16 sps:$4 sm:$0xff]  }
 0x49e   :  { %2043 = vmatpush1.bf16.msra.mxu1 %v10023_v37  ;;  %v10053_v37 = vld [vmem:[#allocation26 + $0x20] ss:$16 sps:$4 sm:$0xff]  }
 0x49f   :  { %2044 = vmatprep.subr.bf16.mxu1 %v10031_v39  ;;  %v10061_v39 = vld [vmem:[#allocation26 + $0x44] ss:$16 sps:$4 sm:$0xff]  }
 0x4a2   :  { %2045 = vmatpush1.bf16.msra.mxu1 %v10029_v41  ;;  %v10059_v41 = vld [vmem:[#allocation26 + $0x40] ss:$16 sps:$4 sm:$0xff]  }
 0x4a3   :  { %2046 = vmatprep.subr.bf16.mxu1 %v10037_v43  ;;  %v10067_v43 = vld [vmem:[#allocation26 + $0x64] ss:$16 sps:$4 sm:$0xff]  }
 0x4a6   :  { %2047 = vmatpush1.bf16.msra.mxu1 %v10035_v45  ;;  %v10065_v45 = vld [vmem:[#allocation26 + $0x60] ss:$16 sps:$4 sm:$0xff]  }
 0x4a7   :  { %2048 = vmatprep.subr.bf16.mxu1 %v10043_v47  ;;  %v10073_v47 = vld [vmem:[#allocation26 + $0x84] ss:$16 sps:$4 sm:$0xff]  }
 0x4aa   :  { %2049 = vmatpush1.bf16.msra.mxu1 %v10041_v49  ;;  %v10071_v49 = vld [vmem:[#allocation26 + $0x80] ss:$16 sps:$4 sm:$0xff]  }
 0x4ab   :  { %2342 = vmatprep.subr.bf16.mxu1 %v10049_v51  ;;  %v10079_v51 = vld [vmem:[#allocation26 + $0xa4] ss:$16 sps:$4 sm:$0xff]  }
 0x520   :  { %v8757_v54 = vpop.f32.mrb[0].mxu1 }
 0x521   :  { %v8758_v55 = vpop.f32.mrb[1].mxu1 }
 0x522   :  { %v8759_v56 = vadd.f32 %v8758_v55, %v8757_v54  ;;  %v8760_v57 = vpop.f32.mrb[2].mxu1  ;;  %v10077_v54 = vld [vmem:[#allocation26 + $0xa0] ss:$16 sps:$4 sm:$0xff]   ;;  %v10080_v55 = vld [vmem:[#allocation26 + $0xa8] ss:$16 sps:$4 sm:$0xff]  }
 0x523   :  { %v8761_v58 = vpop.f32.mrb[3].mxu1 }
 0x524   :  { %v8762_v59 = vadd.f32 %v8761_v58, %v8760_v57  ;;  %v1649_v5 = vadd.f32 %v8759_v56, %v8260_v61  ;;  %v10085_v56 = vld [vmem:[#allocation26 + $0xc4] ss:$16 sps:$4 sm:$0xff]   ;;  %v10088_v57 = vld [vmem:[#allocation26 + $0xcc] ss:$16 sps:$4 sm:$0xff]   ;;  %v10083_v58 = vld [vmem:[#allocation26 + $0xc0] ss:$16 sps:$4 sm:$0xff]  }
 0x526   :  { %v8801_v60 = vpop.f32.mrb[0].mxu0  ;;  %v1652_v10 = vadd.f32 %v8762_v59, %v8260_v61  ;;  %v10086_v59 = vld [vmem:[#allocation26 + $0xc8] ss:$16 sps:$4 sm:$0xff]   ;;  %v10094_v61 = vld [vmem:[#allocation26 + $0xec] ss:$16 sps:$4 sm:$0xff]  }
 0x527   :  { %v8802_v62 = vpop.f32.mrb[1].mxu0 }
 0x528   :  { %v8803_v0 = vadd.f32 %v8802_v62, %v8801_v60  ;;  %v8804_v1 = vpop.f32.mrb[2].mxu0  ;;  %v10091_v60 = vld [vmem:[#allocation26 + $0xe4] ss:$16 sps:$4 sm:$0xff]  }
 0x529   :  { %v8805_v4 = vpop.f32.mrb[3].mxu0  ;;  %v2441_v62 = vld [vmem:[#allocation23 + $0x8] sm:$0xff] }
 0x52a   :  { %v8806_v8 = vadd.f32 %v8805_v4, %v8804_v1  ;;  %v2447_v1 = vld [vmem:[#allocation23 + $0x38] sm:$0xff] }
 0x52b   :  { %v10092_v4 = vld [vmem:[#allocation26 + $0xe8] ss:$16 sps:$4 sm:$0xff]  }
 0x540   :  { %v8779_v63 = vpop.f32.mrb[4].mxu1 }
 0x541   :  { %v8780_v3 = vpop.f32.mrb[5].mxu1 }
 0x542   :  { %v8781_v6 = vadd.f32 %v8780_v3, %v8779_v63  ;;  %v8782_v7 = vpop.f32.mrb[6].mxu1  ;;  %v2445_v63 = vld [vmem:[#allocation23 + $0x28] sm:$0xff]  ;;  %v10089_v3 = vld [vmem:[#allocation26 + $0xe0] ss:$16 sps:$4 sm:$0xff]  }
 0x543   :  { %v8783_v9 = vpop.f32.mrb[7].mxu1 }
 0x544   :  { %v1690_v11 = vadd.f32 %v8781_v6, %v1649_v5  ;;  %v8784_v12 = vadd.f32 %v8783_v9, %v8782_v7  ;;  %v2440_v5 = vld [vmem:[#allocation23] sm:$0xff]  ;;  %v12460_v7 = vpack.c.bf16 %v2445_v63, %v2441_v62  ;;  %v2442_v9 = vld [vmem:[#allocation23 + $0x10] sm:$0xff]  ;;  %v2483_v62 = vld [vmem:[#allocation23 + $0x158] sm:$0xff] }
 0x545   :  { %v2444_v6 = vld [vmem:[#allocation23 + $0x20] sm:$0xff]  ;;  %v2487_v63 = vld [vmem:[#allocation23 + $0x178] sm:$0xff] }
 0x546   :  { %v1731_v13 = vadd.f32 %v8803_v0, %v1690_v11  ;;  %v1693_v14 = vadd.f32 %v8784_v12, %v1652_v10  ;;  %v8845_v16 = vpop.f32.mrb[4].mxu0  ;;  %v2443_v0 = vld [vmem:[#allocation23 + $0x18] sm:$0xff]  ;;  %v2446_v10 = vld [vmem:[#allocation23 + $0x30] sm:$0xff]  ;;  %v2449_v11 = vld [vmem:[#allocation23 + $0x48] sm:$0xff] }
 0x547   :  { %v8846_v18 = vpop.f32.mrb[5].mxu0  ;;  %v2453_v12 = vld [vmem:[#allocation23 + $0x68] sm:$0xff] }
 0x548   :  { %v1734_v15 = vadd.f32 %v8806_v8, %v1693_v14  ;;  %v8847_v19 = vadd.f32 %v8846_v18, %v8845_v16  ;;  %v8848_v21 = vpop.f32.mrb[6].mxu0  ;;  %v12462_v8 = vpack.c.bf16 %v2447_v1, %v2443_v0  ;;  %v2455_v14 = vld [vmem:[#allocation23 + $0x78] sm:$0xff]  ;;  %v12466_v16 = vpack.c.bf16 %v2446_v10, %v2442_v9  ;;  %v2452_v18 = vld [vmem:[#allocation23 + $0x60] sm:$0xff]  ;;  %v2482_v9 = vld [vmem:[#allocation23 + $0x150] sm:$0xff] }
 0x549   :  { %v8849_v24 = vpop.f32.mrb[7].mxu0  ;;  %v2486_v10 = vld [vmem:[#allocation23 + $0x170] sm:$0xff] }
 0x54a   :  { %v8850_v25 = vadd.f32 %v8849_v24, %v8848_v21  ;;  %v2450_v21 = vld [vmem:[#allocation23 + $0x50] sm:$0xff]  ;;  %v2461_v24 = vld [vmem:[#allocation23 + $0xa8] sm:$0xff] }
 0x560   :  { %v8823_v17 = vpop.f32.mrb[8].mxu1 }
 0x561   :  { %v8824_v20 = vpop.f32.mrb[9].mxu1 }
 0x562   :  { %v8825_v22 = vadd.f32 %v8824_v20, %v8823_v17  ;;  %v8826_v23 = vpop.f32.mrb[10].mxu1  ;;  %v2448_v17 = vld [vmem:[#allocation23 + $0x40] sm:$0xff] }
 0x563   :  { %v8827_v26 = vpop.f32.mrb[11].mxu1 }
 0x564   :  { %v1772_v27 = vadd.f32 %v8825_v22, %v1731_v13  ;;  %v8828_v28 = vadd.f32 %v8827_v26, %v8826_v23  ;;  %v2451_v13 = vld [vmem:[#allocation23 + $0x58] sm:$0xff]  ;;  %v2454_v22 = vld [vmem:[#allocation23 + $0x70] sm:$0xff]  ;;  %v2457_v23 = vld [vmem:[#allocation23 + $0x88] sm:$0xff] }
 0x565   :  { %v12472_v20 = vpack.c.bf16 %v2455_v14, %v2451_v13  ;;  %v2463_v26 = vld [vmem:[#allocation23 + $0xb8] sm:$0xff] }
 0x566   :  { %v1813_v29 = vadd.f32 %v8847_v19, %v1772_v27  ;;  %v1775_v30 = vadd.f32 %v8828_v28, %v1734_v15  ;;  %v12464_v15 = vpack.c.bf16 %v2444_v6, %v2440_v5  ;;  %v12470_v19 = vpack.c.bf16 %v2453_v12, %v2449_v11  ;;  %v2489_v11 = vld [vmem:[#allocation23 + $0x188] sm:$0xff]  ;;  %v2491_v13 = vld [vmem:[#allocation23 + $0x198] sm:$0xff] }
 0x567   :  { %v12478_v27 = vpack.c.bf16 %v2452_v18, %v2448_v17  ;;  %v12480_v28 = vpack.c.bf16 %v2454_v22, %v2450_v21  ;;  %v12524_v6 = vpack.c.bf16 %v2487_v63, %v2483_v62  ;;  %v2493_v12 = vld [vmem:[#allocation23 + $0x1a8] sm:$0xff]  ;;  %v2495_v14 = vld [vmem:[#allocation23 + $0x1b8] sm:$0xff]  ;;  %v12530_v18 = vpack.c.bf16 %v2486_v10, %v2482_v9  ;;  %v2488_v21 = vld [vmem:[#allocation23 + $0x180] sm:$0xff] }
 0x568   :  { %v1816_v31 = vadd.f32 %v8850_v25, %v1775_v30  ;;  %v2459_v25 = vld [vmem:[#allocation23 + $0x98] sm:$0xff]  ;;  %v2460_v30 = vld [vmem:[#allocation23 + $0xa0] sm:$0xff] }
 0x569   :  { %v2492_v22 = vld [vmem:[#allocation23 + $0x1a0] sm:$0xff]  ;;  %v2657_v62 = vld [vmem:[#allocation28 + $0x10] sm:$0xff] }
 0x56a   :  { %v12454_v34 = vpack.c.bf16 %v1816_v31, %v1813_v29  ;;  %v2456_v29 = vld [vmem:[#allocation23 + $0x80] sm:$0xff]  ;;  %v12484_v31 = vpack.c.bf16 %v2461_v24, %v2457_v23  ;;  %v12534_v23 = vpack.c.bf16 %v2493_v12, %v2489_v11  ;;  %v12536_v24 = vpack.c.bf16 %v2495_v14, %v2491_v13  ;;  %v2661_v63 = vld [vmem:[#allocation28 + $0x30] sm:$0xff] }
 0x56b   :  { %v2666_v9 = vld [vmem:[#allocation28 + $0x58] sm:$0xff]  ;;  %v12566_v12 = vpack.c.bf16 %v2661_v63, %v2657_v62  ;;  %v2663_v13 = vld [vmem:[#allocation28 + $0x40] sm:$0xff] }
 0x56c   :  { %2067 = vmatmul.mubr.bf16.vlgmr.msra.gmra.mrb[12].mxu1 %v12454_v34  ;;  %2110 = vmatmul.mubr.bf16.vlgmr.msra.gmra.mrb[8].mxu0 %v12454_v34  ;;  %v2670_v10 = vld [vmem:[#allocation28 + $0x78] sm:$0xff]  ;;  %v2667_v14 = vld [vmem:[#allocation28 + $0x60] sm:$0xff] }
 0x56d   :  { %2343 = vmatpush1.bf16.msra.mxu1 %v10047_v32  ;;  %2386 = vmatpush1.bf16.msra.mxu0 %v10050_v33  ;;  %v12486_v32 = vpack.c.bf16 %v2463_v26, %v2459_v25  ;;  %v2458_v33 = vld [vmem:[#allocation23 + $0x90] sm:$0xff]  ;;  %v2682_v62 = vld [vmem:[#allocation28 + $0xd8] sm:$0xff] }
 0x56e   :  { %2344 = vmatprep.subr.bf16.mxu1 %v10055_v35  ;;  %2387 = vmatprep.subr.bf16.mxu0 %v10058_v36  ;;  %v2465_v35 = vld [vmem:[#allocation23 + $0xc8] sm:$0xff]  ;;  %v2490_v25 = vld [vmem:[#allocation23 + $0x190] sm:$0xff]  ;;  %v2686_v63 = vld [vmem:[#allocation28 + $0xf8] sm:$0xff] }
 0x56f   :  { %2374 = vmatprep.mubr.bf16.mxu1 %v13477_v53  ;;  %2417 = vmatprep.mubr.bf16.mxu0 %v13477_v53  ;;  %v2469_v36 = vld [vmem:[#allocation23 + $0xe8] sm:$0xff]  ;;  %v2494_v26 = vld [vmem:[#allocation23 + $0x1b0] sm:$0xff] }
 0x570   :  { %v2696_v53 = vld [vmem:[#allocation28 + $0x148] sm:$0xff] }
 0x571   :  { %2345 = vmatpush1.bf16.msra.mxu1 %v10053_v37  ;;  %2388 = vmatpush1.bf16.msra.mxu0 %v10056_v38  ;;  %v2467_v37 = vld [vmem:[#allocation23 + $0xd8] sm:$0xff] }
 0x572   :  { %2346 = vmatprep.subr.bf16.mxu1 %v10061_v39  ;;  %2389 = vmatprep.subr.bf16.mxu0 %v10064_v40  ;;  %v2471_v38 = vld [vmem:[#allocation23 + $0xf8] sm:$0xff]  ;;  %v12492_v39 = vpack.c.bf16 %v2460_v30, %v2456_v29  ;;  %v2497_v29 = vld [vmem:[#allocation23 + $0x1c8] sm:$0xff] }
 0x573   :  { %v2501_v30 = vld [vmem:[#allocation23 + $0x1e8] sm:$0xff] }
 0x575   :  { %2347 = vmatpush1.bf16.msra.mxu1 %v10059_v41  ;;  %2390 = vmatpush1.bf16.msra.mxu0 %v10062_v42  ;;  %v2464_v41 = vld [vmem:[#allocation23 + $0xc0] sm:$0xff] }
 0x576   :  { %2348 = vmatprep.subr.bf16.mxu1 %v10067_v43  ;;  %2391 = vmatprep.subr.bf16.mxu0 %v10070_v44  ;;  %v2468_v42 = vld [vmem:[#allocation23 + $0xe0] sm:$0xff]  ;;  %v12498_v43 = vpack.c.bf16 %v2469_v36, %v2465_v35  ;;  %v12500_v44 = vpack.c.bf16 %v2471_v38, %v2467_v37  ;;  %v12540_v35 = vpack.c.bf16 %v2492_v22, %v2488_v21 }
 0x577   :  { %v12542_v36 = vpack.c.bf16 %v2494_v26, %v2490_v25  ;;  %v2496_v37 = vld [vmem:[#allocation23 + $0x1c0] sm:$0xff]  ;;  %v12572_v22 = vpack.c.bf16 %v2670_v10, %v2666_v9  ;;  %v2665_v25 = vld [vmem:[#allocation28 + $0x50] sm:$0xff] }
 0x578   :  { %v2500_v38 = vld [vmem:[#allocation23 + $0x1e0] sm:$0xff]  ;;  %v2669_v26 = vld [vmem:[#allocation28 + $0x70] sm:$0xff] }
 0x579   :  { %2349 = vmatpush1.bf16.msra.mxu1 %v10065_v45  ;;  %2392 = vmatpush1.bf16.msra.mxu0 %v10068_v46  ;;  %v2466_v45 = vld [vmem:[#allocation23 + $0xd0] sm:$0xff]  ;;  %v2679_v9 = vld [vmem:[#allocation28 + $0xc0] sm:$0xff] }
 0x57a   :  { %2350 = vmatprep.subr.bf16.mxu1 %v10073_v47  ;;  %2393 = vmatprep.subr.bf16.mxu0 %v10076_v48  ;;  %v2470_v46 = vld [vmem:[#allocation23 + $0xf0] sm:$0xff]  ;;  %v2473_v47 = vld [vmem:[#allocation23 + $0x108] sm:$0xff] }
 0x57b   :  { %v2477_v48 = vld [vmem:[#allocation23 + $0x128] sm:$0xff] }
 0x57c   :  { %v2683_v10 = vld [vmem:[#allocation28 + $0xe0] sm:$0xff] }
 0x57d   :  { %2351 = vmatpush1.bf16.msra.mxu1 %v10071_v49  ;;  %2394 = vmatpush1.bf16.msra.mxu0 %v10074_v50  ;;  %v2475_v49 = vld [vmem:[#allocation23 + $0x118] sm:$0xff] }
 0x57e   :  { %2352 = vmatprep.subr.bf16.mxu1 %v10079_v51  ;;  %2395 = vmatprep.subr.bf16.mxu0 %v10082_v52  ;;  %v2479_v50 = vld [vmem:[#allocation23 + $0x138] sm:$0xff]  ;;  %v12504_v51 = vpack.c.bf16 %v2468_v42, %v2464_v41  ;;  %v12506_v52 = vpack.c.bf16 %v2470_v46, %v2466_v45  ;;  %v12546_v41 = vpack.c.bf16 %v2501_v30, %v2497_v29  ;;  %v2498_v45 = vld [vmem:[#allocation23 + $0x1d0] sm:$0xff] }
 0x57f   :  { %v2502_v46 = vld [vmem:[#allocation23 + $0x1f0] sm:$0xff] }
 0x580   :  { %v2672_v29 = vld [vmem:[#allocation28 + $0x88] sm:$0xff] }
 0x581   :  { %2353 = vmatpush1.bf16.msra.mxu1 %v10077_v54  ;;  %2396 = vmatpush1.bf16.msra.mxu0 %v10080_v55  ;;  %v2472_v54 = vld [vmem:[#allocation23 + $0x100] sm:$0xff]  ;;  %v2676_v30 = vld [vmem:[#allocation28 + $0xa8] sm:$0xff] }
 0x582   :  { %2354 = vmatprep.subr.bf16.mxu1 %v10085_v56  ;;  %2397 = vmatprep.subr.bf16.mxu0 %v10088_v57  ;;  %v2476_v55 = vld [vmem:[#allocation23 + $0x120] sm:$0xff]  ;;  %v12510_v56 = vpack.c.bf16 %v2477_v48, %v2473_v47  ;;  %v12512_v57 = vpack.c.bf16 %v2479_v50, %v2475_v49  ;;  %v2656_v47 = vld [vmem:[#allocation28 + $0x8] sm:$0xff] }
 0x583   :  { %v12516_v0 = vpack.c.bf16 %v2476_v55, %v2472_v54  ;;  %v2660_v48 = vld [vmem:[#allocation28 + $0x28] sm:$0xff]  ;;  %v2658_v49 = vld [vmem:[#allocation28 + $0x18] sm:$0xff]  ;;  %v12552_v54 = vpack.c.bf16 %v2500_v38, %v2496_v37  ;;  %v12554_v55 = vpack.c.bf16 %v2502_v46, %v2498_v45  ;;  %v12578_v37 = vpack.c.bf16 %v2667_v14, %v2663_v13  ;;  %v2671_v45 = vld [vmem:[#allocation28 + $0x80] sm:$0xff] }
 0x584   :  { %v2662_v50 = vld [vmem:[#allocation28 + $0x38] sm:$0xff]  ;;  %v12580_v38 = vpack.c.bf16 %v2669_v26, %v2665_v25  ;;  %v2675_v46 = vld [vmem:[#allocation28 + $0xa0] sm:$0xff]  ;;  %v12600_v14 = vpack.c.bf16 %v2686_v63, %v2682_v62  ;;  %v2681_v25 = vld [vmem:[#allocation28 + $0xd0] sm:$0xff] }
 0x585   :  { %2355 = vmatpush1.bf16.msra.mxu1 %v10083_v58  ;;  %2398 = vmatpush1.bf16.msra.mxu0 %v10086_v59  ;;  %v2474_v58 = vld [vmem:[#allocation23 + $0x110] sm:$0xff] }
 0x586   :  { %2356 = vmatprep.subr.bf16.mxu1 %v10091_v60  ;;  %2399 = vmatprep.subr.bf16.mxu0 %v10094_v61  ;;  %v2478_v59 = vld [vmem:[#allocation23 + $0x130] sm:$0xff]  ;;  %v2481_v60 = vld [vmem:[#allocation23 + $0x148] sm:$0xff]  ;;  %13591 = vst [vmem:[#allocation156_spill] sm:$0xff] %v12600_v14 }
 0x587   :  { %v2485_v61 = vld [vmem:[#allocation23 + $0x168] sm:$0xff]  ;;  %v12518_v1 = vpack.c.bf16 %v2478_v59, %v2474_v58  ;;  %v2685_v26 = vld [vmem:[#allocation28 + $0xf0] sm:$0xff] }
 0x588   :  { %v12522_v5 = vpack.c.bf16 %v2485_v61, %v2481_v60  ;;  %v2655_v58 = vld [vmem:[#allocation28] sm:$0xff]  ;;  %v12558_v60 = vpack.c.bf16 %v2660_v48, %v2656_v47  ;;  %v12560_v61 = vpack.c.bf16 %v2662_v50, %v2658_v49  ;;  %v12584_v47 = vpack.c.bf16 %v2676_v30, %v2672_v29  ;;  %v2673_v49 = vld [vmem:[#allocation28 + $0x90] sm:$0xff]  ;;  %v2688_v29 = vld [vmem:[#allocation28 + $0x108] sm:$0xff] }
 0x589   :  { %2357 = vmatpush1.bf16.msra.mxu1 %v10089_v3  ;;  %2400 = vmatpush1.bf16.msra.mxu0 %v10092_v4  ;;  %v2480_v3 = vld [vmem:[#allocation23 + $0x140] sm:$0xff]  ;;  %v2677_v50 = vld [vmem:[#allocation28 + $0xb0] sm:$0xff]  ;;  %v2692_v30 = vld [vmem:[#allocation28 + $0x128] sm:$0xff] }
 0x58a   :  { %9280 = vmatprep.subr.bf16.mxu1 %v12460_v7  ;;  %9312 = vmatprep.subr.bf16.mxu0 %v12462_v8  ;;  %v2484_v4 = vld [vmem:[#allocation23 + $0x160] sm:$0xff]  ;;  %v2689_v62 = vld [vmem:[#allocation28 + $0x110] sm:$0xff] }
 0x58b   :  { %v12528_v17 = vpack.c.bf16 %v2484_v4, %v2480_v3  ;;  %v2659_v59 = vld [vmem:[#allocation28 + $0x20] sm:$0xff]  ;;  %v2664_v3 = vld [vmem:[#allocation28 + $0x48] sm:$0xff]  ;;  %v2693_v63 = vld [vmem:[#allocation28 + $0x130] sm:$0xff] }
 0x58c   :  { %2375 = vmatmul.mubr.bf16.vlgmr.msra.gmra.mrb[16].mxu1 %v12454_v34  ;;  %2418 = vmatmul.mubr.bf16.vlgmr.msra.gmra.mrb[12].mxu0 %v12454_v34  ;;  %v2462_v34 = vld [vmem:[#allocation23 + $0xb0] sm:$0xff]  ;;  %v12564_v11 = vpack.c.bf16 %v2659_v59, %v2655_v58 }
 0x58d   :  { %9282 = vmatpush1.bf16.msra.mxu1 %v12464_v15  ;;  %9314 = vmatpush1.bf16.msra.mxu0 %v12466_v16  ;;  %v12494_v40 = vpack.c.bf16 %v2462_v34, %v2458_v33  ;;  %v2499_v33 = vld [vmem:[#allocation23 + $0x1d8] sm:$0xff]  ;;  %v2668_v4 = vld [vmem:[#allocation28 + $0x68] sm:$0xff] }
 0x58e   :  { %9284 = vmatprep.subr.bf16.mxu1 %v12470_v19  ;;  %9316 = vmatprep.subr.bf16.mxu0 %v12472_v20  ;;  %v2503_v34 = vld [vmem:[#allocation23 + $0x1f8] sm:$0xff]  ;;  %v12570_v21 = vpack.c.bf16 %v2668_v4, %v2664_v3  ;;  %v2680_v58 = vld [vmem:[#allocation28 + $0xc8] sm:$0xff]  ;;  %v12592_v3 = vpack.c.bf16 %v2675_v46, %v2671_v45  ;;  %v12594_v4 = vpack.c.bf16 %v2677_v50, %v2673_v49  ;;  %v2687_v49 = vld [vmem:[#allocation28 + $0x100] sm:$0xff] }
 0x58f   :  { %2568 = vmatprep.mubr.f32.mxu1 %v13479_v2  ;;  %2639 = vmatprep.mubr.f32.mxu0 %v13479_v2  ;;  %v12548_v42 = vpack.c.bf16 %v2503_v34, %v2499_v33  ;;  %v2674_v33 = vld [vmem:[#allocation28 + $0x98] sm:$0xff]  ;;  %v2684_v59 = vld [vmem:[#allocation28 + $0xe8] sm:$0xff]  ;;  %v12604_v45 = vpack.c.bf16 %v2683_v10, %v2679_v9  ;;  %v12606_v46 = vpack.c.bf16 %v2685_v26, %v2681_v25  ;;  %v2691_v50 = vld [vmem:[#allocation28 + $0x120] sm:$0xff] }
 0x590   :  { %v2678_v34 = vld [vmem:[#allocation28 + $0xb8] sm:$0xff]  ;;  %13588 = vst [vmem:[#allocation153_spill] sm:$0xff] %v12592_v3  ;;  %13589 = vst [vmem:[#allocation154_spill] sm:$0xff] %v12594_v4  ;;  %v12598_v13 = vpack.c.bf16 %v2684_v59, %v2680_v58  ;;  %v12610_v58 = vpack.c.bf16 %v2692_v30, %v2688_v29  ;;  %v12616_v9 = vpack.c.bf16 %v2691_v50, %v2687_v49  ;;  %v2695_v25 = vld [vmem:[#allocation28 + $0x140] sm:$0xff] }
 0x591   :  { %9286 = vmatpush1.bf16.msra.mxu1 %v12478_v27  ;;  %9318 = vmatpush1.bf16.msra.mxu0 %v12480_v28  ;;  %v12586_v48 = vpack.c.bf16 %v2678_v34, %v2674_v33  ;;  %v2690_v33 = vld [vmem:[#allocation28 + $0x118] sm:$0xff]  ;;  %13592 = vst [vmem:[#allocation157_spill] sm:$0xff] %v12604_v45  ;;  %13593 = vst [vmem:[#allocation158_spill] sm:$0xff] %v12606_v46  ;;  %v12618_v10 = vpack.c.bf16 %v2693_v63, %v2689_v62  ;;  %v2699_v26 = vld [vmem:[#allocation28 + $0x160] sm:$0xff] }
 0x592   :  { %9288 = vmatprep.subr.bf16.mxu1 %v12484_v31  ;;  %9320 = vmatprep.subr.bf16.mxu0 %v12486_v32  ;;  %13590 = vst [vmem:[#allocation155_spill] sm:$0xff] %v12598_v13  ;;  %v2694_v34 = vld [vmem:[#allocation28 + $0x138] sm:$0xff]  ;;  %13594 = vst [vmem:[#allocation159_spill] sm:$0xff] %v12610_v58  ;;  %v12628_v49 = vpack.c.bf16 %v2699_v26, %v2695_v25  ;;  %v2703_v62 = vld [vmem:[#allocation28 + $0x180] sm:$0xff] }
 0x593   :  { %v12612_v59 = vpack.c.bf16 %v2694_v34, %v2690_v33  ;;  %13596 = vst [vmem:[#allocation161_spill] sm:$0xff] %v12616_v9  ;;  %13597 = vst [vmem:[#allocation162_spill] sm:$0xff] %v12618_v10  ;;  %v2697_v33 = vld [vmem:[#allocation28 + $0x150] sm:$0xff]  ;;  %v2707_v63 = vld [vmem:[#allocation28 + $0x1a0] sm:$0xff] }
 0x594   :  { %v2701_v34 = vld [vmem:[#allocation28 + $0x170] sm:$0xff]  ;;  %v12640_v25 = vpack.c.bf16 %v2707_v63, %v2703_v62 }
 0x595   :  { %9290 = vmatpush1.bf16.msra.mxu1 %v12492_v39  ;;  %9322 = vmatpush1.bf16.msra.mxu0 %v12494_v40  ;;  %13595 = vst [vmem:[#allocation160_spill] sm:$0xff] %v12612_v59  ;;  %v12630_v50 = vpack.c.bf16 %v2701_v34, %v2697_v33  ;;  %v2711_v33 = vld [vmem:[#allocation28 + $0x1c0] sm:$0xff]  ;;  %v2717_v34 = vld [vmem:[#allocation28 + $0x1f0] sm:$0xff] }
 0x596   :  { %9292 = vmatprep.subr.bf16.mxu1 %v12498_v43  ;;  %9324 = vmatprep.subr.bf16.mxu0 %v12500_v44 }
 0x599   :  { %9294 = vmatpush1.bf16.msra.mxu1 %v12504_v51  ;;  %9326 = vmatpush1.bf16.msra.mxu0 %v12506_v52 }
 0x59a   :  { %9296 = vmatprep.subr.bf16.mxu1 %v12510_v56  ;;  %9328 = vmatprep.subr.bf16.mxu0 %v12512_v57 }
 0x59d   :  { %9298 = vmatpush1.bf16.msra.mxu1 %v12516_v0  ;;  %9330 = vmatpush1.bf16.msra.mxu0 %v12518_v1 }
 0x59e   :  { %9300 = vmatprep.subr.bf16.mxu1 %v12522_v5  ;;  %9332 = vmatprep.subr.bf16.mxu0 %v12524_v6 }
 0x5a1   :  { %9302 = vmatpush1.bf16.msra.mxu1 %v12528_v17  ;;  %9334 = vmatpush1.bf16.msra.mxu0 %v12530_v18 }
 0x5a2   :  { %9304 = vmatprep.subr.bf16.mxu1 %v12534_v23  ;;  %9336 = vmatprep.subr.bf16.mxu0 %v12536_v24 }
 0x5a5   :  { %9306 = vmatpush1.bf16.msra.mxu1 %v12540_v35  ;;  %9338 = vmatpush1.bf16.msra.mxu0 %v12542_v36 }
 0x5a6   :  { %9308 = vmatprep.subr.bf16.mxu1 %v12546_v41  ;;  %9340 = vmatprep.subr.bf16.mxu0 %v12548_v42 }
 0x5a9   :  { %9310 = vmatpush1.bf16.msra.mxu1 %v12552_v54  ;;  %9342 = vmatpush1.bf16.msra.mxu0 %v12554_v55 }
 0x5aa   :  { %9344 = vmatprep.subr.bf16.mxu1 %v12558_v60  ;;  %9376 = vmatprep.subr.bf16.mxu0 %v12560_v61 }
 0x5ac   :  { %2569 = vmatmul.mubr.f32.vlgmr.msra.gmra.mrb[20].mxu1 %v13479_v2  ;;  %2640 = vmatmul.mubr.f32.vlgmr.msra.gmra.mrb[16].mxu0 %v13479_v2 }
 0x5ad   :  { %9346 = vmatpush1.bf16.msra.mxu1 %v12564_v11  ;;  %9378 = vmatpush1.bf16.msra.mxu0 %v12566_v12 }
 0x5ae   :  { %9348 = vmatprep.subr.bf16.mxu1 %v12570_v21  ;;  %9380 = vmatprep.subr.bf16.mxu0 %v12572_v22 }
 0x5af   :  { %2783 = vmatprep.mubr.f32.mxu1 %v13479_v2  ;;  %2854 = vmatprep.mubr.f32.mxu0 %v13479_v2  ;;  %v2700_v2 = vld [vmem:[#allocation28 + $0x168] sm:$0xff] }
 0x5b0   :  { %v12622_v29 = vpack.c.bf16 %v2700_v2, %v2696_v53 }
 0x5b1   :  { %9350 = vmatpush1.bf16.msra.mxu1 %v12578_v37  ;;  %9382 = vmatpush1.bf16.msra.mxu0 %v12580_v38 }
 0x5b2   :  { %9352 = vmatprep.subr.bf16.mxu1 %v12584_v47  ;;  %9384 = vmatprep.subr.bf16.mxu0 %v12586_v48 }
 0x5b5   :  { %9354 = vmatpush1.bf16.msra.mxu1 %v12592_v3  ;;  %9386 = vmatpush1.bf16.msra.mxu0 %v12594_v4  ;;  %v2698_v3 = vld [vmem:[#allocation28 + $0x158] sm:$0xff] }
 0x5b6   :  { %9356 = vmatprep.subr.bf16.mxu1 %v12598_v13  ;;  %9388 = vmatprep.subr.bf16.mxu0 %v12600_v14  ;;  %v2702_v4 = vld [vmem:[#allocation28 + $0x178] sm:$0xff]  ;;  %v2704_v14 = vld [vmem:[#allocation28 + $0x188] sm:$0xff] }
 0x5b7   :  { %v12624_v30 = vpack.c.bf16 %v2702_v4, %v2698_v3  ;;  %v2706_v13 = vld [vmem:[#allocation28 + $0x198] sm:$0xff]  ;;  %v2705_v3 = vld [vmem:[#allocation28 + $0x190] sm:$0xff] }
 0x5b8   :  { %v2709_v4 = vld [vmem:[#allocation28 + $0x1b0] sm:$0xff] }
 0x5b9   :  { %9358 = vmatpush1.bf16.msra.mxu1 %v12604_v45  ;;  %9390 = vmatpush1.bf16.msra.mxu0 %v12606_v46  ;;  %v2708_v45 = vld [vmem:[#allocation28 + $0x1a8] sm:$0xff]  ;;  %v2710_v46 = vld [vmem:[#allocation28 + $0x1b8] sm:$0xff]  ;;  %v12642_v26 = vpack.c.bf16 %v2709_v4, %v2705_v3 }
 0x5ba   :  { %9360 = vmatprep.subr.bf16.mxu1 %v12610_v58  ;;  %9392 = vmatprep.subr.bf16.mxu0 %v12612_v59  ;;  %v12634_v2 = vpack.c.bf16 %v2708_v45, %v2704_v14  ;;  %v12636_v53 = vpack.c.bf16 %v2710_v46, %v2706_v13  ;;  %v2712_v59 = vld [vmem:[#allocation28 + $0x1c8] sm:$0xff]  ;;  %v2714_v58 = vld [vmem:[#allocation28 + $0x1d8] sm:$0xff]  ;;  %v2715_v45 = vld [vmem:[#allocation28 + $0x1e0] sm:$0xff] }
 0x5bb   :  { %v2713_v46 = vld [vmem:[#allocation28 + $0x1d0] sm:$0xff]  ;;  %v12652_v62 = vpack.c.bf16 %v2715_v45, %v2711_v33 }
 0x5bc   :  { %v12654_v63 = vpack.c.bf16 %v2717_v34, %v2713_v46 }
 0x5bd   :  { %9362 = vmatpush1.bf16.msra.mxu1 %v12616_v9  ;;  %9394 = vmatpush1.bf16.msra.mxu0 %v12618_v10  ;;  %v2716_v9 = vld [vmem:[#allocation28 + $0x1e8] sm:$0xff]  ;;  %v2718_v10 = vld [vmem:[#allocation28 + $0x1f8] sm:$0xff] }
 0x5be   :  { %9364 = vmatprep.subr.bf16.mxu1 %v12622_v29  ;;  %9396 = vmatprep.subr.bf16.mxu0 %v12624_v30  ;;  %v12646_v13 = vpack.c.bf16 %v2716_v9, %v2712_v59  ;;  %v12648_v14 = vpack.c.bf16 %v2718_v10, %v2714_v58  ;;  %v13598_v58 = vmov 0.0  }
 0x5bf   :  { %4205 = vst.msk [vmem:[#allocation7] sm:$0xff] %vm4204_vm6, %v13598_v58  ;;  %4206 = vst.msk [vmem:[#allocation7 + $0x8] sm:$0xff] %vm4204_vm6, %v13598_v58 }
 0x5c1   :  { %9366 = vmatpush1.bf16.msra.mxu1 %v12628_v49  ;;  %9398 = vmatpush1.bf16.msra.mxu0 %v12630_v50 }
 0x5c2   :  { %9368 = vmatprep.subr.bf16.mxu1 %v12634_v2  ;;  %9400 = vmatprep.subr.bf16.mxu0 %v12636_v53 }
 0x5c5   :  { %9370 = vmatpush1.bf16.msra.mxu1 %v12640_v25  ;;  %9402 = vmatpush1.bf16.msra.mxu0 %v12642_v26 }
 0x5c6   :  { %9372 = vmatprep.subr.bf16.mxu1 %v12646_v13  ;;  %9404 = vmatprep.subr.bf16.mxu0 %v12648_v14 }
 0x5c9   :  { %9374 = vmatpush1.bf16.msra.mxu1 %v12652_v62  ;;  %9406 = vmatpush1.bf16.msra.mxu0 %v12654_v63 }
 0x5ca   :  { %9408 = vmatprep.subr.bf16.mxu1 %v12460_v7  ;;  %9440 = vmatprep.subr.bf16.mxu0 %v12462_v8  ;;  %v13491_v7 = vlaneseq }
 0x5cc   :  { %2784 = vmatmul.mubr.f32.vlgmr.msra.gmra.mrb[22].mxu1 %v13598_v58  ;;  %2855 = vmatmul.mubr.f32.vlgmr.msra.gmra.mrb[18].mxu0 %v13598_v58  ;;  %v12699_v8 = vshrl.u32 %v13491_v7, 7 }
 0x5cd   :  { %9410 = vmatpush1.bf16.msra.mxu1 %v12464_v15  ;;  %9442 = vmatpush1.bf16.msra.mxu0 %v12466_v16 }
 0x5ce   :  { %9412 = vmatprep.subr.bf16.mxu1 %v12470_v19  ;;  %9444 = vmatprep.subr.bf16.mxu0 %v12472_v20  ;;  %v12702_v15 = vsub.s32 0, %v12699_v8  ;;  %v12705_v16 = vsub.s32 2, %v12699_v8  ;;  %v1852_v19 = vld [vmem:[#allocation25] sm:$0xf]  ;;  %v12708_v20 = vsub.s32 1, %v12699_v8 }
 0x5cf   :  { %3049 = vmatprep.mubr.f32.mxu1 %v13598_v58  ;;  %3120 = vmatprep.mubr.f32.mxu0 %v13598_v58 }
 0x5d0   :  { %13599 = vst [vmem:[#allocation163_spill] sm:$0xff] %v12702_v15  ;;  %13600 = vst [vmem:[#allocation164_spill] sm:$0xff] %v12705_v16 }
 0x5d1   :  { %9414 = vmatpush1.bf16.msra.mxu1 %v12478_v27  ;;  %9446 = vmatpush1.bf16.msra.mxu0 %v12480_v28  ;;  %13601 = vst [vmem:[#allocation165_spill] sm:$0xff] %v12708_v20  ;;  %v12711_v27 = vsub.s32 3, %v12699_v8 }
 0x5d2   :  { %9416 = vmatprep.subr.bf16.mxu1 %v12484_v31  ;;  %9448 = vmatprep.subr.bf16.mxu0 %v12486_v32  ;;  %v1857_v32 = vrot.slane %v1852_v19, %v12702_v15 }
 0x5d3   :  { %13602 = vst [vmem:[#allocation166_spill] sm:$0xff] %v12711_v27 }
 0x5d5   :  { %9418 = vmatpush1.bf16.msra.mxu1 %v12492_v39  ;;  %9450 = vmatpush1.bf16.msra.mxu0 %v12494_v40  ;;  %v1865_v39 = vrot.slane %v1852_v19, %v12705_v16 }
 0x5d6   :  { %9420 = vmatprep.subr.bf16.mxu1 %v12498_v43  ;;  %9452 = vmatprep.subr.bf16.mxu0 %v12500_v44  ;;  %v1861_v44 = vrot.slane %v1852_v19, %v12708_v20 }
 0x5d9   :  { %9422 = vmatpush1.bf16.msra.mxu1 %v12504_v51  ;;  %9454 = vmatpush1.bf16.msra.mxu0 %v12506_v52  ;;  %v1869_v51 = vrot.slane %v1852_v19, %v12711_v27 }
 0x5da   :  { %9424 = vmatprep.subr.bf16.mxu1 %v12510_v56  ;;  %9456 = vmatprep.subr.bf16.mxu0 %v12512_v57 }
 0x5dd   :  { %9426 = vmatpush1.bf16.msra.mxu1 %v12516_v0  ;;  %9458 = vmatpush1.bf16.msra.mxu0 %v12518_v1 }
 0x5de   :  { %9428 = vmatprep.subr.bf16.mxu1 %v12522_v5  ;;  %9460 = vmatprep.subr.bf16.mxu0 %v12524_v6 }
 0x5e1   :  { %9430 = vmatpush1.bf16.msra.mxu1 %v12528_v17  ;;  %9462 = vmatpush1.bf16.msra.mxu0 %v12530_v18  ;;  %v2160_v18 = vld [vmem:[#allocation29] sm:$0xf] }
 0x5e2   :  { %9432 = vmatprep.subr.bf16.mxu1 %v12534_v23  ;;  %9464 = vmatprep.subr.bf16.mxu0 %v12536_v24  ;;  %v2165_v23 = vrot.slane %v2160_v18, %v12702_v15  ;;  %v2173_v24 = vrot.slane %v2160_v18, %v12705_v16 }
 0x5e5   :  { %9434 = vmatpush1.bf16.msra.mxu1 %v12540_v35  ;;  %9466 = vmatpush1.bf16.msra.mxu0 %v12542_v36  ;;  %v2169_v35 = vrot.slane %v2160_v18, %v12708_v20  ;;  %v2177_v36 = vrot.slane %v2160_v18, %v12711_v27 }
 0x5e6   :  { %9436 = vmatprep.subr.bf16.mxu1 %v12546_v41  ;;  %9468 = vmatprep.subr.bf16.mxu0 %v12548_v42 }
 0x5e9   :  { %9438 = vmatpush1.bf16.msra.mxu1 %v12552_v54  ;;  %9470 = vmatpush1.bf16.msra.mxu0 %v12554_v55 }
 0x5ea   :  { %9472 = vmatprep.subr.bf16.mxu1 %v12558_v60  ;;  %9504 = vmatprep.subr.bf16.mxu0 %v12560_v61 }
 0x63f   :  { %v2068_v28 = vpop.f32.mrb[12].mxu1  ;;  %v2111_v31 = vpop.f32.mrb[8].mxu0 }
 0x640   :  { %v2070_v40 = vpop.f32.mrb[13].mxu1  ;;  %v2113_v43 = vpop.f32.mrb[9].mxu0  ;;  %v2069_v45 = vadd.f32 %v2068_v28, %v1857_v32  ;;  %v2112_v46 = vadd.f32 %v2111_v31, %v1865_v39 }
 0x641   :  { %v2072_v52 = vpop.f32.mrb[14].mxu1  ;;  %v2115_v56 = vpop.f32.mrb[10].mxu0  ;;  %v2071_v34 = vadd.f32 %v2070_v40, %v1861_v44  ;;  %v2114_v19 = vadd.f32 %v2113_v43, %v1869_v51 }
 0x642   :  { %v12717_v57 = vadd.f32 %v2072_v52, %v1857_v32  ;;  %v12719_v0 = vadd.f32 %v2115_v56, %v1865_v39  ;;  %v2074_v1 = vpop.f32.mrb[15].mxu1  ;;  %v2117_v5 = vpop.f32.mrb[11].mxu0 }
 0x643   :  { %v12721_v6 = vadd.f32 %v2074_v1, %v1861_v44  ;;  %v12723_v17 = vadd.f32 %v2117_v5, %v1869_v51 }
 0x65f   :  { %v2376_v41 = vpop.f32.mrb[16].mxu1  ;;  %v2419_v42 = vpop.f32.mrb[12].mxu0 }
 0x660   :  { %v12729_v54 = vadd.f32 %v2376_v41, %v2165_v23  ;;  %v12731_v55 = vadd.f32 %v2419_v42, %v2173_v24  ;;  %v2378_v60 = vpop.f32.mrb[17].mxu1  ;;  %v2421_v61 = vpop.f32.mrb[13].mxu0 }
 0x661   :  { %v12733_v59 = vadd.f32 %v2378_v60, %v2169_v35  ;;  %v12735_v9 = vadd.f32 %v2421_v61, %v2177_v36  ;;  %v2380_v10 = vpop.f32.mrb[18].mxu1  ;;  %v2423_v3 = vpop.f32.mrb[14].mxu0 }
 0x662   :  { %v2382_v4 = vpop.f32.mrb[19].mxu1  ;;  %v2425_v33 = vpop.f32.mrb[15].mxu0 }
 0x67f   :  { %v2570_v52 = vpop.f32.mrb[20].mxu1  ;;  %v2641_v56 = vpop.f32.mrb[16].mxu0 }
 0x680   :  { %v2646_v1 = vadd.f32 %v2570_v52, %v2069_v45  ;;  %v2648_v5 = vadd.f32 %v2641_v56, %v2112_v46  ;;  %v2572_v18 = vpop.f32.mrb[21].mxu1  ;;  %v2643_v41 = vpop.f32.mrb[17].mxu0  ;;  %v2381_v45 = vadd.f32 %v2380_v10, %v2165_v23  ;;  %v2424_v46 = vadd.f32 %v2423_v3, %v2173_v24 }
 0x681   :  { %v2647_v42 = vadd.f32 %v2572_v18, %v2071_v34  ;;  %v2649_v7 = vadd.f32 %v2643_v41, %v2114_v19  ;;  %v2383_v34 = vadd.f32 %v2382_v4, %v2169_v35 }
 0x682   :  { %v8405_v60 = vmul.f32 -1.442695, %v2646_v1 }
 0x683   :  { %v8406_v27 = vmul.f32 -1.442695, %v2647_v42  ;;  %v8407_v61 = vmul.f32 -1.442695, %v2649_v7 }
 0x684   :  { %10463 = vpow2.f32 %v8405_v60 }
 0x685   :  { %10465 = vpow2.f32 %v8406_v27  ;;  %v2426_v27 = vadd.f32 %v2425_v33, %v2177_v36 }
 0x686   :  { %10467 = vpow2.f32 %v8407_v61 }
 0x687   :  { %10469 = vtanh.f32 %v2648_v5 }
 0x68e   :  { %v10464_v20 = vpop.eup %10463 }
 0x68f   :  { %v10466_v16 = vpop.eup %10465  ;;  %v2868_v15 = vadd.f32 1.0, %v10464_v20 }
 0x690   :  { %v2874_v28 = vadd.f32 1.0, %v10466_v16  ;;  %v10468_v31 = vpop.eup %10467 }
 0x691   :  { %10471 = vrcp.f32 %v2868_v15  ;;  %v10470_v32 = vpop.eup %10469  ;;  %v2881_v44 = vadd.f32 1.0, %v10468_v31 }
 0x692   :  { %10473 = vrcp.f32 %v2874_v28  ;;  %v13607_v28 = vld [vmem:[#allocation157_spill] sm:$0xff] }
 0x693   :  { %10475 = vrcp.f32 %v2881_v44  ;;  %v13612_v44 = vld [vmem:[#allocation162_spill] sm:$0xff] }
 0x69b   :  { %v10472_v39 = vpop.eup %10471 }
 0x69c   :  { %v10474_v40 = vpop.eup %10473  ;;  %v2904_v43 = vmul.f32 %v10472_v39, %v10470_v32  ;;  %v13609_v32 = vld [vmem:[#allocation159_spill] sm:$0xff] }
 0x69d   :  { %v2903_v51 = vmul.f32 0.0, %v10474_v40  ;;  %v10476_v23 = vpop.eup %10475 }
 0x69f   :  { %v12737_v7 = vadd.f32 %v2904_v43, %v2903_v51  ;;  %v2785_v19 = vpop.f32.mrb[22].mxu1  ;;  %v2856_v20 = vpop.f32.mrb[18].mxu0  ;;  %v13611_v43 = vld [vmem:[#allocation161_spill] sm:$0xff] }
 0x6a0   :  { %v2861_v52 = vadd.f32 %v2785_v19, %v2381_v45  ;;  %v2863_v16 = vadd.f32 %v2856_v20, %v2424_v46  ;;  %v2787_v15 = vpop.f32.mrb[23].mxu1  ;;  %v2858_v56 = vpop.f32.mrb[19].mxu0  ;;  %v4239_v51 = vld [vmem:[%s13613_s27 + $0x9] sm:$0x7f]  ;;  %v4238_v45 = vld [vmem:[%s13613_s27 + $0x1] sm:$0x7f] }
 0x6a1   :  { %10477 = vtanh.f32 %v12737_v7  ;;  %v2862_v1 = vadd.f32 %v2787_v15, %v2383_v34  ;;  %v2864_v5 = vadd.f32 %v2858_v56, %v2426_v27  ;;  %v10100_v46 = vld [vmem:[#allocation35 + $0x28] sm:$0xff]   ;;  %v10101_v19 = vld [vmem:[#allocation35 + $0x30] sm:$0xff]   ;;  %v10102_v20 = vld [vmem:[#allocation35 + $0x38] sm:$0xff]  }
 0x6a2   :  { %v8408_v18 = vmul.f32 -1.442695, %v2861_v52  ;;  %v4252_v34 = vld [vmem:[%s13613_s27 + $0xa] sm:$0x3f]  ;;  %v4251_v27 = vld [vmem:[%s13613_s27 + $0x2] sm:$0x3f] }
 0x6a3   :  { %v8409_v41 = vmul.f32 -1.442695, %v2862_v1  ;;  %v8410_v35 = vmul.f32 -1.442695, %v2864_v5  ;;  %v10103_v52 = vld [vmem:[#allocation37] sm:$0xff]   ;;  %v10107_v15 = vld [vmem:[#allocation37 + $0x10] sm:$0xff]  }
 0x6a4   :  { %10479 = vpow2.f32 %v8408_v18  ;;  %v10109_v56 = vld [vmem:[#allocation37 + $0x18] sm:$0xff]   ;;  %v10111_v1 = vld [vmem:[#allocation37 + $0x20] sm:$0xff]   ;;  %v10113_v5 = vld [vmem:[#allocation37 + $0x28] sm:$0xff]  }
 0x6a5   :  { %10481 = vpow2.f32 %v8409_v41  ;;  %v10115_v18 = vld [vmem:[#allocation37 + $0x30] sm:$0xff]   ;;  %v10117_v41 = vld [vmem:[#allocation37 + $0x38] sm:$0xff]  }
 0x6a6   :  { %10483 = vpow2.f32 %v8410_v35 }
 0x6a7   :  { %10485 = vtanh.f32 %v2863_v16  ;;  %v10105_v16 = vld [vmem:[#allocation37 + $0x8] sm:$0xff]  }
 0x6ab   :  { %v10478_v24 = vpop.eup %10477 }
 0x6ac   :  { %v12740_v36 = vmul.f32 %v10478_v24, %v10476_v23 }
 0x6ae   :  { %v10480_v10 = vpop.eup %10479  ;;  %2913 = vst [vmem:[#allocation5] sm:$0xff] %v12740_v36  ;;  %3050 = vmatmul.mubr.f32.vlgmr.msra.gmra.mrb[24].mxu1 %v12740_v36  ;;  %3121 = vmatmul.mubr.f32.vlgmr.msra.gmra.mrb[20].mxu0 %v12740_v36 }
 0x6af   :  { %v10482_v3 = vpop.eup %10481  ;;  %v2887_v4 = vadd.f32 1.0, %v10480_v10  ;;  %9474 = vmatpush1.bf16.msra.mxu1 %v12564_v11  ;;  %9506 = vmatpush1.bf16.msra.mxu0 %v12566_v12  ;;  %v13603_v11 = vld [vmem:[#allocation153_spill] sm:$0xff]  ;;  %v13604_v12 = vld [vmem:[#allocation154_spill] sm:$0xff] }
 0x6b0   :  { %v2893_v33 = vadd.f32 1.0, %v10482_v3  ;;  %9476 = vmatprep.subr.bf16.mxu1 %v12570_v21  ;;  %9508 = vmatprep.subr.bf16.mxu0 %v12572_v22  ;;  %v13605_v21 = vld [vmem:[#allocation155_spill] sm:$0xff]  ;;  %v13606_v22 = vld [vmem:[#allocation156_spill] sm:$0xff]  ;;  %v10484_v42 = vpop.eup %10483 }
 0x6b1   :  { %10487 = vrcp.f32 %v2887_v4  ;;  %3263 = vmatprep.mubr.f32.mxu1 %v13598_v58  ;;  %3334 = vmatprep.mubr.f32.mxu0 %v13598_v58  ;;  %v10486_v60 = vpop.eup %10485 }
 0x6b2   :  { %10489 = vrcp.f32 %v2893_v33 }
 0x6b3   :  { %9478 = vmatpush1.bf16.msra.mxu1 %v12578_v37  ;;  %9510 = vmatpush1.bf16.msra.mxu0 %v12580_v38  ;;  %v13608_v37 = vld [vmem:[#allocation158_spill] sm:$0xff] }
 0x6b4   :  { %9480 = vmatprep.subr.bf16.mxu1 %v12584_v47  ;;  %9512 = vmatprep.subr.bf16.mxu0 %v12586_v48  ;;  %v2900_v47 = vadd.f32 1.0, %v10484_v42  ;;  %v13610_v48 = vld [vmem:[#allocation160_spill] sm:$0xff] }
 0x6b6   :  { %10491 = vrcp.f32 %v2900_v47 }
 0x6b7   :  { %9482 = vmatpush1.bf16.msra.mxu1 %v13603_v11  ;;  %9514 = vmatpush1.bf16.msra.mxu0 %v13604_v12 }
 0x6b8   :  { %9484 = vmatprep.subr.bf16.mxu1 %v13605_v21  ;;  %9516 = vmatprep.subr.bf16.mxu0 %v13606_v22  ;;  %v4207_v22 = vld [vmem:[%s13613_s27] sm:$0x3f] }
 0x6b9   :  { %4210 = vst.msk [vmem:[#allocation7 + $0x2] sm:$0x3f] %vm4209_vm7, %v4207_v22  ;;  %v10119_v22 = vld [vmem:[#allocation41] sm:$0xff]  }
 0x6bb   :  { %v10488_v61 = vpop.eup %10487  ;;  %9486 = vmatpush1.bf16.msra.mxu1 %v13607_v28  ;;  %9518 = vmatpush1.bf16.msra.mxu0 %v13608_v37  ;;  %v4208_v28 = vld [vmem:[%s13613_s27 + $0x8] sm:$0x3f] }
 0x6bc   :  { %v10490_v38 = vpop.eup %10489  ;;  %v2909_v31 = vmul.f32 %v10488_v61, %v10486_v60  ;;  %9488 = vmatprep.subr.bf16.mxu1 %v13609_v32  ;;  %9520 = vmatprep.subr.bf16.mxu0 %v13610_v48  ;;  %4211 = vst.msk [vmem:[#allocation7 + $0xa] sm:$0x3f] %vm4209_vm7, %v4208_v28  ;;  %v10127_v28 = vld [vmem:[#allocation41 + $0x20] sm:$0xff]  }
 0x6bd   :  { %v2908_v39 = vmul.f32 0.0, %v10490_v38 }
 0x6bf   :  { %v12763_v40 = vadd.f32 %v2909_v31, %v2908_v39  ;;  %9490 = vmatpush1.bf16.msra.mxu1 %v13611_v43  ;;  %9522 = vmatpush1.bf16.msra.mxu0 %v13612_v44 }
 0x6c0   :  { %9492 = vmatprep.subr.bf16.mxu1 %v12622_v29  ;;  %9524 = vmatprep.subr.bf16.mxu0 %v12624_v30  ;;  %v10492_v29 = vpop.eup %10491 }
 0x6c1   :  { %10493 = vtanh.f32 %v12763_v40 }
 0x6c3   :  { %9494 = vmatpush1.bf16.msra.mxu1 %v12628_v49  ;;  %9526 = vmatpush1.bf16.msra.mxu0 %v12630_v50  ;;  %v10095_v50 = vld [vmem:[#allocation35] sm:$0xff]  }
 0x6c4   :  { %9496 = vmatprep.subr.bf16.mxu1 %v12634_v2  ;;  %9528 = vmatprep.subr.bf16.mxu0 %v12636_v53  ;;  %v10096_v2 = vld [vmem:[#allocation35 + $0x8] sm:$0xff]   ;;  %v10097_v53 = vld [vmem:[#allocation35 + $0x10] sm:$0xff]  }
 0x6c7   :  { %9498 = vmatpush1.bf16.msra.mxu1 %v12640_v25  ;;  %9530 = vmatpush1.bf16.msra.mxu0 %v12642_v26  ;;  %v4225_v25 = vld [vmem:[%s13613_s27] sm:$0xff] }
 0x6c8   :  { %9500 = vmatprep.subr.bf16.mxu1 %v12646_v13  ;;  %9532 = vmatprep.subr.bf16.mxu0 %v12648_v14  ;;  %v4212_v26 = vld [vmem:[%s13613_s27] sm:$0x7f]  ;;  %v10098_v13 = vld [vmem:[#allocation35 + $0x18] sm:$0xff]   ;;  %v4226_v14 = vld [vmem:[%s13613_s27 + $0x8] sm:$0xff] }
 0x6c9   :  { %4229 = vrot.lane.b32.xlu1 %v4225_v25, %s11871_s1  ;;  %4216 = vrot.lane.b32.xlu0 %v4212_v26, %s11872_s21 }
 0x6cb   :  { %v10494_v30 = vpop.eup %10493  ;;  %9502 = vmatpush1.bf16.msra.mxu1 %v12652_v62  ;;  %9534 = vmatpush1.bf16.msra.mxu0 %v12654_v63  ;;  %v4213_v62 = vld [vmem:[%s13613_s27 + $0x8] sm:$0x7f]  ;;  %v10099_v63 = vld [vmem:[#allocation35 + $0x20] sm:$0xff]  }
 0x6cc   :  { %v12780_v49 = vmul.f32 %v10494_v30, %v10492_v29  ;;  %9019 = vmatprep.subr.bf16.mxu0 %v13598_v58  ;;  %8999 = vmatprep.subr.bf16.mxu1 %v13598_v58 }
 0x6cd   :  { %4231 = vrot.lane.b32.xlu1 %v4226_v14, %s11871_s1  ;;  %4218 = vrot.lane.b32.xlu0 %v4213_v62, %s11872_s21 }
 0x6ce   :  { %2915 = vst [vmem:[#allocation6 + $0x8] sm:$0xff] %v12780_v49  ;;  %3264 = vmatmul.mubr.f32.vlgmr.msra.gmra.mrb[26].mxu1 %v12780_v49  ;;  %3335 = vmatmul.mubr.f32.vlgmr.msra.gmra.mrb[22].mxu0 %v12780_v49 }
 0x6cf   :  { %9020 = vmatpush3.bf16.msra.mxu0 %v10095_v50  ;;  %9035 = vmatprep.mubr.msk.bf16.mxu0 %vm11875_vm5, %v13598_v58 }
 0x6d0   :  { %9021 = vmatprep.subr.bf16.mxu0 %v13598_v58  ;;  %9015 = vmatprep.mubr.msk.bf16.mxu1 %vm11875_vm5, %v13598_v58 }
 0x6d1   :  { %4244 = vrot.lane.b32.xlu1 %v4239_v51, %s11873_s2  ;;  %4242 = vrot.lane.b32.xlu0 %v4238_v45, %s11873_s2 }
 0x6d2   :  { %9000 = vmatpush3.bf16.msra.mxu1 %v10103_v52  ;;  %v10104_v52 = vld [vmem:[#allocation40] sm:$0xff]  }
 0x6d3   :  { %9022 = vmatpush3.bf16.msra.mxu0 %v10096_v2  ;;  %9001 = vmatprep.subr.bf16.mxu1 %v13598_v58 }
 0x6d4   :  { %9023 = vmatprep.subr.bf16.mxu0 %v13598_v58 }
 0x6d5   :  { %4257 = vrot.lane.b32.xlu1 %v4252_v34, %s11874_s23  ;;  %4255 = vrot.lane.b32.xlu0 %v4251_v27, %s11874_s23 }
 0x6d6   :  { %9002 = vmatpush3.bf16.msra.mxu1 %v10105_v16 }
 0x6d7   :  { %9024 = vmatpush3.bf16.msra.mxu0 %v10097_v53  ;;  %9003 = vmatprep.subr.bf16.mxu1 %v13598_v58 }
 0x6d8   :  { %9025 = vmatprep.subr.bf16.mxu0 %v13598_v58 }
 0x6da   :  { %9004 = vmatpush3.bf16.msra.mxu1 %v10107_v15 }
 0x6db   :  { %9026 = vmatpush3.bf16.msra.mxu0 %v10098_v13  ;;  %9005 = vmatprep.subr.bf16.mxu1 %v13598_v58 }
 0x6dc   :  { %9027 = vmatprep.subr.bf16.mxu0 %v13598_v58 }
 0x6de   :  { %9006 = vmatpush3.bf16.msra.mxu1 %v10109_v56  ;;  %v10108_v56 = vld [vmem:[#allocation40 + $0x10] sm:$0xff]  }
 0x6df   :  { %9028 = vmatpush3.bf16.msra.mxu0 %v10099_v63  ;;  %9007 = vmatprep.subr.bf16.mxu1 %v13598_v58 }
 0x6e0   :  { %9029 = vmatprep.subr.bf16.mxu0 %v13598_v58 }
 0x6e2   :  { %9008 = vmatpush3.bf16.msra.mxu1 %v10111_v1  ;;  %v10110_v1 = vld [vmem:[#allocation40 + $0x18] sm:$0xff]  }
 0x6e3   :  { %9030 = vmatpush3.bf16.msra.mxu0 %v10100_v46  ;;  %9009 = vmatprep.subr.bf16.mxu1 %v13598_v58 }
 0x6e4   :  { %9031 = vmatprep.subr.bf16.mxu0 %v13598_v58 }
 0x6e6   :  { %9010 = vmatpush3.bf16.msra.mxu1 %v10113_v5 }
 0x6e7   :  { %9032 = vmatpush3.bf16.msra.mxu0 %v10101_v19  ;;  %9011 = vmatprep.subr.bf16.mxu1 %v13598_v58 }
 0x6e8   :  { %9033 = vmatprep.subr.bf16.mxu0 %v13598_v58 }
 0x6ea   :  { %9012 = vmatpush3.bf16.msra.mxu1 %v10115_v18 }
 0x6eb   :  { %9034 = vmatpush3.bf16.msra.mxu0 %v10102_v20  ;;  %9013 = vmatprep.subr.bf16.mxu1 %v13598_v58 }
 0x6ec   :  { %9059 = vmatprep.subr.bf16.mxu0 %v13598_v58 }
 0x6ee   :  { %9014 = vmatpush3.bf16.msra.mxu1 %v10117_v41 }
 0x6ef   :  { %9039 = vmatprep.subr.bf16.mxu1 %v13598_v58 }
 0x781   :  { %v3051_v23 = vpop.f32.mrb[24].mxu1  ;;  %v3122_v24 = vpop.f32.mrb[20].mxu0 }
 0x782   :  { %v3127_v35 = vadd.f32 %v3051_v23, %v12717_v57  ;;  %v3129_v10 = vadd.f32 %v3122_v24, %v12719_v0  ;;  %v3053_v3 = vpop.f32.mrb[25].mxu1  ;;  %v3124_v4 = vpop.f32.mrb[21].mxu0 }
 0x783   :  { %v3128_v33 = vadd.f32 %v3053_v3, %v12721_v6  ;;  %v3130_v11 = vadd.f32 %v3124_v4, %v12723_v17  ;;  %v4230_v57 = vpop.permute.xlu1 %4229  ;;  %v4217_v0 = vpop.permute.xlu0 %4216  ;;  %v10114_v4 = vld [vmem:[#allocation40 + $0x28] sm:$0xff]  }
 0x784   :  { %v8411_v12 = vmul.f32 -1.442695, %v3127_v35  ;;  %4223 = vst.msk [vmem:[#allocation7 + $0x1] sm:$0x7f] %vm4222_vm8, %v4217_v0  ;;  %v10121_v0 = vld [vmem:[#allocation41 + $0x8] sm:$0xff]  }
 0x785   :  { %v8412_v21 = vmul.f32 -1.442695, %v3128_v33  ;;  %v8413_v42 = vmul.f32 -1.442695, %v3130_v11  ;;  %4236 = vst.msk [vmem:[#allocation7] sm:$0xff] %vm4235_vm9, %v4230_v57  ;;  %v10116_v33 = vld [vmem:[#allocation40 + $0x30] sm:$0xff]  }
 0x786   :  { %10495 = vpow2.f32 %v8411_v12  ;;  %v10118_v11 = vld [vmem:[#allocation40 + $0x38] sm:$0xff]  }
 0x787   :  { %10497 = vpow2.f32 %v8412_v21  ;;  %v4232_v37 = vpop.permute.xlu1 %4231  ;;  %v4219_v38 = vpop.permute.xlu0 %4218 }
 0x788   :  { %10499 = vpow2.f32 %v8413_v42  ;;  %4224 = vst.msk [vmem:[#allocation7 + $0x9] sm:$0x7f] %vm4222_vm8, %v4219_v38  ;;  %v10120_v42 = vld [vmem:[#allocation31] sm:$0xff]   ;;  %v10129_v38 = vld [vmem:[#allocation41 + $0x28] sm:$0xff]  }
 0x789   :  { %10501 = vtanh.f32 %v3129_v10  ;;  %4237 = vst.msk [vmem:[#allocation7 + $0x8] sm:$0xff] %vm4235_vm9, %v4232_v37  ;;  %v10112_v10 = vld [vmem:[#allocation40 + $0x20] sm:$0xff]  }
 0x78a   :  { %v10128_v37 = vld [vmem:[#allocation31 + $0x20] sm:$0xff]  }
 0x78b   :  { %v4245_v31 = vpop.permute.xlu1 %4244  ;;  %v4243_v47 = vpop.permute.xlu0 %4242 }
 0x78c   :  { %4250 = vst.msk [vmem:[#allocation7 + $0x8] sm:$0x7f] %vm4248_vm10, %v4245_v31  ;;  %4249 = vst.msk [vmem:[#allocation7] sm:$0x7f] %vm4248_vm10, %v4243_v47  ;;  %v10130_v31 = vld [vmem:[#allocation31 + $0x28] sm:$0xff]  }
 0x78f   :  { %v4258_v48 = vpop.permute.xlu1 %4257  ;;  %v4256_v39 = vpop.permute.xlu0 %4255 }
 0x790   :  { %v10496_v6 = vpop.eup %10495  ;;  %4263 = vst.msk [vmem:[#allocation7 + $0x8] sm:$0x3f] %vm4261_vm11, %v4258_v48  ;;  %4262 = vst.msk [vmem:[#allocation7] sm:$0x3f] %vm4261_vm11, %v4256_v39  ;;  %v10132_v48 = vld [vmem:[#allocation31 + $0x30] sm:$0xff]  }
 0x791   :  { %v10498_v17 = vpop.eup %10497  ;;  %v3348_v60 = vadd.f32 1.0, %v10496_v6  ;;  %v10122_v6 = vld [vmem:[#allocation31 + $0x8] sm:$0xff]  }
 0x792   :  { %v3354_v61 = vadd.f32 1.0, %v10498_v17  ;;  %v10500_v32 = vpop.eup %10499  ;;  %v10123_v17 = vld [vmem:[#allocation41 + $0x10] sm:$0xff]  }
 0x793   :  { %10503 = vrcp.f32 %v3348_v60  ;;  %v10502_v43 = vpop.eup %10501  ;;  %v3361_v50 = vadd.f32 1.0, %v10500_v32  ;;  %v10125_v60 = vld [vmem:[#allocation41 + $0x18] sm:$0xff]   ;;  %v10131_v32 = vld [vmem:[#allocation41 + $0x30] sm:$0xff]  }
 0x794   :  { %10505 = vrcp.f32 %v3354_v61  ;;  %v10126_v61 = vld [vmem:[#allocation31 + $0x18] sm:$0xff]  }
 0x795   :  { %10507 = vrcp.f32 %v3361_v50  ;;  %v10135_v50 = vld [vmem:[#allocation32] sm:$0xff]  }
 0x79d   :  { %v10504_v44 = vpop.eup %10503 }
 0x79e   :  { %v10506_v29 = vpop.eup %10505  ;;  %v3384_v30 = vmul.f32 %v10504_v44, %v10502_v43  ;;  %v10133_v43 = vld [vmem:[#allocation41 + $0x38] sm:$0xff]  }
 0x79f   :  { %v3383_v2 = vmul.f32 %v10506_v29, %v12737_v7  ;;  %v10508_v7 = vpop.eup %10507  ;;  %v10134_v44 = vld [vmem:[#allocation31 + $0x38] sm:$0xff]  }
 0x7a1   :  { %v3385_v53 = vadd.f32 %v3384_v30, %v3383_v2  ;;  %v3265_v25 = vpop.f32.mrb[26].mxu1  ;;  %v3336_v26 = vpop.f32.mrb[22].mxu0 }
 0x7a2   :  { %v3341_v13 = vadd.f32 %v3265_v25, %v12729_v54  ;;  %v3343_v14 = vadd.f32 %v3336_v26, %v12731_v55  ;;  %v3267_v62 = vpop.f32.mrb[27].mxu1  ;;  %v3338_v63 = vpop.f32.mrb[23].mxu0  ;;  %v13614_v25 = vmov 0   ;;  %v10137_v26 = vld [vmem:[#allocation32 + $0x10] sm:$0xff]  }
 0x7a3   :  { %10509 = vtanh.f32 %v3385_v53  ;;  %v3342_v51 = vadd.f32 %v3267_v62, %v12733_v59  ;;  %v3344_v45 = vadd.f32 %v3338_v63, %v12735_v9  ;;  %v10106_v9 = vld [vmem:[#allocation40 + $0x8] sm:$0xff]  }
 0x7a4   :  { %v8414_v46 = vmul.f32 -1.442695, %v3341_v13  ;;  %v10136_v53 = vld [vmem:[#allocation32 + $0x8] sm:$0xff]   ;;  %v10138_v13 = vld [vmem:[#allocation32 + $0x18] sm:$0xff]  }
 0x7a5   :  { %v8415_v34 = vmul.f32 -1.442695, %v3342_v51  ;;  %v8416_v19 = vmul.f32 -1.442695, %v3344_v45  ;;  %v10140_v62 = vld [vmem:[#allocation32 + $0x28] sm:$0xff]   ;;  %v10141_v51 = vld [vmem:[#allocation32 + $0x30] sm:$0xff]  }
 0x7a6   :  { %10511 = vpow2.f32 %v8414_v46  ;;  %v10142_v46 = vld [vmem:[#allocation32 + $0x38] sm:$0xff]  }
 0x7a7   :  { %10513 = vpow2.f32 %v8415_v34 }
 0x7a8   :  { %10515 = vpow2.f32 %v8416_v19 }
 0x7a9   :  { %10517 = vtanh.f32 %v3343_v14  ;;  %v10139_v14 = vld [vmem:[#allocation32 + $0x20] sm:$0xff]  }
 0x7ad   :  { %v10510_v27 = vpop.eup %10509 }
 0x7ae   :  { %v3387_v20 = vmul.f32 %v10510_v27, %v10508_v7  ;;  %v10143_v27 = vld [vmem:[#allocation44] sm:$0xff]  }
 0x7b0   :  { %v10512_v16 = vpop.eup %10511  ;;  %3394 = vst [vmem:[#allocation5 + $0x8] sm:$0xff] %v3387_v20  ;;  %v3398_v54 = vpack.c.bf16 %v3387_v20, %v12740_v36  ;;  %v10144_v20 = vld [vmem:[#allocation44 + $0x8] sm:$0xff]  }
 0x7b1   :  { %v10514_v55 = vpop.eup %10513  ;;  %v3367_v15 = vadd.f32 1.0, %v10512_v16  ;;  %v10146_v16 = vld [vmem:[#allocation44 + $0x18] sm:$0xff]  }
 0x7b2   :  { %v3373_v59 = vadd.f32 1.0, %v10514_v55  ;;  %9036 = vmatmul.mubr.bf16.vlgmr.msra.gmra.mrb[24].mxu0 %v3398_v54  ;;  %v10516_v36 = vpop.eup %10515  ;;  %v10148_v55 = vld [vmem:[#allocation44 + $0x28] sm:$0xff]  }
 0x7b3   :  { %10519 = vrcp.f32 %v3367_v15  ;;  %9060 = vmatpush3.bf16.msra.mxu0 %v10104_v52  ;;  %9075 = vmatprep.mubr.msk.bf16.mxu0 %vm11875_vm5, %v13598_v58  ;;  %v10518_v5 = vpop.eup %10517  ;;  %v3380_v24 = vadd.f32 1.0, %v10516_v36  ;;  %v10145_v52 = vld [vmem:[#allocation44 + $0x10] sm:$0xff]   ;;  %v4265_v36 = vld [vmem:[#allocation7 + $0x8] sm:$0xff] }
 0x7b4   :  { %10521 = vrcp.f32 %v3373_v59  ;;  %9061 = vmatprep.subr.bf16.mxu0 %v13598_v58  ;;  %v10149_v15 = vld [vmem:[#allocation44 + $0x30] sm:$0xff]   ;;  %v10150_v59 = vld [vmem:[#allocation44 + $0x38] ss:$0 sps:$4 sm:$0xff]  }
 0x7b5   :  { %10523 = vrcp.f32 %v3380_v24  ;;  %v10157_v24 = vld [vmem:[#allocation47 + $0x20] ss:$16 sps:$4 sm:$0xff]  }
 0x7b7   :  { %9062 = vmatpush3.bf16.msra.mxu0 %v10106_v9  ;;  %v8452_v47 = vld [vmem:[%s8195_s3 + $0x8] sm:$0x1]  ;;  %v3842_v29 = vld [vmem:[%s3841_s29] sm:$0x1]  ;;  %v4339_v9 = vsel %vm4337_vm13, %v10150_v59, 0 }
 0x7b8   :  { %9063 = vmatprep.subr.bf16.mxu0 %v13598_v58  ;;  %v3848_v39 = vrot.slane %v8452_v47, 7  ;;  %v10190_v47 = vld [vmem:[#allocation47 + $0xc8] ss:$16 sps:$4 sm:$0xff]  }
 0x7ba   :  { %v3851_v30 = vsel %vm3850_vm12, %v3842_v29, %v3848_v39  ;;  %v10198_v39 = vld [vmem:[#allocation47 + $0xec] ss:$16 sps:$4 sm:$0xff]   ;;  %v10196_v29 = vld [vmem:[#allocation47 + $0xe8] ss:$16 sps:$4 sm:$0xff]  }
 0x7bb   :  { %9064 = vmatpush3.bf16.msra.mxu0 %v10108_v56  ;;  %v3860_v2 = vpack.c.bf16 %v3851_v30, %v3851_v30  ;;  %v4264_v56 = vld [vmem:[#allocation7] sm:$0xff] }
 0x7bc   :  { %9065 = vmatprep.subr.bf16.mxu0 %v13598_v58 }
 0x7bd   :  { %v10520_v18 = vpop.eup %10519 }
 0x7be   :  { %v10522_v41 = vpop.eup %10521  ;;  %v3389_v23 = vmul.f32 %v10520_v18, %v10518_v5  ;;  %v10153_v5 = vld [vmem:[#allocation47 + $0x4] ss:$16 sps:$4 sm:$0xff]   ;;  %v10156_v18 = vld [vmem:[#allocation47 + $0xc] ss:$16 sps:$4 sm:$0xff]  }
 0x7bf   :  { %v3388_v35 = vmul.f32 %v10522_v41, %v12763_v40  ;;  %9066 = vmatpush3.bf16.msra.mxu0 %v10110_v1  ;;  %v10524_v12 = vpop.eup %10523  ;;  %v4266_v1 = vpack.c.bf16 %v4265_v36, %v4264_v56  ;;  %v10151_v41 = vld [vmem:[#allocation47] ss:$16 sps:$4 sm:$0xff]   ;;  %v11876_v56 = vmov 1966171168  }
 0x7c0   :  { %9067 = vmatprep.subr.bf16.mxu0 %v13598_v58  ;;  %v4080_v36 = vunpack.c.l.s4 %v11876_v56  ;;  %v5004_v56 = vld [vmem:[#allocation49 + $0x8] sm:$0xff] }
 0x7c1   :  { %v3390_v3 = vadd.f32 %v3389_v23, %v3388_v35  ;;  %v10154_v23 = vld [vmem:[#allocation47 + $0x8] ss:$16 sps:$4 sm:$0xff]   ;;  %v10159_v35 = vld [vmem:[#allocation47 + $0x24] ss:$16 sps:$4 sm:$0xff]  }
 0x7c3   :  { %10525 = vtanh.f32 %v3390_v3  ;;  %9068 = vmatpush3.bf16.msra.mxu0 %v10112_v10  ;;  %v10160_v10 = vld [vmem:[#allocation47 + $0x28] ss:$16 sps:$4 sm:$0xff]   ;;  %v10162_v3 = vld [vmem:[#allocation47 + $0x2c] ss:$16 sps:$4 sm:$0xff]  }
 0x7c4   :  { %9069 = vmatprep.subr.bf16.mxu0 %v13598_v58 }
 0x7c7   :  { %9070 = vmatpush3.bf16.msra.mxu0 %v10114_v4  ;;  %v10165_v4 = vld [vmem:[#allocation47 + $0x44] ss:$16 sps:$4 sm:$0xff]  }
 0x7c8   :  { %9071 = vmatprep.subr.bf16.mxu0 %v13598_v58 }
 0x7cb   :  { %9072 = vmatpush3.bf16.msra.mxu0 %v10116_v33  ;;  %v10168_v33 = vld [vmem:[#allocation47 + $0x4c] ss:$16 sps:$4 sm:$0xff]  }
 0x7cc   :  { %9073 = vmatprep.subr.bf16.mxu0 %v13598_v58 }
 0x7cd   :  { %v10526_v40 = vpop.eup %10525 }
 0x7ce   :  { %v3392_v21 = vmul.f32 %v10526_v40, %v10524_v12  ;;  %v10166_v12 = vld [vmem:[#allocation47 + $0x48] ss:$16 sps:$4 sm:$0xff]   ;;  %v10169_v40 = vld [vmem:[#allocation47 + $0x60] ss:$16 sps:$4 sm:$0xff]  }
 0x7cf   :  { %9074 = vmatpush3.bf16.msra.mxu0 %v10118_v11  ;;  %v10163_v11 = vld [vmem:[#allocation47 + $0x40] ss:$16 sps:$4 sm:$0xff]  }
 0x7d0   :  { %3395 = vst [vmem:[#allocation6] sm:$0xff] %v3392_v21  ;;  %9099 = vmatprep.subr.bf16.mxu0 %v13598_v58  ;;  %v3401_v57 = vpack.c.bf16 %v12780_v49, %v3392_v21  ;;  %v10124_v49 = vld [vmem:[#allocation31 + $0x10] sm:$0xff]   ;;  %v10171_v21 = vld [vmem:[#allocation47 + $0x64] ss:$16 sps:$4 sm:$0xff]  }
 0x7d2   :  { %9076 = vmatmul.mubr.bf16.vlgmr.msra.gmra.mrb[28].mxu0 %v3398_v54  ;;  %9016 = vmatmul.mubr.bf16.vlgmr.msra.gmra.mrb[28].mxu1 %v3401_v57  ;;  %v10147_v54 = vld [vmem:[#allocation44 + $0x20] sm:$0xff]  }
 0x7d3   :  { %9040 = vmatpush3.bf16.msra.mxu1 %v10119_v22  ;;  %9100 = vmatpush3.bf16.msra.mxu0 %v10120_v42  ;;  %v10172_v22 = vld [vmem:[#allocation47 + $0x68] ss:$16 sps:$4 sm:$0xff]   ;;  %v10174_v42 = vld [vmem:[#allocation47 + $0x6c] ss:$16 sps:$4 sm:$0xff]  }
 0x7d4   :  { %9041 = vmatprep.subr.bf16.mxu1 %v13598_v58  ;;  %9101 = vmatprep.subr.bf16.mxu0 %v13598_v58 }
 0x7d5   :  { %9055 = vmatprep.mubr.msk.bf16.mxu1 %vm11875_vm5, %v13598_v58  ;;  %9115 = vmatprep.mubr.msk.bf16.mxu0 %vm11875_vm5, %v13598_v58 }
 0x7d7   :  { %9042 = vmatpush3.bf16.msra.mxu1 %v10121_v0  ;;  %9102 = vmatpush3.bf16.msra.mxu0 %v10122_v6  ;;  %v8453_v63 = vld [vmem:[%s8198_s15 + $0x8] sm:$0x1]  ;;  %v3853_v34 = vld [vmem:[%s3852_s16] sm:$0x1]  ;;  %v10180_v0 = vld [vmem:[#allocation47 + $0x8c] ss:$16 sps:$4 sm:$0xff]  }
 0x7d8   :  { %9043 = vmatprep.subr.bf16.mxu1 %v13598_v58  ;;  %9103 = vmatprep.subr.bf16.mxu0 %v13598_v58  ;;  %v3857_v45 = vrot.slane %v8453_v63, 7  ;;  %v10175_v6 = vld [vmem:[#allocation47 + $0x80] ss:$16 sps:$4 sm:$0xff]  }
 0x7da   :  { %v3859_v7 = vsel %vm3850_vm12, %v3853_v34, %v3857_v45 }
 0x7db   :  { %9044 = vmatpush3.bf16.msra.mxu1 %v10123_v17  ;;  %9104 = vmatpush3.bf16.msra.mxu0 %v10124_v49  ;;  %v3877_v19 = vpack.c.bf16 %v3859_v7, %v3859_v7  ;;  %v10178_v17 = vld [vmem:[#allocation47 + $0x88] ss:$16 sps:$4 sm:$0xff]   ;;  %v10183_v49 = vld [vmem:[#allocation47 + $0xa4] ss:$16 sps:$4 sm:$0xff]  }
 0x7dc   :  { %9045 = vmatprep.subr.bf16.mxu1 %v13598_v58  ;;  %9105 = vmatprep.subr.bf16.mxu0 %v13598_v58 }
 0x7df   :  { %9046 = vmatpush3.bf16.msra.mxu1 %v10125_v60  ;;  %9106 = vmatpush3.bf16.msra.mxu0 %v10126_v61  ;;  %v10186_v60 = vld [vmem:[#allocation47 + $0xac] ss:$16 sps:$4 sm:$0xff]   ;;  %v10181_v61 = vld [vmem:[#allocation47 + $0xa0] ss:$16 sps:$4 sm:$0xff]  }
 0x7e0   :  { %9047 = vmatprep.subr.bf16.mxu1 %v13598_v58  ;;  %9107 = vmatprep.subr.bf16.mxu0 %v13598_v58 }
 0x7e3   :  { %9048 = vmatpush3.bf16.msra.mxu1 %v10127_v28  ;;  %9108 = vmatpush3.bf16.msra.mxu0 %v10128_v37  ;;  %v10184_v28 = vld [vmem:[#allocation47 + $0xa8] ss:$16 sps:$4 sm:$0xff]   ;;  %v10189_v37 = vld [vmem:[#allocation47 + $0xc4] ss:$16 sps:$4 sm:$0xff]  }
 0x7e4   :  { %9049 = vmatprep.subr.bf16.mxu1 %v13598_v58  ;;  %9109 = vmatprep.subr.bf16.mxu0 %v13598_v58 }
 0x7e7   :  { %9050 = vmatpush3.bf16.msra.mxu1 %v10129_v38  ;;  %9110 = vmatpush3.bf16.msra.mxu0 %v10130_v31  ;;  %v10192_v38 = vld [vmem:[#allocation47 + $0xcc] ss:$16 sps:$4 sm:$0xff]   ;;  %v10187_v31 = vld [vmem:[#allocation47 + $0xc0] ss:$16 sps:$4 sm:$0xff]  }
 0x7e8   :  { %9051 = vmatprep.subr.bf16.mxu1 %v13598_v58  ;;  %9111 = vmatprep.subr.bf16.mxu0 %v13598_v58 }
 0x7eb   :  { %9052 = vmatpush3.bf16.msra.mxu1 %v10131_v32  ;;  %9112 = vmatpush3.bf16.msra.mxu0 %v10132_v48  ;;  %v10195_v48 = vld [vmem:[#allocation47 + $0xe4] ss:$16 sps:$4 sm:$0xff]  }
 0x7ec   :  { %9053 = vmatprep.subr.bf16.mxu1 %v13598_v58  ;;  %9113 = vmatprep.subr.bf16.mxu0 %v13598_v58 }
 0x7ef   :  { %9054 = vmatpush3.bf16.msra.mxu1 %v10133_v43  ;;  %9114 = vmatpush3.bf16.msra.mxu0 %v10134_v44  ;;  %v10193_v44 = vld [vmem:[#allocation47 + $0xe0] ss:$16 sps:$4 sm:$0xff]  }
 0x7f0   :  { %9079 = vmatprep.subr.bf16.mxu1 %v13598_v58  ;;  %4597 = vmatprep.subr.bf16.mxu0 %v10153_v5 }
 0x7f2   :  { %9056 = vmatmul.mubr.bf16.vlgmr.msra.gmra.mrb[32].mxu1 %v3401_v57  ;;  %9116 = vmatmul.mubr.bf16.vlgmr.msra.gmra.mrb[32].mxu0 %v3860_v2  ;;  %v10177_v57 = vld [vmem:[#allocation47 + $0x84] ss:$16 sps:$4 sm:$0xff]   ;;  %v10201_v2 = vld [vmem:[#allocation52 + $0x4] ss:$16 sps:$4 sm:$0xff]  }
 0x7f3   :  { %9080 = vmatpush3.bf16.msra.mxu1 %v10135_v50  ;;  %9095 = vmatprep.mubr.msk.bf16.mxu1 %vm11875_vm5, %v13598_v58 }
 0x7f4   :  { %9081 = vmatprep.subr.bf16.mxu1 %v13598_v58  ;;  %4629 = vmatprep.mubr.bf16.mxu0 %v13614_v25 }
 0x7f5   :  { %4598 = vmatpush1.bf16.msra.mxu0 %v10151_v41 }
 0x7f6   :  { %4599 = vmatprep.subr.bf16.mxu0 %v10159_v35 }
 0x7f7   :  { %9082 = vmatpush3.bf16.msra.mxu1 %v10136_v53  ;;  %v10204_v53 = vld [vmem:[#allocation52 + $0xc] ss:$16 sps:$4 sm:$0xff]  }
 0x7f8   :  { %9083 = vmatprep.subr.bf16.mxu1 %v13598_v58 }
 0x7f9   :  { %4600 = vmatpush1.bf16.msra.mxu0 %v10157_v24 }
 0x7fa   :  { %4601 = vmatprep.subr.bf16.mxu0 %v10165_v4 }
 0x7fb   :  { %9084 = vmatpush3.bf16.msra.mxu1 %v10137_v26 }
 0x7fc   :  { %9085 = vmatprep.subr.bf16.mxu1 %v13598_v58 }
 0x7fd   :  { %4602 = vmatpush1.bf16.msra.mxu0 %v10163_v11 }
 0x7fe   :  { %4603 = vmatprep.subr.bf16.mxu0 %v10171_v21  ;;  %v13618_v21 = vld [vmem:[#allocation163_spill] sm:$0xff] }
 0x7ff   :  { %9086 = vmatpush3.bf16.msra.mxu1 %v10138_v13 }
 0x800   :  { %9087 = vmatprep.subr.bf16.mxu1 %v13598_v58 }
 0x801   :  { %4604 = vmatpush1.bf16.msra.mxu0 %v10169_v40 }
 0x802   :  { %4605 = vmatprep.subr.bf16.mxu0 %v10177_v57 }
 0x803   :  { %9088 = vmatpush3.bf16.msra.mxu1 %v10139_v14 }
 0x804   :  { %9089 = vmatprep.subr.bf16.mxu1 %v13598_v58 }
 0x805   :  { %4606 = vmatpush1.bf16.msra.mxu0 %v10175_v6 }
 0x806   :  { %4607 = vmatprep.subr.bf16.mxu0 %v10183_v49  ;;  %v8473_v49 = vld [vmem:[#allocation46] ss:$0 sm:$0xff] }
 0x807   :  { %9090 = vmatpush3.bf16.msra.mxu1 %v10140_v62 }
 0x808   :  { %9091 = vmatprep.subr.bf16.mxu1 %v13598_v58 }
 0x809   :  { %4608 = vmatpush1.bf16.msra.mxu0 %v10181_v61 }
 0x80a   :  { %4609 = vmatprep.subr.bf16.mxu0 %v10189_v37 }
 0x80b   :  { %9092 = vmatpush3.bf16.msra.mxu1 %v10141_v51 }
 0x80c   :  { %9093 = vmatprep.subr.bf16.mxu1 %v13598_v58 }
 0x80d   :  { %4610 = vmatpush1.bf16.msra.mxu0 %v10187_v31 }
 0x80e   :  { %4611 = vmatprep.subr.bf16.mxu0 %v10195_v48 }
 0x80f   :  { %9094 = vmatpush3.bf16.msra.mxu1 %v10142_v46 }
 0x810   :  { %9119 = vmatprep.subr.bf16.mxu1 %v13598_v58 }
 0x811   :  { %4612 = vmatpush1.bf16.msra.mxu0 %v10193_v44  ;;  %v10205_v44 = vld [vmem:[#allocation52 + $0x20] ss:$16 sps:$4 sm:$0xff]  }
 0x812   :  { %9096 = vmatmul.mubr.bf16.vlgmr.msra.gmra.mrb[36].mxu1 %v3877_v19  ;;  %4905 = vmatprep.subr.bf16.mxu0 %v10201_v2  ;;  %v10211_v2 = vld [vmem:[#allocation52 + $0x40] ss:$16 sps:$4 sm:$0xff]  }
 0x813   :  { %9120 = vmatpush3.bf16.msra.mxu1 %v10143_v27  ;;  %9135 = vmatprep.mubr.msk.bf16.mxu1 %vm11875_vm5, %v13598_v58 }
 0x814   :  { %9121 = vmatprep.subr.bf16.mxu1 %v13598_v58 }
 0x817   :  { %9122 = vmatpush3.bf16.msra.mxu1 %v10144_v20 }
 0x818   :  { %9123 = vmatprep.subr.bf16.mxu1 %v13598_v58 }
 0x81b   :  { %9124 = vmatpush3.bf16.msra.mxu1 %v10145_v52 }
 0x81c   :  { %9125 = vmatprep.subr.bf16.mxu1 %v13598_v58 }
 0x81f   :  { %9126 = vmatpush3.bf16.msra.mxu1 %v10146_v16 }
 0x820   :  { %9127 = vmatprep.subr.bf16.mxu1 %v13598_v58 }
 0x823   :  { %9128 = vmatpush3.bf16.msra.mxu1 %v10147_v54 }
 0x824   :  { %9129 = vmatprep.subr.bf16.mxu1 %v13598_v58 }
 0x827   :  { %9130 = vmatpush3.bf16.msra.mxu1 %v10148_v55 }
 0x828   :  { %9131 = vmatprep.subr.bf16.mxu1 %v13598_v58 }
 0x82b   :  { %9132 = vmatpush3.bf16.msra.mxu1 %v10149_v15 }
 0x82c   :  { %9133 = vmatprep.subr.bf16.mxu1 %v13598_v58 }
 0x82f   :  { %9134 = vmatpush3.bf16.msra.mxu1 %v4339_v9 }
 0x830   :  { %4640 = vmatprep.subr.bf16.mxu1 %v10156_v18  ;;  %v8470_v18 = vld [vmem:[#allocation34] ss:$0 sm:$0xff] }
 0x832   :  { %9136 = vmatmul.mubr.msk.bf16.vlgmr.msra.gmra.mrb[40].mxu1 %vm4204_vm6, %v4266_v1  ;;  %v4081_v1 = vunpack.c.0.s8 %v4080_v36  ;;  %v5008_v36 = vld [vmem:[#allocation49 + $0x28] sm:$0xff] }
 0x833   :  { %4672 = vmatprep.mubr.bf16.mxu1 %v13614_v25  ;;  %4641 = vmatpush1.bf16.msra.mxu1 %v10154_v23 }
 0x834   :  { %4642 = vmatprep.subr.bf16.mxu1 %v10162_v3  ;;  %v12903_v23 = vsub.s32 %v4081_v1, %v12699_v8  ;;  %v5006_v1 = vld [vmem:[#allocation49 + $0x18] sm:$0xff] }
 0x836   :  { %13617 = vst [vmem:[#allocation155_spill] sm:$0xff] %v12903_v23 }
 0x837   :  { %4643 = vmatpush1.bf16.msra.mxu1 %v10160_v10 }
 0x838   :  { %4644 = vmatprep.subr.bf16.mxu1 %v10168_v33  ;;  %v8433_v33 = vld [vmem:[#allocation38] ss:$0 sm:$0xff] }
 0x83b   :  { %4645 = vmatpush1.bf16.msra.mxu1 %v10166_v12 }
 0x83c   :  { %4646 = vmatprep.subr.bf16.mxu1 %v10174_v42 }
 0x83f   :  { %4647 = vmatpush1.bf16.msra.mxu1 %v10172_v22 }
 0x840   :  { %4648 = vmatprep.subr.bf16.mxu1 %v10180_v0 }
 0x843   :  { %4649 = vmatpush1.bf16.msra.mxu1 %v10178_v17 }
 0x844   :  { %4650 = vmatprep.subr.bf16.mxu1 %v10186_v60 }
 0x847   :  { %4651 = vmatpush1.bf16.msra.mxu1 %v10184_v28 }
 0x848   :  { %4652 = vmatprep.subr.bf16.mxu1 %v10192_v38 }
 0x84b   :  { %4653 = vmatpush1.bf16.msra.mxu1 %v10190_v47  ;;  %v10199_v47 = vld [vmem:[#allocation52] ss:$16 sps:$4 sm:$0xff]  }
 0x84c   :  { %4654 = vmatprep.subr.bf16.mxu1 %v10198_v39  ;;  %v10207_v39 = vld [vmem:[#allocation52 + $0x24] ss:$16 sps:$4 sm:$0xff]  }
 0x84f   :  { %4655 = vmatpush1.bf16.msra.mxu1 %v10196_v29  ;;  %v10208_v29 = vld [vmem:[#allocation52 + $0x28] ss:$16 sps:$4 sm:$0xff]  }
 0x850   :  { %4948 = vmatprep.subr.bf16.mxu1 %v10204_v53  ;;  %v10214_v53 = vld [vmem:[#allocation52 + $0x48] ss:$16 sps:$4 sm:$0xff]  }
 0x885   :  { %v3605_v32 = vpop.f32.mrb[24].mxu0 }
 0x886   :  { %v9037_v43 = vpop.f32.mrb[25].mxu0 }
 0x887   :  { %v3608_v30 = vpop.f32.mrb[26].mxu0  ;;  %v10210_v43 = vld [vmem:[#allocation52 + $0x2c] ss:$16 sps:$4 sm:$0xff]  }
 0x888   :  { %v9038_v50 = vpop.f32.mrb[27].mxu0 }
 0x889   :  { %v10216_v50 = vld [vmem:[#allocation52 + $0x4c] ss:$16 sps:$4 sm:$0xff]  }
 0x8a5   :  { %v3824_v26 = vpop.f32.mrb[28].mxu0  ;;  %v3516_v13 = vpop.f32.mrb[28].mxu1 }
 0x8a6   :  { %v3606_v14 = vadd.f32 %v3605_v32, %v3516_v13  ;;  %v9077_v62 = vpop.f32.mrb[29].mxu0  ;;  %v9017_v63 = vpop.f32.mrb[29].mxu1  ;;  %v10202_v32 = vld [vmem:[#allocation52 + $0x8] ss:$16 sps:$4 sm:$0xff]   ;;  %v10222_v13 = vld [vmem:[#allocation52 + $0x6c] ss:$16 sps:$4 sm:$0xff]  }
 0x8a7   :  { %v3827_v51 = vpop.f32.mrb[30].mxu0  ;;  %v3519_v45 = vpop.f32.mrb[30].mxu1  ;;  %v10220_v62 = vld [vmem:[#allocation52 + $0x68] ss:$16 sps:$4 sm:$0xff]   ;;  %v10225_v63 = vld [vmem:[#allocation52 + $0x84] ss:$16 sps:$4 sm:$0xff]  }
 0x8a8   :  { %v3609_v46 = vadd.f32 %v3608_v30, %v3519_v45  ;;  %v9078_v34 = vpop.f32.mrb[31].mxu0  ;;  %v9018_v7 = vpop.f32.mrb[31].mxu1  ;;  %v3619_v40 = vadd.f32 %v8433_v33, %v3606_v14  ;;  %v10213_v30 = vld [vmem:[#allocation52 + $0x44] ss:$16 sps:$4 sm:$0xff]   ;;  %v10217_v14 = vld [vmem:[#allocation52 + $0x60] ss:$16 sps:$4 sm:$0xff]  }
 0x8a9   :  { %v10223_v45 = vld [vmem:[#allocation52 + $0x80] ss:$16 sps:$4 sm:$0xff]   ;;  %v10231_v34 = vld [vmem:[#allocation52 + $0xa4] ss:$16 sps:$4 sm:$0xff]   ;;  %v10234_v7 = vld [vmem:[#allocation52 + $0xac] ss:$16 sps:$4 sm:$0xff]  }
 0x8aa   :  { %v3620_v57 = vadd.f32 %v8433_v33, %v3609_v46  ;;  %v10226_v46 = vld [vmem:[#allocation52 + $0x88] ss:$16 sps:$4 sm:$0xff]   ;;  %v5009_v33 = vld [vmem:[#allocation49 + $0x30] sm:$0xff] }
 0x8c5   :  { %v3735_v27 = vpop.f32.mrb[32].mxu1  ;;  %v4064_v19 = vpop.f32.mrb[32].mxu0 }
 0x8c6   :  { %v12898_v20 = vadd.f32 %v3824_v26, %v3735_v27  ;;  %v9057_v52 = vpop.f32.mrb[33].mxu1  ;;  %v9117_v16 = vpop.f32.mrb[33].mxu0  ;;  %v10219_v26 = vld [vmem:[#allocation52 + $0x64] ss:$16 sps:$4 sm:$0xff]   ;;  %v10229_v27 = vld [vmem:[#allocation52 + $0xa0] ss:$16 sps:$4 sm:$0xff]  }
 0x8c7   :  { %v3738_v54 = vpop.f32.mrb[34].mxu1  ;;  %v4067_v55 = vpop.f32.mrb[34].mxu0  ;;  %v10237_v52 = vld [vmem:[#allocation52 + $0xc4] ss:$16 sps:$4 sm:$0xff]   ;;  %v10240_v16 = vld [vmem:[#allocation52 + $0xcc] ss:$16 sps:$4 sm:$0xff]  }
 0x8c8   :  { %13615 = vst [vmem:[#allocation153_spill] sm:$0xff] %v12898_v20  ;;  %v12900_v15 = vadd.f32 %v3827_v51, %v3738_v54  ;;  %v9058_v59 = vpop.f32.mrb[35].mxu1  ;;  %v9118_v9 = vpop.f32.mrb[35].mxu0  ;;  %v10228_v51 = vld [vmem:[#allocation52 + $0x8c] ss:$16 sps:$4 sm:$0xff]  }
 0x8c9   :  { %v10235_v54 = vld [vmem:[#allocation52 + $0xc0] ss:$16 sps:$4 sm:$0xff]   ;;  %v10238_v55 = vld [vmem:[#allocation52 + $0xc8] ss:$16 sps:$4 sm:$0xff]   ;;  %v10243_v59 = vld [vmem:[#allocation52 + $0xe4] ss:$16 sps:$4 sm:$0xff]  }
 0x8ca   :  { %13616 = vst [vmem:[#allocation154_spill] sm:$0xff] %v12900_v15  ;;  %v10246_v9 = vld [vmem:[#allocation52 + $0xec] ss:$16 sps:$4 sm:$0xff]  }
 0x8cb   :  { %v5249_v15 = vld [vmem:[#allocation53 + $0xf8] sm:$0xff]  ;;  %v5251_v20 = vld [vmem:[#allocation53 + $0x108] sm:$0xff] }
 0x8e5   :  { %v3976_v5 = vpop.f32.mrb[36].mxu1 }
 0x8e6   :  { %v4065_v41 = vadd.f32 %v4064_v19, %v3976_v5  ;;  %v9097_v24 = vpop.f32.mrb[37].mxu1  ;;  %v10232_v19 = vld [vmem:[#allocation52 + $0xa8] ss:$16 sps:$4 sm:$0xff]  }
 0x8e7   :  { %v3979_v35 = vpop.f32.mrb[38].mxu1  ;;  %v5010_v5 = vld [vmem:[#allocation49 + $0x38] sm:$0xff]  ;;  %v5003_v24 = vld [vmem:[#allocation49] sm:$0xff] }
 0x8e8   :  { %v4077_v10 = vadd.f32 %v8470_v18, %v4065_v41  ;;  %v9098_v3 = vpop.f32.mrb[39].mxu1  ;;  %v10241_v18 = vld [vmem:[#allocation52 + $0xe0] ss:$16 sps:$4 sm:$0xff]   ;;  %v10244_v41 = vld [vmem:[#allocation52 + $0xe8] ss:$16 sps:$4 sm:$0xff]  }
 0x8e9   :  { %v5007_v35 = vld [vmem:[#allocation49 + $0x20] sm:$0xff]  ;;  %v12918_v3 = vpack.c.bf16 %v5010_v5, %v5006_v1  ;;  %v5041_v1 = vld [vmem:[#allocation49 + $0x130] sm:$0xff]  ;;  %v5044_v5 = vld [vmem:[#allocation49 + $0x148] sm:$0xff] }
 0x8ea   :  { %v4085_v4 = vrot.slane %v4077_v10, %v12903_v23  ;;  %v12916_v10 = vpack.c.bf16 %v5008_v36, %v5004_v56  ;;  %v5037_v36 = vld [vmem:[#allocation49 + $0x110] sm:$0xff] }
 0x8ec   :  { %v4086_v11 = vcombine.high %v4085_v4, %v4085_v4  ;;  %v4093_v12 = vrot.slane %v4085_v4, %v12903_v23  ;;  %v5005_v4 = vld [vmem:[#allocation49 + $0x10] sm:$0xff] }
 0x8ee   :  { %v4104_v22 = vrot.slane %v4093_v12, %v13618_v21  ;;  %v4100_v42 = vrot.slane %v4086_v11, %v12903_v23  ;;  %v5012_v11 = vld [vmem:[#allocation49 + $0x48] sm:$0xff] }
 0x8ef   :  { %v5016_v12 = vld [vmem:[#allocation49 + $0x68] sm:$0xff] }
 0x8f0   :  { %v4111_v0 = vmul.f32 %v4104_v22, %v3619_v40  ;;  %v4108_v6 = vrot.slane %v4100_v42, %v13618_v21  ;;  %v5014_v40 = vld [vmem:[#allocation49 + $0x58] sm:$0xff]  ;;  %v12920_v42 = vpack.c.bf16 %v5007_v35, %v5003_v24  ;;  %v5255_v23 = vld [vmem:[#allocation53 + $0x128] sm:$0xff] }
 0x8f1   :  { %v5018_v22 = vld [vmem:[#allocation49 + $0x78] sm:$0xff] }
 0x8f2   :  { %4113 = vadd.xlane.f32.xlu0 %v4111_v0  ;;  %v4112_v17 = vmul.f32 %v4108_v6, %v3620_v57  ;;  %v12922_v57 = vpack.c.bf16 %v5009_v33, %v5005_v4  ;;  %v5011_v0 = vld [vmem:[#allocation49 + $0x40] sm:$0xff]  ;;  %v5050_v24 = vld [vmem:[#allocation49 + $0x178] sm:$0xff]  ;;  %v12974_v4 = vpack.c.bf16 %v5041_v1, %v5037_v36  ;;  %v5223_v36 = vld [vmem:[#allocation53 + $0x28] sm:$0xff] }
 0x8f3   :  { %v5015_v6 = vld [vmem:[#allocation49 + $0x60] sm:$0xff] }
 0x8f4   :  { %4115 = vadd.xlane.f32.xlu1 %v4112_v17  ;;  %v12926_v17 = vpack.c.bf16 %v5016_v12, %v5012_v11  ;;  %v5043_v33 = vld [vmem:[#allocation49 + $0x140] sm:$0xff] }
 0x8f5   :  { %v5047_v11 = vld [vmem:[#allocation49 + $0x160] sm:$0xff] }
 0x8f6   :  { %v5221_v1 = vld [vmem:[#allocation53 + $0x18] sm:$0xff] }
 0x905   :  { %v4375_v60 = vpop.f32.mrb[40].mxu1 }
 0x906   :  { %v9137_v61 = vpop.f32.mrb[41].mxu1  ;;  %v4376_v37 = vadd.f32 %v8473_v49, %v4375_v60  ;;  %v5013_v60 = vld [vmem:[#allocation49 + $0x50] sm:$0xff] }
 0x907   :  { %v4378_v28 = vpop.f32.mrb[42].mxu1  ;;  %v5017_v61 = vld [vmem:[#allocation49 + $0x70] sm:$0xff] }
 0x908   :  { %v4379_v38 = vadd.f32 %v8473_v49, %v4378_v28  ;;  %v9138_v31 = vpop.f32.mrb[43].mxu1  ;;  %v12928_v49 = vpack.c.bf16 %v5018_v22, %v5014_v40  ;;  %v5020_v28 = vld [vmem:[#allocation49 + $0x88] sm:$0xff]  ;;  %v5045_v22 = vld [vmem:[#allocation49 + $0x150] sm:$0xff] }
 0x909   :  { %v5026_v31 = vld [vmem:[#allocation49 + $0xb8] sm:$0xff] }
 0x90a   :  { %v12910_v48 = vpack.c.bf16 %v4379_v38, %v4376_v37  ;;  %v5024_v37 = vld [vmem:[#allocation49 + $0xa8] sm:$0xff]  ;;  %v5022_v38 = vld [vmem:[#allocation49 + $0x98] sm:$0xff] }
 0x90c   :  { %4630 = vmatmul.mubr.bf16.vlgmr.msra.gmra.mrb[36].mxu0 %v12910_v48  ;;  %4673 = vmatmul.mubr.bf16.vlgmr.msra.gmra.mrb[44].mxu1 %v12910_v48 }
 0x90d   :  { %4906 = vmatpush1.bf16.msra.mxu0 %v10199_v47  ;;  %4949 = vmatpush1.bf16.msra.mxu1 %v10202_v32  ;;  %v12934_v47 = vpack.c.bf16 %v5015_v6, %v5011_v0  ;;  %v12936_v32 = vpack.c.bf16 %v5017_v61, %v5013_v60  ;;  %v5049_v0 = vld [vmem:[#allocation49 + $0x170] sm:$0xff]  ;;  %v5052_v6 = vld [vmem:[#allocation49 + $0x188] sm:$0xff]  ;;  %v5054_v61 = vld [vmem:[#allocation49 + $0x198] sm:$0xff] }
 0x90e   :  { %4907 = vmatprep.subr.bf16.mxu0 %v10207_v39  ;;  %4950 = vmatprep.subr.bf16.mxu1 %v10210_v43  ;;  %v5019_v39 = vld [vmem:[#allocation49 + $0x80] sm:$0xff]  ;;  %v5056_v60 = vld [vmem:[#allocation49 + $0x1a8] sm:$0xff] }
 0x90f   :  { %4937 = vmatprep.mubr.bf16.mxu0 %v13614_v25  ;;  %4980 = vmatprep.mubr.bf16.mxu1 %v13614_v25  ;;  %v5023_v43 = vld [vmem:[#allocation49 + $0xa0] sm:$0xff] }
 0x910   :  { %v5253_v25 = vld [vmem:[#allocation53 + $0x118] sm:$0xff] }
 0x911   :  { %4908 = vmatpush1.bf16.msra.mxu0 %v10205_v44  ;;  %4951 = vmatpush1.bf16.msra.mxu1 %v10208_v29  ;;  %v12940_v44 = vpack.c.bf16 %v5024_v37, %v5020_v28  ;;  %v12942_v29 = vpack.c.bf16 %v5026_v31, %v5022_v38  ;;  %v5058_v28 = vld [vmem:[#allocation49 + $0x1b8] sm:$0xff]  ;;  %v12984_v37 = vpack.c.bf16 %v5047_v11, %v5043_v33  ;;  %v5051_v31 = vld [vmem:[#allocation49 + $0x180] sm:$0xff] }
 0x912   :  { %4909 = vmatprep.subr.bf16.mxu0 %v10213_v30  ;;  %4952 = vmatprep.subr.bf16.mxu1 %v10216_v50  ;;  %v5021_v30 = vld [vmem:[#allocation49 + $0x90] sm:$0xff]  ;;  %v5028_v50 = vld [vmem:[#allocation49 + $0xc8] sm:$0xff]  ;;  %v12986_v38 = vpack.c.bf16 %v5049_v0, %v5045_v22 }
 0x913   :  { %v5222_v33 = vld [vmem:[#allocation53 + $0x20] sm:$0xff]  ;;  %v5220_v0 = vld [vmem:[#allocation53 + $0x10] sm:$0xff] }
 0x915   :  { %4910 = vmatpush1.bf16.msra.mxu0 %v10211_v2  ;;  %4953 = vmatpush1.bf16.msra.mxu1 %v10214_v53  ;;  %v5032_v2 = vld [vmem:[#allocation49 + $0xe8] sm:$0xff]  ;;  %v5030_v53 = vld [vmem:[#allocation49 + $0xd8] sm:$0xff] }
 0x916   :  { %4911 = vmatprep.subr.bf16.mxu0 %v10219_v26  ;;  %4954 = vmatprep.subr.bf16.mxu1 %v10222_v13  ;;  %v5034_v26 = vld [vmem:[#allocation49 + $0xf8] sm:$0xff]  ;;  %v12948_v13 = vpack.c.bf16 %v5023_v43, %v5019_v39  ;;  %v5055_v39 = vld [vmem:[#allocation49 + $0x1a0] sm:$0xff]  ;;  %v12990_v43 = vpack.c.bf16 %v5056_v60, %v5052_v6  ;;  %v5227_v60 = vld [vmem:[#allocation53 + $0x48] sm:$0xff] }
 0x917   :  { %v5224_v6 = vld [vmem:[#allocation53 + $0x30] sm:$0xff] }
 0x919   :  { %4912 = vmatpush1.bf16.msra.mxu0 %v10217_v14  ;;  %4955 = vmatpush1.bf16.msra.mxu1 %v10220_v62  ;;  %v5027_v62 = vld [vmem:[#allocation49 + $0xc0] sm:$0xff] }
 0x91a   :  { %4913 = vmatprep.subr.bf16.mxu0 %v10225_v63  ;;  %4956 = vmatprep.subr.bf16.mxu1 %v10228_v51  ;;  %v5031_v63 = vld [vmem:[#allocation49 + $0xe0] sm:$0xff]  ;;  %v12954_v51 = vpack.c.bf16 %v5032_v2, %v5028_v50  ;;  %v5057_v50 = vld [vmem:[#allocation49 + $0x1b0] sm:$0xff]  ;;  %v5060_v2 = vld [vmem:[#allocation49 + $0x1c8] sm:$0xff] }
 0x91d   :  { %4914 = vmatpush1.bf16.msra.mxu0 %v10223_v45  ;;  %4957 = vmatpush1.bf16.msra.mxu1 %v10226_v46  ;;  %v12956_v45 = vpack.c.bf16 %v5034_v26, %v5030_v53  ;;  %v5029_v46 = vld [vmem:[#allocation49 + $0xd0] sm:$0xff]  ;;  %v5064_v53 = vld [vmem:[#allocation49 + $0x1e8] sm:$0xff]  ;;  %v5062_v26 = vld [vmem:[#allocation49 + $0x1d8] sm:$0xff] }
 0x91e   :  { %4915 = vmatprep.subr.bf16.mxu0 %v10231_v34  ;;  %4958 = vmatprep.subr.bf16.mxu1 %v10234_v7  ;;  %v5033_v34 = vld [vmem:[#allocation49 + $0xf0] sm:$0xff]  ;;  %v5036_v7 = vld [vmem:[#allocation49 + $0x108] sm:$0xff] }
 0x921   :  { %4916 = vmatpush1.bf16.msra.mxu0 %v10229_v27  ;;  %4959 = vmatpush1.bf16.msra.mxu1 %v10232_v19  ;;  %v5040_v27 = vld [vmem:[#allocation49 + $0x128] sm:$0xff]  ;;  %v5038_v19 = vld [vmem:[#allocation49 + $0x118] sm:$0xff] }
 0x922   :  { %4917 = vmatprep.subr.bf16.mxu0 %v10237_v52  ;;  %4960 = vmatprep.subr.bf16.mxu1 %v10240_v16  ;;  %v5042_v52 = vld [vmem:[#allocation49 + $0x138] sm:$0xff]  ;;  %v12960_v16 = vpack.c.bf16 %v5031_v63, %v5027_v62  ;;  %v12996_v63 = vpack.c.bf16 %v5055_v39, %v5051_v31 }
 0x923   :  { %v12968_v56 = vpack.c.bf16 %v5042_v52, %v5038_v19  ;;  %v5066_v62 = vld [vmem:[#allocation49 + $0x1f8] sm:$0xff]  ;;  %v5061_v52 = vld [vmem:[#allocation49 + $0x1d0] sm:$0xff] }
 0x924   :  { %v13004_v19 = vpack.c.bf16 %v5066_v62, %v5062_v26  ;;  %v5233_v31 = vld [vmem:[#allocation53 + $0x78] sm:$0xff]  ;;  %v5228_v62 = vld [vmem:[#allocation53 + $0x50] sm:$0xff] }
 0x925   :  { %4918 = vmatpush1.bf16.msra.mxu0 %v10235_v54  ;;  %4961 = vmatpush1.bf16.msra.mxu1 %v10238_v55  ;;  %v12962_v54 = vpack.c.bf16 %v5033_v34, %v5029_v46  ;;  %v5035_v55 = vld [vmem:[#allocation49 + $0x100] sm:$0xff] }
 0x926   :  { %4919 = vmatprep.subr.bf16.mxu0 %v10243_v59  ;;  %4962 = vmatprep.subr.bf16.mxu1 %v10246_v9  ;;  %v5039_v59 = vld [vmem:[#allocation49 + $0x120] sm:$0xff]  ;;  %v12966_v9 = vpack.c.bf16 %v5040_v27, %v5036_v7  ;;  %v13002_v27 = vpack.c.bf16 %v5064_v53, %v5060_v2 }
 0x927   :  { %v12972_v35 = vpack.c.bf16 %v5039_v59, %v5035_v55  ;;  %v5059_v34 = vld [vmem:[#allocation49 + $0x1c0] sm:$0xff]  ;;  %v5065_v55 = vld [vmem:[#allocation49 + $0x1f0] sm:$0xff] }
 0x928   :  { %v5063_v7 = vld [vmem:[#allocation49 + $0x1e0] sm:$0xff]  ;;  %v5219_v59 = vld [vmem:[#allocation53 + $0x8] sm:$0xff] }
 0x929   :  { %4920 = vmatpush1.bf16.msra.mxu0 %v10241_v18  ;;  %4963 = vmatpush1.bf16.msra.mxu1 %v10244_v41  ;;  %v5048_v18 = vld [vmem:[#allocation49 + $0x168] sm:$0xff]  ;;  %v5046_v41 = vld [vmem:[#allocation49 + $0x158] sm:$0xff]  ;;  %v13014_v11 = vpack.c.bf16 %v5223_v36, %v5219_v59 }
 0x92a   :  { %9536 = vmatprep.subr.bf16.mxu0 %v12916_v10  ;;  %9568 = vmatprep.subr.bf16.mxu1 %v12918_v3  ;;  %v12978_v12 = vpack.c.bf16 %v5048_v18, %v5044_v5  ;;  %v12980_v40 = vpack.c.bf16 %v5050_v24, %v5046_v41  ;;  %v5225_v5 = vld [vmem:[#allocation53 + $0x38] sm:$0xff]  ;;  %v13008_v18 = vpack.c.bf16 %v5063_v7, %v5059_v34  ;;  %v5218_v24 = vld [vmem:[#allocation53] sm:$0xff]  ;;  %v5232_v34 = vld [vmem:[#allocation53 + $0x70] sm:$0xff] }
 0x92b   :  { %v13010_v41 = vpack.c.bf16 %v5065_v55, %v5061_v52  ;;  %v13016_v22 = vpack.c.bf16 %v5225_v5, %v5221_v1  ;;  %v13020_v39 = vpack.c.bf16 %v5222_v33, %v5218_v24  ;;  %v5230_v2 = vld [vmem:[#allocation53 + $0x60] sm:$0xff]  ;;  %v5235_v7 = vld [vmem:[#allocation53 + $0x88] sm:$0xff]  ;;  %v5237_v55 = vld [vmem:[#allocation53 + $0x98] sm:$0xff]  ;;  %v13036_v1 = vpack.c.bf16 %v5232_v34, %v5228_v62 }
 0x92c   :  { %4938 = vmatmul.mubr.bf16.vlgmr.msra.gmra.mrb[40].mxu0 %v12910_v48  ;;  %4981 = vmatmul.mubr.bf16.vlgmr.msra.gmra.mrb[48].mxu1 %v12910_v48  ;;  %v5025_v48 = vld [vmem:[#allocation49 + $0xb0] sm:$0xff]  ;;  %v5241_v59 = vld [vmem:[#allocation53 + $0xb8] sm:$0xff]  ;;  %v5234_v5 = vld [vmem:[#allocation53 + $0x80] sm:$0xff] }
 0x92d   :  { %9538 = vmatpush1.bf16.msra.mxu0 %v12920_v42  ;;  %9570 = vmatpush1.bf16.msra.mxu1 %v12922_v57  ;;  %v12950_v14 = vpack.c.bf16 %v5025_v48, %v5021_v30  ;;  %v12992_v30 = vpack.c.bf16 %v5058_v28, %v5054_v61  ;;  %v5053_v48 = vld [vmem:[#allocation49 + $0x190] sm:$0xff]  ;;  %v5229_v28 = vld [vmem:[#allocation53 + $0x58] sm:$0xff]  ;;  %13619 = vst [vmem:[#allocation156_spill] sm:$0xff] %v13036_v1  ;;  %v5238_v24 = vld [vmem:[#allocation53 + $0xa0] sm:$0xff] }
 0x92e   :  { %9540 = vmatprep.subr.bf16.mxu0 %v12926_v17  ;;  %9572 = vmatprep.subr.bf16.mxu1 %v12928_v49  ;;  %v12998_v46 = vpack.c.bf16 %v5057_v50, %v5053_v48  ;;  %v5231_v61 = vld [vmem:[#allocation53 + $0x68] sm:$0xff]  ;;  %v13022_v48 = vpack.c.bf16 %v5224_v6, %v5220_v0  ;;  %v5226_v50 = vld [vmem:[#allocation53 + $0x40] sm:$0xff]  ;;  %v13028_v26 = vpack.c.bf16 %v5233_v31, %v5229_v28  ;;  %v5236_v6 = vld [vmem:[#allocation53 + $0x90] sm:$0xff] }
 0x92f   :  { %5131 = vmatprep.mubr.f32.mxu0 %v13598_v58  ;;  %5202 = vmatprep.mubr.f32.mxu1 %v13598_v58  ;;  %v13026_v53 = vpack.c.bf16 %v5231_v61, %v5227_v60  ;;  %v5239_v52 = vld [vmem:[#allocation53 + $0xa8] sm:$0xff]  ;;  %v13034_v36 = vpack.c.bf16 %v5230_v2, %v5226_v50  ;;  %v13042_v0 = vpack.c.bf16 %v5241_v59, %v5237_v55  ;;  %v5240_v60 = vld [vmem:[#allocation53 + $0xb0] sm:$0xff]  ;;  %v5245_v31 = vld [vmem:[#allocation53 + $0xd8] sm:$0xff] }
 0x930   :  { %v13040_v33 = vpack.c.bf16 %v5239_v52, %v5235_v7  ;;  %v5243_v61 = vld [vmem:[#allocation53 + $0xc8] sm:$0xff]  ;;  %v13048_v50 = vpack.c.bf16 %v5238_v24, %v5234_v5  ;;  %v13050_v2 = vpack.c.bf16 %v5240_v60, %v5236_v6  ;;  %v5242_v62 = vld [vmem:[#allocation53 + $0xc0] sm:$0xff]  ;;  %v13056_v52 = vpack.c.bf16 %v5249_v15, %v5245_v31  ;;  %v5244_v55 = vld [vmem:[#allocation53 + $0xd0] sm:$0xff] }
 0x931   :  { %9542 = vmatpush1.bf16.msra.mxu0 %v12934_v47  ;;  %9574 = vmatpush1.bf16.msra.mxu1 %v12936_v32  ;;  %13621 = vst [vmem:[#allocation158_spill] sm:$0xff] %v13042_v0  ;;  %v5247_v28 = vld [vmem:[#allocation53 + $0xe8] sm:$0xff]  ;;  %v5246_v34 = vld [vmem:[#allocation53 + $0xe0] sm:$0xff]  ;;  %v5248_v59 = vld [vmem:[#allocation53 + $0xf0] sm:$0xff]  ;;  %v13066_v15 = vpack.c.bf16 %v5255_v23, %v5251_v20 }
 0x932   :  { %9544 = vmatprep.subr.bf16.mxu0 %v12940_v44  ;;  %9576 = vmatprep.subr.bf16.mxu1 %v12942_v29  ;;  %13620 = vst [vmem:[#allocation157_spill] sm:$0xff] %v13040_v33  ;;  %13622 = vst [vmem:[#allocation159_spill] sm:$0xff] %v13048_v50  ;;  %v13054_v7 = vpack.c.bf16 %v5247_v28, %v5243_v61  ;;  %v13060_v5 = vpack.c.bf16 %v5246_v34, %v5242_v62  ;;  %v5250_v6 = vld [vmem:[#allocation53 + $0x100] sm:$0xff]  ;;  %v5252_v28 = vld [vmem:[#allocation53 + $0x110] sm:$0xff] }
 0x933   :  { %13623 = vst [vmem:[#allocation160_spill] sm:$0xff] %v13050_v2  ;;  %13625 = vst [vmem:[#allocation162_spill] sm:$0xff] %v13056_v52  ;;  %v13062_v24 = vpack.c.bf16 %v5248_v59, %v5244_v55  ;;  %v5254_v60 = vld [vmem:[#allocation53 + $0x120] sm:$0xff]  ;;  %v5256_v31 = vld [vmem:[#allocation53 + $0x130] sm:$0xff] }
 0x934   :  { %13624 = vst [vmem:[#allocation161_spill] sm:$0xff] %v13054_v7  ;;  %13626 = vst [vmem:[#allocation163_spill] sm:$0xff] %v13060_v5  ;;  %v13072_v62 = vpack.c.bf16 %v5254_v60, %v5250_v6  ;;  %v13074_v34 = vpack.c.bf16 %v5256_v31, %v5252_v28  ;;  %v5258_v55 = vld [vmem:[#allocation53 + $0x140] sm:$0xff]  ;;  %v5260_v23 = vld [vmem:[#allocation53 + $0x150] sm:$0xff] }
 0x935   :  { %9546 = vmatpush1.bf16.msra.mxu0 %v12948_v13  ;;  %9578 = vmatpush1.bf16.msra.mxu1 %v12950_v14  ;;  %13627 = vst [vmem:[#allocation167_spill] sm:$0xff] %v13062_v24  ;;  %13628 = vst [vmem:[#allocation168_spill] sm:$0xff] %v13066_v15  ;;  %v5262_v59 = vld [vmem:[#allocation53 + $0x160] sm:$0xff] }
 0x936   :  { %9548 = vmatprep.subr.bf16.mxu0 %v12954_v51  ;;  %9580 = vmatprep.subr.bf16.mxu1 %v12956_v45  ;;  %13630 = vst [vmem:[#allocation170_spill] sm:$0xff] %v13072_v62  ;;  %13631 = vst [vmem:[#allocation171_spill] sm:$0xff] %v13074_v34  ;;  %v13084_v6 = vpack.c.bf16 %v5262_v59, %v5258_v55  ;;  %v5266_v28 = vld [vmem:[#allocation53 + $0x180] sm:$0xff] }
 0x937   :  { %v5270_v31 = vld [vmem:[#allocation53 + $0x1a0] sm:$0xff] }
 0x938   :  { %v13096_v55 = vpack.c.bf16 %v5270_v31, %v5266_v28 }
 0x939   :  { %9550 = vmatpush1.bf16.msra.mxu0 %v12960_v16  ;;  %9582 = vmatpush1.bf16.msra.mxu1 %v12962_v54 }
 0x93a   :  { %9552 = vmatprep.subr.bf16.mxu0 %v12966_v9  ;;  %9584 = vmatprep.subr.bf16.mxu1 %v12968_v56 }
 0x93d   :  { %9554 = vmatpush1.bf16.msra.mxu0 %v12972_v35  ;;  %9586 = vmatpush1.bf16.msra.mxu1 %v12974_v4 }
 0x93e   :  { %9556 = vmatprep.subr.bf16.mxu0 %v12978_v12  ;;  %9588 = vmatprep.subr.bf16.mxu1 %v12980_v40 }
 0x941   :  { %9558 = vmatpush1.bf16.msra.mxu0 %v12984_v37  ;;  %9590 = vmatpush1.bf16.msra.mxu1 %v12986_v38 }
 0x942   :  { %9560 = vmatprep.subr.bf16.mxu0 %v12990_v43  ;;  %9592 = vmatprep.subr.bf16.mxu1 %v12992_v30 }
 0x945   :  { %9562 = vmatpush1.bf16.msra.mxu0 %v12996_v63  ;;  %9594 = vmatpush1.bf16.msra.mxu1 %v12998_v46 }
 0x946   :  { %9564 = vmatprep.subr.bf16.mxu0 %v13002_v27  ;;  %9596 = vmatprep.subr.bf16.mxu1 %v13004_v19 }
 0x949   :  { %9566 = vmatpush1.bf16.msra.mxu0 %v13008_v18  ;;  %9598 = vmatpush1.bf16.msra.mxu1 %v13010_v41 }
 0x94a   :  { %9600 = vmatprep.subr.bf16.mxu0 %v13014_v11  ;;  %9632 = vmatprep.subr.bf16.mxu1 %v13016_v22 }
 0x94c   :  { %5132 = vmatmul.mubr.f32.vlgmr.msra.gmra.mrb[44].mxu0 %v13598_v58  ;;  %5203 = vmatmul.mubr.f32.vlgmr.msra.gmra.mrb[52].mxu1 %v13598_v58 }
 0x94d   :  { %9602 = vmatpush1.bf16.msra.mxu0 %v13020_v39  ;;  %9634 = vmatpush1.bf16.msra.mxu1 %v13022_v48 }
 0x94e   :  { %9604 = vmatprep.subr.bf16.mxu0 %v13026_v53  ;;  %9636 = vmatprep.subr.bf16.mxu1 %v13028_v26 }
 0x94f   :  { %5346 = vmatprep.mubr.f32.mxu0 %v13598_v58  ;;  %5417 = vmatprep.mubr.f32.mxu1 %v13598_v58 }
 0x951   :  { %9606 = vmatpush1.bf16.msra.mxu0 %v13034_v36  ;;  %9638 = vmatpush1.bf16.msra.mxu1 %v13036_v1  ;;  %v5257_v1 = vld [vmem:[#allocation53 + $0x138] sm:$0xff] }
 0x952   :  { %9608 = vmatprep.subr.bf16.mxu0 %v13040_v33  ;;  %9640 = vmatprep.subr.bf16.mxu1 %v13042_v0  ;;  %v13068_v61 = vpack.c.bf16 %v5257_v1, %v5253_v25  ;;  %v5259_v0 = vld [vmem:[#allocation53 + $0x148] sm:$0xff]  ;;  %v5261_v33 = vld [vmem:[#allocation53 + $0x158] sm:$0xff]  ;;  %v5264_v1 = vld [vmem:[#allocation53 + $0x170] sm:$0xff] }
 0x953   :  { %v13086_v60 = vpack.c.bf16 %v5264_v1, %v5260_v23  ;;  %v5274_v23 = vld [vmem:[#allocation53 + $0x1c0] sm:$0xff]  ;;  %v5280_v1 = vld [vmem:[#allocation53 + $0x1f0] sm:$0xff] }
 0x954   :  { %13629 = vst [vmem:[#allocation169_spill] sm:$0xff] %v13068_v61 }
 0x955   :  { %9610 = vmatpush1.bf16.msra.mxu0 %v13048_v50  ;;  %9642 = vmatpush1.bf16.msra.mxu1 %v13050_v2  ;;  %v5263_v50 = vld [vmem:[#allocation53 + $0x168] sm:$0xff]  ;;  %v5265_v2 = vld [vmem:[#allocation53 + $0x178] sm:$0xff] }
 0x956   :  { %9612 = vmatprep.subr.bf16.mxu0 %v13054_v7  ;;  %9644 = vmatprep.subr.bf16.mxu1 %v13056_v52  ;;  %v13078_v25 = vpack.c.bf16 %v5263_v50, %v5259_v0  ;;  %v13080_v20 = vpack.c.bf16 %v5265_v2, %v5261_v33  ;;  %v5267_v52 = vld [vmem:[#allocation53 + $0x188] sm:$0xff]  ;;  %v5269_v7 = vld [vmem:[#allocation53 + $0x198] sm:$0xff]  ;;  %v5268_v50 = vld [vmem:[#allocation53 + $0x190] sm:$0xff] }
 0x957   :  { %v5272_v2 = vld [vmem:[#allocation53 + $0x1b0] sm:$0xff] }
 0x958   :  { %v13098_v59 = vpack.c.bf16 %v5272_v2, %v5268_v50 }
 0x959   :  { %9614 = vmatpush1.bf16.msra.mxu0 %v13060_v5  ;;  %9646 = vmatpush1.bf16.msra.mxu1 %v13062_v24  ;;  %v5271_v5 = vld [vmem:[#allocation53 + $0x1a8] sm:$0xff]  ;;  %v5273_v24 = vld [vmem:[#allocation53 + $0x1b8] sm:$0xff] }
 0x95a   :  { %9616 = vmatprep.subr.bf16.mxu0 %v13066_v15  ;;  %9648 = vmatprep.subr.bf16.mxu1 %v13068_v61  ;;  %v13090_v33 = vpack.c.bf16 %v5271_v5, %v5267_v52  ;;  %v13092_v0 = vpack.c.bf16 %v5273_v24, %v5269_v7  ;;  %v5275_v61 = vld [vmem:[#allocation53 + $0x1c8] sm:$0xff]  ;;  %v5277_v15 = vld [vmem:[#allocation53 + $0x1d8] sm:$0xff]  ;;  %v5278_v5 = vld [vmem:[#allocation53 + $0x1e0] sm:$0xff] }
 0x95b   :  { %v5276_v24 = vld [vmem:[#allocation53 + $0x1d0] sm:$0xff]  ;;  %v13108_v28 = vpack.c.bf16 %v5278_v5, %v5274_v23 }
 0x95c   :  { %v13110_v31 = vpack.c.bf16 %v5280_v1, %v5276_v24 }
 0x95d   :  { %9618 = vmatpush1.bf16.msra.mxu0 %v13072_v62  ;;  %9650 = vmatpush1.bf16.msra.mxu1 %v13074_v34  ;;  %v5279_v62 = vld [vmem:[#allocation53 + $0x1e8] sm:$0xff]  ;;  %v5281_v34 = vld [vmem:[#allocation53 + $0x1f8] sm:$0xff] }
 0x95e   :  { %9620 = vmatprep.subr.bf16.mxu0 %v13078_v25  ;;  %9652 = vmatprep.subr.bf16.mxu1 %v13080_v20  ;;  %v13102_v7 = vpack.c.bf16 %v5279_v62, %v5275_v61  ;;  %v13104_v52 = vpack.c.bf16 %v5281_v34, %v5277_v15  ;;  %v4119_v15 = vstv %s12861_s7  ;;  %v13634_v62 = vld [vmem:[#allocation166_spill] sm:$0xff] }
 0x95f   :  { %vm4129_vm14 = vcmp.lt.s32.totalorder %v12699_v8, %v4119_v15 }
 0x961   :  { %9622 = vmatpush1.bf16.msra.mxu0 %v13084_v6  ;;  %9654 = vmatpush1.bf16.msra.mxu1 %v13086_v60 }
 0x962   :  { %9624 = vmatprep.subr.bf16.mxu0 %v13090_v33  ;;  %9656 = vmatprep.subr.bf16.mxu1 %v13092_v0 }
 0x965   :  { %9626 = vmatpush1.bf16.msra.mxu0 %v13096_v55  ;;  %9658 = vmatpush1.bf16.msra.mxu1 %v13098_v59 }
 0x966   :  { %9628 = vmatprep.subr.bf16.mxu0 %v13102_v7  ;;  %9660 = vmatprep.subr.bf16.mxu1 %v13104_v52 }
 0x969   :  { %9630 = vmatpush1.bf16.msra.mxu0 %v13108_v28  ;;  %9662 = vmatpush1.bf16.msra.mxu1 %v13110_v31 }
 0x96a   :  { %9664 = vmatprep.subr.bf16.mxu0 %v12916_v10  ;;  %9696 = vmatprep.subr.bf16.mxu1 %v12918_v3  ;;  %v8471_v10 = vsel %vm4129_vm14, 1.0, %v13598_v58 }
 0x96b   :  { %v4135_v3 = vsub.f32 1.0, %v8471_v10 }
 0x96c   :  { %5347 = vmatmul.mubr.f32.vlgmr.msra.gmra.mrb[46].mxu0 %v13598_v58  ;;  %5418 = vmatmul.mubr.f32.vlgmr.msra.gmra.mrb[54].mxu1 %v13598_v58 }
 0x96d   :  { %9666 = vmatpush1.bf16.msra.mxu0 %v12920_v42  ;;  %9698 = vmatpush1.bf16.msra.mxu1 %v12922_v57  ;;  %v4137_v42 = vmul.f32 -10000.0, %v4135_v3  ;;  %v4723_v3 = vld [vmem:[#allocation55] sm:$0xf] }
 0x96e   :  { %9668 = vmatprep.subr.bf16.mxu0 %v12926_v17  ;;  %9700 = vmatprep.subr.bf16.mxu1 %v12928_v49 }
 0x96f   :  { %5612 = vmatprep.mubr.f32.mxu0 %v13598_v58  ;;  %5683 = vmatprep.mubr.f32.mxu1 %v13598_v58 }
 0x971   :  { %9670 = vmatpush1.bf16.msra.mxu0 %v12934_v47  ;;  %9702 = vmatpush1.bf16.msra.mxu1 %v12936_v32 }
 0x972   :  { %9672 = vmatprep.subr.bf16.mxu0 %v12940_v44  ;;  %9704 = vmatprep.subr.bf16.mxu1 %v12942_v29 }
 0x975   :  { %9674 = vmatpush1.bf16.msra.mxu0 %v12948_v13  ;;  %9706 = vmatpush1.bf16.msra.mxu1 %v12950_v14 }
 0x976   :  { %9676 = vmatprep.subr.bf16.mxu0 %v12954_v51  ;;  %9708 = vmatprep.subr.bf16.mxu1 %v12956_v45 }
 0x979   :  { %9678 = vmatpush1.bf16.msra.mxu0 %v12960_v16  ;;  %9710 = vmatpush1.bf16.msra.mxu1 %v12962_v54 }
 0x97a   :  { %9680 = vmatprep.subr.bf16.mxu0 %v12966_v9  ;;  %9712 = vmatprep.subr.bf16.mxu1 %v12968_v56 }
 0x97d   :  { %9682 = vmatpush1.bf16.msra.mxu0 %v12972_v35  ;;  %9714 = vmatpush1.bf16.msra.mxu1 %v12974_v4 }
 0x97e   :  { %9684 = vmatprep.subr.bf16.mxu0 %v12978_v12  ;;  %9716 = vmatprep.subr.bf16.mxu1 %v12980_v40 }
 0x97f   :  { %v4114_v57 = vpop.xlane.xlu0 %4113 }
 0x980   :  { %v4117_v17 = vmul.f32 0.35355338, %v4114_v57 }
 0x981   :  { %9686 = vmatpush1.bf16.msra.mxu0 %v12984_v37  ;;  %9718 = vmatpush1.bf16.msra.mxu1 %v12986_v38 }
 0x982   :  { %v4139_v49 = vadd.f32 %v4137_v42, %v4117_v17  ;;  %9688 = vmatprep.subr.bf16.mxu0 %v12990_v43  ;;  %9720 = vmatprep.subr.bf16.mxu1 %v12992_v30  ;;  %v4415_v30 = vld [vmem:[#allocation50] sm:$0xf]  ;;  %v4728_v42 = vrot.slane %v4723_v3, %v13618_v21 }
 0x983   :  { %v4432_v34 = vrot.slane %v4415_v30, %v13634_v62 }
 0x984   :  { %v4142_v47 = vsel %vm4141_vm15, %v4139_v49, -inf }
 0x985   :  { %v4143_v32 = vrot.slane %v4142_v47, 4  ;;  %9690 = vmatpush1.bf16.msra.mxu0 %v12996_v63  ;;  %9722 = vmatpush1.bf16.msra.mxu1 %v12998_v46 }
 0x986   :  { %9692 = vmatprep.subr.bf16.mxu0 %v13002_v27  ;;  %9724 = vmatprep.subr.bf16.mxu1 %v13004_v19  ;;  %v4420_v27 = vrot.slane %v4415_v30, %v13618_v21  ;;  %v13632_v19 = vld [vmem:[#allocation164_spill] sm:$0xff] }
 0x987   :  { %v4144_v44 = vmax.f32 %v4142_v47, %v4143_v32  ;;  %v4736_v57 = vrot.slane %v4723_v3, %v13632_v19 }
 0x989   :  { %v4145_v29 = vrot.slane %v4144_v44, 2  ;;  %9694 = vmatpush1.bf16.msra.mxu0 %v13008_v18  ;;  %9726 = vmatpush1.bf16.msra.mxu1 %v13010_v41  ;;  %v4428_v18 = vrot.slane %v4415_v30, %v13632_v19 }
 0x98a   :  { %9728 = vmatprep.subr.bf16.mxu0 %v13014_v11  ;;  %9760 = vmatprep.subr.bf16.mxu1 %v13016_v22  ;;  %v13633_v22 = vld [vmem:[#allocation165_spill] sm:$0xff] }
 0x98b   :  { %v4146_v13 = vmax.f32 %v4144_v44, %v4145_v29  ;;  %v4424_v61 = vrot.slane %v4415_v30, %v13633_v22  ;;  %v4732_v17 = vrot.slane %v4723_v3, %v13633_v22 }
 0x98d   :  { %v4147_v14 = vrot.slane %v4146_v13, 1 }
 0x98f   :  { %v4148_v51 = vmax.f32 %v4146_v13, %v4147_v14 }
 0x991   :  { %v4156_v45 = vsub.f32 %v4139_v49, %v4148_v51  ;;  %v4740_v49 = vrot.slane %v4723_v3, %v13634_v62 }
 0x993   :  { %v4158_v16 = vmul.f32 1.442695, %v4156_v45 }
 0x995   :  { %10527 = vpow2.f32 %v4158_v16 }
 0x99f   :  { %v10528_v54 = vpop.eup %10527 }
 0x9a0   :  { %v4162_v9 = vsel %vm4141_vm15, %v10528_v54, 0.0 }
 0x9a1   :  { %v4163_v56 = vrot.slane %v4162_v9, 4 }
 0x9a3   :  { %v4164_v35 = vadd.f32 %v4163_v56, %v4162_v9 }
 0x9a5   :  { %v4165_v4 = vrot.slane %v4164_v35, 2 }
 0x9a7   :  { %v4166_v12 = vadd.f32 %v4165_v4, %v4164_v35 }
 0x9a9   :  { %v4167_v40 = vrot.slane %v4166_v12, 1 }
 0x9ab   :  { %v4168_v37 = vadd.f32 %v4167_v40, %v4166_v12 }
 0x9ad   :  { %10529 = vrcp.f32 %v4168_v37 }
 0x9b7   :  { %v10530_v38 = vpop.eup %10529 }
 0x9b8   :  { %v4177_v43 = vmul.f32 %v10530_v38, %v10528_v54 }
 0x9ba   :  { %4182 = vperm.xlu1 %9917, %v4177_v43  }
 0x9df   :  { %v4631_v63 = vpop.f32.mrb[36].mxu0  ;;  %v4674_v46 = vpop.f32.mrb[44].mxu1 }
 0x9e0   :  { %v4633_v41 = vpop.f32.mrb[37].mxu0  ;;  %v4676_v11 = vpop.f32.mrb[45].mxu1  ;;  %v4632_v35 = vadd.f32 %v4631_v63, %v4420_v27  ;;  %v4675_v4 = vadd.f32 %v4674_v46, %v4428_v18 }
 0x9e1   :  { %v4635_v50 = vpop.f32.mrb[38].mxu0  ;;  %v4678_v2 = vpop.f32.mrb[46].mxu1  ;;  %v4634_v12 = vadd.f32 %v4633_v41, %v4424_v61  ;;  %v4677_v40 = vadd.f32 %v4676_v11, %v4432_v34 }
 0x9e2   :  { %v13163_v23 = vadd.f32 %v4635_v50, %v4420_v27  ;;  %v13165_v5 = vadd.f32 %v4678_v2, %v4428_v18  ;;  %v4637_v24 = vpop.f32.mrb[39].mxu0  ;;  %v4680_v1 = vpop.f32.mrb[47].mxu1 }
 0x9e3   :  { %v13167_v15 = vadd.f32 %v4637_v24, %v4424_v61  ;;  %v13169_v10 = vadd.f32 %v4680_v1, %v4432_v34 }
 0x9ff   :  { %v4939_v47 = vpop.f32.mrb[40].mxu0  ;;  %v4982_v32 = vpop.f32.mrb[48].mxu1 }
 0xa00   :  { %v13175_v44 = vadd.f32 %v4939_v47, %v4728_v42  ;;  %v13177_v29 = vadd.f32 %v4982_v32, %v4736_v57  ;;  %v4941_v13 = vpop.f32.mrb[41].mxu0  ;;  %v4984_v14 = vpop.f32.mrb[49].mxu1 }
 0xa01   :  { %v13179_v51 = vadd.f32 %v4941_v13, %v4732_v17  ;;  %v13181_v45 = vadd.f32 %v4984_v14, %v4740_v49  ;;  %v4943_v16 = vpop.f32.mrb[42].mxu0  ;;  %v4986_v54 = vpop.f32.mrb[50].mxu1 }
 0xa02   :  { %v4945_v9 = vpop.f32.mrb[43].mxu0  ;;  %v4988_v56 = vpop.f32.mrb[51].mxu1 }
 0xa1f   :  { %v5133_v37 = vpop.f32.mrb[44].mxu0  ;;  %v5204_v38 = vpop.f32.mrb[52].mxu1 }
 0xa20   :  { %v5209_v43 = vadd.f32 %v5133_v37, %v4632_v35  ;;  %v5211_v30 = vadd.f32 %v5204_v38, %v4675_v4  ;;  %v5135_v50 = vpop.f32.mrb[45].mxu0  ;;  %v5206_v2 = vpop.f32.mrb[53].mxu1  ;;  %v4944_v35 = vadd.f32 %v4943_v16, %v4728_v42  ;;  %v4987_v4 = vadd.f32 %v4986_v54, %v4736_v57 }
 0xa21   :  { %v5210_v24 = vadd.f32 %v5135_v50, %v4634_v12  ;;  %v5212_v1 = vadd.f32 %v5206_v2, %v4677_v40  ;;  %v4946_v12 = vadd.f32 %v4945_v9, %v4732_v17  ;;  %v4989_v40 = vadd.f32 %v4988_v56, %v4740_v49 }
 0xa22   :  { %v8547_v3 = vmul.f32 -1.442695, %v5209_v43 }
 0xa23   :  { %v8548_v47 = vmul.f32 -1.442695, %v5210_v24  ;;  %v8549_v32 = vmul.f32 -1.442695, %v5212_v1 }
 0xa24   :  { %10531 = vpow2.f32 %v8547_v3 }
 0xa25   :  { %10533 = vpow2.f32 %v8548_v47 }
 0xa26   :  { %10535 = vpow2.f32 %v8549_v32  ;;  %v13635_v32 = vld [vmem:[#allocation156_spill] sm:$0xff] }
 0xa27   :  { %10537 = vtanh.f32 %v5211_v30 }
 0xa2e   :  { %v10532_v13 = vpop.eup %10531 }
 0xa2f   :  { %v10534_v14 = vpop.eup %10533  ;;  %v5431_v62 = vadd.f32 1.0, %v10532_v13  ;;  %v13636_v13 = vld [vmem:[#allocation157_spill] sm:$0xff] }
 0xa30   :  { %v5437_v63 = vadd.f32 1.0, %v10534_v14  ;;  %v10536_v46 = vpop.eup %10535  ;;  %v13639_v14 = vld [vmem:[#allocation160_spill] sm:$0xff] }
 0xa31   :  { %10539 = vrcp.f32 %v5431_v62  ;;  %v10538_v27 = vpop.eup %10537  ;;  %v5444_v61 = vadd.f32 1.0, %v10536_v46 }
 0xa32   :  { %10541 = vrcp.f32 %v5437_v63 }
 0xa33   :  { %10543 = vrcp.f32 %v5444_v61 }
 0xa3b   :  { %v10540_v18 = vpop.eup %10539 }
 0xa3c   :  { %v10542_v41 = vpop.eup %10541  ;;  %v5467_v11 = vmul.f32 %v10540_v18, %v10538_v27  ;;  %v13642_v18 = vld [vmem:[#allocation163_spill] sm:$0xff] }
 0xa3d   :  { %v5466_v34 = vmul.f32 0.0, %v10542_v41  ;;  %v10544_v42 = vpop.eup %10543 }
 0xa3f   :  { %v13183_v37 = vadd.f32 %v5467_v11, %v5466_v34  ;;  %v5348_v38 = vpop.f32.mrb[46].mxu0  ;;  %v5419_v43 = vpop.f32.mrb[54].mxu1  ;;  %v13644_v34 = vld [vmem:[#allocation168_spill] sm:$0xff] }
 0xa40   :  { %v5424_v30 = vadd.f32 %v5348_v38, %v4944_v35  ;;  %v5426_v50 = vadd.f32 %v5419_v43, %v4987_v4  ;;  %v5350_v62 = vpop.f32.mrb[47].mxu0  ;;  %v5421_v2 = vpop.f32.mrb[55].mxu1  ;;  %v13645_v35 = vld [vmem:[#allocation169_spill] sm:$0xff]  ;;  %v13647_v38 = vld [vmem:[#allocation171_spill] sm:$0xff] }
 0xa41   :  { %10545 = vtanh.f32 %v13183_v37  ;;  %v5425_v24 = vadd.f32 %v5350_v62, %v4946_v12  ;;  %v5427_v1 = vadd.f32 %v5421_v2, %v4989_v40  ;;  %v13646_v40 = vld [vmem:[#allocation170_spill] sm:$0xff]  ;;  %v10263_v62 = vld [vmem:[#allocation61 + $0x20] sm:$0xff]  }
 0xa42   :  { %v8550_v3 = vmul.f32 -1.442695, %v5424_v30  ;;  %v10257_v43 = vld [vmem:[#allocation61 + $0x8] sm:$0xff]   ;;  %v10259_v30 = vld [vmem:[#allocation61 + $0x10] sm:$0xff]  }
 0xa43   :  { %v8551_v47 = vmul.f32 -1.442695, %v5425_v24  ;;  %v8552_v17 = vmul.f32 -1.442695, %v5427_v1  ;;  %v10265_v2 = vld [vmem:[#allocation61 + $0x28] sm:$0xff]   ;;  %v10267_v24 = vld [vmem:[#allocation61 + $0x30] sm:$0xff]  }
 0xa44   :  { %10547 = vpow2.f32 %v8550_v3  ;;  %v10269_v1 = vld [vmem:[#allocation61 + $0x38] sm:$0xff]  }
 0xa45   :  { %10549 = vpow2.f32 %v8551_v47 }
 0xa46   :  { %10551 = vpow2.f32 %v8552_v17 }
 0xa47   :  { %10553 = vtanh.f32 %v5426_v50  ;;  %v10261_v50 = vld [vmem:[#allocation61 + $0x18] sm:$0xff]  }
 0xa4b   :  { %v10546_v57 = vpop.eup %10545 }
 0xa4c   :  { %v13186_v49 = vmul.f32 %v10546_v57, %v10544_v42 }
 0xa4e   :  { %v10548_v16 = vpop.eup %10547  ;;  %5476 = vst [vmem:[#allocation10] sm:$0xff] %v13186_v49  ;;  %5613 = vmatmul.mubr.f32.vlgmr.msra.gmra.mrb[48].mxu0 %v13186_v49  ;;  %5684 = vmatmul.mubr.f32.vlgmr.msra.gmra.mrb[56].mxu1 %v13186_v49 }
 0xa4f   :  { %v10550_v54 = vpop.eup %10549  ;;  %v5450_v9 = vadd.f32 1.0, %v10548_v16  ;;  %9730 = vmatpush1.bf16.msra.mxu0 %v13020_v39  ;;  %9762 = vmatpush1.bf16.msra.mxu1 %v13022_v48  ;;  %v13637_v39 = vld [vmem:[#allocation158_spill] sm:$0xff]  ;;  %v13638_v48 = vld [vmem:[#allocation159_spill] sm:$0xff] }
 0xa50   :  { %v5456_v56 = vadd.f32 1.0, %v10550_v54  ;;  %9732 = vmatprep.subr.bf16.mxu0 %v13026_v53  ;;  %9764 = vmatprep.subr.bf16.mxu1 %v13028_v26  ;;  %v13640_v53 = vld [vmem:[#allocation161_spill] sm:$0xff]  ;;  %v13641_v26 = vld [vmem:[#allocation162_spill] sm:$0xff]  ;;  %v10552_v63 = vpop.eup %10551 }
 0xa51   :  { %10555 = vrcp.f32 %v5450_v9  ;;  %5826 = vmatprep.mubr.f32.mxu0 %v13598_v58  ;;  %5897 = vmatprep.mubr.f32.mxu1 %v13598_v58  ;;  %v10554_v46 = vpop.eup %10553  ;;  %v5463_v61 = vadd.f32 1.0, %v10552_v63 }
 0xa52   :  { %10557 = vrcp.f32 %v5456_v56 }
 0xa53   :  { %9734 = vmatpush1.bf16.msra.mxu0 %v13034_v36  ;;  %9766 = vmatpush1.bf16.msra.mxu1 %v13635_v32  ;;  %v13643_v36 = vld [vmem:[#allocation167_spill] sm:$0xff]  ;;  %10559 = vrcp.f32 %v5463_v61 }
 0xa54   :  { %9736 = vmatprep.subr.bf16.mxu0 %v13636_v13  ;;  %9768 = vmatprep.subr.bf16.mxu1 %v13637_v39 }
 0xa57   :  { %9738 = vmatpush1.bf16.msra.mxu0 %v13638_v48  ;;  %9770 = vmatpush1.bf16.msra.mxu1 %v13639_v14 }
 0xa58   :  { %9740 = vmatprep.subr.bf16.mxu0 %v13640_v53  ;;  %9772 = vmatprep.subr.bf16.mxu1 %v13641_v26 }
 0xa5b   :  { %v10556_v27 = vpop.eup %10555  ;;  %9742 = vmatpush1.bf16.msra.mxu0 %v13642_v18  ;;  %9774 = vmatpush1.bf16.msra.mxu1 %v13643_v36 }
 0xa5c   :  { %v10558_v41 = vpop.eup %10557  ;;  %v5472_v11 = vmul.f32 %v10556_v27, %v10554_v46  ;;  %9744 = vmatprep.subr.bf16.mxu0 %v13644_v34  ;;  %9776 = vmatprep.subr.bf16.mxu1 %v13645_v35 }
 0xa5d   :  { %v5471_v4 = vmul.f32 0.0, %v10558_v41 }
 0xa5f   :  { %v13209_v12 = vadd.f32 %v5472_v11, %v5471_v4  ;;  %9746 = vmatpush1.bf16.msra.mxu0 %v13646_v40  ;;  %9778 = vmatpush1.bf16.msra.mxu1 %v13647_v38 }
 0xa60   :  { %9748 = vmatprep.subr.bf16.mxu0 %v13078_v25  ;;  %9780 = vmatprep.subr.bf16.mxu1 %v13080_v20  ;;  %v10560_v25 = vpop.eup %10559 }
 0xa61   :  { %10561 = vtanh.f32 %v13209_v12 }
 0xa63   :  { %9750 = vmatpush1.bf16.msra.mxu0 %v13084_v6  ;;  %9782 = vmatpush1.bf16.msra.mxu1 %v13086_v60  ;;  %v10247_v60 = vld [vmem:[#allocation59] sm:$0xff]  }
 0xa64   :  { %9752 = vmatprep.subr.bf16.mxu0 %v13090_v33  ;;  %9784 = vmatprep.subr.bf16.mxu1 %v13092_v0  ;;  %v10248_v33 = vld [vmem:[#allocation59 + $0x8] sm:$0xff]   ;;  %v10249_v0 = vld [vmem:[#allocation59 + $0x10] sm:$0xff]  }
 0xa67   :  { %9754 = vmatpush1.bf16.msra.mxu0 %v13096_v55  ;;  %9786 = vmatpush1.bf16.msra.mxu1 %v13098_v59  ;;  %v10250_v55 = vld [vmem:[#allocation59 + $0x18] sm:$0xff]   ;;  %v10251_v59 = vld [vmem:[#allocation59 + $0x20] sm:$0xff]  }
 0xa68   :  { %9756 = vmatprep.subr.bf16.mxu0 %v13102_v7  ;;  %9788 = vmatprep.subr.bf16.mxu1 %v13104_v52  ;;  %v10252_v7 = vld [vmem:[#allocation59 + $0x28] sm:$0xff]   ;;  %v10253_v52 = vld [vmem:[#allocation59 + $0x30] sm:$0xff]  }
 0xa6b   :  { %v10562_v20 = vpop.eup %10561  ;;  %9758 = vmatpush1.bf16.msra.mxu0 %v13108_v28  ;;  %9790 = vmatpush1.bf16.msra.mxu1 %v13110_v31  ;;  %v10254_v28 = vld [vmem:[#allocation59 + $0x38] sm:$0xff]   ;;  %v10255_v31 = vld [vmem:[#allocation61] sm:$0xff]  }
 0xa6c   :  { %v13226_v6 = vmul.f32 %v10562_v20, %v10560_v25  ;;  %9159 = vmatprep.subr.bf16.mxu1 %v13598_v58  ;;  %9139 = vmatprep.subr.bf16.mxu0 %v13598_v58 }
 0xa6e   :  { %5478 = vst [vmem:[#allocation11 + $0x8] sm:$0xff] %v13226_v6  ;;  %5827 = vmatmul.mubr.f32.vlgmr.msra.gmra.mrb[50].mxu0 %v13226_v6  ;;  %5898 = vmatmul.mubr.f32.vlgmr.msra.gmra.mrb[58].mxu1 %v13226_v6 }
 0xa6f   :  { %9175 = vmatprep.mubr.msk.bf16.mxu1 %vm11875_vm5, %v13598_v58  ;;  %9155 = vmatprep.mubr.msk.bf16.mxu0 %vm11875_vm5, %v13598_v58 }
 0xa70   :  { %9160 = vmatpush3.bf16.msra.mxu1 %v10247_v60  ;;  %9140 = vmatpush3.bf16.msra.mxu0 %v10255_v31 }
 0xa71   :  { %9161 = vmatprep.subr.bf16.mxu1 %v13598_v58  ;;  %9141 = vmatprep.subr.bf16.mxu0 %v13598_v58 }
 0xa74   :  { %9162 = vmatpush3.bf16.msra.mxu1 %v10248_v33  ;;  %9142 = vmatpush3.bf16.msra.mxu0 %v10257_v43  ;;  %v10256_v33 = vld [vmem:[#allocation64] sm:$0xff]  }
 0xa75   :  { %9163 = vmatprep.subr.bf16.mxu1 %v13598_v58  ;;  %9143 = vmatprep.subr.bf16.mxu0 %v13598_v58 }
 0xa78   :  { %9164 = vmatpush3.bf16.msra.mxu1 %v10249_v0  ;;  %9144 = vmatpush3.bf16.msra.mxu0 %v10259_v30 }
 0xa79   :  { %9165 = vmatprep.subr.bf16.mxu1 %v13598_v58  ;;  %9145 = vmatprep.subr.bf16.mxu0 %v13598_v58 }
 0xa7c   :  { %9166 = vmatpush3.bf16.msra.mxu1 %v10250_v55  ;;  %9146 = vmatpush3.bf16.msra.mxu0 %v10261_v50 }
 0xa7d   :  { %9167 = vmatprep.subr.bf16.mxu1 %v13598_v58  ;;  %9147 = vmatprep.subr.bf16.mxu0 %v13598_v58 }
 0xa80   :  { %9168 = vmatpush3.bf16.msra.mxu1 %v10251_v59  ;;  %9148 = vmatpush3.bf16.msra.mxu0 %v10263_v62  ;;  %v10260_v59 = vld [vmem:[#allocation64 + $0x10] sm:$0xff]   ;;  %v10264_v62 = vld [vmem:[#allocation64 + $0x20] sm:$0xff]  }
 0xa81   :  { %9169 = vmatprep.subr.bf16.mxu1 %v13598_v58  ;;  %9149 = vmatprep.subr.bf16.mxu0 %v13598_v58 }
 0xa84   :  { %9170 = vmatpush3.bf16.msra.mxu1 %v10252_v7  ;;  %9150 = vmatpush3.bf16.msra.mxu0 %v10265_v2  ;;  %v10262_v7 = vld [vmem:[#allocation64 + $0x18] sm:$0xff]  }
 0xa85   :  { %9171 = vmatprep.subr.bf16.mxu1 %v13598_v58  ;;  %9151 = vmatprep.subr.bf16.mxu0 %v13598_v58 }
 0xa88   :  { %9172 = vmatpush3.bf16.msra.mxu1 %v10253_v52  ;;  %9152 = vmatpush3.bf16.msra.mxu0 %v10267_v24  ;;  %v10266_v24 = vld [vmem:[#allocation64 + $0x28] sm:$0xff]  }
 0xa89   :  { %9173 = vmatprep.subr.bf16.mxu1 %v13598_v58  ;;  %9153 = vmatprep.subr.bf16.mxu0 %v13598_v58 }
 0xa8c   :  { %9174 = vmatpush3.bf16.msra.mxu1 %v10254_v28  ;;  %9154 = vmatpush3.bf16.msra.mxu0 %v10269_v1  ;;  %v10268_v1 = vld [vmem:[#allocation64 + $0x30] sm:$0xff]  }
 0xa8d   :  { %9199 = vmatprep.subr.bf16.mxu1 %v13598_v58  ;;  %9179 = vmatprep.subr.bf16.mxu0 %v13598_v58 }
 0xb21   :  { %v5614_v3 = vpop.f32.mrb[48].mxu0  ;;  %v5685_v47 = vpop.f32.mrb[56].mxu1 }
 0xb22   :  { %v5690_v42 = vadd.f32 %v5614_v3, %v13163_v23  ;;  %v5692_v57 = vadd.f32 %v5685_v47, %v13165_v5  ;;  %v5616_v17 = vpop.f32.mrb[49].mxu0  ;;  %v5687_v16 = vpop.f32.mrb[57].mxu1  ;;  %v10270_v3 = vld [vmem:[#allocation64 + $0x38] sm:$0xff]  }
 0xb23   :  { %v5691_v54 = vadd.f32 %v5616_v17, %v13167_v15  ;;  %v5693_v9 = vadd.f32 %v5687_v16, %v13169_v10  ;;  %v10272_v17 = vld [vmem:[%s13648_s17] sm:$0xff]  }
 0xb24   :  { %v8553_v56 = vmul.f32 -1.442695, %v5690_v42 }
 0xb25   :  { %v8554_v32 = vmul.f32 -1.442695, %v5691_v54  ;;  %v8555_v13 = vmul.f32 -1.442695, %v5693_v9  ;;  %v10273_v54 = vld [vmem:[#allocation65 + $0x8] sm:$0xff]   ;;  %v10274_v9 = vld [vmem:[%s13648_s17 + $0x8] sm:$0xff]  }
 0xb26   :  { %10563 = vpow2.f32 %v8553_v56  ;;  %v10276_v56 = vld [vmem:[%s13648_s17 + $0x10] sm:$0xff]  }
 0xb27   :  { %10565 = vpow2.f32 %v8554_v32  ;;  %v10277_v32 = vld [vmem:[#allocation65 + $0x18] sm:$0xff]  }
 0xb28   :  { %10567 = vpow2.f32 %v8555_v13  ;;  %v10278_v13 = vld [vmem:[%s13648_s17 + $0x18] sm:$0xff]  }
 0xb29   :  { %10569 = vtanh.f32 %v5692_v57  ;;  %v10271_v57 = vld [vmem:[#allocation65] sm:$0xff]  }
 0xb30   :  { %v10564_v39 = vpop.eup %10563 }
 0xb31   :  { %v10566_v48 = vpop.eup %10565  ;;  %v5911_v14 = vadd.f32 1.0, %v10564_v39  ;;  %v10279_v39 = vld [vmem:[#allocation65 + $0x20] sm:$0xff]  }
 0xb32   :  { %v5917_v53 = vadd.f32 1.0, %v10566_v48  ;;  %v10568_v23 = vpop.eup %10567  ;;  %v10280_v48 = vld [vmem:[%s13648_s17 + $0x20] sm:$0xff]  }
 0xb33   :  { %10571 = vrcp.f32 %v5911_v14  ;;  %v10570_v5 = vpop.eup %10569  ;;  %v5924_v46 = vadd.f32 1.0, %v10568_v23  ;;  %v10281_v14 = vld [vmem:[#allocation65 + $0x28] sm:$0xff]  }
 0xb34   :  { %10573 = vrcp.f32 %v5917_v53  ;;  %v10282_v53 = vld [vmem:[%s13648_s17 + $0x28] sm:$0xff]  }
 0xb35   :  { %10575 = vrcp.f32 %v5924_v46  ;;  %v10286_v46 = vld [vmem:[%s13648_s17 + $0x38] sm:$0xff]  }
 0xb3d   :  { %v10572_v26 = vpop.eup %10571 }
 0xb3e   :  { %v10574_v63 = vpop.eup %10573  ;;  %v5947_v15 = vmul.f32 %v10572_v26, %v10570_v5  ;;  %v10283_v5 = vld [vmem:[#allocation65 + $0x30] sm:$0xff]   ;;  %v10284_v26 = vld [vmem:[%s13648_s17 + $0x30] sm:$0xff]  }
 0xb3f   :  { %v5946_v10 = vmul.f32 %v10574_v63, %v13183_v37  ;;  %v10576_v37 = vpop.eup %10575 }
 0xb41   :  { %v5948_v27 = vadd.f32 %v5947_v15, %v5946_v10  ;;  %v5828_v18 = vpop.f32.mrb[50].mxu0  ;;  %v5899_v36 = vpop.f32.mrb[58].mxu1  ;;  %v10285_v15 = vld [vmem:[#allocation65 + $0x38] sm:$0xff]  }
 0xb42   :  { %v5904_v41 = vadd.f32 %v5828_v18, %v13175_v44  ;;  %v5906_v11 = vadd.f32 %v5899_v36, %v13177_v29  ;;  %v5830_v61 = vpop.f32.mrb[51].mxu0  ;;  %v5901_v34 = vpop.f32.mrb[59].mxu1  ;;  %v10287_v18 = vld [vmem:[#allocation56] sm:$0xff]  }
 0xb43   :  { %10577 = vtanh.f32 %v5948_v27  ;;  %v5905_v35 = vadd.f32 %v5830_v61, %v13179_v51  ;;  %v5907_v4 = vadd.f32 %v5901_v34, %v13181_v45  ;;  %v10258_v45 = vld [vmem:[#allocation64 + $0x8] sm:$0xff]   ;;  %v10290_v34 = vld [vmem:[#allocation56 + $0x18] sm:$0xff]  }
 0xb44   :  { %v8556_v40 = vmul.f32 -1.442695, %v5904_v41  ;;  %v10288_v41 = vld [vmem:[#allocation56 + $0x8] sm:$0xff]   ;;  %v10289_v61 = vld [vmem:[#allocation56 + $0x10] sm:$0xff]  }
 0xb45   :  { %v8557_v38 = vmul.f32 -1.442695, %v5905_v35  ;;  %v8558_v20 = vmul.f32 -1.442695, %v5907_v4  ;;  %v10291_v35 = vld [vmem:[#allocation56 + $0x20] sm:$0xff]   ;;  %v10292_v4 = vld [vmem:[#allocation56 + $0x28] sm:$0xff]  }
 0xb46   :  { %10579 = vpow2.f32 %v8556_v40 }
 0xb47   :  { %10581 = vpow2.f32 %v8557_v38  ;;  %v10293_v38 = vld [vmem:[#allocation56 + $0x30] sm:$0xff]  }
 0xb48   :  { %10583 = vpow2.f32 %v8558_v20 }
 0xb49   :  { %10585 = vtanh.f32 %v5906_v11  ;;  %v13649_v11 = vmov 0  }
 0xb4d   :  { %v10578_v25 = vpop.eup %10577 }
 0xb4e   :  { %v5950_v60 = vmul.f32 %v10578_v25, %v10576_v37  ;;  %v10294_v25 = vld [vmem:[#allocation56 + $0x38] sm:$0xff]  }
 0xb50   :  { %v10580_v0 = vpop.eup %10579  ;;  %5957 = vst [vmem:[#allocation10 + $0x8] sm:$0xff] %v5950_v60  ;;  %v5961_v44 = vpack.c.bf16 %v5950_v60, %v13186_v49 }
 0xb51   :  { %v10582_v29 = vpop.eup %10581  ;;  %v5930_v55 = vadd.f32 1.0, %v10580_v0 }
 0xb52   :  { %v5936_v51 = vadd.f32 1.0, %v10582_v29  ;;  %9176 = vmatmul.mubr.bf16.vlgmr.msra.gmra.mrb[60].mxu1 %v5961_v44  ;;  %v10584_v49 = vpop.eup %10583 }
 0xb53   :  { %10587 = vrcp.f32 %v5930_v55  ;;  %9200 = vmatpush3.bf16.msra.mxu1 %v10256_v33  ;;  %9215 = vmatprep.mubr.msk.bf16.mxu1 %vm11875_vm5, %v13598_v58  ;;  %v10586_v52 = vpop.eup %10585  ;;  %v5943_v30 = vadd.f32 1.0, %v10584_v49 }
 0xb54   :  { %10589 = vrcp.f32 %v5936_v51  ;;  %9201 = vmatprep.subr.bf16.mxu1 %v13598_v58  ;;  %v4120_v51 = vstv %s12855_s8 }
 0xb55   :  { %10591 = vrcp.f32 %v5943_v30  ;;  %vm4130_vm0 = vcmp.lt.s32.totalorder %v12699_v8, %v4120_v51 }
 0xb57   :  { %9202 = vmatpush3.bf16.msra.mxu1 %v10258_v45  ;;  %v8594_v23 = vld [vmem:[%s8201_s6 + $0x8] sm:$0x1]  ;;  %v6405_v10 = vld [vmem:[%s6404_s18] sm:$0x1]  ;;  %v8472_v45 = vsel %vm4130_vm0, 1.0, %v13598_v58 }
 0xb58   :  { %9203 = vmatprep.subr.bf16.mxu1 %v13598_v58  ;;  %v6411_v63 = vrot.slane %v8594_v23, 7 }
 0xb5a   :  { %v6413_v27 = vsel %vm3850_vm12, %v6405_v10, %v6411_v63 }
 0xb5b   :  { %9204 = vmatpush3.bf16.msra.mxu1 %v10260_v59  ;;  %v6422_v36 = vpack.c.bf16 %v6413_v27, %v6413_v27  ;;  %v4116_v59 = vpop.xlane.xlu1 %4115 }
 0xb5c   :  { %9205 = vmatprep.subr.bf16.mxu1 %v13598_v58 }
 0xb5d   :  { %v10588_v28 = vpop.eup %10587 }
 0xb5e   :  { %v10590_v31 = vpop.eup %10589  ;;  %v5952_v43 = vmul.f32 %v10588_v28, %v10586_v52  ;;  %v4136_v52 = vsub.f32 1.0, %v8472_v45 }
 0xb5f   :  { %v5951_v50 = vmul.f32 %v10590_v31, %v13209_v12  ;;  %9206 = vmatpush3.bf16.msra.mxu1 %v10262_v7  ;;  %v10592_v12 = vpop.eup %10591 }
 0xb60   :  { %9207 = vmatprep.subr.bf16.mxu1 %v13598_v58 }
 0xb61   :  { %v5953_v2 = vadd.f32 %v5952_v43, %v5951_v50 }
 0xb63   :  { %10593 = vtanh.f32 %v5953_v2  ;;  %9208 = vmatpush3.bf16.msra.mxu1 %v10264_v62 }
 0xb64   :  { %9209 = vmatprep.subr.bf16.mxu1 %v13598_v58 }
 0xb67   :  { %9210 = vmatpush3.bf16.msra.mxu1 %v10266_v24 }
 0xb68   :  { %9211 = vmatprep.subr.bf16.mxu1 %v13598_v58 }
 0xb6b   :  { %9212 = vmatpush3.bf16.msra.mxu1 %v10268_v1  ;;  %v4138_v1 = vmul.f32 -10000.0, %v4136_v52 }
 0xb6c   :  { %9213 = vmatprep.subr.bf16.mxu1 %v13598_v58 }
 0xb6d   :  { %v10594_v47 = vpop.eup %10593 }
 0xb6e   :  { %v5955_v42 = vmul.f32 %v10594_v47, %v10592_v12 }
 0xb6f   :  { %9214 = vmatpush3.bf16.msra.mxu1 %v10270_v3  ;;  %v4118_v3 = vmul.f32 0.35355338, %v4116_v59 }
 0xb70   :  { %5958 = vst [vmem:[#allocation11] sm:$0xff] %v5955_v42  ;;  %9239 = vmatprep.subr.bf16.mxu1 %v13598_v58  ;;  %v5964_v16 = vpack.c.bf16 %v13226_v6, %v5955_v42  ;;  %v10275_v6 = vld [vmem:[#allocation65 + $0x10] sm:$0xff]  }
 0xb71   :  { %v4140_v12 = vadd.f32 %v4138_v1, %v4118_v3  ;;  %v6681_v1 = vstv %s13294_s12  ;;  %v6682_v3 = vstv %s13287_s20 }
 0xb72   :  { %9216 = vmatmul.mubr.bf16.vlgmr.msra.gmra.mrb[64].mxu1 %v5961_v44  ;;  %9156 = vmatmul.mubr.bf16.vlgmr.msra.gmra.mrb[52].mxu0 %v5964_v16  ;;  %vm6689_vm1 = vcmp.lt.s32.totalorder %v12699_v8, %v6681_v1  ;;  %vm6690_vm2 = vcmp.lt.s32.totalorder %v12699_v8, %v6682_v3  ;;  %v10313_v1 = vld [vmem:[#allocation68 + $0x60] ss:$16 sps:$4 sm:$0xff]   ;;  %v10316_v3 = vld [vmem:[#allocation68 + $0x68] ss:$16 sps:$4 sm:$0xff]  }
 0xb73   :  { %9180 = vmatpush3.bf16.msra.mxu0 %v10271_v57  ;;  %9240 = vmatpush3.bf16.msra.mxu1 %v10272_v17  ;;  %v4149_v47 = vsel %vm4141_vm15, %v4140_v12, -inf }
 0xb74   :  { %9181 = vmatprep.subr.bf16.mxu0 %v13598_v58  ;;  %9241 = vmatprep.subr.bf16.mxu1 %v13598_v58  ;;  %v4150_v42 = vrot.slane %v4149_v47, 4 }
 0xb75   :  { %9195 = vmatprep.mubr.msk.bf16.mxu0 %vm11875_vm5, %v13598_v58  ;;  %9255 = vmatprep.mubr.msk.bf16.mxu1 %vm11875_vm5, %v13598_v58 }
 0xb76   :  { %v4151_v57 = vmax.f32 %v4149_v47, %v4150_v42  ;;  %v8614_v42 = vsel %vm6690_vm2, 1.0, %v13598_v58 }
 0xb77   :  { %9182 = vmatpush3.bf16.msra.mxu0 %v10273_v54  ;;  %9242 = vmatpush3.bf16.msra.mxu1 %v10274_v9  ;;  %v8595_v40 = vld [vmem:[%s8204_s22 + $0x8] sm:$0x1]  ;;  %v6415_v20 = vld [vmem:[%s6414_s26] sm:$0x1] }
 0xb78   :  { %9183 = vmatprep.subr.bf16.mxu0 %v13598_v58  ;;  %9243 = vmatprep.subr.bf16.mxu1 %v13598_v58  ;;  %v6419_v37 = vrot.slane %v8595_v40, 7  ;;  %v4152_v17 = vrot.slane %v4151_v57, 2 }
 0xb7a   :  { %v6421_v60 = vsel %vm3850_vm12, %v6415_v20, %v6419_v37 }
 0xb7b   :  { %9184 = vmatpush3.bf16.msra.mxu0 %v10275_v6  ;;  %9244 = vmatpush3.bf16.msra.mxu1 %v10276_v56  ;;  %v6439_v33 = vpack.c.bf16 %v6421_v60, %v6421_v60 }
 0xb7c   :  { %9185 = vmatprep.subr.bf16.mxu0 %v13598_v58  ;;  %9245 = vmatprep.subr.bf16.mxu1 %v13598_v58 }
 0xb7f   :  { %9186 = vmatpush3.bf16.msra.mxu0 %v10277_v32  ;;  %9246 = vmatpush3.bf16.msra.mxu1 %v10278_v13 }
 0xb80   :  { %9187 = vmatprep.subr.bf16.mxu0 %v13598_v58  ;;  %9247 = vmatprep.subr.bf16.mxu1 %v13598_v58 }
 0xb83   :  { %9188 = vmatpush3.bf16.msra.mxu0 %v10279_v39  ;;  %9248 = vmatpush3.bf16.msra.mxu1 %v10280_v48 }
 0xb84   :  { %9189 = vmatprep.subr.bf16.mxu0 %v13598_v58  ;;  %9249 = vmatprep.subr.bf16.mxu1 %v13598_v58 }
 0xb87   :  { %9190 = vmatpush3.bf16.msra.mxu0 %v10281_v14  ;;  %9250 = vmatpush3.bf16.msra.mxu1 %v10282_v53 }
 0xb88   :  { %9191 = vmatprep.subr.bf16.mxu0 %v13598_v58  ;;  %9251 = vmatprep.subr.bf16.mxu1 %v13598_v58 }
 0xb8b   :  { %9192 = vmatpush3.bf16.msra.mxu0 %v10283_v5  ;;  %9252 = vmatpush3.bf16.msra.mxu1 %v10284_v26 }
 0xb8c   :  { %9193 = vmatprep.subr.bf16.mxu0 %v13598_v58  ;;  %9253 = vmatprep.subr.bf16.mxu1 %v13598_v58 }
 0xb8f   :  { %9194 = vmatpush3.bf16.msra.mxu0 %v10285_v15  ;;  %9254 = vmatpush3.bf16.msra.mxu1 %v10286_v46 }
 0xb90   :  { %9219 = vmatprep.subr.bf16.mxu0 %v13598_v58 }
 0xb92   :  { %9196 = vmatmul.mubr.bf16.vlgmr.msra.gmra.mrb[56].mxu0 %v5964_v16  ;;  %9256 = vmatmul.mubr.bf16.vlgmr.msra.gmra.mrb[68].mxu1 %v6422_v36  ;;  %v4153_v16 = vmax.f32 %v4151_v57, %v4152_v17  ;;  %v6696_v17 = vsub.f32 1.0, %v8614_v42  ;;  %v10319_v42 = vld [vmem:[#allocation68 + $0x80] ss:$16 sps:$4 sm:$0xff]  }
 0xb93   :  { %9220 = vmatpush3.bf16.msra.mxu0 %v10287_v18  ;;  %9235 = vmatprep.mubr.msk.bf16.mxu0 %vm11875_vm5, %v13598_v58  ;;  %v8612_v18 = vld [vmem:[#allocation58] ss:$0 sm:$0xff] }
 0xb94   :  { %9221 = vmatprep.subr.bf16.mxu0 %v13598_v58  ;;  %7062 = vmatprep.mubr.bf16.mxu1 %v13649_v11  ;;  %v4154_v54 = vrot.slane %v4153_v16, 1 }
 0xb96   :  { %v4155_v5 = vmax.f32 %v4153_v16, %v4154_v54 }
 0xb97   :  { %9222 = vmatpush3.bf16.msra.mxu0 %v10288_v41 }
 0xb98   :  { %9223 = vmatprep.subr.bf16.mxu0 %v13598_v58  ;;  %v4157_v26 = vsub.f32 %v4140_v12, %v4155_v5  ;;  %v8613_v12 = vsel %vm6689_vm1, 1.0, %v13598_v58 }
 0xb99   :  { %v6695_v47 = vsub.f32 1.0, %v8613_v12  ;;  %v10321_v12 = vld [vmem:[#allocation68 + $0x84] ss:$16 sps:$4 sm:$0xff]  }
 0xb9a   :  { %v4160_v63 = vmul.f32 1.442695, %v4157_v26 }
 0xb9b   :  { %9224 = vmatpush3.bf16.msra.mxu0 %v10289_v61  ;;  %v6697_v57 = vmul.f32 -10000.0, %v6695_v47  ;;  %v10324_v47 = vld [vmem:[#allocation68 + $0x8c] ss:$16 sps:$4 sm:$0xff]  }
 0xb9c   :  { %9225 = vmatprep.subr.bf16.mxu0 %v13598_v58  ;;  %10595 = vpow2.f32 %v4160_v63 }
 0xb9f   :  { %9226 = vmatpush3.bf16.msra.mxu0 %v10290_v34 }
 0xba0   :  { %9227 = vmatprep.subr.bf16.mxu0 %v13598_v58 }
 0xba3   :  { %9228 = vmatpush3.bf16.msra.mxu0 %v10291_v35 }
 0xba4   :  { %9229 = vmatprep.subr.bf16.mxu0 %v13598_v58 }
 0xba6   :  { %v10596_v15 = vpop.eup %10595 }
 0xba7   :  { %9230 = vmatpush3.bf16.msra.mxu0 %v10292_v4  ;;  %v4169_v46 = vsel %vm4141_vm15, %v10596_v15, 0.0  ;;  %v13650_v4 = vld [vmem:[#allocation155_spill] sm:$0xff] }
 0xba8   :  { %9231 = vmatprep.subr.bf16.mxu0 %v13598_v58  ;;  %v4170_v10 = vrot.slane %v4169_v46, 4 }
 0xbaa   :  { %v4171_v35 = vadd.f32 %v4170_v10, %v4169_v46 }
 0xbab   :  { %9232 = vmatpush3.bf16.msra.mxu0 %v10293_v38  ;;  %v8575_v38 = vld [vmem:[#allocation62] ss:$0 sm:$0xff] }
 0xbac   :  { %9233 = vmatprep.subr.bf16.mxu0 %v13598_v58  ;;  %v4172_v20 = vrot.slane %v4171_v35, 2 }
 0xbae   :  { %v4173_v51 = vadd.f32 %v4172_v20, %v4171_v35 }
 0xbaf   :  { %9234 = vmatpush3.bf16.msra.mxu0 %v10294_v25 }
 0xbb0   :  { %v4174_v59 = vrot.slane %v4173_v51, 1 }
 0xbb2   :  { %9236 = vmatmul.mubr.bf16.vlgmr.msra.gmra.mrb[60].mxu0 %v6439_v33 }
 0xbb3   :  { %7021 = vmatprep.mubr.bf16.mxu0 %v13649_v11 }
 0xc25   :  { %v6168_v0 = vpop.f32.mrb[60].mxu1 }
 0xc26   :  { %v9177_v44 = vpop.f32.mrb[61].mxu1 }
 0xc27   :  { %v6171_v29 = vpop.f32.mrb[62].mxu1 }
 0xc28   :  { %v9178_v55 = vpop.f32.mrb[63].mxu1 }
 0xc45   :  { %v6387_v49 = vpop.f32.mrb[64].mxu1  ;;  %v6079_v7 = vpop.f32.mrb[52].mxu0 }
 0xc46   :  { %v6169_v28 = vadd.f32 %v6168_v0, %v6079_v7  ;;  %v9217_v31 = vpop.f32.mrb[65].mxu1  ;;  %v9157_v43 = vpop.f32.mrb[53].mxu0 }
 0xc47   :  { %v6390_v30 = vpop.f32.mrb[66].mxu1  ;;  %v6082_v50 = vpop.f32.mrb[54].mxu0  ;;  %v10295_v31 = vld [vmem:[#allocation68] ss:$16 sps:$4 sm:$0xff]   ;;  %v10298_v43 = vld [vmem:[#allocation68 + $0x8] ss:$16 sps:$4 sm:$0xff]  }
 0xc48   :  { %v6172_v62 = vadd.f32 %v6171_v29, %v6082_v50  ;;  %v9218_v2 = vpop.f32.mrb[67].mxu1  ;;  %v9158_v24 = vpop.f32.mrb[55].mxu0  ;;  %v6182_v60 = vadd.f32 %v8575_v38, %v6169_v28  ;;  %v10297_v28 = vld [vmem:[#allocation68 + $0x4] ss:$16 sps:$4 sm:$0xff]  }
 0xc49   :  { %v10303_v50 = vld [vmem:[#allocation68 + $0x24] ss:$16 sps:$4 sm:$0xff]   ;;  %6989 = vmatprep.subr.bf16.mxu0 %v10297_v28  ;;  %v10301_v2 = vld [vmem:[#allocation68 + $0x20] ss:$16 sps:$4 sm:$0xff]   ;;  %v10304_v24 = vld [vmem:[#allocation68 + $0x28] ss:$16 sps:$4 sm:$0xff]  }
 0xc4a   :  { %v6183_v44 = vadd.f32 %v8575_v38, %v6172_v62  ;;  %v10306_v62 = vld [vmem:[#allocation68 + $0x2c] ss:$16 sps:$4 sm:$0xff]   ;;  %6990 = vmatpush1.bf16.msra.mxu0 %v10295_v31  ;;  %v10309_v28 = vld [vmem:[#allocation68 + $0x44] ss:$16 sps:$4 sm:$0xff]  }
 0xc4b   :  { %6991 = vmatprep.subr.bf16.mxu0 %v10303_v50  ;;  %v10307_v50 = vld [vmem:[#allocation68 + $0x40] ss:$16 sps:$4 sm:$0xff]  }
 0xc4e   :  { %6992 = vmatpush1.bf16.msra.mxu0 %v10301_v2  ;;  %v10315_v2 = vld [vmem:[#allocation68 + $0x64] ss:$16 sps:$4 sm:$0xff]  }
 0xc4f   :  { %6993 = vmatprep.subr.bf16.mxu0 %v10309_v28 }
 0xc52   :  { %6994 = vmatpush1.bf16.msra.mxu0 %v10307_v50 }
 0xc53   :  { %6995 = vmatprep.subr.bf16.mxu0 %v10315_v2 }
 0xc56   :  { %6996 = vmatpush1.bf16.msra.mxu0 %v10313_v1 }
 0xc57   :  { %6997 = vmatprep.subr.bf16.mxu0 %v10321_v12 }
 0xc5a   :  { %6998 = vmatpush1.bf16.msra.mxu0 %v10319_v42 }
 0xc65   :  { %v6298_v9 = vpop.f32.mrb[56].mxu0  ;;  %v6626_v6 = vpop.f32.mrb[68].mxu1 }
 0xc66   :  { %v13327_v56 = vadd.f32 %v6387_v49, %v6298_v9  ;;  %v9197_v32 = vpop.f32.mrb[57].mxu0  ;;  %v9257_v13 = vpop.f32.mrb[69].mxu1  ;;  %v4175_v49 = vadd.f32 %v4174_v59, %v4173_v51 }
 0xc67   :  { %v6301_v39 = vpop.f32.mrb[58].mxu0  ;;  %v6629_v48 = vpop.f32.mrb[70].mxu1 }
 0xc68   :  { %v13329_v14 = vadd.f32 %v6390_v30, %v6301_v39  ;;  %v9198_v53 = vpop.f32.mrb[59].mxu0  ;;  %v9258_v23 = vpop.f32.mrb[71].mxu1  ;;  %10597 = vrcp.f32 %v4175_v49  ;;  %v10300_v30 = vld [vmem:[#allocation68 + $0xc] ss:$16 sps:$4 sm:$0xff]  }
 0xc69   :  { %7030 = vmatprep.subr.bf16.mxu1 %v10300_v30 }
 0xc6a   :  { %7031 = vmatpush1.bf16.msra.mxu1 %v10298_v43  ;;  %v10312_v43 = vld [vmem:[#allocation68 + $0x4c] ss:$16 sps:$4 sm:$0xff]  }
 0xc6b   :  { %7032 = vmatprep.subr.bf16.mxu1 %v10306_v62  ;;  %v10310_v62 = vld [vmem:[#allocation68 + $0x48] ss:$16 sps:$4 sm:$0xff]  }
 0xc6e   :  { %7033 = vmatpush1.bf16.msra.mxu1 %v10304_v24  ;;  %v10318_v24 = vld [vmem:[#allocation68 + $0x6c] ss:$16 sps:$4 sm:$0xff]  }
 0xc6f   :  { %7034 = vmatprep.subr.bf16.mxu1 %v10312_v43 }
 0xc72   :  { %v10598_v7 = vpop.eup %10597  ;;  %7035 = vmatpush1.bf16.msra.mxu1 %v10310_v62 }
 0xc73   :  { %v4179_v52 = vmul.f32 %v10598_v7, %v10596_v15  ;;  %7036 = vmatprep.subr.bf16.mxu1 %v10318_v24 }
 0xc76   :  { %7037 = vmatpush1.bf16.msra.mxu1 %v10316_v3 }
 0xc77   :  { %7038 = vmatprep.subr.bf16.mxu1 %v10324_v47 }
 0xc85   :  { %v6538_v27 = vpop.f32.mrb[60].mxu0 }
 0xc86   :  { %v6627_v36 = vadd.f32 %v6626_v6, %v6538_v27  ;;  %v9237_v41 = vpop.f32.mrb[61].mxu0  ;;  %v6698_v6 = vmul.f32 -10000.0, %v6696_v17  ;;  %v10327_v17 = vld [vmem:[#allocation68 + $0xa4] ss:$16 sps:$4 sm:$0xff]  }
 0xc87   :  { %v6541_v11 = vpop.f32.mrb[62].mxu0  ;;  %6999 = vmatprep.subr.bf16.mxu0 %v10327_v17  ;;  %v10345_v17 = vld [vmem:[#allocation74 + $0x4] ss:$8 sps:$4 sm:$0xff]  }
 0xc88   :  { %v6639_v61 = vadd.f32 %v8612_v18, %v6627_v36  ;;  %v9238_v34 = vpop.f32.mrb[63].mxu0 }
 0xc8a   :  { %v6647_v40 = vrot.slane %v6639_v61, %v13650_v4 }
 0xc8c   :  { %v6648_v37 = vcombine.high %v6647_v40, %v6647_v40  ;;  %v6655_v25 = vrot.slane %v6647_v40, %v13650_v4 }
 0xc8e   :  { %v6666_v33 = vrot.slane %v6655_v25, %v13618_v21  ;;  %v6662_v0 = vrot.slane %v6648_v37, %v13650_v4 }
 0xc90   :  { %v6673_v29 = vmul.f32 %v6666_v33, %v6182_v60  ;;  %v6670_v55 = vrot.slane %v6662_v0, %v13618_v21 }
 0xc92   :  { %6675 = vadd.xlane.f32.xlu0 %v6673_v29  ;;  %v6674_v45 = vmul.f32 %v6670_v55, %v6183_v44 }
 0xc96   :  { %6677 = vadd.xlane.f32.xlu0 %v6674_v45 }
 0xcac   :  { %4187 = vperm.xlu0 %9918, %v4179_v52  }
 0xd1f   :  { %v6676_v16 = vpop.xlane.xlu0 %6675 }
 0xd20   :  { %v6679_v54 = vmul.f32 0.35355338, %v6676_v16  ;;  %v10330_v16 = vld [vmem:[#allocation68 + $0xac] ss:$16 sps:$4 sm:$0xff]  }
 0xd22   :  { %v6699_v9 = vadd.f32 %v6697_v57, %v6679_v54  ;;  %v10322_v57 = vld [vmem:[#allocation68 + $0x88] ss:$16 sps:$4 sm:$0xff]   ;;  %v10325_v54 = vld [vmem:[#allocation68 + $0xa0] ss:$16 sps:$4 sm:$0xff]  }
 0xd23   :  { %v6678_v32 = vpop.xlane.xlu0 %6677  ;;  %7039 = vmatpush1.bf16.msra.mxu1 %v10322_v57  ;;  %7000 = vmatpush1.bf16.msra.mxu0 %v10325_v54  ;;  %v10348_v54 = vld [vmem:[#allocation74 + $0x14] ss:$8 sps:$4 sm:$0xff]  }
 0xd24   :  { %v6701_v13 = vsel %vm4141_vm15, %v6699_v9, -inf  ;;  %v6680_v39 = vmul.f32 0.35355338, %v6678_v32  ;;  %7040 = vmatprep.subr.bf16.mxu1 %v10330_v16  ;;  %v10336_v32 = vld [vmem:[#allocation68 + $0xcc] ss:$16 sps:$4 sm:$0xff]  }
 0xd25   :  { %v6702_v48 = vrot.slane %v6701_v13, 4  ;;  %v10343_v16 = vld [vmem:[#allocation74] ss:$8 sps:$4 sm:$0xff]  }
 0xd26   :  { %v6700_v53 = vadd.f32 %v6698_v6, %v6680_v39  ;;  %v10333_v6 = vld [vmem:[#allocation68 + $0xc4] ss:$16 sps:$4 sm:$0xff]   ;;  %v10334_v39 = vld [vmem:[#allocation68 + $0xc8] ss:$16 sps:$4 sm:$0xff]  }
 0xd27   :  { %v6703_v23 = vmax.f32 %v6701_v13, %v6702_v48  ;;  %v10331_v13 = vld [vmem:[#allocation68 + $0xc0] ss:$16 sps:$4 sm:$0xff]   ;;  %7001 = vmatprep.subr.bf16.mxu0 %v10333_v6  ;;  %v10339_v48 = vld [vmem:[#allocation68 + $0xe4] ss:$16 sps:$4 sm:$0xff]  }
 0xd28   :  { %v6708_v5 = vsel %vm4141_vm15, %v6700_v53, -inf  ;;  %7002 = vmatpush1.bf16.msra.mxu0 %v10331_v13  ;;  %v10351_v6 = vld [vmem:[#allocation74 + $0x24] ss:$8 sps:$4 sm:$0xff]   ;;  %v10354_v13 = vld [vmem:[#allocation74 + $0x34] ss:$8 sps:$4 sm:$0xff]  }
 0xd29   :  { %v6704_v26 = vrot.slane %v6703_v23, 2  ;;  %v6709_v8 = vrot.slane %v6708_v5, 4  ;;  %7003 = vmatprep.subr.bf16.mxu0 %v10339_v48  ;;  %v10357_v48 = vld [vmem:[#allocation74 + $0x44] ss:$8 sps:$4 sm:$0xff]  }
 0xd2b   :  { %v6705_v63 = vmax.f32 %v6703_v23, %v6704_v26  ;;  %v6710_v15 = vmax.f32 %v6708_v5, %v6709_v8  ;;  %v10337_v23 = vld [vmem:[#allocation68 + $0xe0] ss:$16 sps:$4 sm:$0xff]   ;;  %v10340_v5 = vld [vmem:[#allocation68 + $0xe8] ss:$16 sps:$4 sm:$0xff]   ;;  %v4183_v8 = vpop.permute.xlu1 %4182 }
 0xd2c   :  { %7004 = vmatpush1.bf16.msra.mxu0 %v10337_v23  ;;  %v8450_v26 = vld [vmem:[#allocation43] ss:$0 sm:$0xff]  ;;  %v10360_v23 = vld [vmem:[#allocation74 + $0x54] ss:$8 sps:$4 sm:$0xff]  }
 0xd2d   :  { %v6706_v46 = vrot.slane %v6705_v63, 1  ;;  %v6711_v10 = vrot.slane %v6710_v15, 2  ;;  %7613 = vmatprep.subr.bf16.mxu0 %v10345_v17 }
 0xd2f   :  { %v6707_v27 = vmax.f32 %v6705_v63, %v6706_v46  ;;  %v6712_v18 = vmax.f32 %v6710_v15, %v6711_v10  ;;  %v13651_v63 = vld [vmem:[#allocation153_spill] sm:$0xff]  ;;  %v4188_v10 = vpop.permute.xlu0 %4187 }
 0xd30   :  { %v3838_v15 = vadd.f32 %v8450_v26, %v13651_v63  ;;  %v10366_v63 = vld [vmem:[#allocation74 + $0x74] ss:$8 sps:$4 sm:$0xff]  }
 0xd31   :  { %v6715_v36 = vsub.f32 %v6699_v9, %v6707_v27  ;;  %v6713_v41 = vrot.slane %v6712_v18, 1  ;;  %v10328_v9 = vld [vmem:[#allocation68 + $0xa8] ss:$16 sps:$4 sm:$0xff]  }
 0xd32   :  { %7041 = vmatpush1.bf16.msra.mxu1 %v10328_v9  ;;  %v4190_v46 = vmul.f32 %v4183_v8, %v3838_v15  ;;  %v13652_v27 = vld [vmem:[#allocation154_spill] sm:$0xff] }
 0xd33   :  { %v6717_v11 = vmul.f32 1.442695, %v6715_v36  ;;  %v6714_v61 = vmax.f32 %v6712_v18, %v6713_v41  ;;  %7042 = vmatprep.subr.bf16.mxu1 %v10336_v32  ;;  %v3839_v18 = vadd.f32 %v8450_v26, %v13652_v27  ;;  %v10346_v9 = vld [vmem:[#allocation74 + $0x10] ss:$8 sps:$4 sm:$0xff]   ;;  %v10349_v32 = vld [vmem:[#allocation74 + $0x20] ss:$8 sps:$4 sm:$0xff]  }
 0xd34   :  { %v4192_v36 = vrot.slane %v4190_v46, 4  ;;  %v10363_v26 = vld [vmem:[#allocation74 + $0x64] ss:$8 sps:$4 sm:$0xff]   ;;  %v10361_v8 = vld [vmem:[#allocation74 + $0x60] ss:$8 sps:$4 sm:$0xff]  }
 0xd35   :  { %10599 = vpow2.f32 %v6717_v11  ;;  %v6716_v34 = vsub.f32 %v6700_v53, %v6714_v61  ;;  %v10342_v53 = vld [vmem:[#allocation68 + $0xec] ss:$16 sps:$4 sm:$0xff]   ;;  %v4191_v41 = vmul.f32 %v4188_v10, %v3839_v18  ;;  %v10372_v27 = vld [vmem:[#allocation74 + $0x94] ss:$8 sps:$4 sm:$0xff]  }
 0xd36   :  { %7043 = vmatpush1.bf16.msra.mxu1 %v10334_v39  ;;  %v8592_v11 = vld [vmem:[#allocation67] ss:$0 sm:$0xff]  ;;  %v4193_v61 = vadd.f32 %v4192_v36, %v4190_v46  ;;  %v10369_v46 = vld [vmem:[#allocation74 + $0x84] ss:$8 sps:$4 sm:$0xff]   ;;  %v10367_v10 = vld [vmem:[#allocation74 + $0x80] ss:$8 sps:$4 sm:$0xff]  }
 0xd37   :  { %v6719_v35 = vmul.f32 1.442695, %v6716_v34  ;;  %7044 = vmatprep.subr.bf16.mxu1 %v10342_v53  ;;  %v4198_v34 = vrot.slane %v4191_v41, 4  ;;  %v10352_v39 = vld [vmem:[#allocation74 + $0x30] ss:$8 sps:$4 sm:$0xff]  }
 0xd38   :  { %v10355_v53 = vld [vmem:[#allocation74 + $0x40] ss:$8 sps:$4 sm:$0xff]   ;;  %v10364_v15 = vld [vmem:[#allocation74 + $0x70] ss:$8 sps:$4 sm:$0xff]   ;;  %v10375_v36 = vld [vmem:[#allocation74 + $0xa4] ss:$8 sps:$4 sm:$0xff]  }
 0xd39   :  { %10601 = vpow2.f32 %v6719_v35  ;;  %v6401_v35 = vadd.f32 %v8592_v11, %v13327_v56  ;;  %v10370_v18 = vld [vmem:[#allocation74 + $0x90] ss:$8 sps:$4 sm:$0xff]  }
 0xd3a   :  { %7045 = vmatpush1.bf16.msra.mxu1 %v10340_v5  ;;  %v10358_v5 = vld [vmem:[#allocation74 + $0x50] ss:$8 sps:$4 sm:$0xff]  }
 0xd3f   :  { %v10600_v4 = vpop.eup %10599 }
 0xd40   :  { %v6721_v40 = vsel %vm4141_vm15, %v10600_v4, 0.0 }
 0xd41   :  { %v6722_v38 = vrot.slane %v6721_v40, 4 }
 0xd43   :  { %v10602_v37 = vpop.eup %10601  ;;  %v6723_v25 = vadd.f32 %v6722_v38, %v6721_v40  ;;  %v4194_v40 = vrot.slane %v4193_v61, 2  ;;  %v4199_v38 = vadd.f32 %v4198_v34, %v4191_v41  ;;  %v10373_v41 = vld [vmem:[#allocation74 + $0xa0] ss:$8 sps:$4 sm:$0xff]   ;;  %v10381_v34 = vld [vmem:[#allocation74 + $0xc4] ss:$8 sps:$4 sm:$0xff]  }
 0xd44   :  { %v6728_v20 = vsel %vm4141_vm15, %v10602_v37, 0.0 }
 0xd45   :  { %v6729_v60 = vrot.slane %v6728_v20, 4  ;;  %v6724_v33 = vrot.slane %v6723_v25, 2 }
 0xd47   :  { %v6730_v0 = vadd.f32 %v6729_v60, %v6728_v20  ;;  %v6725_v44 = vadd.f32 %v6724_v33, %v6723_v25  ;;  %v6402_v20 = vadd.f32 %v8592_v11, %v13329_v14  ;;  %v4195_v33 = vadd.f32 %v4194_v40, %v4193_v61  ;;  %v10378_v11 = vld [vmem:[#allocation74 + $0xb4] ss:$8 sps:$4 sm:$0xff]   ;;  %v10376_v61 = vld [vmem:[#allocation74 + $0xb0] ss:$8 sps:$4 sm:$0xff]  }
 0xd48   :  { %v10384_v40 = vld [vmem:[#allocation74 + $0xd4] ss:$8 sps:$4 sm:$0xff]  }
 0xd49   :  { %v6726_v29 = vrot.slane %v6725_v44, 1  ;;  %v6731_v55 = vrot.slane %v6730_v0, 2 }
 0xd4b   :  { %v6727_v51 = vadd.f32 %v6726_v29, %v6725_v44  ;;  %v6732_v45 = vadd.f32 %v6731_v55, %v6730_v0  ;;  %v4200_v0 = vrot.slane %v4199_v38, 2 }
 0xd4d   :  { %10603 = vrcp.f32 %v6727_v51  ;;  %v6733_v59 = vrot.slane %v6732_v45, 1 }
 0xd4f   :  { %v6734_v49 = vadd.f32 %v6733_v59, %v6732_v45  ;;  %v4196_v45 = vrot.slane %v4195_v33, 1  ;;  %v4201_v59 = vadd.f32 %v4200_v0, %v4199_v38  ;;  %v10387_v38 = vld [vmem:[#allocation74 + $0xe4] ss:$8 sps:$4 sm:$0xff]  }
 0xd51   :  { %10605 = vrcp.f32 %v6734_v49  ;;  %v4202_v28 = vrot.slane %v4201_v59, 1 }
 0xd53   :  { %v4203_v14 = vadd.f32 %v4202_v28, %v4201_v59 }
 0xd57   :  { %v10604_v7 = vpop.eup %10603 }
 0xd58   :  { %v6736_v52 = vmul.f32 %v10604_v7, %v10600_v4 }
 0xd5a   :  { %6741 = vperm.xlu1 %9917, %v6736_v52  }
 0xd5b   :  { %v10606_v31 = vpop.eup %10605 }
 0xd5c   :  { %v6738_v30 = vmul.f32 %v10606_v31, %v10602_v37  ;;  %v4197_v31 = vadd.f32 %v4196_v45, %v4195_v33  ;;  %v6799_v33 = vld [vmem:[#allocation70] sm:$0xf] }
 0xd5d   :  { %v6804_v0 = vrot.slane %v6799_v33, %v13618_v21 }
 0xd5e   :  { %6746 = vperm.xlu1 %9917, %v6738_v30  }
 0xdd9   :  { %v6742_v4 = vpop.permute.xlu1 %6741 }
 0xdda   :  { %v6749_v37 = vmul.f32 %v6742_v4, %v6401_v35  ;;  %v10379_v35 = vld [vmem:[#allocation74 + $0xc0] ss:$8 sps:$4 sm:$0xff]   ;;  %v10382_v4 = vld [vmem:[#allocation74 + $0xd0] ss:$8 sps:$4 sm:$0xff]  }
 0xddc   :  { %v6751_v25 = vrot.slane %v6749_v37, 4 }
 0xddd   :  { %v6747_v60 = vpop.permute.xlu1 %6746 }
 0xdde   :  { %v6752_v44 = vadd.f32 %v6751_v25, %v6749_v37  ;;  %v6750_v29 = vmul.f32 %v6747_v60, %v6402_v20  ;;  %v10385_v37 = vld [vmem:[#allocation74 + $0xe0] ss:$8 sps:$4 sm:$0xff]   ;;  %v10390_v25 = vld [vmem:[#allocation74 + $0xf4] ss:$8 sps:$4 sm:$0xff]   ;;  %v10388_v20 = vld [vmem:[#allocation74 + $0xf0] ss:$8 sps:$4 sm:$0xff]  }
 0xddf   :  { %v10393_v60 = vld [vmem:[#allocation74 + $0x104] ss:$8 sps:$4 sm:$0xff]  }
 0xde0   :  { %v6753_v55 = vrot.slane %v6752_v44, 2  ;;  %v6757_v51 = vrot.slane %v6750_v29, 4 }
 0xde2   :  { %v6754_v49 = vadd.f32 %v6753_v55, %v6752_v44  ;;  %v6758_v7 = vadd.f32 %v6757_v51, %v6750_v29  ;;  %v6812_v44 = vrot.slane %v6799_v33, %v13632_v19  ;;  %v6808_v29 = vrot.slane %v6799_v33, %v13633_v22  ;;  %v13653_v55 = vld [vmem:[#allocation166_spill] sm:$0xff] }
 0xde3   :  { %v6816_v51 = vrot.slane %v6799_v33, %v13653_v55 }
 0xde4   :  { %v6755_v52 = vrot.slane %v6754_v49, 1  ;;  %v6759_v56 = vrot.slane %v6758_v7, 2 }
 0xde6   :  { %v6756_v43 = vadd.f32 %v6755_v52, %v6754_v49  ;;  %v6760_v30 = vadd.f32 %v6759_v56, %v6758_v7 }
 0xde8   :  { %v6763_v50 = vadd.f32 %v6756_v43, %v4197_v31  ;;  %v6761_v62 = vrot.slane %v6760_v30, 1 }
 0xdea   :  { %v6762_v2 = vadd.f32 %v6761_v62, %v6760_v30  ;;  %v6765_v24 = vpack.c.bf16 %v6763_v50, %v6763_v50 }
 0xdec   :  { %v6764_v1 = vadd.f32 %v6762_v2, %v4203_v14  ;;  %v6823_v12 = vunpack.c.l.b16 %v6765_v24 }
 0xdee   :  { %v6766_v3 = vpack.c.bf16 %v6764_v1, %v6764_v1 }
 0xdf0   :  { %v6824_v47 = vunpack.c.l.b16 %v6766_v3 }
 0xdf2   :  { %v6826_v42 = vsel %vm6825_vm3, %v6824_v47, %v6823_v12 }
 0xdf3   :  { %v6827_v57 = vpack.c.b16 %v6826_v42, %v6826_v42 }
 0xdf5   :  { %7022 = vmatmul.mubr.bf16.vlgmr.msra.gmra.mrb[64].mxu0 %v6827_v57  ;;  %7063 = vmatmul.mubr.bf16.vlgmr.msra.gmra.mrb[72].mxu1 %v6827_v57 }
 0xdf6   :  { %7614 = vmatpush1.bf16.msra.mxu0 %v10343_v16 }
 0xdf7   :  { %7615 = vmatprep.subr.bf16.mxu0 %v10348_v54 }
 0xdfa   :  { %7616 = vmatpush1.bf16.msra.mxu0 %v10346_v9 }
 0xdfb   :  { %7617 = vmatprep.subr.bf16.mxu0 %v10351_v6 }
 0xdfe   :  { %7618 = vmatpush1.bf16.msra.mxu0 %v10349_v32 }
 0xdff   :  { %7619 = vmatprep.subr.bf16.mxu0 %v10354_v13 }
 0xe02   :  { %7620 = vmatpush1.bf16.msra.mxu0 %v10352_v39 }
 0xe03   :  { %7621 = vmatprep.subr.bf16.mxu0 %v10357_v48 }
 0xe06   :  { %7622 = vmatpush1.bf16.msra.mxu0 %v10355_v53 }
 0xe07   :  { %7623 = vmatprep.subr.bf16.mxu0 %v10360_v23 }
 0xe0a   :  { %7624 = vmatpush1.bf16.msra.mxu0 %v10358_v5 }
 0xe0b   :  { %7625 = vmatprep.subr.bf16.mxu0 %v10363_v26 }
 0xe0e   :  { %7626 = vmatpush1.bf16.msra.mxu0 %v10361_v8 }
 0xe0f   :  { %7627 = vmatprep.subr.bf16.mxu0 %v10366_v63 }
 0xe12   :  { %7628 = vmatpush1.bf16.msra.mxu0 %v10364_v15 }
 0xe13   :  { %7629 = vmatprep.subr.bf16.mxu0 %v10369_v46 }
 0xe16   :  { %7630 = vmatpush1.bf16.msra.mxu0 %v10367_v10 }
 0xe17   :  { %7631 = vmatprep.subr.bf16.mxu0 %v10372_v27 }
 0xe1a   :  { %7632 = vmatpush1.bf16.msra.mxu0 %v10370_v18 }
 0xe1b   :  { %7633 = vmatprep.subr.bf16.mxu0 %v10375_v36 }
 0xe1e   :  { %7634 = vmatpush1.bf16.msra.mxu0 %v10373_v41 }
 0xe1f   :  { %7635 = vmatprep.subr.bf16.mxu0 %v10378_v11 }
 0xe22   :  { %7636 = vmatpush1.bf16.msra.mxu0 %v10376_v61 }
 0xe23   :  { %7637 = vmatprep.subr.bf16.mxu0 %v10381_v34 }
 0xe26   :  { %7638 = vmatpush1.bf16.msra.mxu0 %v10379_v35 }
 0xe27   :  { %7639 = vmatprep.subr.bf16.mxu0 %v10384_v40 }
 0xe2a   :  { %7640 = vmatpush1.bf16.msra.mxu0 %v10382_v4 }
 0xe2b   :  { %7641 = vmatprep.subr.bf16.mxu0 %v10387_v38 }
 0xe2e   :  { %7642 = vmatpush1.bf16.msra.mxu0 %v10385_v37 }
 0xe2f   :  { %7643 = vmatprep.subr.bf16.mxu0 %v10390_v25 }
 0xe32   :  { %7644 = vmatpush1.bf16.msra.mxu0 %v10388_v20 }
 0xe33   :  { %7654 = vmatprep.subr.bf16.mxu0 %v10393_v60 }
 0xec8   :  { %v7023_v45 = vpop.f32.mrb[64].mxu0  ;;  %v7064_v59 = vpop.f32.mrb[72].mxu1 }
 0xec9   :  { %v7024_v49 = vadd.f32 %v7023_v45, %v6804_v0  ;;  %v7065_v7 = vadd.f32 %v7064_v59, %v6812_v44  ;;  %v7025_v52 = vpop.f32.mrb[65].mxu0  ;;  %v7066_v56 = vpop.f32.mrb[73].mxu1 }
 0xeca   :  { %v7026_v31 = vadd.f32 %v7025_v52, %v6808_v29  ;;  %v7067_v28 = vadd.f32 %v7066_v56, %v6816_v51  ;;  %v7027_v43 = vpop.f32.mrb[66].mxu0  ;;  %v7068_v30 = vpop.f32.mrb[74].mxu1 }
 0xecb   :  { %v7074_v50 = vsel %vm7073_vm4, %v7024_v49, 0.0  ;;  %v7088_v62 = vsel %vm7073_vm4, %v7065_v7, 0.0  ;;  %v7028_v14 = vpop.f32.mrb[67].mxu0  ;;  %v7069_v2 = vpop.f32.mrb[75].mxu1 }
 0xecc   :  { %v7075_v24 = vrot.slane %v7074_v50, 4  ;;  %v7089_v1 = vrot.slane %v7088_v62, 4  ;;  %v7081_v3 = vsel %vm7073_vm4, %v7026_v31, 0.0  ;;  %v7095_v12 = vsel %vm7073_vm4, %v7067_v28, 0.0 }
 0xecd   :  { %v7082_v47 = vrot.slane %v7081_v3, 4  ;;  %v7096_v42 = vrot.slane %v7095_v12, 4 }
 0xece   :  { %v7076_v57 = vadd.f32 %v7075_v24, %v7074_v50  ;;  %v7090_v17 = vadd.f32 %v7089_v1, %v7088_v62 }
 0xecf   :  { %v7083_v16 = vadd.f32 %v7082_v47, %v7081_v3  ;;  %v7097_v54 = vadd.f32 %v7096_v42, %v7095_v12 }
 0xed0   :  { %v7077_v9 = vrot.slane %v7076_v57, 2  ;;  %v7091_v6 = vrot.slane %v7090_v17, 2 }
 0xed1   :  { %v7084_v32 = vrot.slane %v7083_v16, 2  ;;  %v7098_v13 = vrot.slane %v7097_v54, 2 }
 0xed2   :  { %v7078_v39 = vadd.f32 %v7077_v9, %v7076_v57  ;;  %v7092_v48 = vadd.f32 %v7091_v6, %v7090_v17 }
 0xed3   :  { %v7085_v53 = vadd.f32 %v7084_v32, %v7083_v16  ;;  %v7099_v23 = vadd.f32 %v7098_v13, %v7097_v54 }
 0xed4   :  { %v7079_v5 = vrot.slane %v7078_v39, 1  ;;  %v7093_v26 = vrot.slane %v7092_v48, 1 }
 0xed5   :  { %v7086_v8 = vrot.slane %v7085_v53, 1  ;;  %v7100_v63 = vrot.slane %v7099_v23, 1 }
 0xed6   :  { %v7080_v15 = vadd.f32 %v7079_v5, %v7078_v39  ;;  %v7094_v46 = vadd.f32 %v7093_v26, %v7092_v48  ;;  %v7071_v48 = vld [vmem:[#allocation71] sm:$0xf] }
 0xed7   :  { %v7087_v10 = vadd.f32 %v7086_v8, %v7085_v53  ;;  %v7101_v27 = vadd.f32 %v7100_v63, %v7099_v23  ;;  %v7072_v53 = vld [vmem:[#allocation73] sm:$0xf]  ;;  %v7163_v23 = vrot.slane %v7071_v48, %v13618_v21  ;;  %v7171_v26 = vrot.slane %v7071_v48, %v13632_v19 }
 0xed8   :  { %v7103_v18 = vmul.f32 0.5, %v7080_v15  ;;  %v7105_v36 = vmul.f32 0.5, %v7094_v46  ;;  %v7188_v15 = vrot.slane %v7072_v53, %v13618_v21  ;;  %v7167_v46 = vrot.slane %v7071_v48, %v13633_v22 }
 0xed9   :  { %v7104_v41 = vmul.f32 0.5, %v7087_v10  ;;  %v7106_v11 = vmul.f32 0.5, %v7101_v27 }
 0xeda   :  { %v7107_v61 = vsub.f32 %v7024_v49, %v7103_v18  ;;  %v7109_v34 = vsub.f32 %v7065_v7, %v7105_v36  ;;  %v7196_v18 = vrot.slane %v7072_v53, %v13632_v19  ;;  %v7175_v36 = vrot.slane %v7071_v48, %v13653_v55  ;;  %v10438_v48 = vld [vmem:[#allocation74 + $0x1f4] ss:$8 sps:$4 sm:$0xff]  }
 0xedb   :  { %v7108_v35 = vsub.f32 %v7026_v31, %v7104_v41  ;;  %v13359_v4 = vsub.f32 %v7067_v28, %v7106_v11 }
 0xedc   :  { %v7111_v40 = vmul.f32 %v7107_v61, %v7107_v61  ;;  %v7113_v38 = vmul.f32 %v7109_v34, %v7109_v34 }
 0xedd   :  { %v7112_v37 = vmul.f32 %v7108_v35, %v7108_v35  ;;  %v7114_v25 = vmul.f32 %v13359_v4, %v13359_v4 }
 0xede   :  { %v7115_v20 = vsel %vm7073_vm4, %v7111_v40, 0.0  ;;  %v7129_v60 = vsel %vm7073_vm4, %v7113_v38, 0.0  ;;  %v7192_v38 = vrot.slane %v7072_v53, %v13633_v22 }
 0xedf   :  { %v7116_v33 = vrot.slane %v7115_v20, 4  ;;  %v7130_v0 = vrot.slane %v7129_v60, 4  ;;  %v7122_v44 = vsel %vm7073_vm4, %v7112_v37, 0.0  ;;  %v7136_v29 = vsel %vm7073_vm4, %v7114_v25, 0.0 }
 0xee0   :  { %v7123_v51 = vrot.slane %v7122_v44, 4  ;;  %v7137_v45 = vrot.slane %v7136_v29, 4 }
 0xee1   :  { %v7117_v59 = vadd.f32 %v7116_v33, %v7115_v20  ;;  %v7131_v49 = vadd.f32 %v7130_v0, %v7129_v60 }
 0xee2   :  { %v7124_v7 = vadd.f32 %v7123_v51, %v7122_v44  ;;  %v7138_v52 = vadd.f32 %v7137_v45, %v7136_v29  ;;  %v10391_v45 = vld [vmem:[#allocation74 + $0x100] ss:$8 sps:$4 sm:$0xff]  }
 0xee3   :  { %v7118_v56 = vrot.slane %v7117_v59, 2  ;;  %v7132_v31 = vrot.slane %v7131_v49, 2 }
 0xee4   :  { %v7125_v28 = vrot.slane %v7124_v7, 2  ;;  %v7139_v43 = vrot.slane %v7138_v52, 2 }
 0xee5   :  { %v7119_v30 = vadd.f32 %v7118_v56, %v7117_v59  ;;  %v7133_v50 = vadd.f32 %v7132_v31, %v7131_v49  ;;  %v10396_v49 = vld [vmem:[#allocation74 + $0x114] ss:$8 sps:$4 sm:$0xff]   ;;  %v10400_v31 = vld [vmem:[#allocation74 + $0x130] ss:$8 sps:$4 sm:$0xff]  }
 0xee6   :  { %v7126_v62 = vadd.f32 %v7125_v28, %v7124_v7  ;;  %v7140_v14 = vadd.f32 %v7139_v43, %v7138_v52  ;;  %v10399_v7 = vld [vmem:[#allocation74 + $0x124] ss:$8 sps:$4 sm:$0xff]   ;;  %v10397_v52 = vld [vmem:[#allocation74 + $0x120] ss:$8 sps:$4 sm:$0xff]   ;;  %v10402_v56 = vld [vmem:[#allocation74 + $0x134] ss:$8 sps:$4 sm:$0xff]  }
 0xee7   :  { %v7120_v2 = vrot.slane %v7119_v30, 1  ;;  %v7134_v24 = vrot.slane %v7133_v50, 1  ;;  %v10405_v28 = vld [vmem:[#allocation74 + $0x144] ss:$8 sps:$4 sm:$0xff]   ;;  %v10403_v43 = vld [vmem:[#allocation74 + $0x140] ss:$8 sps:$4 sm:$0xff]  }
 0xee8   :  { %v7127_v1 = vrot.slane %v7126_v62, 1  ;;  %v7141_v3 = vrot.slane %v7140_v14, 1 }
 0xee9   :  { %v7121_v12 = vadd.f32 %v7120_v2, %v7119_v30  ;;  %v7135_v47 = vadd.f32 %v7134_v24, %v7133_v50  ;;  %v10408_v30 = vld [vmem:[#allocation74 + $0x154] ss:$8 sps:$4 sm:$0xff]   ;;  %v10406_v50 = vld [vmem:[#allocation74 + $0x150] ss:$8 sps:$4 sm:$0xff]  }
 0xeea   :  { %v7128_v42 = vadd.f32 %v7127_v1, %v7126_v62  ;;  %v7142_v57 = vadd.f32 %v7141_v3, %v7140_v14  ;;  %v10411_v62 = vld [vmem:[#allocation74 + $0x164] ss:$8 sps:$4 sm:$0xff]   ;;  %v10409_v14 = vld [vmem:[#allocation74 + $0x160] ss:$8 sps:$4 sm:$0xff]   ;;  %v10414_v2 = vld [vmem:[#allocation74 + $0x174] ss:$8 sps:$4 sm:$0xff]  }
 0xeeb   :  { %v7143_v17 = vmul.f32 0.5, %v7121_v12  ;;  %v7145_v16 = vmul.f32 0.5, %v7135_v47  ;;  %v10412_v24 = vld [vmem:[#allocation74 + $0x170] ss:$8 sps:$4 sm:$0xff]   ;;  %v10417_v1 = vld [vmem:[#allocation74 + $0x184] ss:$8 sps:$4 sm:$0xff]  }
 0xeec   :  { %v7144_v54 = vmul.f32 0.5, %v7128_v42  ;;  %v7146_v9 = vmul.f32 0.5, %v7142_v57  ;;  %v10415_v3 = vld [vmem:[#allocation74 + $0x180] ss:$8 sps:$4 sm:$0xff]   ;;  %v10420_v12 = vld [vmem:[#allocation74 + $0x194] ss:$8 sps:$4 sm:$0xff]  }
 0xeed   :  { %v7147_v6 = vadd.f32 1e-05, %v7143_v17  ;;  %v7149_v32 = vadd.f32 1e-05, %v7145_v16  ;;  %v10418_v47 = vld [vmem:[#allocation74 + $0x190] ss:$8 sps:$4 sm:$0xff]  }
 0xeee   :  { %v7148_v13 = vadd.f32 1e-05, %v7144_v54  ;;  %v7150_v39 = vadd.f32 1e-05, %v7146_v9  ;;  %v10423_v42 = vld [vmem:[#allocation74 + $0x1a4] ss:$8 sps:$4 sm:$0xff]  }
 0xeef   :  { %10607 = vrsqrt.f32 %v7147_v6  ;;  %v10421_v57 = vld [vmem:[#allocation74 + $0x1a0] ss:$8 sps:$4 sm:$0xff]   ;;  %v10426_v17 = vld [vmem:[#allocation74 + $0x1b4] ss:$8 sps:$4 sm:$0xff]   ;;  %v10424_v16 = vld [vmem:[#allocation74 + $0x1b0] ss:$8 sps:$4 sm:$0xff]  }
 0xef0   :  { %10609 = vrsqrt.f32 %v7149_v32  ;;  %v10429_v54 = vld [vmem:[#allocation74 + $0x1c4] ss:$8 sps:$4 sm:$0xff]   ;;  %v10427_v9 = vld [vmem:[#allocation74 + $0x1c0] ss:$8 sps:$4 sm:$0xff]   ;;  %v10432_v6 = vld [vmem:[#allocation74 + $0x1d4] ss:$8 sps:$4 sm:$0xff]  }
 0xef1   :  { %10611 = vrsqrt.f32 %v7148_v13  ;;  %v10430_v32 = vld [vmem:[#allocation74 + $0x1d0] ss:$8 sps:$4 sm:$0xff]   ;;  %v10435_v13 = vld [vmem:[#allocation74 + $0x1e4] ss:$8 sps:$4 sm:$0xff]  }
 0xef2   :  { %10613 = vrsqrt.f32 %v7150_v39  ;;  %v10433_v39 = vld [vmem:[#allocation74 + $0x1e0] ss:$8 sps:$4 sm:$0xff]  }
 0xef9   :  { %v10608_v5 = vpop.eup %10607 }
 0xefa   :  { %v10610_v8 = vpop.eup %10609  ;;  %v7155_v63 = vmul.f32 %v10608_v5, %v7107_v61  ;;  %v7200_v61 = vrot.slane %v7072_v53, %v13653_v55  ;;  %v10394_v55 = vld [vmem:[#allocation74 + $0x110] ss:$8 sps:$4 sm:$0xff]  }
 0xefb   :  { %v10612_v10 = vpop.eup %10611  ;;  %v7157_v27 = vmul.f32 %v10610_v8, %v7109_v34  ;;  %v10436_v53 = vld [vmem:[#allocation74 + $0x1f0] ss:$8 sps:$4 sm:$0xff]   ;;  %v10440_v8 = vld [vmem:[%s13654_s9] sm:$0xff]  }
 0xefc   :  { %v10614_v41 = vpop.eup %10613  ;;  %v7180_v11 = vmul.f32 %v7163_v23, %v7155_v63  ;;  %v7156_v40 = vmul.f32 %v10612_v10, %v7108_v35  ;;  %v10441_v63 = vld [vmem:[%s13654_s9 + $0x48] sm:$0xff]   ;;  %v10444_v10 = vld [vmem:[%s13654_s9 + $0x10] sm:$0xff]  }
 0xefd   :  { %v7182_v37 = vmul.f32 %v7171_v26, %v7157_v27  ;;  %v7158_v25 = vmul.f32 %v10614_v41, %v13359_v4  ;;  %v10439_v26 = vld [vmem:[%s13654_s9 + $0x40] sm:$0xff]   ;;  %v10445_v27 = vld [vmem:[%s13654_s9 + $0x58] sm:$0xff]  }
 0xefe   :  { %v7205_v20 = vadd.f32 %v7188_v15, %v7180_v11  ;;  %v7181_v60 = vmul.f32 %v7167_v46, %v7156_v40  ;;  %8968 = vmatprep.subr.bf16.mxu1 %v10439_v26  ;;  %v10442_v15 = vld [vmem:[%s13654_s9 + $0x8] sm:$0xff]   ;;  %v10443_v46 = vld [vmem:[%s13654_s9 + $0x50] sm:$0xff]   ;;  %v10448_v41 = vld [vmem:[%s13654_s9 + $0x20] sm:$0xff]  }
 0xeff   :  { %v13376_v33 = vadd.f32 %v7196_v18, %v7182_v37  ;;  %v7183_v0 = vmul.f32 %v7175_v36, %v7158_v25  ;;  %8969 = vmatpush3.bf16.msra.mxu1 %v10440_v8  ;;  %v10446_v18 = vld [vmem:[%s13654_s9 + $0x18] sm:$0xff]   ;;  %v10447_v36 = vld [vmem:[%s13654_s9 + $0x60] sm:$0xff]   ;;  %v10449_v11 = vld [vmem:[%s13654_s9 + $0x68] sm:$0xff]  }
 0xf00   :  { %v7206_v34 = vadd.f32 %v7192_v38, %v7181_v60  ;;  %10615 = vtanh.f32 %v7205_v20  ;;  %8970 = vmatprep.subr.bf16.mxu1 %v10441_v63  ;;  %v10450_v40 = vld [vmem:[%s13654_s9 + $0x28] sm:$0xff]   ;;  %v10451_v38 = vld [vmem:[%s13654_s9 + $0x70] sm:$0xff]   ;;  %v10453_v25 = vld [vmem:[%s13654_s9 + $0x78] sm:$0xff]  }
 0xf01   :  { %v7208_v19 = vadd.f32 %v7200_v61, %v7183_v0  ;;  %v10452_v37 = vld [vmem:[%s13654_s9 + $0x30] sm:$0xff]   ;;  %v10454_v61 = vld [vmem:[%s13654_s9 + $0x38] sm:$0xff]  }
 0xf02   :  { %10617 = vtanh.f32 %v7206_v34  ;;  %v7281_v20 = vld [vmem:[#allocation76] sm:$0x3]  ;;  %v7695_v63 = vld [vmem:[#allocation77] sm:$0x3] }
 0xf03   :  { %10619 = vtanh.f32 %v7208_v19  ;;  %8971 = vmatpush3.bf16.msra.mxu1 %v10442_v15  ;;  %v7286_v60 = vrot.slane %v7281_v20, %v13618_v21  ;;  %v7696_v15 = vld [vmem:[#allocation79] sm:$0x3] }
 0xf04   :  { %10621 = vtanh.f32 %v13376_v33  ;;  %8972 = vmatprep.subr.bf16.mxu1 %v10443_v46  ;;  %v7290_v33 = vrot.slane %v7281_v20, %v13633_v22  ;;  %v7743_v46 = vrot.slane %v7695_v63, %v13618_v21 }
 0xf07   :  { %8973 = vmatpush3.bf16.msra.mxu1 %v10444_v10 }
 0xf08   :  { %8974 = vmatprep.subr.bf16.mxu1 %v10445_v27  ;;  %v7747_v27 = vrot.slane %v7695_v63, %v13633_v22 }
 0xf0a   :  { %v10616_v44 = vpop.eup %10615 }
 0xf0b   :  { %v7213_v59 = vpack.c.bf16 %v10616_v44, %v10616_v44  ;;  %8975 = vmatpush3.bf16.msra.mxu1 %v10446_v18 }
 0xf0c   :  { %v10618_v29 = vpop.eup %10617  ;;  %8976 = vmatprep.subr.bf16.mxu1 %v10447_v36 }
 0xf0d   :  { %v10620_v35 = vpop.eup %10619  ;;  %v7214_v51 = vpack.c.bf16 %v10618_v29, %v10618_v29 }
 0xf0e   :  { %v7216_v4 = vpack.c.bf16 %v10620_v35, %v10620_v35  ;;  %v10622_v23 = vpop.eup %10621 }
 0xf0f   :  { %7645 = vmatprep.mubr.bf16.mxu0 %v7214_v51  ;;  %v7215_v5 = vpack.c.bf16 %v10622_v23, %v10622_v23  ;;  %8977 = vmatpush3.bf16.msra.mxu1 %v10448_v41  ;;  %v7756_v41 = vrot.slane %v7696_v15, %v13618_v21  ;;  %v10455_v21 = vld [vmem:[%s12142_s5] sm:$0xff]  }
 0xf10   :  { %7646 = vmatmul.mubr.bf16.vlgmr.msra.gmra.mrb[68].mxu0 %v7213_v59  ;;  %8978 = vmatprep.subr.bf16.mxu1 %v10449_v11 }
 0xf11   :  { %7655 = vmatpush1.bf16.msra.mxu0 %v10391_v45  ;;  %7686 = vmatprep.mubr.bf16.mxu0 %v7216_v4 }
 0xf12   :  { %7656 = vmatprep.subr.bf16.mxu0 %v10396_v49 }
 0xf13   :  { %8979 = vmatpush3.bf16.msra.mxu1 %v10450_v40  ;;  %v7760_v40 = vrot.slane %v7696_v15, %v13633_v22  ;;  %v10456_v22 = vld [vmem:[%s12142_s5 + $0x8] sm:$0xff]   ;;  %v8730_v15 = vld [vmem:[#allocation85] ss:$0 sm:$0xff] }
 0xf14   :  { %8980 = vmatprep.subr.bf16.mxu1 %v10451_v38 }
 0xf15   :  { %7657 = vmatpush1.bf16.msra.mxu0 %v10394_v55 }
 0xf16   :  { %7658 = vmatprep.subr.bf16.mxu0 %v10399_v7 }
 0xf17   :  { %8981 = vmatpush3.bf16.msra.mxu1 %v10452_v37 }
 0xf18   :  { %8982 = vmatprep.subr.bf16.mxu1 %v10453_v25 }
 0xf19   :  { %7659 = vmatpush1.bf16.msra.mxu0 %v10397_v52 }
 0xf1a   :  { %7660 = vmatprep.subr.bf16.mxu0 %v10402_v56 }
 0xf1b   :  { %8983 = vmatpush3.bf16.msra.mxu1 %v10454_v61 }
 0xf1c   :  { %9259 = vmatprep.subr.bf16.mxu1 %v13598_v58 }
 0xf1d   :  { %7661 = vmatpush1.bf16.msra.mxu0 %v10400_v31 }
 0xf1e   :  { %7662 = vmatprep.subr.bf16.mxu0 %v10405_v28 }
 0xf21   :  { %7663 = vmatpush1.bf16.msra.mxu0 %v10403_v43 }
 0xf22   :  { %7664 = vmatprep.subr.bf16.mxu0 %v10408_v30 }
 0xf25   :  { %7665 = vmatpush1.bf16.msra.mxu0 %v10406_v50 }
 0xf26   :  { %7666 = vmatprep.subr.bf16.mxu0 %v10411_v62 }
 0xf29   :  { %7667 = vmatpush1.bf16.msra.mxu0 %v10409_v14 }
 0xf2a   :  { %7668 = vmatprep.subr.bf16.mxu0 %v10414_v2 }
 0xf2d   :  { %7669 = vmatpush1.bf16.msra.mxu0 %v10412_v24 }
 0xf2e   :  { %7670 = vmatprep.subr.bf16.mxu0 %v10417_v1 }
 0xf31   :  { %7671 = vmatpush1.bf16.msra.mxu0 %v10415_v3 }
 0xf32   :  { %7672 = vmatprep.subr.bf16.mxu0 %v10420_v12 }
 0xf35   :  { %7673 = vmatpush1.bf16.msra.mxu0 %v10418_v47 }
 0xf36   :  { %7674 = vmatprep.subr.bf16.mxu0 %v10423_v42 }
 0xf39   :  { %7675 = vmatpush1.bf16.msra.mxu0 %v10421_v57 }
 0xf3a   :  { %7676 = vmatprep.subr.bf16.mxu0 %v10426_v17 }
 0xf3d   :  { %7677 = vmatpush1.bf16.msra.mxu0 %v10424_v16 }
 0xf3e   :  { %7678 = vmatprep.subr.bf16.mxu0 %v10429_v54 }
 0xf41   :  { %7679 = vmatpush1.bf16.msra.mxu0 %v10427_v9 }
 0xf42   :  { %7680 = vmatprep.subr.bf16.mxu0 %v10432_v6 }
 0xf45   :  { %7681 = vmatpush1.bf16.msra.mxu0 %v10430_v32 }
 0xf46   :  { %7682 = vmatprep.subr.bf16.mxu0 %v10435_v13 }
 0xf49   :  { %7683 = vmatpush1.bf16.msra.mxu0 %v10433_v39 }
 0xf4a   :  { %7684 = vmatprep.subr.bf16.mxu0 %v10438_v48 }
 0xf4d   :  { %7685 = vmatpush1.bf16.msra.mxu0 %v10436_v53 }
 0xf50   :  { %7687 = vmatmul.mubr.bf16.vlgmr.msra.gmra.mrb[68].mxu0 %v7215_v5 }
0x1023   :  { %v7688_v0 = vpop.f32.mrb[68].mxu0 }
0x1024   :  { %v9791_v34 = vadd.f32 %v7688_v0, %v7286_v60  ;;  %v7690_v19 = vpop.f32.mrb[69].mxu0 }
0x1025   :  { %v9792_v44 = vadd.f32 %v7690_v19, %v7290_v33  ;;  %v7692_v29 = vpop.f32.mrb[70].mxu0  ;;  %v10458_v19 = vld [vmem:[%s12142_s5 + $0x18] sm:$0xff]  }
0x1026   :  { %v7697_v35 = vsel %vm7073_vm4, %v9791_v34, 0.0  ;;  %v7693_v51 = vpop.f32.mrb[71].mxu0  ;;  %v10460_v29 = vld [vmem:[%s12142_s5 + $0x28] sm:$0xff]  }
0x1027   :  { %v7698_v45 = vrot.slane %v7697_v35, 4  ;;  %v7704_v59 = vsel %vm7073_vm4, %v9792_v44, 0.0  ;;  %v10462_v51 = vld [vmem:[%s12142_s5 + $0x38] sm:$0xff]  }
0x1028   :  { %v7705_v49 = vrot.slane %v7704_v59, 4 }
0x1029   :  { %v7699_v4 = vadd.f32 %v7698_v45, %v7697_v35  ;;  %v10461_v35 = vld [vmem:[%s12142_s5 + $0x30] sm:$0xff]  }
0x102a   :  { %v7706_v55 = vadd.f32 %v7705_v49, %v7704_v59  ;;  %v8711_v59 = vld [vmem:[#allocation80] ss:$0 sm:$0xff] }
0x102b   :  { %v7700_v7 = vrot.slane %v7699_v4, 2 }
0x102c   :  { %v7707_v52 = vrot.slane %v7706_v55, 2 }
0x102d   :  { %v7701_v56 = vadd.f32 %v7700_v7, %v7699_v4 }
0x102e   :  { %v7708_v31 = vadd.f32 %v7707_v52, %v7706_v55 }
0x102f   :  { %v7702_v28 = vrot.slane %v7701_v56, 1 }
0x1030   :  { %v7709_v43 = vrot.slane %v7708_v31, 1 }
0x1031   :  { %v7703_v30 = vadd.f32 %v7702_v28, %v7701_v56 }
0x1032   :  { %v7710_v50 = vadd.f32 %v7709_v43, %v7708_v31 }
0x1033   :  { %v7711_v62 = vmul.f32 0.5, %v7703_v30 }
0x1034   :  { %v7712_v14 = vmul.f32 0.5, %v7710_v50 }
0x1035   :  { %v7713_v2 = vsub.f32 %v9791_v34, %v7711_v62  ;;  %v10457_v34 = vld [vmem:[%s12142_s5 + $0x10] sm:$0xff]  }
0x1036   :  { %v7714_v24 = vsub.f32 %v9792_v44, %v7712_v14  ;;  %v10459_v44 = vld [vmem:[%s12142_s5 + $0x20] sm:$0xff]   ;;  %s8115_s5 = sld [smem:[#allocation18]] }
0x1037   :  { %v7715_v1 = vmul.f32 %v7713_v2, %v7713_v2 }
0x1038   :  { %v7716_v3 = vmul.f32 %v7714_v24, %v7714_v24 }
0x1039   :  { %v7717_v12 = vsel %vm7073_vm4, %v7715_v1, 0.0 }
0x103a   :  { %v7718_v47 = vrot.slane %v7717_v12, 4  ;;  %v7724_v42 = vsel %vm7073_vm4, %v7716_v3, 0.0 }
0x103b   :  { %v7725_v57 = vrot.slane %v7724_v42, 4 }
0x103c   :  { %v7719_v17 = vadd.f32 %v7718_v47, %v7717_v12 }
0x103d   :  { %v7726_v16 = vadd.f32 %v7725_v57, %v7724_v42 }
0x103e   :  { %v7720_v54 = vrot.slane %v7719_v17, 2 }
0x103f   :  { %v7727_v9 = vrot.slane %v7726_v16, 2 }
0x1040   :  { %v7721_v6 = vadd.f32 %v7720_v54, %v7719_v17 }
0x1041   :  { %v7728_v32 = vadd.f32 %v7727_v9, %v7726_v16 }
0x1042   :  { %v7722_v13 = vrot.slane %v7721_v6, 1 }
0x1043   :  { %v7729_v39 = vrot.slane %v7728_v32, 1 }
0x1044   :  { %v7723_v48 = vadd.f32 %v7722_v13, %v7721_v6  ;;  %v8728_v6 = vld [vmem:[#allocation82] ss:$0 sm:$0xff]  ;;  %v8729_v13 = vld [vmem:[#allocation83] ss:$0 sm:$0xff] }
0x1045   :  { %v7730_v53 = vadd.f32 %v7729_v39, %v7728_v32 }
0x1046   :  { %v7731_v23 = vmul.f32 0.5, %v7723_v48 }
0x1047   :  { %v7732_v5 = vmul.f32 0.5, %v7730_v53 }
0x1048   :  { %v7733_v26 = vadd.f32 1e-05, %v7731_v23 }
0x1049   :  { %v7734_v8 = vadd.f32 1e-05, %v7732_v5 }
0x104a   :  { %10623 = vrsqrt.f32 %v7733_v26 }
0x104b   :  { %10625 = vrsqrt.f32 %v7734_v8 }
0x1054   :  { %v10624_v10 = vpop.eup %10623 }
0x1055   :  { %v10626_v18 = vpop.eup %10625  ;;  %v7737_v36 = vmul.f32 %v10624_v10, %v7713_v2 }
0x1056   :  { %v7738_v11 = vmul.f32 %v10626_v18, %v7714_v24 }
0x1057   :  { %v7750_v38 = vmul.f32 %v7743_v46, %v7737_v36 }
0x1058   :  { %v7751_v37 = vmul.f32 %v7747_v27, %v7738_v11  ;;  %v8116_v11 = vstv %s8115_s5 }
0x1059   :  { %v7763_v25 = vadd.f32 %v7756_v41, %v7750_v38 }
0x105a   :  { %v7764_v61 = vadd.f32 %v7760_v40, %v7751_v37  ;;  %v8118_v40 = vstv %s8739_s28 }
0x105b   :  { %v7765_v20 = vmax.f32 %v7763_v25, 0.0  ;;  %v8119_v38 = vsel %vm3850_vm12, %v8116_v11, %v8118_v40 }
0x105c   :  { %v7766_v60 = vmax.f32 %v7764_v61, 0.0 }
0x105d   :  { %v7767_v0 = vpack.c.bf16 %v7765_v20, %v7765_v20 }
0x105e   :  { %v7768_v33 = vpack.c.bf16 %v7766_v60, %v7766_v60 }
0x1060   :  { %7936 = vmatprep.mubr.bf16.mxu1 %v7768_v33 }
0x1061   :  { %7937 = vmatmul.mubr.bf16.vlgmr.msra.gmra.mrb[76].mxu1 %v7767_v0  ;;  %v13655_v0 = vlaneseq }
0x1062   :  { %9275 = vmatprep.mubr.msk.bf16.mxu1 %vm11875_vm5, %v13598_v58  ;;  %9260 = vmatpush3.bf16.msra.mxu1 %v10455_v21  ;;  %vm8098_vm5 = vcmask 25600  }
0x1063   :  { %9261 = vmatprep.subr.bf16.mxu1 %v13598_v58  ;;  %v8114_v21 = vand.u32 127, %v13655_v0 }
0x1066   :  { %9262 = vmatpush3.bf16.msra.mxu1 %v10456_v22 }
0x1067   :  { %9263 = vmatprep.subr.bf16.mxu1 %v13598_v58 }
0x106a   :  { %9264 = vmatpush3.bf16.msra.mxu1 %v10457_v34 }
0x106b   :  { %9265 = vmatprep.subr.bf16.mxu1 %v13598_v58 }
0x106e   :  { %9266 = vmatpush3.bf16.msra.mxu1 %v10458_v19 }
0x106f   :  { %9267 = vmatprep.subr.bf16.mxu1 %v13598_v58 }
0x1072   :  { %9268 = vmatpush3.bf16.msra.mxu1 %v10459_v44 }
0x1073   :  { %9269 = vmatprep.subr.bf16.mxu1 %v13598_v58 }
0x1076   :  { %9270 = vmatpush3.bf16.msra.mxu1 %v10460_v29 }
0x1077   :  { %9271 = vmatprep.subr.bf16.mxu1 %v13598_v58 }
0x107a   :  { %9272 = vmatpush3.bf16.msra.mxu1 %v10461_v35 }
0x107b   :  { %9273 = vmatprep.subr.bf16.mxu1 %v13598_v58 }
0x107e   :  { %9274 = vmatpush3.bf16.msra.mxu1 %v10462_v51 }
0x1134   :  { %v8984_v45 = vpop.f32.mrb[76].mxu1 }
0x1135   :  { %v8985_v49 = vpop.f32.mrb[77].mxu1 }
0x1136   :  { %v8986_v4 = vadd.f32 %v8985_v49, %v8984_v45  ;;  %v8987_v55 = vpop.f32.mrb[78].mxu1 }
0x1137   :  { %v8988_v7 = vpop.f32.mrb[79].mxu1 }
0x1138   :  { %v7939_v52 = vadd.f32 %v8986_v4, %v8711_v59 }
0x113a   :  { %v7946_v56 = vsel %vm7073_vm4, %v7939_v52, 0.0 }
0x113b   :  { %v7947_v31 = vrot.slane %v7946_v56, 4 }
0x113d   :  { %v7948_v28 = vadd.f32 %v7947_v31, %v7946_v56 }
0x113f   :  { %v7949_v43 = vrot.slane %v7948_v28, 2 }
0x1141   :  { %v7950_v30 = vadd.f32 %v7949_v43, %v7948_v28 }
0x1143   :  { %v7951_v50 = vrot.slane %v7950_v30, 1 }
0x1145   :  { %v7952_v62 = vadd.f32 %v7951_v50, %v7950_v30 }
0x1147   :  { %v7953_v14 = vmul.f32 0.5, %v7952_v62 }
0x1149   :  { %v7954_v2 = vsub.f32 %v7939_v52, %v7953_v14 }
0x114b   :  { %v7955_v24 = vmul.f32 %v7954_v2, %v7954_v2 }
0x114d   :  { %v7956_v1 = vsel %vm7073_vm4, %v7955_v24, 0.0 }
0x114e   :  { %v7957_v3 = vrot.slane %v7956_v1, 4 }
0x1150   :  { %v7958_v12 = vadd.f32 %v7957_v3, %v7956_v1 }
0x1152   :  { %v7959_v47 = vrot.slane %v7958_v12, 2 }
0x1154   :  { %v7960_v42 = vadd.f32 %v7959_v47, %v7958_v12 }
0x1156   :  { %v7961_v57 = vrot.slane %v7960_v42, 1 }
0x1158   :  { %v7962_v17 = vadd.f32 %v7961_v57, %v7960_v42 }
0x115a   :  { %v7963_v16 = vmul.f32 0.5, %v7962_v17 }
0x115c   :  { %v7964_v54 = vadd.f32 1e-05, %v7963_v16 }
0x115e   :  { %10627 = vrsqrt.f32 %v7964_v54 }
0x1168   :  { %v10628_v9 = vpop.eup %10627 }
0x1169   :  { %v7966_v32 = vmul.f32 %v10628_v9, %v7954_v2 }
0x116b   :  { %v7973_v39 = vmul.f32 %v8728_v6, %v7966_v32 }
0x116d   :  { %v7980_v48 = vadd.f32 %v8729_v13, %v7973_v39 }
0x116f   :  { %v7982_v53 = vmul.f32 0.70710677, %v7980_v48  ;;  %v7981_v5 = vmul.f32 0.5, %v7980_v48 }
0x1171   :  { %10629 = verf.f32 %v7982_v53 }
0x117b   :  { %v10630_v23 = vpop.eup %10629 }
0x117c   :  { %v7984_v26 = vadd.f32 1.0, %v10630_v23 }
0x117e   :  { %v7985_v8 = vmul.f32 %v7984_v26, %v7981_v5 }
0x1180   :  { %v7986_v63 = vpack.c.bf16 %v7985_v8, %v7985_v8 }
0x1182   :  { %9276 = vmatmul.mubr.bf16.vlgmr.msra.gmra.mrb[80].mxu1 %v7986_v63 }
0x1255   :  { %v8092_v46 = vpop.f32.mrb[80].mxu1 }
0x1256   :  { %v8093_v10 = vadd.f32 %v8730_v15, %v8092_v46  ;;  %v9277_v27 = vpop.f32.mrb[81].mxu1 }
0x1257   :  { %v8095_v18 = vpop.f32.mrb[82].mxu1 }
0x1258   :  { %v9278_v36 = vpop.f32.mrb[83].mxu1  ;;  %v8100_v41 = vsel %vm8098_vm5, %v8093_v10, -inf  ;;  %8099 = vst.msk [vmem:[#allocation86] sm:$0x3] %vm8098_vm5, %v8093_v10 }
0x1259   :  { %8101 = vmax.xlane.f32.xlu1 %v8100_v41 }
0x126a   :  { %8121 = vperm.xlu1 %9917, %v8119_v38  }
0x12e6   :  { %v8102_v37 = vpop.xlane.xlu1 %8101 }
0x12e7   :  { %v8103_v25 = vsub.f32 %v8093_v10, %v8102_v37 }
0x12e9   :  { %v8104_v61 = vmul.f32 1.442695, %v8103_v25 }
0x12ea   :  { %v8122_v34 = vpop.permute.xlu1 %8121 }
0x12eb   :  { %10631 = vpow2.f32 %v8104_v61  ;;  %vm8123_vm6 = vcmp.eq.s32.totalorder %v8114_v21, %v8122_v34 }
0x12ec   :  { %v8740_v35 = vsel %vm8123_vm6, 1.0, %v13598_v58 }
0x12f5   :  { %v10632_v20 = vpop.eup %10631 }
0x12f6   :  { %v8106_v60 = vsel %vm8098_vm5, %v10632_v20, 0.0 }
0x12f7   :  { %8107 = vadd.xlane.f32.xlu0 %v8106_v60 }
0x1384   :  { %v8108_v33 = vpop.xlane.xlu0 %8107 }
0x1385   :  { %10633 = vlog2.f32 %v8108_v33 }
0x138f   :  { %v10634_v22 = vpop.eup %10633 }
0x1390   :  { %v8110_v19 = vmul.f32 0.6931472, %v10634_v22 }
0x1392   :  { %v8111_v44 = vadd.f32 %v8110_v19, %v8102_v37 }
0x1394   :  { %v8112_v29 = vsub.f32 %v8093_v10, %v8111_v44 }
0x1396   :  { %v8126_v51 = vmul.f32 %v8740_v35, %v8112_v29 }
0x1398   :  { %v8127_v45 = vsel %vm8098_vm5, %v8126_v51, 0.0 }
0x1399   :  { %8128 = vadd.xlane.f32.xlu0 %v8127_v45 }
0x139a   :  { %11672 = shalt.err (!%p11669_p1)
}
0x139b   :  { %s11673_s11 = scalar_lea.hbm %s12152_s4, 32 }
0x139c   :  { %p11674_p2 = scmp.ne.s32.totalorder %s12152_s4, %s11673_s11  ;;  %p11677_p3 = scmp.lt.u32.totalorder %s11673_s11, %s12152_s4 }
0x139e   :  { %p11679_p4 = pnand %p11677_p3, %p11674_p2 }
0x13a0   :  { %11682 = shalt.err (!%p11679_p4)
}
0x13a1   :  { %8150 = dma.vmem_to_hbm [thread:$0]  %s8148_s19, 32, %s12152_s4, [#allocation14]   ;;  %vm8139_vm7 = vcmask 0  }
0x13a2   :  { %s11878_s14 = smov [#allocation87]  }
0x13a3   :  { %s8157_s0 = sshll.u32 %s11878_s14, 4  ;;  %s8158_s0 = int_to_ptr.vmem [resolvable:$true] %s8157_s0 }
0x13a4   :  { %s11683_s30 = scalar_lea.vmem %s8158_s0, 16  ;;  %s11687_s13 = scalar_lea.vmem %s8158_s0, 32 }
0x13a5   :  { %p11684_p5 = scmp.ne.s32.totalorder %s8158_s0, %s11683_s30  ;;  %p11688_p6 = scmp.lt.s32.totalorder %s8158_s0, %s8158_s0 }
0x13a6   :  { %p11689_p7 = scmp.lt.s32.totalorder %s11687_s13, %s11683_s30 }
0x13a8   :  { %p11690_p8 = por %p11689_p7, %p11688_p6 }
0x13aa   :  { %p11691_p9 = pnand %p11690_p8, %p11684_p5 }
0x1426   :  { %v8129_v58 = vpop.xlane.xlu0 %8128 }
0x1427   :  { %v8130_v59 = vsub.f32 0.0, %v8129_v58 }
0x1429   :  { %v8131_v49 = vsel %vm7073_vm4, %v8130_v59, 0.0 }
0x142a   :  { %v8132_v4 = vrot.slane %v8131_v49, 4 }
0x142c   :  { %v8133_v55 = vadd.f32 %v8132_v4, %v8131_v49 }
0x142e   :  { %v8134_v7 = vrot.slane %v8133_v55, 2 }
0x1430   :  { %v8135_v52 = vadd.f32 %v8134_v7, %v8133_v55 }
0x1432   :  { %v8136_v56 = vrot.slane %v8135_v52, 1 }
0x1434   :  { %v8137_v31 = vadd.f32 %v8136_v56, %v8135_v52 }
0x1436   :  { %v8138_v28 = vmul.f32 0.5, %v8137_v31 }
0x1438   :  { %8140 = vst.msk [vmem:[#allocation87] sm:$0x1] %vm8139_vm7, %v8138_v28 }
0x1439   :  { %11694 = shalt.err (!%p11691_p9)
}
0x143a   :  { %s11695_s4 = scalar_lea.hbm %s12157_s25, 16 }
0x143b   :  { %p11696_p10 = scmp.ne.s32.totalorder %s12157_s25, %s11695_s4  ;;  %p11699_p11 = scmp.lt.u32.totalorder %s11695_s4, %s12157_s25 }
0x143d   :  { %p11701_p12 = pnand %p11699_p11, %p11696_p10 }
0x143f   :  { %11704 = shalt.err (!%p11701_p12)
}
0x1440   :  { %8160 = dma.vmem_to_hbm [thread:$0]  %s8158_s0, 16, %s12157_s25, [#allocation88]  }
0x1441   :  { %11755 = dma.done.wait [#allocation14], 32  }
0x1442   :  { %11756 = vsyncadd [#allocation14], 4294967264 }
0x1443   :  { %11757 = dma.done.wait [#allocation88], 16  }
0x1444   :  { %11758 = vsyncadd [#allocation88], 4294967280 }
0x1445   :  { %8167 = vsyncpa [#allocation13], 1 }
0x1446   :  { %8168 = vsyncpa [#allocation21], 1 }
0x1447   :  { %8169 = vsyncpa [#allocation24], 1 }
0x1448   :  { %8170 = vsyncpa [#allocation27], 1 }
0x1449   :  { %8171 = vsyncpa [#allocation30], 1 }
0x144a   :  { %8172 = vsyncpa [#allocation33], 1 }
0x144b   :  { %8173 = vsyncpa [#allocation36], 1 }
0x144c   :  { %8174 = vsyncpa [#allocation39], 1 }
0x144d   :  { %8175 = vsyncpa [#allocation42], 1 }
0x144e   :  { %8176 = vsyncpa [#allocation45], 1 }
0x144f   :  { %8177 = vsyncpa [#allocation48], 1 }
0x1450   :  { %8178 = vsyncpa [#allocation51], 1 }
0x1451   :  { %8179 = vsyncpa [#allocation54], 1 }
0x1452   :  { %8180 = vsyncpa [#allocation57], 1 }
0x1453   :  { %8181 = vsyncpa [#allocation60], 1 }
0x1454   :  { %8182 = vsyncpa [#allocation63], 1 }
0x1455   :  { %8183 = vsyncpa [#allocation66], 1 }
0x1456   :  { %8184 = vsyncpa [#allocation69], 1 }
0x1457   :  { %8185 = vsyncpa [#allocation72], 1 }
0x1458   :  { %8186 = vsyncpa [#allocation75], 1 }
0x1459   :  { %8187 = vsyncpa [#allocation78], 1 }
0x145a   :  { %8188 = vsyncpa [#allocation81], 1 }
0x145b   :  { %8189 = vsyncpa [#allocation84], 1 }
0x145c   :  { %8190 = vsyncpa [#allocation14], 1 }
0x145d   :  { %8191 = vsyncpa [#allocation88], 1 }
0x145e   :  { %8192 = vsyncpa [#allocation15], 1 }
0x145f   :  { %8193 = vsyncpa [#allocation17], 1 }

</bundles_post_ra>
